<compile_context>
chip_gen: v7x
topology: tpu7x:2x2x1
jax: 0.10.0
libtpu: 0.0.40
codegen_flags: <defaults>
</compile_context>

<pallas_src>
import functools

import jax
import jax.numpy as jnp
from jax.experimental import pallas as pl
from jax.experimental.pallas import tpu as pltpu

EPS = 1e-5
_VMEM_LIMIT = 32 * 1024 * 1024  # explicit scoped-VMEM cap: >= v5e default, == v6e/v7x default


def _ceil_to(x, m):
    return (x + m - 1) // m * m


def _cdiv(a, b):
    return -(-a // b)


# ---------------------------------------------------------------------------
# Kernel 1: fused 3x3 / stride-1 conv (+folded BN bias) (+residual) (+ReLU)
# ---------------------------------------------------------------------------
def _conv3x3_kernel(*refs, relu, has_res, th, w, c, cout):
    if has_res:
        x_ref, xh_ref, w_ref, b_ref, r_ref, o_ref = refs
    else:
        x_ref, xh_ref, w_ref, b_ref, o_ref = refs
        r_ref = None

    x_main = x_ref[0]                                    # (th,   w+2, c)
    x_halo = xh_ref[0]                                   # (2,    w+2, c)
    x = jnp.concatenate([x_main, x_halo], axis=0)        # (th+2, w+2, c)

    acc = jnp.zeros((th * w, cout), jnp.float32)
    for dt in range(3):
        for dw in range(3):
            tap = x[dt:dt + th, dw:dw + w, :].reshape(th * w, c)
            acc = acc + jnp.dot(tap, w_ref[dt * 3 + dw],
                                preferred_element_type=jnp.float32)

    y = acc.reshape(th, w, cout) + b_ref[...]            # bias broadcasts over (th, w)
    if has_res:
        y = y + r_ref[0].astype(jnp.float32)
    if relu:
        y = jnp.maximum(y, 0.0)
    o_ref[0] = y.astype(o_ref.dtype)


def _pick_block_rows(t, w, c, n_batch):
    th = (512 * 1024) // max(w * c * 2, 1)               # ~1 MiB bf16 of input rows
    if n_batch == 1 and t > 64:
        th = min(th, (t + 1) // 2)                       # >=2 grid steps (v7x megacore)
    th = min(th, _ceil_to(max(t, 1), 8))
    return max(8, _ceil_to(th, 8))


def conv3x3_s1(x, conv, relu=True, residual=None):
    """3x3 / stride-1 / pad-1 conv with eval-mode BN folded into w9/bias.

    x: (N, T, W, C) bf16 -> (N, T, W, Cout) bf16.  Taps accumulate in-kernel (no im2col);
    the +2 row halo of each T-block comes from a second 2-row BlockSpec on the same
    zero-padded activation.
    """
    n, t, w, c = x.shape
    cout = conv["w9"].shape[-1]
    th = _pick_block_rows(t, w, c, n)
    nt = _cdiv(t, th)
    tr = nt * th + 2                                      # rows needed incl. every halo
    x_pad = jnp.pad(x, ((0, 0), (1, tr - t - 1), (1, 1), (0, 0)))
    wp = w + 2
    bias = conv["bias"].reshape(1, cout).astype(jnp.float32)

    in_specs = [
        pl.BlockSpec((1, th, wp, c), lambda b, i: (b, i, 0, 0)),
        pl.BlockSpec((1, 2, wp, c), lambda b, i: (b, (i + 1) * (th // 2), 0, 0)),
        pl.BlockSpec((9, c, cout), lambda b, i: (0, 0, 0)),
        pl.BlockSpec((1, cout), lambda b, i: (0, 0)),
    ]
    args = [x_pad, x_pad, conv["w9"], bias]
    has_res = residual is not None
    if has_res:
        args.append(residual.astype(jnp.bfloat16))
        in_specs.append(pl.BlockSpec((1, th, w, cout), lambda b, i: (b, i, 0, 0)))

    return pl.pallas_call(
        functools.partial(_conv3x3_kernel, relu=relu, has_res=has_res,
                          th=th, w=w, c=c, cout=cout),
        out_shape=jax.ShapeDtypeStruct((n, t, w, cout), jnp.bfloat16),
        grid=(n, nt),
        in_specs=in_specs,
        out_specs=pl.BlockSpec((1, th, w, cout), lambda b, i: (b, i, 0, 0)),
        compiler_params=pltpu.CompilerParams(
            dimension_semantics=("parallel", "parallel"),
            vmem_limit_bytes=_VMEM_LIMIT),
    )(*args)


# ---------------------------------------------------------------------------
# Kernel 2: GEMM + bias (+ReLU), optionally with a split (dual) output
# ---------------------------------------------------------------------------
def _gemm_kernel(a_ref, b_ref, bias_ref, o_ref, *, relu):
    y = jnp.dot(a_ref[...], b_ref[...], preferred_element_type=jnp.float32)
    y = y + bias_ref[...]
    if relu:
        y = jnp.maximum(y, 0.0)
    o_ref[...] = y.astype(o_ref.dtype)


def _gemm_split_kernel(a_ref, b_ref, bias_ref, o1_ref, o2_ref, *, n1, relu1):
    y = jnp.dot(a_ref[...], b_ref[...], preferred_element_type=jnp.float32)
    y = y + bias_ref[...]
    y1 = y[:, :n1]
    if relu1:
        y1 = jnp.maximum(y1, 0.0)
    o1_ref[...] = y1.astype(o1_ref.dtype)
    o2_ref[...] = y[:, n1:].astype(o2_ref.dtype)


def _pick_tm(m, k):
    tm = max(256, (2 * 1024 * 1024) // max(k * 2, 1))     # ~2 MiB bf16 A tile
    tm = min(tm, 8192)
    if m > 1024:
        tm = min(tm, _ceil_to((m + 1) // 2, 256))          # >=2 grid steps (v7x megacore)
    tm = min(tm, max(m, 1))
    return _ceil_to(tm, 16)                                # bf16 sublane packing


def _gemm_specs(m, k, n_out, tm):
    in_specs = [pl.BlockSpec((tm, k), lambda i: (i, 0)),
                pl.BlockSpec((k, n_out), lambda i: (0, 0)),
                pl.BlockSpec((1, n_out), lambda i: (0, 0))]
    cp = pltpu.CompilerParams(dimension_semantics=("parallel",),
                              vmem_limit_bytes=_VMEM_LIMIT)
    return in_specs, cp


def matmul_bias(a, b, bias, relu=False, out_dtype=jnp.bfloat16):
    """(M,K)bf16 @ (K,N)bf16 + bias [+ReLU]; no A padding, partial blocks are masked."""
    m, k = a.shape
    _, n_out = b.shape
    tm = _pick_tm(m, k)
    in_specs, cp = _gemm_specs(m, k, n_out, tm)
    bias2 = bias.reshape(1, n_out).astype(jnp.float32)
    return pl.pallas_call(
        functools.partial(_gemm_kernel, relu=relu),
        out_shape=jax.ShapeDtypeStruct((m, n_out), out_dtype),
        grid=(_cdiv(m, tm),),
        in_specs=in_specs,
        out_specs=pl.BlockSpec((tm, n_out), lambda i: (i, 0)),
        compiler_params=cp,
    )(a, b, bias2)


def matmul_bias_split(a, b, bias, n1, relu1=True, out_dtype=jnp.bfloat16):
    """Single GEMM whose output is split into (relu'd first n1 cols, remaining cols)."""
    m, k = a.shape
    _, n_out = b.shape
    tm = _pick_tm(m, k)
    in_specs, cp = _gemm_specs(m, k, n_out, tm)
    bias2 = bias.reshape(1, n_out).astype(jnp.float32)
    return pl.pallas_call(
        functools.partial(_gemm_split_kernel, n1=n1, relu1=relu1),
        out_shape=(jax.ShapeDtypeStruct((m, n1), out_dtype),
                   jax.ShapeDtypeStruct((m, n_out - n1), out_dtype)),
        grid=(_cdiv(m, tm),),
        in_specs=in_specs,
        out_specs=(pl.BlockSpec((tm, n1), lambda i: (i, 0)),
                   pl.BlockSpec((tm, n_out - n1), lambda i: (i, 0))),
        compiler_params=cp,
    )(a, b, bias2)


# ---------------------------------------------------------------------------
# conv glue (im2col only for the stem and the two stride-2 layer-entry convs)
# ---------------------------------------------------------------------------
def im2col(x, kh, kw, stride, pad):
    """x: (N, H, W, C) -> (N*Ho*Wo, kh*kw*C); flattening order (kh, kw, c)."""
    n, h, w, c = x.shape
    if pad:
        x = jnp.pad(x, ((0, 0), (pad, pad), (pad, pad), (0, 0)))
    hp, wp = h + 2 * pad, w + 2 * pad
    ho = (hp - kh) // stride + 1
    wo = (wp - kw) // stride + 1
    pieces = []
    for i in range(kh):
        for j in range(kw):
            pieces.append(
                x[:, i: i + stride * (ho - 1) + 1: stride,
                     j: j + stride * (wo - 1) + 1: stride, :])
    cols = pieces[0] if len(pieces) == 1 else jnp.concatenate(pieces, axis=-1)
    return cols.reshape(n * ho * wo, kh * kw * c), (n, ho, wo)


def conv_stem(x, conv):
    """3x3 stride-1 conv with cin=1 (K padded 9->16) + BN + ReLU via the GEMM kernel."""
    cols, (n, ho, wo) = im2col(x, 3, 3, stride=1, pad=1)
    k = cols.shape[1]
    kp, cout = conv["w"].shape
    if kp != k:
        cols = jnp.pad(cols, ((0, 0), (0, kp - k)))
    out = matmul_bias(cols, conv["w"], conv["bias"], relu=True)
    return out.reshape(n, ho, wo, cout)


def conv_downsample_block(x, blk):
    """Layer-entry block: 3x3(stride s)+BN+ReLU and the 1x1 downsample (embedded at the
    centre-tap rows of the concatenated weight) computed by ONE split-output GEMM."""
    s = blk["stride"]
    planes = blk["planes"]
    cols, (n, ho, wo) = im2col(x, 3, 3, stride=s, pad=1)
    out, ident = matmul_bias_split(cols, blk["fused_w"], blk["fused_bias"],
                                   n1=planes, relu1=True)
    return out.reshape(n, ho, wo, planes), ident.reshape(n, ho, wo, planes)


# ---------------------------------------------------------------------------
# parameters
# ---------------------------------------------------------------------------
RESNET_CONFIG_BASE = [(64, 2, 4), (128, 2, 4)]


def _make_bn(c):
    # (gamma, beta, running_mean, running_var) -- PyTorch BatchNorm2d init.
    return (jnp.ones((c,), jnp.float32), jnp.zeros((c,), jnp.float32),
            jnp.zeros((c,), jnp.float32), jnp.ones((c,), jnp.float32))


def _kaiming(key, kh, kw, cin, cout):
    fan_out = kh * kw * cout
    std = (2.0 / fan_out) ** 0.5
    return jax.random.normal(key, (kh, kw, cin, cout), jnp.float32) * std


def _conv_out_len(l):
    # k=3, stride=2, pad=1
    return (l + 2 * 1 - 3) // 2 + 1


def init_params(key, num_mel_bins, output_dim, res_config=RESNET_CONFIG_BASE):
    keys = iter(jax.random.split(key, 128))
    p = {"conv1_w": _kaiming(next(keys), 3, 3, 1, 64), "bn1": _make_bn(64)}
    inplanes = 64
    layers = []
    pooling = []
    for planes, stride, nblocks in res_config:
        blocks = []
        for bi in range(nblocks):
            s = stride if bi == 0 else 1
            cin = inplanes if bi == 0 else planes
            blk = {
                "stride": s,
                "conv1_w": _kaiming(next(keys), 3, 3, cin, planes),
                "bn1": _make_bn(planes),
                "conv2_w": _kaiming(next(keys), 3, 3, planes, planes),
                "bn2": _make_bn(planes),
            }
            if bi == 0 and (s != 1 or inplanes != planes):
                blk["ds_w"] = _kaiming(next(keys), 1, 1, inplanes, planes)
                blk["ds_bn"] = _make_bn(planes)
            blocks.append(blk)
        layers.append(blocks)
        pooling.append(stride)
        inplanes = planes
    p["layers"] = layers
    p["pooling_kernel_sizes"] = pooling

    mel = num_mel_bins
    for _ in res_config:
        mel = _conv_out_len(mel)
    conv_agg_dim = inplanes * mel
    k = 1.0 / (conv_agg_dim ** 0.5)
    p["out_proj_w"] = jax.random.uniform(next(keys), (conv_agg_dim, output_dim),
                                         jnp.float32, -k, k)
    p["out_proj_b"] = jax.random.uniform(next(keys), (output_dim,), jnp.float32, -k, k)
    return p


def _fold_bn(bn):
    gamma, beta, mean, var = bn
    scale = gamma / jnp.sqrt(var + EPS)
    return scale, beta - mean * scale


def _fold_conv_taps(w_hwio, bn):
    """Fold eval-mode BN; keep per-tap weights (9, cin, cout) bf16 for the fused kernel."""
    scale, bias = _fold_bn(bn)
    kh, kw, cin, cout = w_hwio.shape
    w9 = (w_hwio * scale).reshape(kh * kw, cin, cout)
    return {"w9": w9.astype(jnp.bfloat16), "bias": bias.astype(jnp.float32)}


def _fold_conv_flat(w_hwio, bn):
    """Fold eval-mode BN; flatten to (kh*kw*cin, cout) f32 (caller casts)."""
    scale, bias = _fold_bn(bn)
    kh, kw, cin, cout = w_hwio.shape
    return (w_hwio * scale).reshape(kh * kw * cin, cout), bias


def prepare_params(p):
    """Raw (HWIO f32 conv weights + BN tuples) -> inference-ready folded bf16 params."""
    w1, b1 = _fold_conv_flat(p["conv1_w"], p["bn1"])         # K = 9
    kpad = _ceil_to(w1.shape[0], 16)                          # 9 -> 16 (bf16 packing)
    w1 = jnp.pad(w1, ((0, kpad - w1.shape[0]), (0, 0)))
    prep = {
        "conv1": {"w": w1.astype(jnp.bfloat16), "bias": b1.astype(jnp.float32)},
        "layers": [],
        "pooling_kernel_sizes": p["pooling_kernel_sizes"],
        "out_w": p["out_proj_w"].astype(jnp.bfloat16),
        "out_b": p["out_proj_b"].astype(jnp.float32),
    }
    for blocks in p["layers"]:
        pblocks = []
        for blk in blocks:
            planes = blk["conv1_w"].shape[-1]
            e = {"stride": blk["stride"], "planes": planes,
                 "conv2": _fold_conv_taps(blk["conv2_w"], blk["bn2"])}
            if "ds_w" in blk:
                wc, bc = _fold_conv_flat(blk["conv1_w"], blk["bn1"])   # (9*cin, planes)
                wd, bd = _fold_conv_flat(blk["ds_w"], blk["ds_bn"])    # (cin,   planes)
                cin = blk["conv1_w"].shape[2]
                wd_full = jnp.zeros_like(wc).at[4 * cin:5 * cin].set(wd)
                e["fused_w"] = jnp.concatenate([wc, wd_full], axis=1).astype(jnp.bfloat16)
                e["fused_bias"] = jnp.concatenate([bc, bd]).astype(jnp.float32)
            else:
                e["conv1"] = _fold_conv_taps(blk["conv1_w"], blk["bn1"])
            pblocks.append(e)
        prep["layers"].append(pblocks)
    return prep


# ---------------------------------------------------------------------------
# forward
# ---------------------------------------------------------------------------
def resnet_forward(prep, fbank, fbk_lengths):
    """fbank: (bsz, seq, num_mel_bins) f32, fbk_lengths: (bsz,) int32."""
    x = fbank.astype(jnp.bfloat16)[..., None]                 # NHWC, C=1
    x = conv_stem(x, prep["conv1"])                            # (B, T, MEL, 64)

    for blocks in prep["layers"]:
        for blk in blocks:
            if "fused_w" in blk:
                out, identity = conv_downsample_block(x, blk)
            else:
                out = conv3x3_s1(x, blk["conv1"], relu=True)
                identity = x
            # conv2 + bn2, + identity, then ReLU -- all fused in one kernel
            x = conv3x3_s1(out, blk["conv2"], relu=True, residual=identity)

    lengths = fbk_lengths
    for s in prep["pooling_kernel_sizes"]:
        lengths = jnp.ceil(lengths.astype(jnp.float32) / s).astype(jnp.int32)

    b, t, w, c = x.shape
    # match torch: (B, C, T, W) -> permute(2,0,1,3) -> (T, B, C, W) -> (T, B, C*W)
    feat = jnp.transpose(x, (1, 0, 3, 2)).reshape(t * b, c * w)
    y = matmul_bias(feat, prep["out_w"], prep["out_b"], relu=False, out_dtype=jnp.float32)
    y = y.reshape(t, b, -1)

    padding_mask = jnp.arange(t)[None, :] >= lengths[:, None]
    return y, padding_mask


# ---------------------------------------------------------------------------
# main
# ---------------------------------------------------------------------------
if __name__ == "__main__":
    key = jax.random.PRNGKey(0)
    kparam, kx = jax.random.split(key)

    bsz, seq, num_mel_bins, output_dim = 2, 16, 16, 32
    raw_params = init_params(kparam, num_mel_bins, output_dim)
    prep = prepare_params(raw_params)

    fbank = jax.random.normal(kx, (bsz, seq, num_mel_bins), jnp.float32)
    fbk_lengths = jnp.array([16, 11], jnp.int32)

    fwd = jax.jit(lambda f, l: resnet_forward(prep, f, l))
    y, mask = fwd(fbank, fbk_lengths)
    jax.block_until_ready((y, mask))

    assert y.shape == (seq // 4, bsz, output_dim), y.shape
    assert y.dtype == jnp.float32, y.dtype
    assert mask.shape == (bsz, seq // 4) and mask.dtype == jnp.bool_, (mask.shape, mask.dtype)
    assert bool(jnp.isfinite(y).all())
    print("KERNEL_OK")
</pallas_src>

<mosaic_0001>
module attributes {stable_mosaic.version = 11 : i64} {
  func.func @_gemm_kernel(%arg0: i32, %arg1: memref<512x16xbf16, #tpu.memory_space<vmem>>, %arg2: memref<16x64xbf16, #tpu.memory_space<vmem>>, %arg3: memref<1x64xf32, #tpu.memory_space<vmem>>, %arg4: memref<512x64xbf16, #tpu.memory_space<vmem>>) attributes {dimension_semantics = [#tpu.dimension_semantics<parallel>], iteration_bounds = array<i64: 1>, scalar_prefetch = 0 : i64, scratch_operands = 0 : i64, tpu.core_type = #tpu.core_type<tc>, window_params = [{transform_indices = @transform_0, window_bounds = array<i64: 512, 16>}, {pipeline_mode = #tpu.pipeline_mode<synchronous>, transform_indices = @transform_1, window_bounds = array<i64: 16, 64>}, {pipeline_mode = #tpu.pipeline_mode<synchronous>, transform_indices = @transform_2, window_bounds = array<i64: 1, 64>}, {transform_indices = @transform_3, window_bounds = array<i64: 512, 64>}]} {
    %c0 = arith.constant 0 : index
    %c0_0 = arith.constant 0 : index
    %0 = vector.load %arg1[%c0, %c0_0] : memref<512x16xbf16, #tpu.memory_space<vmem>>, vector<512x16xbf16>
    %c0_1 = arith.constant 0 : index
    %c0_2 = arith.constant 0 : index
    %1 = vector.load %arg2[%c0_1, %c0_2] : memref<16x64xbf16, #tpu.memory_space<vmem>>, vector<16x64xbf16>
    %cst = arith.constant dense<0.000000e+00> : vector<512x64xf32>
    %2 = tpu.matmul %0, %1, %cst {dimension_numbers = #tpu.dot_dimension_numbers<[1], [0], [0], [1], [0, 0, 1, 1], [], []>} : vector<512x16xbf16>, vector<16x64xbf16>, vector<512x64xf32> -> vector<512x64xf32>
    %c0_3 = arith.constant 0 : index
    %c0_4 = arith.constant 0 : index
    %3 = vector.load %arg3[%c0_3, %c0_4] : memref<1x64xf32, #tpu.memory_space<vmem>>, vector<1x64xf32>
    %4 = vector.broadcast %3 : vector<1x64xf32> to vector<512x64xf32>
    %5 = arith.addf %2, %4 : vector<512x64xf32>
    %cst_5 = arith.constant 0.000000e+00 : f32
    %6 = vector.broadcast %cst_5 : f32 to vector<512x64xf32>
    %7 = arith.maximumf %5, %6 : vector<512x64xf32>
    %8 = arith.truncf %7 : vector<512x64xf32> to vector<512x64xbf16>
    %c0_6 = arith.constant 0 : index
    %c0_7 = arith.constant 0 : index
    %9 = vector.load %arg4[%c0_6, %c0_7] : memref<512x64xbf16, #tpu.memory_space<vmem>>, vector<512x64xbf16>
    tpu.vector_store %arg4[%c0_6, %c0_7], %8 {strides = array<i32>} : memref<512x64xbf16, #tpu.memory_space<vmem>>, vector<512x64xbf16>,
    return
  }
  func.func @transform_0(%arg0: i32) -> (i32, i32) {
    %c0_i32 = arith.constant 0 : i32
    %c0_i32_0 = arith.constant 0 : i32
    return %arg0, %c0_i32 : i32, i32
  }
  func.func @transform_1(%arg0: i32) -> (i32, i32) {
    %c0_i32 = arith.constant 0 : i32
    %c0_i32_0 = arith.constant 0 : i32
    %c0_i32_1 = arith.constant 0 : i32
    return %c0_i32, %c0_i32_0 : i32, i32
  }
  func.func @transform_2(%arg0: i32) -> (i32, i32) {
    %c0_i32 = arith.constant 0 : i32
    %c0_i32_0 = arith.constant 0 : i32
    %c0_i32_1 = arith.constant 0 : i32
    return %c0_i32, %c0_i32_0 : i32, i32
  }
  func.func @transform_3(%arg0: i32) -> (i32, i32) {
    %c0_i32 = arith.constant 0 : i32
    %c0_i32_0 = arith.constant 0 : i32
    return %arg0, %c0_i32 : i32, i32
  }
}

module attributes {stable_mosaic.version = 11 : i64} {
  func.func @_gemm_split_kernel(%arg0: i32, %arg1: memref<128x576xbf16, #tpu.memory_space<vmem>>, %arg2: memref<576x128xbf16, #tpu.memory_space<vmem>>, %arg3: memref<1x128xf32, #tpu.memory_space<vmem>>, %arg4: memref<128x64xbf16, #tpu.memory_space<vmem>>, %arg5: memref<128x64xbf16, #tpu.memory_space<vmem>>) attributes {dimension_semantics = [#tpu.dimension_semantics<parallel>], iteration_bounds = array<i64: 1>, scalar_prefetch = 0 : i64, scratch_operands = 0 : i64, tpu.core_type = #tpu.core_type<tc>, window_params = [{transform_indices = @transform_0, window_bounds = array<i64: 128, 576>}, {pipeline_mode = #tpu.pipeline_mode<synchronous>, transform_indices = @transform_1, window_bounds = array<i64: 576, 128>}, {pipeline_mode = #tpu.pipeline_mode<synchronous>, transform_indices = @transform_2, window_bounds = array<i64: 1, 128>}, {transform_indices = @transform_3, window_bounds = array<i64: 128, 64>}, {transform_indices = @transform_4, window_bounds = array<i64: 128, 64>}]} {
    %c0 = arith.constant 0 : index
    %c0_0 = arith.constant 0 : index
    %0 = vector.load %arg1[%c0, %c0_0] : memref<128x576xbf16, #tpu.memory_space<vmem>>, vector<128x576xbf16>
    %c0_1 = arith.constant 0 : index
    %c0_2 = arith.constant 0 : index
    %1 = vector.load %arg2[%c0_1, %c0_2] : memref<576x128xbf16, #tpu.memory_space<vmem>>, vector<576x128xbf16>
    %cst = arith.constant dense<0.000000e+00> : vector<128x128xf32>
    %2 = tpu.matmul %0, %1, %cst {dimension_numbers = #tpu.dot_dimension_numbers<[1], [0], [0], [1], [0, 0, 1, 1], [], []>} : vector<128x576xbf16>, vector<576x128xbf16>, vector<128x128xf32> -> vector<128x128xf32>
    %c0_3 = arith.constant 0 : index
    %c0_4 = arith.constant 0 : index
    %3 = vector.load %arg3[%c0_3, %c0_4] : memref<1x128xf32, #tpu.memory_space<vmem>>, vector<1x128xf32>
    %4 = vector.broadcast %3 : vector<1x128xf32> to vector<128x128xf32>
    %5 = arith.addf %2, %4 : vector<128x128xf32>
    %6 = vector.extract_strided_slice %5 {offsets = [0, 0], sizes = [128, 64], strides = [1, 1]} : vector<128x128xf32> to vector<128x64xf32>
    %cst_5 = arith.constant 0.000000e+00 : f32
    %7 = vector.broadcast %cst_5 : f32 to vector<128x64xf32>
    %8 = arith.maximumf %6, %7 : vector<128x64xf32>
    %9 = arith.truncf %8 : vector<128x64xf32> to vector<128x64xbf16>
    %c0_6 = arith.constant 0 : index
    %c0_7 = arith.constant 0 : index
    %10 = vector.load %arg4[%c0_6, %c0_7] : memref<128x64xbf16, #tpu.memory_space<vmem>>, vector<128x64xbf16>
    tpu.vector_store %arg4[%c0_6, %c0_7], %9 {strides = array<i32>} : memref<128x64xbf16, #tpu.memory_space<vmem>>, vector<128x64xbf16>,
    %11 = vector.extract_strided_slice %5 {offsets = [0, 64], sizes = [128, 64], strides = [1, 1]} : vector<128x128xf32> to vector<128x64xf32>
    %12 = arith.truncf %11 : vector<128x64xf32> to vector<128x64xbf16>
    %c0_8 = arith.constant 0 : index
    %c0_9 = arith.constant 0 : index
    %13 = vector.load %arg5[%c0_8, %c0_9] : memref<128x64xbf16, #tpu.memory_space<vmem>>, vector<128x64xbf16>
    tpu.vector_store %arg5[%c0_8, %c0_9], %12 {strides = array<i32>} : memref<128x64xbf16, #tpu.memory_space<vmem>>, vector<128x64xbf16>,
    return
  }
  func.func @transform_0(%arg0: i32) -> (i32, i32) {
    %c0_i32 = arith.constant 0 : i32
    %c0_i32_0 = arith.constant 0 : i32
    return %arg0, %c0_i32 : i32, i32
  }
  func.func @transform_1(%arg0: i32) -> (i32, i32) {
    %c0_i32 = arith.constant 0 : i32
    %c0_i32_0 = arith.constant 0 : i32
    %c0_i32_1 = arith.constant 0 : i32
    return %c0_i32, %c0_i32_0 : i32, i32
  }
  func.func @transform_2(%arg0: i32) -> (i32, i32) {
    %c0_i32 = arith.constant 0 : i32
    %c0_i32_0 = arith.constant 0 : i32
    %c0_i32_1 = arith.constant 0 : i32
    return %c0_i32, %c0_i32_0 : i32, i32
  }
  func.func @transform_3(%arg0: i32) -> (i32, i32) {
    %c0_i32 = arith.constant 0 : i32
    %c0_i32_0 = arith.constant 0 : i32
    return %arg0, %c0_i32 : i32, i32
  }
  func.func @transform_4(%arg0: i32) -> (i32, i32) {
    %c0_i32 = arith.constant 0 : i32
    %c0_i32_0 = arith.constant 0 : i32
    return %arg0, %c0_i32 : i32, i32
  }
}

module attributes {stable_mosaic.version = 11 : i64} {
  func.func @_conv3x3_kernel(%arg0: i32, %arg1: i32, %arg2: memref<1x8x10x64xbf16, #tpu.memory_space<vmem>>, %arg3: memref<1x2x10x64xbf16, #tpu.memory_space<vmem>>, %arg4: memref<9x64x64xbf16, #tpu.memory_space<vmem>>, %arg5: memref<1x64xf32, #tpu.memory_space<vmem>>, %arg6: memref<1x8x8x64xbf16, #tpu.memory_space<vmem>>, %arg7: memref<1x8x8x64xbf16, #tpu.memory_space<vmem>>) attributes {dimension_semantics = [#tpu.dimension_semantics<parallel>, #tpu.dimension_semantics<parallel>], iteration_bounds = array<i64: 2, 1>, scalar_prefetch = 0 : i64, scratch_operands = 0 : i64, tpu.core_type = #tpu.core_type<tc>, window_params = [{transform_indices = @transform_0, window_bounds = array<i64: 1, 8, 10, 64>}, {transform_indices = @transform_1, window_bounds = array<i64: 1, 2, 10, 64>}, {pipeline_mode = #tpu.pipeline_mode<synchronous>, transform_indices = @transform_2, window_bounds = array<i64: 9, 64, 64>}, {pipeline_mode = #tpu.pipeline_mode<synchronous>, transform_indices = @transform_3, window_bounds = array<i64: 1, 64>}, {transform_indices = @transform_4, window_bounds = array<i64: 1, 8, 8, 64>}, {transform_indices = @transform_5, window_bounds = array<i64: 1, 8, 8, 64>}]} {
    %c0 = arith.constant 0 : index
    %c0_0 = arith.constant 0 : index
    %c0_1 = arith.constant 0 : index
    %c0_2 = arith.constant 0 : index
    %0 = vector.load %arg2[%c0, %c0_0, %c0_1, %c0_2] : memref<1x8x10x64xbf16, #tpu.memory_space<vmem>>, vector<1x8x10x64xbf16>
    %1 = vector.shape_cast %0 : vector<1x8x10x64xbf16> to vector<8x10x64xbf16>
    %c0_3 = arith.constant 0 : index
    %c0_4 = arith.constant 0 : index
    %c0_5 = arith.constant 0 : index
    %c0_6 = arith.constant 0 : index
    %2 = vector.load %arg3[%c0_3, %c0_4, %c0_5, %c0_6] : memref<1x2x10x64xbf16, #tpu.memory_space<vmem>>, vector<1x2x10x64xbf16>
    %3 = vector.shape_cast %2 : vector<1x2x10x64xbf16> to vector<2x10x64xbf16>
    %4 = tpu.concatenate %1, %3 in 0 : vector<8x10x64xbf16>, vector<2x10x64xbf16> -> vector<10x10x64xbf16>
    %cst = arith.constant 0.000000e+00 : f32
    %5 = vector.broadcast %cst : f32 to vector<64x64xf32>
    %6 = vector.extract_strided_slice %4 {offsets = [0, 0, 0], sizes = [8, 8, 64], strides = [1, 1, 1]} : vector<10x10x64xbf16> to vector<8x8x64xbf16>
    %7 = vector.shape_cast %6 : vector<8x8x64xbf16> to vector<64x64xbf16>
    %c0_7 = arith.constant 0 : index
    %c0_8 = arith.constant 0 : index
    %c0_9 = arith.constant 0 : index
    %8 = vector.load %arg4[%c0_7, %c0_8, %c0_9] : memref<9x64x64xbf16, #tpu.memory_space<vmem>>, vector<1x64x64xbf16>
    %9 = vector.shape_cast %8 : vector<1x64x64xbf16> to vector<64x64xbf16>
    %cst_10 = arith.constant dense<0.000000e+00> : vector<64x64xf32>
    %10 = tpu.matmul %7, %9, %cst_10 {dimension_numbers = #tpu.dot_dimension_numbers<[1], [0], [0], [1], [0, 0, 1, 1], [], []>} : vector<64x64xbf16>, vector<64x64xbf16>, vector<64x64xf32> -> vector<64x64xf32>
    %11 = arith.addf %5, %10 : vector<64x64xf32>
    %12 = vector.extract_strided_slice %4 {offsets = [0, 1, 0], sizes = [8, 8, 64], strides = [1, 1, 1]} : vector<10x10x64xbf16> to vector<8x8x64xbf16>
    %13 = vector.shape_cast %12 : vector<8x8x64xbf16> to vector<64x64xbf16>
    %c1 = arith.constant 1 : index
    %c0_11 = arith.constant 0 : index
    %c0_12 = arith.constant 0 : index
    %14 = vector.load %arg4[%c1, %c0_11, %c0_12] : memref<9x64x64xbf16, #tpu.memory_space<vmem>>, vector<1x64x64xbf16>
    %15 = vector.shape_cast %14 : vector<1x64x64xbf16> to vector<64x64xbf16>
    %cst_13 = arith.constant dense<0.000000e+00> : vector<64x64xf32>
    %16 = tpu.matmul %13, %15, %cst_13 {dimension_numbers = #tpu.dot_dimension_numbers<[1], [0], [0], [1], [0, 0, 1, 1], [], []>} : vector<64x64xbf16>, vector<64x64xbf16>, vector<64x64xf32> -> vector<64x64xf32>
    %17 = arith.addf %11, %16 : vector<64x64xf32>
    %18 = vector.extract_strided_slice %4 {offsets = [0, 2, 0], sizes = [8, 8, 64], strides = [1, 1, 1]} : vector<10x10x64xbf16> to vector<8x8x64xbf16>
    %19 = vector.shape_cast %18 : vector<8x8x64xbf16> to vector<64x64xbf16>
    %c2 = arith.constant 2 : index
    %c0_14 = arith.constant 0 : index
    %c0_15 = arith.constant 0 : index
    %20 = vector.load %arg4[%c2, %c0_14, %c0_15] : memref<9x64x64xbf16, #tpu.memory_space<vmem>>, vector<1x64x64xbf16>
    %21 = vector.shape_cast %20 : vector<1x64x64xbf16> to vector<64x64xbf16>
    %cst_16 = arith.constant dense<0.000000e+00> : vector<64x64xf32>
    %22 = tpu.matmul %19, %21, %cst_16 {dimension_numbers = #tpu.dot_dimension_numbers<[1], [0], [0], [1], [0, 0, 1, 1], [], []>} : vector<64x64xbf16>, vector<64x64xbf16>, vector<64x64xf32> -> vector<64x64xf32>
    %23 = arith.addf %17, %22 : vector<64x64xf32>
    %24 = vector.extract_strided_slice %4 {offsets = [1, 0, 0], sizes = [8, 8, 64], strides = [1, 1, 1]} : vector<10x10x64xbf16> to vector<8x8x64xbf16>
    %25 = vector.shape_cast %24 : vector<8x8x64xbf16> to vector<64x64xbf16>
    %c3 = arith.constant 3 : index
    %c0_17 = arith.constant 0 : index
    %c0_18 = arith.constant 0 : index
    %26 = vector.load %arg4[%c3, %c0_17, %c0_18] : memref<9x64x64xbf16, #tpu.memory_space<vmem>>, vector<1x64x64xbf16>
    %27 = vector.shape_cast %26 : vector<1x64x64xbf16> to vector<64x64xbf16>
    %cst_19 = arith.constant dense<0.000000e+00> : vector<64x64xf32>
    %28 = tpu.matmul %25, %27, %cst_19 {dimension_numbers = #tpu.dot_dimension_numbers<[1], [0], [0], [1], [0, 0, 1, 1], [], []>} : vector<64x64xbf16>, vector<64x64xbf16>, vector<64x64xf32> -> vector<64x64xf32>
    %29 = arith.addf %23, %28 : vector<64x64xf32>
    %30 = vector.extract_strided_slice %4 {offsets = [1, 1, 0], sizes = [8, 8, 64], strides = [1, 1, 1]} : vector<10x10x64xbf16> to vector<8x8x64xbf16>
    %31 = vector.shape_cast %30 : vector<8x8x64xbf16> to vector<64x64xbf16>
    %c4 = arith.constant 4 : index
    %c0_20 = arith.constant 0 : index
    %c0_21 = arith.constant 0 : index
    %32 = vector.load %arg4[%c4, %c0_20, %c0_21] : memref<9x64x64xbf16, #tpu.memory_space<vmem>>, vector<1x64x64xbf16>
    %33 = vector.shape_cast %32 : vector<1x64x64xbf16> to vector<64x64xbf16>
    %cst_22 = arith.constant dense<0.000000e+00> : vector<64x64xf32>
    %34 = tpu.matmul %31, %33, %cst_22 {dimension_numbers = #tpu.dot_dimension_numbers<[1], [0], [0], [1], [0, 0, 1, 1], [], []>} : vector<64x64xbf16>, vector<64x64xbf16>, vector<64x64xf32> -> vector<64x64xf32>
    %35 = arith.addf %29, %34 : vector<64x64xf32>
    %36 = vector.extract_strided_slice %4 {offsets = [1, 2, 0], sizes = [8, 8, 64], strides = [1, 1, 1]} : vector<10x10x64xbf16> to vector<8x8x64xbf16>
    %37 = vector.shape_cast %36 : vector<8x8x64xbf16> to vector<64x64xbf16>
    %c5 = arith.constant 5 : index
    %c0_23 = arith.constant 0 : index
    %c0_24 = arith.constant 0 : index
    %38 = vector.load %arg4[%c5, %c0_23, %c0_24] : memref<9x64x64xbf16, #tpu.memory_space<vmem>>, vector<1x64x64xbf16>
    %39 = vector.shape_cast %38 : vector<1x64x64xbf16> to vector<64x64xbf16>
    %cst_25 = arith.constant dense<0.000000e+00> : vector<64x64xf32>
    %40 = tpu.matmul %37, %39, %cst_25 {dimension_numbers = #tpu.dot_dimension_numbers<[1], [0], [0], [1], [0, 0, 1, 1], [], []>} : vector<64x64xbf16>, vector<64x64xbf16>, vector<64x64xf32> -> vector<64x64xf32>
    %41 = arith.addf %35, %40 : vector<64x64xf32>
    %42 = vector.extract_strided_slice %4 {offsets = [2, 0, 0], sizes = [8, 8, 64], strides = [1, 1, 1]} : vector<10x10x64xbf16> to vector<8x8x64xbf16>
    %43 = vector.shape_cast %42 : vector<8x8x64xbf16> to vector<64x64xbf16>
    %c6 = arith.constant 6 : index
    %c0_26 = arith.constant 0 : index
    %c0_27 = arith.constant 0 : index
    %44 = vector.load %arg4[%c6, %c0_26, %c0_27] : memref<9x64x64xbf16, #tpu.memory_space<vmem>>, vector<1x64x64xbf16>
    %45 = vector.shape_cast %44 : vector<1x64x64xbf16> to vector<64x64xbf16>
    %cst_28 = arith.constant dense<0.000000e+00> : vector<64x64xf32>
    %46 = tpu.matmul %43, %45, %cst_28 {dimension_numbers = #tpu.dot_dimension_numbers<[1], [0], [0], [1], [0, 0, 1, 1], [], []>} : vector<64x64xbf16>, vector<64x64xbf16>, vector<64x64xf32> -> vector<64x64xf32>
    %47 = arith.addf %41, %46 : vector<64x64xf32>
    %48 = vector.extract_strided_slice %4 {offsets = [2, 1, 0], sizes = [8, 8, 64], strides = [1, 1, 1]} : vector<10x10x64xbf16> to vector<8x8x64xbf16>
    %49 = vector.shape_cast %48 : vector<8x8x64xbf16> to vector<64x64xbf16>
    %c7 = arith.constant 7 : index
    %c0_29 = arith.constant 0 : index
    %c0_30 = arith.constant 0 : index
    %50 = vector.load %arg4[%c7, %c0_29, %c0_30] : memref<9x64x64xbf16, #tpu.memory_space<vmem>>, vector<1x64x64xbf16>
    %51 = vector.shape_cast %50 : vector<1x64x64xbf16> to vector<64x64xbf16>
    %cst_31 = arith.constant dense<0.000000e+00> : vector<64x64xf32>
    %52 = tpu.matmul %49, %51, %cst_31 {dimension_numbers = #tpu.dot_dimension_numbers<[1], [0], [0], [1], [0, 0, 1, 1], [], []>} : vector<64x64xbf16>, vector<64x64xbf16>, vector<64x64xf32> -> vector<64x64xf32>
    %53 = arith.addf %47, %52 : vector<64x64xf32>
    %54 = vector.extract_strided_slice %4 {offsets = [2, 2, 0], sizes = [8, 8, 64], strides = [1, 1, 1]} : vector<10x10x64xbf16> to vector<8x8x64xbf16>
    %55 = vector.shape_cast %54 : vector<8x8x64xbf16> to vector<64x64xbf16>
    %c8 = arith.constant 8 : index
    %c0_32 = arith.constant 0 : index
    %c0_33 = arith.constant 0 : index
    %56 = vector.load %arg4[%c8, %c0_32, %c0_33] : memref<9x64x64xbf16, #tpu.memory_space<vmem>>, vector<1x64x64xbf16>
    %57 = vector.shape_cast %56 : vector<1x64x64xbf16> to vector<64x64xbf16>
    %cst_34 = arith.constant dense<0.000000e+00> : vector<64x64xf32>
    %58 = tpu.matmul %55, %57, %cst_34 {dimension_numbers = #tpu.dot_dimension_numbers<[1], [0], [0], [1], [0, 0, 1, 1], [], []>} : vector<64x64xbf16>, vector<64x64xbf16>, vector<64x64xf32> -> vector<64x64xf32>
    %59 = arith.addf %53, %58 : vector<64x64xf32>
    %60 = vector.shape_cast %59 : vector<64x64xf32> to vector<8x8x64xf32>
    %c0_35 = arith.constant 0 : index
    %c0_36 = arith.constant 0 : index
    %61 = vector.load %arg5[%c0_35, %c0_36] : memref<1x64xf32, #tpu.memory_space<vmem>>, vector<1x64xf32>
    %62 = vector.shape_cast %61 : vector<1x64xf32> to vector<1x1x64xf32>
    %63 = vector.broadcast %62 : vector<1x1x64xf32> to vector<8x8x64xf32>
    %64 = arith.addf %60, %63 : vector<8x8x64xf32>
    %c0_37 = arith.constant 0 : index
    %c0_38 = arith.constant 0 : index
    %c0_39 = arith.constant 0 : index
    %c0_40 = arith.constant 0 : index
    %65 = vector.load %arg6[%c0_37, %c0_38, %c0_39, %c0_40] : memref<1x8x8x64xbf16, #tpu.memory_space<vmem>>, vector<1x8x8x64xbf16>
    %66 = vector.shape_cast %65 : vector<1x8x8x64xbf16> to vector<8x8x64xbf16>
    %67 = arith.extf %66 : vector<8x8x64xbf16> to vector<8x8x64xf32>
    %68 = arith.addf %64, %67 : vector<8x8x64xf32>
    %cst_41 = arith.constant 0.000000e+00 : f32
    %69 = vector.broadcast %cst_41 : f32 to vector<8x8x64xf32>
    %70 = arith.maximumf %68, %69 : vector<8x8x64xf32>
    %71 = arith.truncf %70 : vector<8x8x64xf32> to vector<8x8x64xbf16>
    %c0_42 = arith.constant 0 : index
    %c0_43 = arith.constant 0 : index
    %c0_44 = arith.constant 0 : index
    %c0_45 = arith.constant 0 : index
    %72 = vector.load %arg7[%c0_42, %c0_43, %c0_44, %c0_45] : memref<1x8x8x64xbf16, #tpu.memory_space<vmem>>, vector<1x8x8x64xbf16>
    %73 = vector.shape_cast %72 : vector<1x8x8x64xbf16> to vector<8x8x64xbf16>
    %74 = vector.shape_cast %71 : vector<8x8x64xbf16> to vector<1x8x8x64xbf16>
    tpu.vector_store %arg7[%c0_42, %c0_43, %c0_44, %c0_45], %74 {strides = array<i32>} : memref<1x8x8x64xbf16, #tpu.memory_space<vmem>>, vector<1x8x8x64xbf16>,
    return
  }
  func.func @transform_0(%arg0: i32, %arg1: i32) -> (i32, i32, i32, i32) {
    %c0_i32 = arith.constant 0 : i32
    %c0_i32_0 = arith.constant 0 : i32
    %c0_i32_1 = arith.constant 0 : i32
    return %arg0, %arg1, %c0_i32, %c0_i32_0 : i32, i32, i32, i32
  }
  func.func @transform_1(%arg0: i32, %arg1: i32) -> (i32, i32, i32, i32) {
    %c1_i32 = arith.constant 1 : i32
    %0 = arith.addi %arg1, %c1_i32 : i32
    %c4_i32 = arith.constant 4 : i32
    %1 = arith.muli %0, %c4_i32 : i32
    %c0_i32 = arith.constant 0 : i32
    %c0_i32_0 = arith.constant 0 : i32
    %c0_i32_1 = arith.constant 0 : i32
    return %arg0, %1, %c0_i32, %c0_i32_0 : i32, i32, i32, i32
  }
  func.func @transform_2(%arg0: i32, %arg1: i32) -> (i32, i32, i32) {
    %c0_i32 = arith.constant 0 : i32
    %c0_i32_0 = arith.constant 0 : i32
    %c0_i32_1 = arith.constant 0 : i32
    %c0_i32_2 = arith.constant 0 : i32
    return %c0_i32, %c0_i32_0, %c0_i32_1 : i32, i32, i32
  }
  func.func @transform_3(%arg0: i32, %arg1: i32) -> (i32, i32) {
    %c0_i32 = arith.constant 0 : i32
    %c0_i32_0 = arith.constant 0 : i32
    %c0_i32_1 = arith.constant 0 : i32
    return %c0_i32, %c0_i32_0 : i32, i32
  }
  func.func @transform_4(%arg0: i32, %arg1: i32) -> (i32, i32, i32, i32) {
    %c0_i32 = arith.constant 0 : i32
    %c0_i32_0 = arith.constant 0 : i32
    %c0_i32_1 = arith.constant 0 : i32
    return %arg0, %arg1, %c0_i32, %c0_i32_0 : i32, i32, i32, i32
  }
  func.func @transform_5(%arg0: i32, %arg1: i32) -> (i32, i32, i32, i32) {
    %c0_i32 = arith.constant 0 : i32
    %c0_i32_0 = arith.constant 0 : i32
    %c0_i32_1 = arith.constant 0 : i32
    return %arg0, %arg1, %c0_i32, %c0_i32_0 : i32, i32, i32, i32
  }
}

module attributes {stable_mosaic.version = 11 : i64} {
  func.func @_conv3x3_kernel(%arg0: i32, %arg1: i32, %arg2: memref<1x8x10x64xbf16, #tpu.memory_space<vmem>>, %arg3: memref<1x2x10x64xbf16, #tpu.memory_space<vmem>>, %arg4: memref<9x64x64xbf16, #tpu.memory_space<vmem>>, %arg5: memref<1x64xf32, #tpu.memory_space<vmem>>, %arg6: memref<1x8x8x64xbf16, #tpu.memory_space<vmem>>) attributes {dimension_semantics = [#tpu.dimension_semantics<parallel>, #tpu.dimension_semantics<parallel>], iteration_bounds = array<i64: 2, 1>, scalar_prefetch = 0 : i64, scratch_operands = 0 : i64, tpu.core_type = #tpu.core_type<tc>, window_params = [{transform_indices = @transform_0, window_bounds = array<i64: 1, 8, 10, 64>}, {transform_indices = @transform_1, window_bounds = array<i64: 1, 2, 10, 64>}, {pipeline_mode = #tpu.pipeline_mode<synchronous>, transform_indices = @transform_2, window_bounds = array<i64: 9, 64, 64>}, {pipeline_mode = #tpu.pipeline_mode<synchronous>, transform_indices = @transform_3, window_bounds = array<i64: 1, 64>}, {transform_indices = @transform_4, window_bounds = array<i64: 1, 8, 8, 64>}]} {
    %c0 = arith.constant 0 : index
    %c0_0 = arith.constant 0 : index
    %c0_1 = arith.constant 0 : index
    %c0_2 = arith.constant 0 : index
    %0 = vector.load %arg2[%c0, %c0_0, %c0_1, %c0_2] : memref<1x8x10x64xbf16, #tpu.memory_space<vmem>>, vector<1x8x10x64xbf16>
    %1 = vector.shape_cast %0 : vector<1x8x10x64xbf16> to vector<8x10x64xbf16>
    %c0_3 = arith.constant 0 : index
    %c0_4 = arith.constant 0 : index
    %c0_5 = arith.constant 0 : index
    %c0_6 = arith.constant 0 : index
    %2 = vector.load %arg3[%c0_3, %c0_4, %c0_5, %c0_6] : memref<1x2x10x64xbf16, #tpu.memory_space<vmem>>, vector<1x2x10x64xbf16>
    %3 = vector.shape_cast %2 : vector<1x2x10x64xbf16> to vector<2x10x64xbf16>
    %4 = tpu.concatenate %1, %3 in 0 : vector<8x10x64xbf16>, vector<2x10x64xbf16> -> vector<10x10x64xbf16>
    %cst = arith.constant 0.000000e+00 : f32
    %5 = vector.broadcast %cst : f32 to vector<64x64xf32>
    %6 = vector.extract_strided_slice %4 {offsets = [0, 0, 0], sizes = [8, 8, 64], strides = [1, 1, 1]} : vector<10x10x64xbf16> to vector<8x8x64xbf16>
    %7 = vector.shape_cast %6 : vector<8x8x64xbf16> to vector<64x64xbf16>
    %c0_7 = arith.constant 0 : index
    %c0_8 = arith.constant 0 : index
    %c0_9 = arith.constant 0 : index
    %8 = vector.load %arg4[%c0_7, %c0_8, %c0_9] : memref<9x64x64xbf16, #tpu.memory_space<vmem>>, vector<1x64x64xbf16>
    %9 = vector.shape_cast %8 : vector<1x64x64xbf16> to vector<64x64xbf16>
    %cst_10 = arith.constant dense<0.000000e+00> : vector<64x64xf32>
    %10 = tpu.matmul %7, %9, %cst_10 {dimension_numbers = #tpu.dot_dimension_numbers<[1], [0], [0], [1], [0, 0, 1, 1], [], []>} : vector<64x64xbf16>, vector<64x64xbf16>, vector<64x64xf32> -> vector<64x64xf32>
    %11 = arith.addf %5, %10 : vector<64x64xf32>
    %12 = vector.extract_strided_slice %4 {offsets = [0, 1, 0], sizes = [8, 8, 64], strides = [1, 1, 1]} : vector<10x10x64xbf16> to vector<8x8x64xbf16>
    %13 = vector.shape_cast %12 : vector<8x8x64xbf16> to vector<64x64xbf16>
    %c1 = arith.constant 1 : index
    %c0_11 = arith.constant 0 : index
    %c0_12 = arith.constant 0 : index
    %14 = vector.load %arg4[%c1, %c0_11, %c0_12] : memref<9x64x64xbf16, #tpu.memory_space<vmem>>, vector<1x64x64xbf16>
    %15 = vector.shape_cast %14 : vector<1x64x64xbf16> to vector<64x64xbf16>
    %cst_13 = arith.constant dense<0.000000e+00> : vector<64x64xf32>
    %16 = tpu.matmul %13, %15, %cst_13 {dimension_numbers = #tpu.dot_dimension_numbers<[1], [0], [0], [1], [0, 0, 1, 1], [], []>} : vector<64x64xbf16>, vector<64x64xbf16>, vector<64x64xf32> -> vector<64x64xf32>
    %17 = arith.addf %11, %16 : vector<64x64xf32>
    %18 = vector.extract_strided_slice %4 {offsets = [0, 2, 0], sizes = [8, 8, 64], strides = [1, 1, 1]} : vector<10x10x64xbf16> to vector<8x8x64xbf16>
    %19 = vector.shape_cast %18 : vector<8x8x64xbf16> to vector<64x64xbf16>
    %c2 = arith.constant 2 : index
    %c0_14 = arith.constant 0 : index
    %c0_15 = arith.constant 0 : index
    %20 = vector.load %arg4[%c2, %c0_14, %c0_15] : memref<9x64x64xbf16, #tpu.memory_space<vmem>>, vector<1x64x64xbf16>
    %21 = vector.shape_cast %20 : vector<1x64x64xbf16> to vector<64x64xbf16>
    %cst_16 = arith.constant dense<0.000000e+00> : vector<64x64xf32>
    %22 = tpu.matmul %19, %21, %cst_16 {dimension_numbers = #tpu.dot_dimension_numbers<[1], [0], [0], [1], [0, 0, 1, 1], [], []>} : vector<64x64xbf16>, vector<64x64xbf16>, vector<64x64xf32> -> vector<64x64xf32>
    %23 = arith.addf %17, %22 : vector<64x64xf32>
    %24 = vector.extract_strided_slice %4 {offsets = [1, 0, 0], sizes = [8, 8, 64], strides = [1, 1, 1]} : vector<10x10x64xbf16> to vector<8x8x64xbf16>
    %25 = vector.shape_cast %24 : vector<8x8x64xbf16> to vector<64x64xbf16>
    %c3 = arith.constant 3 : index
    %c0_17 = arith.constant 0 : index
    %c0_18 = arith.constant 0 : index
    %26 = vector.load %arg4[%c3, %c0_17, %c0_18] : memref<9x64x64xbf16, #tpu.memory_space<vmem>>, vector<1x64x64xbf16>
    %27 = vector.shape_cast %26 : vector<1x64x64xbf16> to vector<64x64xbf16>
    %cst_19 = arith.constant dense<0.000000e+00> : vector<64x64xf32>
    %28 = tpu.matmul %25, %27, %cst_19 {dimension_numbers = #tpu.dot_dimension_numbers<[1], [0], [0], [1], [0, 0, 1, 1], [], []>} : vector<64x64xbf16>, vector<64x64xbf16>, vector<64x64xf32> -> vector<64x64xf32>
    %29 = arith.addf %23, %28 : vector<64x64xf32>
    %30 = vector.extract_strided_slice %4 {offsets = [1, 1, 0], sizes = [8, 8, 64], strides = [1, 1, 1]} : vector<10x10x64xbf16> to vector<8x8x64xbf16>
    %31 = vector.shape_cast %30 : vector<8x8x64xbf16> to vector<64x64xbf16>
    %c4 = arith.constant 4 : index
    %c0_20 = arith.constant 0 : index
    %c0_21 = arith.constant 0 : index
    %32 = vector.load %arg4[%c4, %c0_20, %c0_21] : memref<9x64x64xbf16, #tpu.memory_space<vmem>>, vector<1x64x64xbf16>
    %33 = vector.shape_cast %32 : vector<1x64x64xbf16> to vector<64x64xbf16>
    %cst_22 = arith.constant dense<0.000000e+00> : vector<64x64xf32>
    %34 = tpu.matmul %31, %33, %cst_22 {dimension_numbers = #tpu.dot_dimension_numbers<[1], [0], [0], [1], [0, 0, 1, 1], [], []>} : vector<64x64xbf16>, vector<64x64xbf16>, vector<64x64xf32> -> vector<64x64xf32>
    %35 = arith.addf %29, %34 : vector<64x64xf32>
    %36 = vector.extract_strided_slice %4 {offsets = [1, 2, 0], sizes = [8, 8, 64], strides = [1, 1, 1]} : vector<10x10x64xbf16> to vector<8x8x64xbf16>
    %37 = vector.shape_cast %36 : vector<8x8x64xbf16> to vector<64x64xbf16>
    %c5 = arith.constant 5 : index
    %c0_23 = arith.constant 0 : index
    %c0_24 = arith.constant 0 : index
    %38 = vector.load %arg4[%c5, %c0_23, %c0_24] : memref<9x64x64xbf16, #tpu.memory_space<vmem>>, vector<1x64x64xbf16>
    %39 = vector.shape_cast %38 : vector<1x64x64xbf16> to vector<64x64xbf16>
    %cst_25 = arith.constant dense<0.000000e+00> : vector<64x64xf32>
    %40 = tpu.matmul %37, %39, %cst_25 {dimension_numbers = #tpu.dot_dimension_numbers<[1], [0], [0], [1], [0, 0, 1, 1], [], []>} : vector<64x64xbf16>, vector<64x64xbf16>, vector<64x64xf32> -> vector<64x64xf32>
    %41 = arith.addf %35, %40 : vector<64x64xf32>
    %42 = vector.extract_strided_slice %4 {offsets = [2, 0, 0], sizes = [8, 8, 64], strides = [1, 1, 1]} : vector<10x10x64xbf16> to vector<8x8x64xbf16>
    %43 = vector.shape_cast %42 : vector<8x8x64xbf16> to vector<64x64xbf16>
    %c6 = arith.constant 6 : index
    %c0_26 = arith.constant 0 : index
    %c0_27 = arith.constant 0 : index
    %44 = vector.load %arg4[%c6, %c0_26, %c0_27] : memref<9x64x64xbf16, #tpu.memory_space<vmem>>, vector<1x64x64xbf16>
    %45 = vector.shape_cast %44 : vector<1x64x64xbf16> to vector<64x64xbf16>
    %cst_28 = arith.constant dense<0.000000e+00> : vector<64x64xf32>
    %46 = tpu.matmul %43, %45, %cst_28 {dimension_numbers = #tpu.dot_dimension_numbers<[1], [0], [0], [1], [0, 0, 1, 1], [], []>} : vector<64x64xbf16>, vector<64x64xbf16>, vector<64x64xf32> -> vector<64x64xf32>
    %47 = arith.addf %41, %46 : vector<64x64xf32>
    %48 = vector.extract_strided_slice %4 {offsets = [2, 1, 0], sizes = [8, 8, 64], strides = [1, 1, 1]} : vector<10x10x64xbf16> to vector<8x8x64xbf16>
    %49 = vector.shape_cast %48 : vector<8x8x64xbf16> to vector<64x64xbf16>
    %c7 = arith.constant 7 : index
    %c0_29 = arith.constant 0 : index
    %c0_30 = arith.constant 0 : index
    %50 = vector.load %arg4[%c7, %c0_29, %c0_30] : memref<9x64x64xbf16, #tpu.memory_space<vmem>>, vector<1x64x64xbf16>
    %51 = vector.shape_cast %50 : vector<1x64x64xbf16> to vector<64x64xbf16>
    %cst_31 = arith.constant dense<0.000000e+00> : vector<64x64xf32>
    %52 = tpu.matmul %49, %51, %cst_31 {dimension_numbers = #tpu.dot_dimension_numbers<[1], [0], [0], [1], [0, 0, 1, 1], [], []>} : vector<64x64xbf16>, vector<64x64xbf16>, vector<64x64xf32> -> vector<64x64xf32>
    %53 = arith.addf %47, %52 : vector<64x64xf32>
    %54 = vector.extract_strided_slice %4 {offsets = [2, 2, 0], sizes = [8, 8, 64], strides = [1, 1, 1]} : vector<10x10x64xbf16> to vector<8x8x64xbf16>
    %55 = vector.shape_cast %54 : vector<8x8x64xbf16> to vector<64x64xbf16>
    %c8 = arith.constant 8 : index
    %c0_32 = arith.constant 0 : index
    %c0_33 = arith.constant 0 : index
    %56 = vector.load %arg4[%c8, %c0_32, %c0_33] : memref<9x64x64xbf16, #tpu.memory_space<vmem>>, vector<1x64x64xbf16>
    %57 = vector.shape_cast %56 : vector<1x64x64xbf16> to vector<64x64xbf16>
    %cst_34 = arith.constant dense<0.000000e+00> : vector<64x64xf32>
    %58 = tpu.matmul %55, %57, %cst_34 {dimension_numbers = #tpu.dot_dimension_numbers<[1], [0], [0], [1], [0, 0, 1, 1], [], []>} : vector<64x64xbf16>, vector<64x64xbf16>, vector<64x64xf32> -> vector<64x64xf32>
    %59 = arith.addf %53, %58 : vector<64x64xf32>
    %60 = vector.shape_cast %59 : vector<64x64xf32> to vector<8x8x64xf32>
    %c0_35 = arith.constant 0 : index
    %c0_36 = arith.constant 0 : index
    %61 = vector.load %arg5[%c0_35, %c0_36] : memref<1x64xf32, #tpu.memory_space<vmem>>, vector<1x64xf32>
    %62 = vector.shape_cast %61 : vector<1x64xf32> to vector<1x1x64xf32>
    %63 = vector.broadcast %62 : vector<1x1x64xf32> to vector<8x8x64xf32>
    %64 = arith.addf %60, %63 : vector<8x8x64xf32>
    %cst_37 = arith.constant 0.000000e+00 : f32
    %65 = vector.broadcast %cst_37 : f32 to vector<8x8x64xf32>
    %66 = arith.maximumf %64, %65 : vector<8x8x64xf32>
    %67 = arith.truncf %66 : vector<8x8x64xf32> to vector<8x8x64xbf16>
    %c0_38 = arith.constant 0 : index
    %c0_39 = arith.constant 0 : index
    %c0_40 = arith.constant 0 : index
    %c0_41 = arith.constant 0 : index
    %68 = vector.load %arg6[%c0_38, %c0_39, %c0_40, %c0_41] : memref<1x8x8x64xbf16, #tpu.memory_space<vmem>>, vector<1x8x8x64xbf16>
    %69 = vector.shape_cast %68 : vector<1x8x8x64xbf16> to vector<8x8x64xbf16>
    %70 = vector.shape_cast %67 : vector<8x8x64xbf16> to vector<1x8x8x64xbf16>
    tpu.vector_store %arg6[%c0_38, %c0_39, %c0_40, %c0_41], %70 {strides = array<i32>} : memref<1x8x8x64xbf16, #tpu.memory_space<vmem>>, vector<1x8x8x64xbf16>,
    return
  }
  func.func @transform_0(%arg0: i32, %arg1: i32) -> (i32, i32, i32, i32) {
    %c0_i32 = arith.constant 0 : i32
    %c0_i32_0 = arith.constant 0 : i32
    %c0_i32_1 = arith.constant 0 : i32
    return %arg0, %arg1, %c0_i32, %c0_i32_0 : i32, i32, i32, i32
  }
  func.func @transform_1(%arg0: i32, %arg1: i32) -> (i32, i32, i32, i32) {
    %c1_i32 = arith.constant 1 : i32
    %0 = arith.addi %arg1, %c1_i32 : i32
    %c4_i32 = arith.constant 4 : i32
    %1 = arith.muli %0, %c4_i32 : i32
    %c0_i32 = arith.constant 0 : i32
    %c0_i32_0 = arith.constant 0 : i32
    %c0_i32_1 = arith.constant 0 : i32
    return %arg0, %1, %c0_i32, %c0_i32_0 : i32, i32, i32, i32
  }
  func.func @transform_2(%arg0: i32, %arg1: i32) -> (i32, i32, i32) {
    %c0_i32 = arith.constant 0 : i32
    %c0_i32_0 = arith.constant 0 : i32
    %c0_i32_1 = arith.constant 0 : i32
    %c0_i32_2 = arith.constant 0 : i32
    return %c0_i32, %c0_i32_0, %c0_i32_1 : i32, i32, i32
  }
  func.func @transform_3(%arg0: i32, %arg1: i32) -> (i32, i32) {
    %c0_i32 = arith.constant 0 : i32
    %c0_i32_0 = arith.constant 0 : i32
    %c0_i32_1 = arith.constant 0 : i32
    return %c0_i32, %c0_i32_0 : i32, i32
  }
  func.func @transform_4(%arg0: i32, %arg1: i32) -> (i32, i32, i32, i32) {
    %c0_i32 = arith.constant 0 : i32
    %c0_i32_0 = arith.constant 0 : i32
    %c0_i32_1 = arith.constant 0 : i32
    return %arg0, %arg1, %c0_i32, %c0_i32_0 : i32, i32, i32, i32
  }
}

module attributes {stable_mosaic.version = 11 : i64} {
  func.func @_gemm_split_kernel(%arg0: i32, %arg1: memref<32x576xbf16, #tpu.memory_space<vmem>>, %arg2: memref<576x256xbf16, #tpu.memory_space<vmem>>, %arg3: memref<1x256xf32, #tpu.memory_space<vmem>>, %arg4: memref<32x128xbf16, #tpu.memory_space<vmem>>, %arg5: memref<32x128xbf16, #tpu.memory_space<vmem>>) attributes {dimension_semantics = [#tpu.dimension_semantics<parallel>], iteration_bounds = array<i64: 1>, scalar_prefetch = 0 : i64, scratch_operands = 0 : i64, tpu.core_type = #tpu.core_type<tc>, window_params = [{transform_indices = @transform_0, window_bounds = array<i64: 32, 576>}, {pipeline_mode = #tpu.pipeline_mode<synchronous>, transform_indices = @transform_1, window_bounds = array<i64: 576, 256>}, {pipeline_mode = #tpu.pipeline_mode<synchronous>, transform_indices = @transform_2, window_bounds = array<i64: 1, 256>}, {transform_indices = @transform_3, window_bounds = array<i64: 32, 128>}, {transform_indices = @transform_4, window_bounds = array<i64: 32, 128>}]} {
    %c0 = arith.constant 0 : index
    %c0_0 = arith.constant 0 : index
    %0 = vector.load %arg1[%c0, %c0_0] : memref<32x576xbf16, #tpu.memory_space<vmem>>, vector<32x576xbf16>
    %c0_1 = arith.constant 0 : index
    %c0_2 = arith.constant 0 : index
    %1 = vector.load %arg2[%c0_1, %c0_2] : memref<576x256xbf16, #tpu.memory_space<vmem>>, vector<576x256xbf16>
    %cst = arith.constant dense<0.000000e+00> : vector<32x256xf32>
    %2 = tpu.matmul %0, %1, %cst {dimension_numbers = #tpu.dot_dimension_numbers<[1], [0], [0], [1], [0, 0, 1, 1], [], []>} : vector<32x576xbf16>, vector<576x256xbf16>, vector<32x256xf32> -> vector<32x256xf32>
    %c0_3 = arith.constant 0 : index
    %c0_4 = arith.constant 0 : index
    %3 = vector.load %arg3[%c0_3, %c0_4] : memref<1x256xf32, #tpu.memory_space<vmem>>, vector<1x256xf32>
    %4 = vector.broadcast %3 : vector<1x256xf32> to vector<32x256xf32>
    %5 = arith.addf %2, %4 : vector<32x256xf32>
    %6 = vector.extract_strided_slice %5 {offsets = [0, 0], sizes = [32, 128], strides = [1, 1]} : vector<32x256xf32> to vector<32x128xf32>
    %cst_5 = arith.constant 0.000000e+00 : f32
    %7 = vector.broadcast %cst_5 : f32 to vector<32x128xf32>
    %8 = arith.maximumf %6, %7 : vector<32x128xf32>
    %9 = arith.truncf %8 : vector<32x128xf32> to vector<32x128xbf16>
    %c0_6 = arith.constant 0 : index
    %c0_7 = arith.constant 0 : index
    %10 = vector.load %arg4[%c0_6, %c0_7] : memref<32x128xbf16, #tpu.memory_space<vmem>>, vector<32x128xbf16>
    tpu.vector_store %arg4[%c0_6, %c0_7], %9 {strides = array<i32>} : memref<32x128xbf16, #tpu.memory_space<vmem>>, vector<32x128xbf16>,
    %11 = vector.extract_strided_slice %5 {offsets = [0, 128], sizes = [32, 128], strides = [1, 1]} : vector<32x256xf32> to vector<32x128xf32>
    %12 = arith.truncf %11 : vector<32x128xf32> to vector<32x128xbf16>
    %c0_8 = arith.constant 0 : index
    %c0_9 = arith.constant 0 : index
    %13 = vector.load %arg5[%c0_8, %c0_9] : memref<32x128xbf16, #tpu.memory_space<vmem>>, vector<32x128xbf16>
    tpu.vector_store %arg5[%c0_8, %c0_9], %12 {strides = array<i32>} : memref<32x128xbf16, #tpu.memory_space<vmem>>, vector<32x128xbf16>,
    return
  }
  func.func @transform_0(%arg0: i32) -> (i32, i32) {
    %c0_i32 = arith.constant 0 : i32
    %c0_i32_0 = arith.constant 0 : i32
    return %arg0, %c0_i32 : i32, i32
  }
  func.func @transform_1(%arg0: i32) -> (i32, i32) {
    %c0_i32 = arith.constant 0 : i32
    %c0_i32_0 = arith.constant 0 : i32
    %c0_i32_1 = arith.constant 0 : i32
    return %c0_i32, %c0_i32_0 : i32, i32
  }
  func.func @transform_2(%arg0: i32) -> (i32, i32) {
    %c0_i32 = arith.constant 0 : i32
    %c0_i32_0 = arith.constant 0 : i32
    %c0_i32_1 = arith.constant 0 : i32
    return %c0_i32, %c0_i32_0 : i32, i32
  }
  func.func @transform_3(%arg0: i32) -> (i32, i32) {
    %c0_i32 = arith.constant 0 : i32
    %c0_i32_0 = arith.constant 0 : i32
    return %arg0, %c0_i32 : i32, i32
  }
  func.func @transform_4(%arg0: i32) -> (i32, i32) {
    %c0_i32 = arith.constant 0 : i32
    %c0_i32_0 = arith.constant 0 : i32
    return %arg0, %c0_i32 : i32, i32
  }
}

module attributes {stable_mosaic.version = 11 : i64} {
  func.func @_conv3x3_kernel(%arg0: i32, %arg1: i32, %arg2: memref<1x8x6x128xbf16, #tpu.memory_space<vmem>>, %arg3: memref<1x2x6x128xbf16, #tpu.memory_space<vmem>>, %arg4: memref<9x128x128xbf16, #tpu.memory_space<vmem>>, %arg5: memref<1x128xf32, #tpu.memory_space<vmem>>, %arg6: memref<1x8x4x128xbf16, #tpu.memory_space<vmem>>) attributes {dimension_semantics = [#tpu.dimension_semantics<parallel>, #tpu.dimension_semantics<parallel>], iteration_bounds = array<i64: 2, 1>, scalar_prefetch = 0 : i64, scratch_operands = 0 : i64, tpu.core_type = #tpu.core_type<tc>, window_params = [{transform_indices = @transform_0, window_bounds = array<i64: 1, 8, 6, 128>}, {transform_indices = @transform_1, window_bounds = array<i64: 1, 2, 6, 128>}, {pipeline_mode = #tpu.pipeline_mode<synchronous>, transform_indices = @transform_2, window_bounds = array<i64: 9, 128, 128>}, {pipeline_mode = #tpu.pipeline_mode<synchronous>, transform_indices = @transform_3, window_bounds = array<i64: 1, 128>}, {transform_indices = @transform_4, window_bounds = array<i64: 1, 8, 4, 128>}]} {
    %c0 = arith.constant 0 : index
    %c0_0 = arith.constant 0 : index
    %c0_1 = arith.constant 0 : index
    %c0_2 = arith.constant 0 : index
    %0 = vector.load %arg2[%c0, %c0_0, %c0_1, %c0_2] : memref<1x8x6x128xbf16, #tpu.memory_space<vmem>>, vector<1x8x6x128xbf16>
    %1 = vector.shape_cast %0 : vector<1x8x6x128xbf16> to vector<8x6x128xbf16>
    %c0_3 = arith.constant 0 : index
    %c0_4 = arith.constant 0 : index
    %c0_5 = arith.constant 0 : index
    %c0_6 = arith.constant 0 : index
    %2 = vector.load %arg3[%c0_3, %c0_4, %c0_5, %c0_6] : memref<1x2x6x128xbf16, #tpu.memory_space<vmem>>, vector<1x2x6x128xbf16>
    %3 = vector.shape_cast %2 : vector<1x2x6x128xbf16> to vector<2x6x128xbf16>
    %4 = tpu.concatenate %1, %3 in 0 : vector<8x6x128xbf16>, vector<2x6x128xbf16> -> vector<10x6x128xbf16>
    %cst = arith.constant 0.000000e+00 : f32
    %5 = vector.broadcast %cst : f32 to vector<32x128xf32>
    %6 = vector.extract_strided_slice %4 {offsets = [0, 0, 0], sizes = [8, 4, 128], strides = [1, 1, 1]} : vector<10x6x128xbf16> to vector<8x4x128xbf16>
    %7 = vector.shape_cast %6 : vector<8x4x128xbf16> to vector<32x128xbf16>
    %c0_7 = arith.constant 0 : index
    %c0_8 = arith.constant 0 : index
    %c0_9 = arith.constant 0 : index
    %8 = vector.load %arg4[%c0_7, %c0_8, %c0_9] : memref<9x128x128xbf16, #tpu.memory_space<vmem>>, vector<1x128x128xbf16>
    %9 = vector.shape_cast %8 : vector<1x128x128xbf16> to vector<128x128xbf16>
    %cst_10 = arith.constant dense<0.000000e+00> : vector<32x128xf32>
    %10 = tpu.matmul %7, %9, %cst_10 {dimension_numbers = #tpu.dot_dimension_numbers<[1], [0], [0], [1], [0, 0, 1, 1], [], []>} : vector<32x128xbf16>, vector<128x128xbf16>, vector<32x128xf32> -> vector<32x128xf32>
    %11 = arith.addf %5, %10 : vector<32x128xf32>
    %12 = vector.extract_strided_slice %4 {offsets = [0, 1, 0], sizes = [8, 4, 128], strides = [1, 1, 1]} : vector<10x6x128xbf16> to vector<8x4x128xbf16>
    %13 = vector.shape_cast %12 : vector<8x4x128xbf16> to vector<32x128xbf16>
    %c1 = arith.constant 1 : index
    %c0_11 = arith.constant 0 : index
    %c0_12 = arith.constant 0 : index
    %14 = vector.load %arg4[%c1, %c0_11, %c0_12] : memref<9x128x128xbf16, #tpu.memory_space<vmem>>, vector<1x128x128xbf16>
    %15 = vector.shape_cast %14 : vector<1x128x128xbf16> to vector<128x128xbf16>
    %cst_13 = arith.constant dense<0.000000e+00> : vector<32x128xf32>
    %16 = tpu.matmul %13, %15, %cst_13 {dimension_numbers = #tpu.dot_dimension_numbers<[1], [0], [0], [1], [0, 0, 1, 1], [], []>} : vector<32x128xbf16>, vector<128x128xbf16>, vector<32x128xf32> -> vector<32x128xf32>
    %17 = arith.addf %11, %16 : vector<32x128xf32>
    %18 = vector.extract_strided_slice %4 {offsets = [0, 2, 0], sizes = [8, 4, 128], strides = [1, 1, 1]} : vector<10x6x128xbf16> to vector<8x4x128xbf16>
    %19 = vector.shape_cast %18 : vector<8x4x128xbf16> to vector<32x128xbf16>
    %c2 = arith.constant 2 : index
    %c0_14 = arith.constant 0 : index
    %c0_15 = arith.constant 0 : index
    %20 = vector.load %arg4[%c2, %c0_14, %c0_15] : memref<9x128x128xbf16, #tpu.memory_space<vmem>>, vector<1x128x128xbf16>
    %21 = vector.shape_cast %20 : vector<1x128x128xbf16> to vector<128x128xbf16>
    %cst_16 = arith.constant dense<0.000000e+00> : vector<32x128xf32>
    %22 = tpu.matmul %19, %21, %cst_16 {dimension_numbers = #tpu.dot_dimension_numbers<[1], [0], [0], [1], [0, 0, 1, 1], [], []>} : vector<32x128xbf16>, vector<128x128xbf16>, vector<32x128xf32> -> vector<32x128xf32>
    %23 = arith.addf %17, %22 : vector<32x128xf32>
    %24 = vector.extract_strided_slice %4 {offsets = [1, 0, 0], sizes = [8, 4, 128], strides = [1, 1, 1]} : vector<10x6x128xbf16> to vector<8x4x128xbf16>
    %25 = vector.shape_cast %24 : vector<8x4x128xbf16> to vector<32x128xbf16>
    %c3 = arith.constant 3 : index
    %c0_17 = arith.constant 0 : index
    %c0_18 = arith.constant 0 : index
    %26 = vector.load %arg4[%c3, %c0_17, %c0_18] : memref<9x128x128xbf16, #tpu.memory_space<vmem>>, vector<1x128x128xbf16>
    %27 = vector.shape_cast %26 : vector<1x128x128xbf16> to vector<128x128xbf16>
    %cst_19 = arith.constant dense<0.000000e+00> : vector<32x128xf32>
    %28 = tpu.matmul %25, %27, %cst_19 {dimension_numbers = #tpu.dot_dimension_numbers<[1], [0], [0], [1], [0, 0, 1, 1], [], []>} : vector<32x128xbf16>, vector<128x128xbf16>, vector<32x128xf32> -> vector<32x128xf32>
    %29 = arith.addf %23, %28 : vector<32x128xf32>
    %30 = vector.extract_strided_slice %4 {offsets = [1, 1, 0], sizes = [8, 4, 128], strides = [1, 1, 1]} : vector<10x6x128xbf16> to vector<8x4x128xbf16>
    %31 = vector.shape_cast %30 : vector<8x4x128xbf16> to vector<32x128xbf16>
    %c4 = arith.constant 4 : index
    %c0_20 = arith.constant 0 : index
    %c0_21 = arith.constant 0 : index
    %32 = vector.load %arg4[%c4, %c0_20, %c0_21] : memref<9x128x128xbf16, #tpu.memory_space<vmem>>, vector<1x128x128xbf16>
    %33 = vector.shape_cast %32 : vector<1x128x128xbf16> to vector<128x128xbf16>
    %cst_22 = arith.constant dense<0.000000e+00> : vector<32x128xf32>
    %34 = tpu.matmul %31, %33, %cst_22 {dimension_numbers = #tpu.dot_dimension_numbers<[1], [0], [0], [1], [0, 0, 1, 1], [], []>} : vector<32x128xbf16>, vector<128x128xbf16>, vector<32x128xf32> -> vector<32x128xf32>
    %35 = arith.addf %29, %34 : vector<32x128xf32>
    %36 = vector.extract_strided_slice %4 {offsets = [1, 2, 0], sizes = [8, 4, 128], strides = [1, 1, 1]} : vector<10x6x128xbf16> to vector<8x4x128xbf16>
    %37 = vector.shape_cast %36 : vector<8x4x128xbf16> to vector<32x128xbf16>
    %c5 = arith.constant 5 : index
    %c0_23 = arith.constant 0 : index
    %c0_24 = arith.constant 0 : index
    %38 = vector.load %arg4[%c5, %c0_23, %c0_24] : memref<9x128x128xbf16, #tpu.memory_space<vmem>>, vector<1x128x128xbf16>
    %39 = vector.shape_cast %38 : vector<1x128x128xbf16> to vector<128x128xbf16>
    %cst_25 = arith.constant dense<0.000000e+00> : vector<32x128xf32>
    %40 = tpu.matmul %37, %39, %cst_25 {dimension_numbers = #tpu.dot_dimension_numbers<[1], [0], [0], [1], [0, 0, 1, 1], [], []>} : vector<32x128xbf16>, vector<128x128xbf16>, vector<32x128xf32> -> vector<32x128xf32>
    %41 = arith.addf %35, %40 : vector<32x128xf32>
    %42 = vector.extract_strided_slice %4 {offsets = [2, 0, 0], sizes = [8, 4, 128], strides = [1, 1, 1]} : vector<10x6x128xbf16> to vector<8x4x128xbf16>
    %43 = vector.shape_cast %42 : vector<8x4x128xbf16> to vector<32x128xbf16>
    %c6 = arith.constant 6 : index
    %c0_26 = arith.constant 0 : index
    %c0_27 = arith.constant 0 : index
    %44 = vector.load %arg4[%c6, %c0_26, %c0_27] : memref<9x128x128xbf16, #tpu.memory_space<vmem>>, vector<1x128x128xbf16>
    %45 = vector.shape_cast %44 : vector<1x128x128xbf16> to vector<128x128xbf16>
    %cst_28 = arith.constant dense<0.000000e+00> : vector<32x128xf32>
    %46 = tpu.matmul %43, %45, %cst_28 {dimension_numbers = #tpu.dot_dimension_numbers<[1], [0], [0], [1], [0, 0, 1, 1], [], []>} : vector<32x128xbf16>, vector<128x128xbf16>, vector<32x128xf32> -> vector<32x128xf32>
    %47 = arith.addf %41, %46 : vector<32x128xf32>
    %48 = vector.extract_strided_slice %4 {offsets = [2, 1, 0], sizes = [8, 4, 128], strides = [1, 1, 1]} : vector<10x6x128xbf16> to vector<8x4x128xbf16>
    %49 = vector.shape_cast %48 : vector<8x4x128xbf16> to vector<32x128xbf16>
    %c7 = arith.constant 7 : index
    %c0_29 = arith.constant 0 : index
    %c0_30 = arith.constant 0 : index
    %50 = vector.load %arg4[%c7, %c0_29, %c0_30] : memref<9x128x128xbf16, #tpu.memory_space<vmem>>, vector<1x128x128xbf16>
    %51 = vector.shape_cast %50 : vector<1x128x128xbf16> to vector<128x128xbf16>
    %cst_31 = arith.constant dense<0.000000e+00> : vector<32x128xf32>
    %52 = tpu.matmul %49, %51, %cst_31 {dimension_numbers = #tpu.dot_dimension_numbers<[1], [0], [0], [1], [0, 0, 1, 1], [], []>} : vector<32x128xbf16>, vector<128x128xbf16>, vector<32x128xf32> -> vector<32x128xf32>
    %53 = arith.addf %47, %52 : vector<32x128xf32>
    %54 = vector.extract_strided_slice %4 {offsets = [2, 2, 0], sizes = [8, 4, 128], strides = [1, 1, 1]} : vector<10x6x128xbf16> to vector<8x4x128xbf16>
    %55 = vector.shape_cast %54 : vector<8x4x128xbf16> to vector<32x128xbf16>
    %c8 = arith.constant 8 : index
    %c0_32 = arith.constant 0 : index
    %c0_33 = arith.constant 0 : index
    %56 = vector.load %arg4[%c8, %c0_32, %c0_33] : memref<9x128x128xbf16, #tpu.memory_space<vmem>>, vector<1x128x128xbf16>
    %57 = vector.shape_cast %56 : vector<1x128x128xbf16> to vector<128x128xbf16>
    %cst_34 = arith.constant dense<0.000000e+00> : vector<32x128xf32>
    %58 = tpu.matmul %55, %57, %cst_34 {dimension_numbers = #tpu.dot_dimension_numbers<[1], [0], [0], [1], [0, 0, 1, 1], [], []>} : vector<32x128xbf16>, vector<128x128xbf16>, vector<32x128xf32> -> vector<32x128xf32>
    %59 = arith.addf %53, %58 : vector<32x128xf32>
    %60 = vector.shape_cast %59 : vector<32x128xf32> to vector<8x4x128xf32>
    %c0_35 = arith.constant 0 : index
    %c0_36 = arith.constant 0 : index
    %61 = vector.load %arg5[%c0_35, %c0_36] : memref<1x128xf32, #tpu.memory_space<vmem>>, vector<1x128xf32>
    %62 = vector.shape_cast %61 : vector<1x128xf32> to vector<1x1x128xf32>
    %63 = vector.broadcast %62 : vector<1x1x128xf32> to vector<8x4x128xf32>
    %64 = arith.addf %60, %63 : vector<8x4x128xf32>
    %cst_37 = arith.constant 0.000000e+00 : f32
    %65 = vector.broadcast %cst_37 : f32 to vector<8x4x128xf32>
    %66 = arith.maximumf %64, %65 : vector<8x4x128xf32>
    %67 = arith.truncf %66 : vector<8x4x128xf32> to vector<8x4x128xbf16>
    %c0_38 = arith.constant 0 : index
    %c0_39 = arith.constant 0 : index
    %c0_40 = arith.constant 0 : index
    %c0_41 = arith.constant 0 : index
    %68 = vector.load %arg6[%c0_38, %c0_39, %c0_40, %c0_41] : memref<1x8x4x128xbf16, #tpu.memory_space<vmem>>, vector<1x8x4x128xbf16>
    %69 = vector.shape_cast %68 : vector<1x8x4x128xbf16> to vector<8x4x128xbf16>
    %70 = vector.shape_cast %67 : vector<8x4x128xbf16> to vector<1x8x4x128xbf16>
    tpu.vector_store %arg6[%c0_38, %c0_39, %c0_40, %c0_41], %70 {strides = array<i32>} : memref<1x8x4x128xbf16, #tpu.memory_space<vmem>>, vector<1x8x4x128xbf16>,
    return
  }
  func.func @transform_0(%arg0: i32, %arg1: i32) -> (i32, i32, i32, i32) {
    %c0_i32 = arith.constant 0 : i32
    %c0_i32_0 = arith.constant 0 : i32
    %c0_i32_1 = arith.constant 0 : i32
    return %arg0, %arg1, %c0_i32, %c0_i32_0 : i32, i32, i32, i32
  }
  func.func @transform_1(%arg0: i32, %arg1: i32) -> (i32, i32, i32, i32) {
    %c1_i32 = arith.constant 1 : i32
    %0 = arith.addi %arg1, %c1_i32 : i32
    %c4_i32 = arith.constant 4 : i32
    %1 = arith.muli %0, %c4_i32 : i32
    %c0_i32 = arith.constant 0 : i32
    %c0_i32_0 = arith.constant 0 : i32
    %c0_i32_1 = arith.constant 0 : i32
    return %arg0, %1, %c0_i32, %c0_i32_0 : i32, i32, i32, i32
  }
  func.func @transform_2(%arg0: i32, %arg1: i32) -> (i32, i32, i32) {
    %c0_i32 = arith.constant 0 : i32
    %c0_i32_0 = arith.constant 0 : i32
    %c0_i32_1 = arith.constant 0 : i32
    %c0_i32_2 = arith.constant 0 : i32
    return %c0_i32, %c0_i32_0, %c0_i32_1 : i32, i32, i32
  }
  func.func @transform_3(%arg0: i32, %arg1: i32) -> (i32, i32) {
    %c0_i32 = arith.constant 0 : i32
    %c0_i32_0 = arith.constant 0 : i32
    %c0_i32_1 = arith.constant 0 : i32
    return %c0_i32, %c0_i32_0 : i32, i32
  }
  func.func @transform_4(%arg0: i32, %arg1: i32) -> (i32, i32, i32, i32) {
    %c0_i32 = arith.constant 0 : i32
    %c0_i32_0 = arith.constant 0 : i32
    %c0_i32_1 = arith.constant 0 : i32
    return %arg0, %arg1, %c0_i32, %c0_i32_0 : i32, i32, i32, i32
  }
}

module attributes {stable_mosaic.version = 11 : i64} {
  func.func @_conv3x3_kernel(%arg0: i32, %arg1: i32, %arg2: memref<1x8x6x128xbf16, #tpu.memory_space<vmem>>, %arg3: memref<1x2x6x128xbf16, #tpu.memory_space<vmem>>, %arg4: memref<9x128x128xbf16, #tpu.memory_space<vmem>>, %arg5: memref<1x128xf32, #tpu.memory_space<vmem>>, %arg6: memref<1x8x4x128xbf16, #tpu.memory_space<vmem>>, %arg7: memref<1x8x4x128xbf16, #tpu.memory_space<vmem>>) attributes {dimension_semantics = [#tpu.dimension_semantics<parallel>, #tpu.dimension_semantics<parallel>], iteration_bounds = array<i64: 2, 1>, scalar_prefetch = 0 : i64, scratch_operands = 0 : i64, tpu.core_type = #tpu.core_type<tc>, window_params = [{transform_indices = @transform_0, window_bounds = array<i64: 1, 8, 6, 128>}, {transform_indices = @transform_1, window_bounds = array<i64: 1, 2, 6, 128>}, {pipeline_mode = #tpu.pipeline_mode<synchronous>, transform_indices = @transform_2, window_bounds = array<i64: 9, 128, 128>}, {pipeline_mode = #tpu.pipeline_mode<synchronous>, transform_indices = @transform_3, window_bounds = array<i64: 1, 128>}, {transform_indices = @transform_4, window_bounds = array<i64: 1, 8, 4, 128>}, {transform_indices = @transform_5, window_bounds = array<i64: 1, 8, 4, 128>}]} {
    %c0 = arith.constant 0 : index
    %c0_0 = arith.constant 0 : index
    %c0_1 = arith.constant 0 : index
    %c0_2 = arith.constant 0 : index
    %0 = vector.load %arg2[%c0, %c0_0, %c0_1, %c0_2] : memref<1x8x6x128xbf16, #tpu.memory_space<vmem>>, vector<1x8x6x128xbf16>
    %1 = vector.shape_cast %0 : vector<1x8x6x128xbf16> to vector<8x6x128xbf16>
    %c0_3 = arith.constant 0 : index
    %c0_4 = arith.constant 0 : index
    %c0_5 = arith.constant 0 : index
    %c0_6 = arith.constant 0 : index
    %2 = vector.load %arg3[%c0_3, %c0_4, %c0_5, %c0_6] : memref<1x2x6x128xbf16, #tpu.memory_space<vmem>>, vector<1x2x6x128xbf16>
    %3 = vector.shape_cast %2 : vector<1x2x6x128xbf16> to vector<2x6x128xbf16>
    %4 = tpu.concatenate %1, %3 in 0 : vector<8x6x128xbf16>, vector<2x6x128xbf16> -> vector<10x6x128xbf16>
    %cst = arith.constant 0.000000e+00 : f32
    %5 = vector.broadcast %cst : f32 to vector<32x128xf32>
    %6 = vector.extract_strided_slice %4 {offsets = [0, 0, 0], sizes = [8, 4, 128], strides = [1, 1, 1]} : vector<10x6x128xbf16> to vector<8x4x128xbf16>
    %7 = vector.shape_cast %6 : vector<8x4x128xbf16> to vector<32x128xbf16>
    %c0_7 = arith.constant 0 : index
    %c0_8 = arith.constant 0 : index
    %c0_9 = arith.constant 0 : index
    %8 = vector.load %arg4[%c0_7, %c0_8, %c0_9] : memref<9x128x128xbf16, #tpu.memory_space<vmem>>, vector<1x128x128xbf16>
    %9 = vector.shape_cast %8 : vector<1x128x128xbf16> to vector<128x128xbf16>
    %cst_10 = arith.constant dense<0.000000e+00> : vector<32x128xf32>
    %10 = tpu.matmul %7, %9, %cst_10 {dimension_numbers = #tpu.dot_dimension_numbers<[1], [0], [0], [1], [0, 0, 1, 1], [], []>} : vector<32x128xbf16>, vector<128x128xbf16>, vector<32x128xf32> -> vector<32x128xf32>
    %11 = arith.addf %5, %10 : vector<32x128xf32>
    %12 = vector.extract_strided_slice %4 {offsets = [0, 1, 0], sizes = [8, 4, 128], strides = [1, 1, 1]} : vector<10x6x128xbf16> to vector<8x4x128xbf16>
    %13 = vector.shape_cast %12 : vector<8x4x128xbf16> to vector<32x128xbf16>
    %c1 = arith.constant 1 : index
    %c0_11 = arith.constant 0 : index
    %c0_12 = arith.constant 0 : index
    %14 = vector.load %arg4[%c1, %c0_11, %c0_12] : memref<9x128x128xbf16, #tpu.memory_space<vmem>>, vector<1x128x128xbf16>
    %15 = vector.shape_cast %14 : vector<1x128x128xbf16> to vector<128x128xbf16>
    %cst_13 = arith.constant dense<0.000000e+00> : vector<32x128xf32>
    %16 = tpu.matmul %13, %15, %cst_13 {dimension_numbers = #tpu.dot_dimension_numbers<[1], [0], [0], [1], [0, 0, 1, 1], [], []>} : vector<32x128xbf16>, vector<128x128xbf16>, vector<32x128xf32> -> vector<32x128xf32>
    %17 = arith.addf %11, %16 : vector<32x128xf32>
    %18 = vector.extract_strided_slice %4 {offsets = [0, 2, 0], sizes = [8, 4, 128], strides = [1, 1, 1]} : vector<10x6x128xbf16> to vector<8x4x128xbf16>
    %19 = vector.shape_cast %18 : vector<8x4x128xbf16> to vector<32x128xbf16>
    %c2 = arith.constant 2 : index
    %c0_14 = arith.constant 0 : index
    %c0_15 = arith.constant 0 : index
    %20 = vector.load %arg4[%c2, %c0_14, %c0_15] : memref<9x128x128xbf16, #tpu.memory_space<vmem>>, vector<1x128x128xbf16>
    %21 = vector.shape_cast %20 : vector<1x128x128xbf16> to vector<128x128xbf16>
    %cst_16 = arith.constant dense<0.000000e+00> : vector<32x128xf32>
    %22 = tpu.matmul %19, %21, %cst_16 {dimension_numbers = #tpu.dot_dimension_numbers<[1], [0], [0], [1], [0, 0, 1, 1], [], []>} : vector<32x128xbf16>, vector<128x128xbf16>, vector<32x128xf32> -> vector<32x128xf32>
    %23 = arith.addf %17, %22 : vector<32x128xf32>
    %24 = vector.extract_strided_slice %4 {offsets = [1, 0, 0], sizes = [8, 4, 128], strides = [1, 1, 1]} : vector<10x6x128xbf16> to vector<8x4x128xbf16>
    %25 = vector.shape_cast %24 : vector<8x4x128xbf16> to vector<32x128xbf16>
    %c3 = arith.constant 3 : index
    %c0_17 = arith.constant 0 : index
    %c0_18 = arith.constant 0 : index
    %26 = vector.load %arg4[%c3, %c0_17, %c0_18] : memref<9x128x128xbf16, #tpu.memory_space<vmem>>, vector<1x128x128xbf16>
    %27 = vector.shape_cast %26 : vector<1x128x128xbf16> to vector<128x128xbf16>
    %cst_19 = arith.constant dense<0.000000e+00> : vector<32x128xf32>
    %28 = tpu.matmul %25, %27, %cst_19 {dimension_numbers = #tpu.dot_dimension_numbers<[1], [0], [0], [1], [0, 0, 1, 1], [], []>} : vector<32x128xbf16>, vector<128x128xbf16>, vector<32x128xf32> -> vector<32x128xf32>
    %29 = arith.addf %23, %28 : vector<32x128xf32>
    %30 = vector.extract_strided_slice %4 {offsets = [1, 1, 0], sizes = [8, 4, 128], strides = [1, 1, 1]} : vector<10x6x128xbf16> to vector<8x4x128xbf16>
    %31 = vector.shape_cast %30 : vector<8x4x128xbf16> to vector<32x128xbf16>
    %c4 = arith.constant 4 : index
    %c0_20 = arith.constant 0 : index
    %c0_21 = arith.constant 0 : index
    %32 = vector.load %arg4[%c4, %c0_20, %c0_21] : memref<9x128x128xbf16, #tpu.memory_space<vmem>>, vector<1x128x128xbf16>
    %33 = vector.shape_cast %32 : vector<1x128x128xbf16> to vector<128x128xbf16>
    %cst_22 = arith.constant dense<0.000000e+00> : vector<32x128xf32>
    %34 = tpu.matmul %31, %33, %cst_22 {dimension_numbers = #tpu.dot_dimension_numbers<[1], [0], [0], [1], [0, 0, 1, 1], [], []>} : vector<32x128xbf16>, vector<128x128xbf16>, vector<32x128xf32> -> vector<32x128xf32>
    %35 = arith.addf %29, %34 : vector<32x128xf32>
    %36 = vector.extract_strided_slice %4 {offsets = [1, 2, 0], sizes = [8, 4, 128], strides = [1, 1, 1]} : vector<10x6x128xbf16> to vector<8x4x128xbf16>
    %37 = vector.shape_cast %36 : vector<8x4x128xbf16> to vector<32x128xbf16>
    %c5 = arith.constant 5 : index
    %c0_23 = arith.constant 0 : index
    %c0_24 = arith.constant 0 : index
    %38 = vector.load %arg4[%c5, %c0_23, %c0_24] : memref<9x128x128xbf16, #tpu.memory_space<vmem>>, vector<1x128x128xbf16>
    %39 = vector.shape_cast %38 : vector<1x128x128xbf16> to vector<128x128xbf16>
    %cst_25 = arith.constant dense<0.000000e+00> : vector<32x128xf32>
    %40 = tpu.matmul %37, %39, %cst_25 {dimension_numbers = #tpu.dot_dimension_numbers<[1], [0], [0], [1], [0, 0, 1, 1], [], []>} : vector<32x128xbf16>, vector<128x128xbf16>, vector<32x128xf32> -> vector<32x128xf32>
    %41 = arith.addf %35, %40 : vector<32x128xf32>
    %42 = vector.extract_strided_slice %4 {offsets = [2, 0, 0], sizes = [8, 4, 128], strides = [1, 1, 1]} : vector<10x6x128xbf16> to vector<8x4x128xbf16>
    %43 = vector.shape_cast %42 : vector<8x4x128xbf16> to vector<32x128xbf16>
    %c6 = arith.constant 6 : index
    %c0_26 = arith.constant 0 : index
    %c0_27 = arith.constant 0 : index
    %44 = vector.load %arg4[%c6, %c0_26, %c0_27] : memref<9x128x128xbf16, #tpu.memory_space<vmem>>, vector<1x128x128xbf16>
    %45 = vector.shape_cast %44 : vector<1x128x128xbf16> to vector<128x128xbf16>
    %cst_28 = arith.constant dense<0.000000e+00> : vector<32x128xf32>
    %46 = tpu.matmul %43, %45, %cst_28 {dimension_numbers = #tpu.dot_dimension_numbers<[1], [0], [0], [1], [0, 0, 1, 1], [], []>} : vector<32x128xbf16>, vector<128x128xbf16>, vector<32x128xf32> -> vector<32x128xf32>
    %47 = arith.addf %41, %46 : vector<32x128xf32>
    %48 = vector.extract_strided_slice %4 {offsets = [2, 1, 0], sizes = [8, 4, 128], strides = [1, 1, 1]} : vector<10x6x128xbf16> to vector<8x4x128xbf16>
    %49 = vector.shape_cast %48 : vector<8x4x128xbf16> to vector<32x128xbf16>
    %c7 = arith.constant 7 : index
    %c0_29 = arith.constant 0 : index
    %c0_30 = arith.constant 0 : index
    %50 = vector.load %arg4[%c7, %c0_29, %c0_30] : memref<9x128x128xbf16, #tpu.memory_space<vmem>>, vector<1x128x128xbf16>
    %51 = vector.shape_cast %50 : vector<1x128x128xbf16> to vector<128x128xbf16>
    %cst_31 = arith.constant dense<0.000000e+00> : vector<32x128xf32>
    %52 = tpu.matmul %49, %51, %cst_31 {dimension_numbers = #tpu.dot_dimension_numbers<[1], [0], [0], [1], [0, 0, 1, 1], [], []>} : vector<32x128xbf16>, vector<128x128xbf16>, vector<32x128xf32> -> vector<32x128xf32>
    %53 = arith.addf %47, %52 : vector<32x128xf32>
    %54 = vector.extract_strided_slice %4 {offsets = [2, 2, 0], sizes = [8, 4, 128], strides = [1, 1, 1]} : vector<10x6x128xbf16> to vector<8x4x128xbf16>
    %55 = vector.shape_cast %54 : vector<8x4x128xbf16> to vector<32x128xbf16>
    %c8 = arith.constant 8 : index
    %c0_32 = arith.constant 0 : index
    %c0_33 = arith.constant 0 : index
    %56 = vector.load %arg4[%c8, %c0_32, %c0_33] : memref<9x128x128xbf16, #tpu.memory_space<vmem>>, vector<1x128x128xbf16>
    %57 = vector.shape_cast %56 : vector<1x128x128xbf16> to vector<128x128xbf16>
    %cst_34 = arith.constant dense<0.000000e+00> : vector<32x128xf32>
    %58 = tpu.matmul %55, %57, %cst_34 {dimension_numbers = #tpu.dot_dimension_numbers<[1], [0], [0], [1], [0, 0, 1, 1], [], []>} : vector<32x128xbf16>, vector<128x128xbf16>, vector<32x128xf32> -> vector<32x128xf32>
    %59 = arith.addf %53, %58 : vector<32x128xf32>
    %60 = vector.shape_cast %59 : vector<32x128xf32> to vector<8x4x128xf32>
    %c0_35 = arith.constant 0 : index
    %c0_36 = arith.constant 0 : index
    %61 = vector.load %arg5[%c0_35, %c0_36] : memref<1x128xf32, #tpu.memory_space<vmem>>, vector<1x128xf32>
    %62 = vector.shape_cast %61 : vector<1x128xf32> to vector<1x1x128xf32>
    %63 = vector.broadcast %62 : vector<1x1x128xf32> to vector<8x4x128xf32>
    %64 = arith.addf %60, %63 : vector<8x4x128xf32>
    %c0_37 = arith.constant 0 : index
    %c0_38 = arith.constant 0 : index
    %c0_39 = arith.constant 0 : index
    %c0_40 = arith.constant 0 : index
    %65 = vector.load %arg6[%c0_37, %c0_38, %c0_39, %c0_40] : memref<1x8x4x128xbf16, #tpu.memory_space<vmem>>, vector<1x8x4x128xbf16>
    %66 = vector.shape_cast %65 : vector<1x8x4x128xbf16> to vector<8x4x128xbf16>
    %67 = arith.extf %66 : vector<8x4x128xbf16> to vector<8x4x128xf32>
    %68 = arith.addf %64, %67 : vector<8x4x128xf32>
    %cst_41 = arith.constant 0.000000e+00 : f32
    %69 = vector.broadcast %cst_41 : f32 to vector<8x4x128xf32>
    %70 = arith.maximumf %68, %69 : vector<8x4x128xf32>
    %71 = arith.truncf %70 : vector<8x4x128xf32> to vector<8x4x128xbf16>
    %c0_42 = arith.constant 0 : index
    %c0_43 = arith.constant 0 : index
    %c0_44 = arith.constant 0 : index
    %c0_45 = arith.constant 0 : index
    %72 = vector.load %arg7[%c0_42, %c0_43, %c0_44, %c0_45] : memref<1x8x4x128xbf16, #tpu.memory_space<vmem>>, vector<1x8x4x128xbf16>
    %73 = vector.shape_cast %72 : vector<1x8x4x128xbf16> to vector<8x4x128xbf16>
    %74 = vector.shape_cast %71 : vector<8x4x128xbf16> to vector<1x8x4x128xbf16>
    tpu.vector_store %arg7[%c0_42, %c0_43, %c0_44, %c0_45], %74 {strides = array<i32>} : memref<1x8x4x128xbf16, #tpu.memory_space<vmem>>, vector<1x8x4x128xbf16>,
    return
  }
  func.func @transform_0(%arg0: i32, %arg1: i32) -> (i32, i32, i32, i32) {
    %c0_i32 = arith.constant 0 : i32
    %c0_i32_0 = arith.constant 0 : i32
    %c0_i32_1 = arith.constant 0 : i32
    return %arg0, %arg1, %c0_i32, %c0_i32_0 : i32, i32, i32, i32
  }
  func.func @transform_1(%arg0: i32, %arg1: i32) -> (i32, i32, i32, i32) {
    %c1_i32 = arith.constant 1 : i32
    %0 = arith.addi %arg1, %c1_i32 : i32
    %c4_i32 = arith.constant 4 : i32
    %1 = arith.muli %0, %c4_i32 : i32
    %c0_i32 = arith.constant 0 : i32
    %c0_i32_0 = arith.constant 0 : i32
    %c0_i32_1 = arith.constant 0 : i32
    return %arg0, %1, %c0_i32, %c0_i32_0 : i32, i32, i32, i32
  }
  func.func @transform_2(%arg0: i32, %arg1: i32) -> (i32, i32, i32) {
    %c0_i32 = arith.constant 0 : i32
    %c0_i32_0 = arith.constant 0 : i32
    %c0_i32_1 = arith.constant 0 : i32
    %c0_i32_2 = arith.constant 0 : i32
    return %c0_i32, %c0_i32_0, %c0_i32_1 : i32, i32, i32
  }
  func.func @transform_3(%arg0: i32, %arg1: i32) -> (i32, i32) {
    %c0_i32 = arith.constant 0 : i32
    %c0_i32_0 = arith.constant 0 : i32
    %c0_i32_1 = arith.constant 0 : i32
    return %c0_i32, %c0_i32_0 : i32, i32
  }
  func.func @transform_4(%arg0: i32, %arg1: i32) -> (i32, i32, i32, i32) {
    %c0_i32 = arith.constant 0 : i32
    %c0_i32_0 = arith.constant 0 : i32
    %c0_i32_1 = arith.constant 0 : i32
    return %arg0, %arg1, %c0_i32, %c0_i32_0 : i32, i32, i32, i32
  }
  func.func @transform_5(%arg0: i32, %arg1: i32) -> (i32, i32, i32, i32) {
    %c0_i32 = arith.constant 0 : i32
    %c0_i32_0 = arith.constant 0 : i32
    %c0_i32_1 = arith.constant 0 : i32
    return %arg0, %arg1, %c0_i32, %c0_i32_0 : i32, i32, i32, i32
  }
}

module attributes {stable_mosaic.version = 11 : i64} {
  func.func @_gemm_kernel(%arg0: i32, %arg1: memref<16x512xbf16, #tpu.memory_space<vmem>>, %arg2: memref<512x32xbf16, #tpu.memory_space<vmem>>, %arg3: memref<1x32xf32, #tpu.memory_space<vmem>>, %arg4: memref<16x32xf32, #tpu.memory_space<vmem>>) attributes {dimension_semantics = [#tpu.dimension_semantics<parallel>], iteration_bounds = array<i64: 1>, scalar_prefetch = 0 : i64, scratch_operands = 0 : i64, tpu.core_type = #tpu.core_type<tc>, window_params = [{transform_indices = @transform_0, window_bounds = array<i64: 16, 512>}, {pipeline_mode = #tpu.pipeline_mode<synchronous>, transform_indices = @transform_1, window_bounds = array<i64: 512, 32>}, {pipeline_mode = #tpu.pipeline_mode<synchronous>, transform_indices = @transform_2, window_bounds = array<i64: 1, 32>}, {transform_indices = @transform_3, window_bounds = array<i64: 16, 32>}]} {
    %c0 = arith.constant 0 : index
    %c0_0 = arith.constant 0 : index
    %0 = vector.load %arg1[%c0, %c0_0] : memref<16x512xbf16, #tpu.memory_space<vmem>>, vector<16x512xbf16>
    %c0_1 = arith.constant 0 : index
    %c0_2 = arith.constant 0 : index
    %1 = vector.load %arg2[%c0_1, %c0_2] : memref<512x32xbf16, #tpu.memory_space<vmem>>, vector<512x32xbf16>
    %cst = arith.constant dense<0.000000e+00> : vector<16x32xf32>
    %2 = tpu.matmul %0, %1, %cst {dimension_numbers = #tpu.dot_dimension_numbers<[1], [0], [0], [1], [0, 0, 1, 1], [], []>} : vector<16x512xbf16>, vector<512x32xbf16>, vector<16x32xf32> -> vector<16x32xf32>
    %c0_3 = arith.constant 0 : index
    %c0_4 = arith.constant 0 : index
    %3 = vector.load %arg3[%c0_3, %c0_4] : memref<1x32xf32, #tpu.memory_space<vmem>>, vector<1x32xf32>
    %4 = vector.broadcast %3 : vector<1x32xf32> to vector<16x32xf32>
    %5 = arith.addf %2, %4 : vector<16x32xf32>
    %c0_5 = arith.constant 0 : index
    %c0_6 = arith.constant 0 : index
    %6 = vector.load %arg4[%c0_5, %c0_6] : memref<16x32xf32, #tpu.memory_space<vmem>>, vector<16x32xf32>
    tpu.vector_store %arg4[%c0_5, %c0_6], %5 {strides = array<i32>} : memref<16x32xf32, #tpu.memory_space<vmem>>, vector<16x32xf32>,
    return
  }
  func.func @transform_0(%arg0: i32) -> (i32, i32) {
    %c0_i32 = arith.constant 0 : i32
    %c0_i32_0 = arith.constant 0 : i32
    return %arg0, %c0_i32 : i32, i32
  }
  func.func @transform_1(%arg0: i32) -> (i32, i32) {
    %c0_i32 = arith.constant 0 : i32
    %c0_i32_0 = arith.constant 0 : i32
    %c0_i32_1 = arith.constant 0 : i32
    return %c0_i32, %c0_i32_0 : i32, i32
  }
  func.func @transform_2(%arg0: i32) -> (i32, i32) {
    %c0_i32 = arith.constant 0 : i32
    %c0_i32_0 = arith.constant 0 : i32
    %c0_i32_1 = arith.constant 0 : i32
    return %c0_i32, %c0_i32_0 : i32, i32
  }
  func.func @transform_3(%arg0: i32) -> (i32, i32) {
    %c0_i32 = arith.constant 0 : i32
    %c0_i32_0 = arith.constant 0 : i32
    return %arg0, %c0_i32 : i32, i32
  }
}

</mosaic_0001>

<bundles_post_ra>
// kernel: _lambda_.18
= control target key start
LH: loop header
LB: loop body
LE: loop exit
PB: predicated region body
PF: predicated region fallthrough
CT: control target
= control target key end

     0   :  { %vm254_vm0 = vcmask 130048   ;;  %vm960_vm1 = vcmask 519168   ;;  %s1833_s1 = inlined_call_operand.vmem [shape: bf16[16,64], index: 1, kind: input, shape index: {}]   ;;  %s1834_s0 = inlined_call_operand.vmem [shape: bf16[512,16], index: 0, kind: input, shape index: {}]   ;;  %s1835_s2 = inlined_call_operand.vmem [shape: f32[1,64], index: 2, kind: input, shape index: {}]   ;;  %s1836_s3 = inlined_call_operand.vmem [shape: bf16[512,64], index: 3, kind: output, shape index: {}]  }
   0x1   :  { %v1324_v0 = vld [vmem:[%s1833_s1] sm:$0xff]   ;;  %v1327_v3 = vld [vmem:[%s1834_s0 + $0x8] sm:$0xff]   ;;  %v1329_v5 = vld [vmem:[%s1834_s0 + $0x10] sm:$0xff]  }
   0x2   :  { %v1325_v1 = vld [vmem:[%s1834_s0] sm:$0xff]   ;;  %1256 = vmatprep.subr.bf16.mxu0 %v1324_v0  ;;  %1322 = vmatprep.subr.bf16.mxu1 %v1324_v0  ;;  %v1328_v4 = vld [vmem:[%s1834_s0 + $0x88] sm:$0xff]   ;;  %v1330_v6 = vld [vmem:[%s1834_s0 + $0x90] sm:$0xff]  }
   0x3   :  { %v1326_v2 = vld [vmem:[%s1834_s0 + $0x80] sm:$0xff]   ;;  %1257 = vmatpush3.bf16.msra.mxu0 %v1324_v0  ;;  %1323 = vmatpush3.bf16.msra.mxu1 %v1324_v0  ;;  %v1331_v7 = vld [vmem:[%s1834_s0 + $0x18] sm:$0xff]   ;;  %v1335_v11 = vld [vmem:[%s1834_s0 + $0x28] sm:$0xff]  }
   0x4   :  { %1258 = vmatprep.mubr.msk.bf16.mxu0 %vm254_vm0, %v1325_v1  ;;  %1290 = vmatprep.mubr.msk.bf16.mxu1 %vm254_vm0, %v1326_v2  ;;  %v1332_v8 = vld [vmem:[%s1834_s0 + $0x98] sm:$0xff]   ;;  %v1333_v9 = vld [vmem:[%s1834_s0 + $0x20] sm:$0xff]   ;;  %v1336_v12 = vld [vmem:[%s1834_s0 + $0xa8] sm:$0xff]  }
   0x5   :  { %v1334_v10 = vld [vmem:[%s1834_s0 + $0xa0] sm:$0xff]   ;;  %v1337_v13 = vld [vmem:[%s1834_s0 + $0x30] sm:$0xff]   ;;  %v1339_v15 = vld [vmem:[%s1834_s0 + $0x38] sm:$0xff]  }
   0x6   :  { %1259 = vmatmul.mubr.msk.bf16.vlgmr.msra.gmra.mrb[0].mxu0 %vm254_vm0, %v1327_v3  ;;  %1291 = vmatmul.mubr.msk.bf16.vlgmr.msra.gmra.mrb[0].mxu1 %vm254_vm0, %v1328_v4  ;;  %v1338_v14 = vld [vmem:[%s1834_s0 + $0xb0] sm:$0xff]   ;;  %v1340_v16 = vld [vmem:[%s1834_s0 + $0xb8] sm:$0xff]   ;;  %v1341_v17 = vld [vmem:[%s1834_s0 + $0x40] sm:$0xff]  }
   0x7   :  { %1262 = vmatprep.mubr.msk.bf16.mxu0 %vm254_vm0, %v1329_v5  ;;  %1294 = vmatprep.mubr.msk.bf16.mxu1 %vm254_vm0, %v1330_v6  ;;  %v1342_v18 = vld [vmem:[%s1834_s0 + $0xc0] sm:$0xff]   ;;  %v1343_v19 = vld [vmem:[%s1834_s0 + $0x48] sm:$0xff]   ;;  %v1345_v21 = vld [vmem:[%s1834_s0 + $0x50] sm:$0xff]  }
   0x8   :  { %v1344_v20 = vld [vmem:[%s1834_s0 + $0xc8] sm:$0xff]   ;;  %v1346_v22 = vld [vmem:[%s1834_s0 + $0xd0] sm:$0xff]   ;;  %v1347_v23 = vld [vmem:[%s1834_s0 + $0x58] sm:$0xff]  }
   0x9   :  { %v1348_v24 = vld [vmem:[%s1834_s0 + $0xd8] sm:$0xff]   ;;  %v1349_v25 = vld [vmem:[%s1834_s0 + $0x60] sm:$0xff]   ;;  %v1351_v27 = vld [vmem:[%s1834_s0 + $0x68] sm:$0xff]  }
   0xa   :  { %v1350_v26 = vld [vmem:[%s1834_s0 + $0xe0] sm:$0xff]   ;;  %v1352_v28 = vld [vmem:[%s1834_s0 + $0xe8] sm:$0xff]   ;;  %v1353_v29 = vld [vmem:[%s1834_s0 + $0x70] sm:$0xff]  }
   0xb   :  { %v1354_v30 = vld [vmem:[%s1834_s0 + $0xf0] sm:$0xff]   ;;  %v1355_v31 = vld [vmem:[%s1834_s0 + $0x78] sm:$0xff]   ;;  %v1511_v33 = vld [vmem:[%s1835_s2] ss:$0 sm:$0xff] }
   0xc   :  { %v1356_v32 = vld [vmem:[%s1834_s0 + $0xf8] sm:$0xff]  }
   0xe   :  { %1263 = vmatmul.mubr.msk.bf16.gmra.mrb[4].mxu0 %vm254_vm0, %v1331_v7  ;;  %1295 = vmatmul.mubr.msk.bf16.gmra.mrb[4].mxu1 %vm254_vm0, %v1332_v8 }
   0xf   :  { %1266 = vmatprep.mubr.msk.bf16.mxu0 %vm254_vm0, %v1333_v9  ;;  %1298 = vmatprep.mubr.msk.bf16.mxu1 %vm254_vm0, %v1334_v10 }
  0x16   :  { %1267 = vmatmul.mubr.msk.bf16.gmra.mrb[8].mxu0 %vm254_vm0, %v1335_v11  ;;  %1299 = vmatmul.mubr.msk.bf16.gmra.mrb[8].mxu1 %vm254_vm0, %v1336_v12 }
  0x17   :  { %1270 = vmatprep.mubr.msk.bf16.mxu0 %vm254_vm0, %v1337_v13  ;;  %1302 = vmatprep.mubr.msk.bf16.mxu1 %vm254_vm0, %v1338_v14 }
  0x1e   :  { %1271 = vmatmul.mubr.msk.bf16.gmra.mrb[12].mxu0 %vm254_vm0, %v1339_v15  ;;  %1303 = vmatmul.mubr.msk.bf16.gmra.mrb[12].mxu1 %vm254_vm0, %v1340_v16 }
  0x1f   :  { %1274 = vmatprep.mubr.msk.bf16.mxu0 %vm254_vm0, %v1341_v17  ;;  %1306 = vmatprep.mubr.msk.bf16.mxu1 %vm254_vm0, %v1342_v18 }
  0x26   :  { %1275 = vmatmul.mubr.msk.bf16.gmra.mrb[16].mxu0 %vm254_vm0, %v1343_v19  ;;  %1307 = vmatmul.mubr.msk.bf16.gmra.mrb[16].mxu1 %vm254_vm0, %v1344_v20 }
  0x27   :  { %1278 = vmatprep.mubr.msk.bf16.mxu0 %vm254_vm0, %v1345_v21  ;;  %1310 = vmatprep.mubr.msk.bf16.mxu1 %vm254_vm0, %v1346_v22 }
  0x2e   :  { %1279 = vmatmul.mubr.msk.bf16.gmra.mrb[20].mxu0 %vm254_vm0, %v1347_v23  ;;  %1311 = vmatmul.mubr.msk.bf16.gmra.mrb[20].mxu1 %vm254_vm0, %v1348_v24 }
  0x2f   :  { %1282 = vmatprep.mubr.msk.bf16.mxu0 %vm254_vm0, %v1349_v25  ;;  %1314 = vmatprep.mubr.msk.bf16.mxu1 %vm254_vm0, %v1350_v26 }
  0x36   :  { %1283 = vmatmul.mubr.msk.bf16.gmra.mrb[24].mxu0 %vm254_vm0, %v1351_v27  ;;  %1315 = vmatmul.mubr.msk.bf16.gmra.mrb[24].mxu1 %vm254_vm0, %v1352_v28 }
  0x37   :  { %1286 = vmatprep.mubr.msk.bf16.mxu0 %vm254_vm0, %v1353_v29  ;;  %1318 = vmatprep.mubr.msk.bf16.mxu1 %vm254_vm0, %v1354_v30 }
  0x3e   :  { %1287 = vmatmul.mubr.msk.bf16.gmra.mrb[28].mxu0 %vm254_vm0, %v1355_v31  ;;  %1319 = vmatmul.mubr.msk.bf16.gmra.mrb[28].mxu1 %vm254_vm0, %v1356_v32 }
  0xd9   :  { %v1260_v34 = vpop.f32.mrb[0].mxu0  ;;  %v1292_v35 = vpop.f32.mrb[0].mxu1 }
  0xda   :  { %v394_v36 = vadd.f32 %v1260_v34, %v1511_v33  ;;  %v522_v37 = vadd.f32 %v1292_v35, %v1511_v33  ;;  %v385_v38 = vpop.f32.mrb[1].mxu0  ;;  %v513_v39 = vpop.f32.mrb[1].mxu1 }
  0xdb   :  { %v386_v40 = vadd.f32 %v1511_v33, %v385_v38  ;;  %v514_v41 = vadd.f32 %v1511_v33, %v513_v39  ;;  %v1261_v42 = vpop.f32.mrb[2].mxu0  ;;  %v1293_v43 = vpop.f32.mrb[2].mxu1 }
  0xdc   :  { %v642_v44 = vmax.f32 %v394_v36, 0.0  ;;  %v674_v45 = vmax.f32 %v522_v37, 0.0  ;;  %v397_v46 = vadd.f32 %v1261_v42, %v1511_v33  ;;  %v525_v47 = vadd.f32 %v1293_v43, %v1511_v33  ;;  %v388_v48 = vpop.f32.mrb[3].mxu0  ;;  %v516_v49 = vpop.f32.mrb[3].mxu1 }
  0xdd   :  { %v640_v50 = vmax.f32 %v386_v40, 0.0  ;;  %v672_v51 = vmax.f32 %v514_v41, 0.0  ;;  %v389_v52 = vadd.f32 %v1511_v33, %v388_v48  ;;  %v517_v53 = vadd.f32 %v1511_v33, %v516_v49 }
  0xde   :  { %v1161_v54 = vpack.c.bf16 %v642_v44, %v642_v44  ;;  %v1193_v55 = vpack.c.bf16 %v674_v45, %v674_v45  ;;  %v643_v56 = vmax.f32 %v397_v46, 0.0  ;;  %v675_v57 = vmax.f32 %v525_v47, 0.0 }
  0xdf   :  { %v1159_v58 = vpack.c.bf16 %v640_v50, %v640_v50  ;;  %v1191_v59 = vpack.c.bf16 %v672_v51, %v672_v51  ;;  %v641_v60 = vmax.f32 %v389_v52, 0.0  ;;  %v673_v61 = vmax.f32 %v517_v53, 0.0 }
  0xe0   :  { %963 = vst.msk [vmem:[%s1836_s3 + $0x8] sm:$0xf] %vm960_vm1, %v1161_v54  ;;  %995 = vst.msk [vmem:[%s1836_s3 + $0x88] sm:$0xf] %vm960_vm1, %v1193_v55  ;;  %v1162_v62 = vpack.c.bf16 %v643_v56, %v643_v56  ;;  %v1194_v63 = vpack.c.bf16 %v675_v57, %v675_v57 }
  0xe1   :  { %961 = vst.msk [vmem:[%s1836_s3] sm:$0xf] %vm960_vm1, %v1159_v58  ;;  %993 = vst.msk [vmem:[%s1836_s3 + $0x80] sm:$0xf] %vm960_vm1, %v1191_v59  ;;  %v1160_v0 = vpack.c.bf16 %v641_v60, %v641_v60  ;;  %v1192_v1 = vpack.c.bf16 %v673_v61, %v673_v61  ;;  %v1264_v2 = vpop.f32.mrb[4].mxu0  ;;  %v1296_v3 = vpop.f32.mrb[4].mxu1 }
  0xe2   :  { %964 = vst.msk [vmem:[%s1836_s3 + $0xc] sm:$0xf] %vm960_vm1, %v1162_v62  ;;  %996 = vst.msk [vmem:[%s1836_s3 + $0x8c] sm:$0xf] %vm960_vm1, %v1194_v63  ;;  %v410_v4 = vadd.f32 %v1264_v2, %v1511_v33  ;;  %v538_v5 = vadd.f32 %v1296_v3, %v1511_v33  ;;  %v401_v6 = vpop.f32.mrb[5].mxu0  ;;  %v529_v7 = vpop.f32.mrb[5].mxu1 }
  0xe3   :  { %962 = vst.msk [vmem:[%s1836_s3 + $0x4] sm:$0xf] %vm960_vm1, %v1160_v0  ;;  %994 = vst.msk [vmem:[%s1836_s3 + $0x84] sm:$0xf] %vm960_vm1, %v1192_v1  ;;  %v402_v8 = vadd.f32 %v1511_v33, %v401_v6  ;;  %v530_v9 = vadd.f32 %v1511_v33, %v529_v7  ;;  %v1265_v10 = vpop.f32.mrb[6].mxu0  ;;  %v1297_v11 = vpop.f32.mrb[6].mxu1 }
  0xe4   :  { %v646_v12 = vmax.f32 %v410_v4, 0.0  ;;  %v678_v13 = vmax.f32 %v538_v5, 0.0  ;;  %v413_v14 = vadd.f32 %v1265_v10, %v1511_v33  ;;  %v541_v15 = vadd.f32 %v1297_v11, %v1511_v33  ;;  %v404_v16 = vpop.f32.mrb[7].mxu0  ;;  %v532_v17 = vpop.f32.mrb[7].mxu1 }
  0xe5   :  { %v644_v18 = vmax.f32 %v402_v8, 0.0  ;;  %v676_v19 = vmax.f32 %v530_v9, 0.0  ;;  %v405_v20 = vadd.f32 %v1511_v33, %v404_v16  ;;  %v533_v21 = vadd.f32 %v1511_v33, %v532_v17 }
  0xe6   :  { %v1165_v22 = vpack.c.bf16 %v646_v12, %v646_v12  ;;  %v1197_v23 = vpack.c.bf16 %v678_v13, %v678_v13  ;;  %v647_v24 = vmax.f32 %v413_v14, 0.0  ;;  %v679_v25 = vmax.f32 %v541_v15, 0.0 }
  0xe7   :  { %v1163_v26 = vpack.c.bf16 %v644_v18, %v644_v18  ;;  %v1195_v27 = vpack.c.bf16 %v676_v19, %v676_v19  ;;  %v645_v28 = vmax.f32 %v405_v20, 0.0  ;;  %v677_v29 = vmax.f32 %v533_v21, 0.0 }
  0xe8   :  { %967 = vst.msk [vmem:[%s1836_s3 + $0x18] sm:$0xf] %vm960_vm1, %v1165_v22  ;;  %999 = vst.msk [vmem:[%s1836_s3 + $0x98] sm:$0xf] %vm960_vm1, %v1197_v23  ;;  %v1166_v30 = vpack.c.bf16 %v647_v24, %v647_v24  ;;  %v1198_v31 = vpack.c.bf16 %v679_v25, %v679_v25 }
  0xe9   :  { %965 = vst.msk [vmem:[%s1836_s3 + $0x10] sm:$0xf] %vm960_vm1, %v1163_v26  ;;  %997 = vst.msk [vmem:[%s1836_s3 + $0x90] sm:$0xf] %vm960_vm1, %v1195_v27  ;;  %v1164_v32 = vpack.c.bf16 %v645_v28, %v645_v28  ;;  %v1196_v34 = vpack.c.bf16 %v677_v29, %v677_v29  ;;  %v1268_v35 = vpop.f32.mrb[8].mxu0  ;;  %v1300_v36 = vpop.f32.mrb[8].mxu1 }
  0xea   :  { %968 = vst.msk [vmem:[%s1836_s3 + $0x1c] sm:$0xf] %vm960_vm1, %v1166_v30  ;;  %1000 = vst.msk [vmem:[%s1836_s3 + $0x9c] sm:$0xf] %vm960_vm1, %v1198_v31  ;;  %v426_v37 = vadd.f32 %v1268_v35, %v1511_v33  ;;  %v554_v38 = vadd.f32 %v1300_v36, %v1511_v33  ;;  %v417_v39 = vpop.f32.mrb[9].mxu0  ;;  %v545_v40 = vpop.f32.mrb[9].mxu1 }
  0xeb   :  { %966 = vst.msk [vmem:[%s1836_s3 + $0x14] sm:$0xf] %vm960_vm1, %v1164_v32  ;;  %998 = vst.msk [vmem:[%s1836_s3 + $0x94] sm:$0xf] %vm960_vm1, %v1196_v34  ;;  %v418_v41 = vadd.f32 %v1511_v33, %v417_v39  ;;  %v546_v42 = vadd.f32 %v1511_v33, %v545_v40  ;;  %v1269_v43 = vpop.f32.mrb[10].mxu0  ;;  %v1301_v44 = vpop.f32.mrb[10].mxu1 }
  0xec   :  { %v650_v45 = vmax.f32 %v426_v37, 0.0  ;;  %v682_v46 = vmax.f32 %v554_v38, 0.0  ;;  %v429_v47 = vadd.f32 %v1269_v43, %v1511_v33  ;;  %v557_v48 = vadd.f32 %v1301_v44, %v1511_v33  ;;  %v420_v49 = vpop.f32.mrb[11].mxu0  ;;  %v548_v50 = vpop.f32.mrb[11].mxu1 }
  0xed   :  { %v648_v51 = vmax.f32 %v418_v41, 0.0  ;;  %v680_v52 = vmax.f32 %v546_v42, 0.0  ;;  %v421_v53 = vadd.f32 %v1511_v33, %v420_v49  ;;  %v549_v54 = vadd.f32 %v1511_v33, %v548_v50 }
  0xee   :  { %v1169_v55 = vpack.c.bf16 %v650_v45, %v650_v45  ;;  %v1201_v56 = vpack.c.bf16 %v682_v46, %v682_v46  ;;  %v651_v57 = vmax.f32 %v429_v47, 0.0  ;;  %v683_v58 = vmax.f32 %v557_v48, 0.0 }
  0xef   :  { %v1167_v59 = vpack.c.bf16 %v648_v51, %v648_v51  ;;  %v1199_v60 = vpack.c.bf16 %v680_v52, %v680_v52  ;;  %v649_v61 = vmax.f32 %v421_v53, 0.0  ;;  %v681_v62 = vmax.f32 %v549_v54, 0.0 }
  0xf0   :  { %971 = vst.msk [vmem:[%s1836_s3 + $0x28] sm:$0xf] %vm960_vm1, %v1169_v55  ;;  %1003 = vst.msk [vmem:[%s1836_s3 + $0xa8] sm:$0xf] %vm960_vm1, %v1201_v56  ;;  %v1170_v63 = vpack.c.bf16 %v651_v57, %v651_v57  ;;  %v1202_v0 = vpack.c.bf16 %v683_v58, %v683_v58 }
  0xf1   :  { %969 = vst.msk [vmem:[%s1836_s3 + $0x20] sm:$0xf] %vm960_vm1, %v1167_v59  ;;  %1001 = vst.msk [vmem:[%s1836_s3 + $0xa0] sm:$0xf] %vm960_vm1, %v1199_v60  ;;  %v1168_v1 = vpack.c.bf16 %v649_v61, %v649_v61  ;;  %v1200_v2 = vpack.c.bf16 %v681_v62, %v681_v62  ;;  %v1272_v3 = vpop.f32.mrb[12].mxu0  ;;  %v1304_v4 = vpop.f32.mrb[12].mxu1 }
  0xf2   :  { %972 = vst.msk [vmem:[%s1836_s3 + $0x2c] sm:$0xf] %vm960_vm1, %v1170_v63  ;;  %1004 = vst.msk [vmem:[%s1836_s3 + $0xac] sm:$0xf] %vm960_vm1, %v1202_v0  ;;  %v442_v5 = vadd.f32 %v1272_v3, %v1511_v33  ;;  %v570_v6 = vadd.f32 %v1304_v4, %v1511_v33  ;;  %v433_v7 = vpop.f32.mrb[13].mxu0  ;;  %v561_v8 = vpop.f32.mrb[13].mxu1 }
  0xf3   :  { %970 = vst.msk [vmem:[%s1836_s3 + $0x24] sm:$0xf] %vm960_vm1, %v1168_v1  ;;  %1002 = vst.msk [vmem:[%s1836_s3 + $0xa4] sm:$0xf] %vm960_vm1, %v1200_v2  ;;  %v434_v9 = vadd.f32 %v1511_v33, %v433_v7  ;;  %v562_v10 = vadd.f32 %v1511_v33, %v561_v8  ;;  %v1273_v11 = vpop.f32.mrb[14].mxu0  ;;  %v1305_v12 = vpop.f32.mrb[14].mxu1 }
  0xf4   :  { %v654_v13 = vmax.f32 %v442_v5, 0.0  ;;  %v686_v14 = vmax.f32 %v570_v6, 0.0  ;;  %v445_v15 = vadd.f32 %v1273_v11, %v1511_v33  ;;  %v573_v16 = vadd.f32 %v1305_v12, %v1511_v33  ;;  %v436_v17 = vpop.f32.mrb[15].mxu0  ;;  %v564_v18 = vpop.f32.mrb[15].mxu1 }
  0xf5   :  { %v652_v19 = vmax.f32 %v434_v9, 0.0  ;;  %v684_v20 = vmax.f32 %v562_v10, 0.0  ;;  %v437_v21 = vadd.f32 %v1511_v33, %v436_v17  ;;  %v565_v22 = vadd.f32 %v1511_v33, %v564_v18 }
  0xf6   :  { %v1173_v23 = vpack.c.bf16 %v654_v13, %v654_v13  ;;  %v1205_v24 = vpack.c.bf16 %v686_v14, %v686_v14  ;;  %v655_v25 = vmax.f32 %v445_v15, 0.0  ;;  %v687_v26 = vmax.f32 %v573_v16, 0.0 }
  0xf7   :  { %v1171_v27 = vpack.c.bf16 %v652_v19, %v652_v19  ;;  %v1203_v28 = vpack.c.bf16 %v684_v20, %v684_v20  ;;  %v653_v29 = vmax.f32 %v437_v21, 0.0  ;;  %v685_v30 = vmax.f32 %v565_v22, 0.0 }
  0xf8   :  { %975 = vst.msk [vmem:[%s1836_s3 + $0x38] sm:$0xf] %vm960_vm1, %v1173_v23  ;;  %1007 = vst.msk [vmem:[%s1836_s3 + $0xb8] sm:$0xf] %vm960_vm1, %v1205_v24  ;;  %v1174_v31 = vpack.c.bf16 %v655_v25, %v655_v25  ;;  %v1206_v32 = vpack.c.bf16 %v687_v26, %v687_v26 }
  0xf9   :  { %973 = vst.msk [vmem:[%s1836_s3 + $0x30] sm:$0xf] %vm960_vm1, %v1171_v27  ;;  %1005 = vst.msk [vmem:[%s1836_s3 + $0xb0] sm:$0xf] %vm960_vm1, %v1203_v28  ;;  %v1172_v34 = vpack.c.bf16 %v653_v29, %v653_v29  ;;  %v1204_v35 = vpack.c.bf16 %v685_v30, %v685_v30  ;;  %v1276_v36 = vpop.f32.mrb[16].mxu0  ;;  %v1308_v37 = vpop.f32.mrb[16].mxu1 }
  0xfa   :  { %976 = vst.msk [vmem:[%s1836_s3 + $0x3c] sm:$0xf] %vm960_vm1, %v1174_v31  ;;  %1008 = vst.msk [vmem:[%s1836_s3 + $0xbc] sm:$0xf] %vm960_vm1, %v1206_v32  ;;  %v458_v38 = vadd.f32 %v1276_v36, %v1511_v33  ;;  %v586_v39 = vadd.f32 %v1308_v37, %v1511_v33  ;;  %v449_v40 = vpop.f32.mrb[17].mxu0  ;;  %v577_v41 = vpop.f32.mrb[17].mxu1 }
  0xfb   :  { %974 = vst.msk [vmem:[%s1836_s3 + $0x34] sm:$0xf] %vm960_vm1, %v1172_v34  ;;  %1006 = vst.msk [vmem:[%s1836_s3 + $0xb4] sm:$0xf] %vm960_vm1, %v1204_v35  ;;  %v450_v42 = vadd.f32 %v1511_v33, %v449_v40  ;;  %v578_v43 = vadd.f32 %v1511_v33, %v577_v41  ;;  %v1277_v44 = vpop.f32.mrb[18].mxu0  ;;  %v1309_v45 = vpop.f32.mrb[18].mxu1 }
  0xfc   :  { %v658_v46 = vmax.f32 %v458_v38, 0.0  ;;  %v690_v47 = vmax.f32 %v586_v39, 0.0  ;;  %v461_v48 = vadd.f32 %v1277_v44, %v1511_v33  ;;  %v589_v49 = vadd.f32 %v1309_v45, %v1511_v33  ;;  %v452_v50 = vpop.f32.mrb[19].mxu0  ;;  %v580_v51 = vpop.f32.mrb[19].mxu1 }
  0xfd   :  { %v656_v52 = vmax.f32 %v450_v42, 0.0  ;;  %v688_v53 = vmax.f32 %v578_v43, 0.0  ;;  %v453_v54 = vadd.f32 %v1511_v33, %v452_v50  ;;  %v581_v55 = vadd.f32 %v1511_v33, %v580_v51 }
  0xfe   :  { %v1177_v56 = vpack.c.bf16 %v658_v46, %v658_v46  ;;  %v1209_v57 = vpack.c.bf16 %v690_v47, %v690_v47  ;;  %v659_v58 = vmax.f32 %v461_v48, 0.0  ;;  %v691_v59 = vmax.f32 %v589_v49, 0.0 }
  0xff   :  { %v1175_v60 = vpack.c.bf16 %v656_v52, %v656_v52  ;;  %v1207_v61 = vpack.c.bf16 %v688_v53, %v688_v53  ;;  %v657_v62 = vmax.f32 %v453_v54, 0.0  ;;  %v689_v63 = vmax.f32 %v581_v55, 0.0 }
 0x100   :  { %979 = vst.msk [vmem:[%s1836_s3 + $0x48] sm:$0xf] %vm960_vm1, %v1177_v56  ;;  %1011 = vst.msk [vmem:[%s1836_s3 + $0xc8] sm:$0xf] %vm960_vm1, %v1209_v57  ;;  %v1178_v0 = vpack.c.bf16 %v659_v58, %v659_v58  ;;  %v1210_v1 = vpack.c.bf16 %v691_v59, %v691_v59 }
 0x101   :  { %977 = vst.msk [vmem:[%s1836_s3 + $0x40] sm:$0xf] %vm960_vm1, %v1175_v60  ;;  %1009 = vst.msk [vmem:[%s1836_s3 + $0xc0] sm:$0xf] %vm960_vm1, %v1207_v61  ;;  %v1176_v2 = vpack.c.bf16 %v657_v62, %v657_v62  ;;  %v1208_v3 = vpack.c.bf16 %v689_v63, %v689_v63  ;;  %v1280_v4 = vpop.f32.mrb[20].mxu0  ;;  %v1312_v5 = vpop.f32.mrb[20].mxu1 }
 0x102   :  { %980 = vst.msk [vmem:[%s1836_s3 + $0x4c] sm:$0xf] %vm960_vm1, %v1178_v0  ;;  %1012 = vst.msk [vmem:[%s1836_s3 + $0xcc] sm:$0xf] %vm960_vm1, %v1210_v1  ;;  %v474_v6 = vadd.f32 %v1280_v4, %v1511_v33  ;;  %v602_v7 = vadd.f32 %v1312_v5, %v1511_v33  ;;  %v465_v8 = vpop.f32.mrb[21].mxu0  ;;  %v593_v9 = vpop.f32.mrb[21].mxu1 }
 0x103   :  { %978 = vst.msk [vmem:[%s1836_s3 + $0x44] sm:$0xf] %vm960_vm1, %v1176_v2  ;;  %1010 = vst.msk [vmem:[%s1836_s3 + $0xc4] sm:$0xf] %vm960_vm1, %v1208_v3  ;;  %v466_v10 = vadd.f32 %v1511_v33, %v465_v8  ;;  %v594_v11 = vadd.f32 %v1511_v33, %v593_v9  ;;  %v1281_v12 = vpop.f32.mrb[22].mxu0  ;;  %v1313_v13 = vpop.f32.mrb[22].mxu1 }
 0x104   :  { %v662_v14 = vmax.f32 %v474_v6, 0.0  ;;  %v694_v15 = vmax.f32 %v602_v7, 0.0  ;;  %v477_v16 = vadd.f32 %v1281_v12, %v1511_v33  ;;  %v605_v17 = vadd.f32 %v1313_v13, %v1511_v33  ;;  %v468_v18 = vpop.f32.mrb[23].mxu0  ;;  %v596_v19 = vpop.f32.mrb[23].mxu1 }
 0x105   :  { %v660_v20 = vmax.f32 %v466_v10, 0.0  ;;  %v692_v21 = vmax.f32 %v594_v11, 0.0  ;;  %v469_v22 = vadd.f32 %v1511_v33, %v468_v18  ;;  %v597_v23 = vadd.f32 %v1511_v33, %v596_v19 }
 0x106   :  { %v1181_v24 = vpack.c.bf16 %v662_v14, %v662_v14  ;;  %v1213_v25 = vpack.c.bf16 %v694_v15, %v694_v15  ;;  %v663_v26 = vmax.f32 %v477_v16, 0.0  ;;  %v695_v27 = vmax.f32 %v605_v17, 0.0 }
 0x107   :  { %v1179_v28 = vpack.c.bf16 %v660_v20, %v660_v20  ;;  %v1211_v29 = vpack.c.bf16 %v692_v21, %v692_v21  ;;  %v661_v30 = vmax.f32 %v469_v22, 0.0  ;;  %v693_v31 = vmax.f32 %v597_v23, 0.0 }
 0x108   :  { %983 = vst.msk [vmem:[%s1836_s3 + $0x58] sm:$0xf] %vm960_vm1, %v1181_v24  ;;  %1015 = vst.msk [vmem:[%s1836_s3 + $0xd8] sm:$0xf] %vm960_vm1, %v1213_v25  ;;  %v1182_v32 = vpack.c.bf16 %v663_v26, %v663_v26  ;;  %v1214_v34 = vpack.c.bf16 %v695_v27, %v695_v27 }
 0x109   :  { %981 = vst.msk [vmem:[%s1836_s3 + $0x50] sm:$0xf] %vm960_vm1, %v1179_v28  ;;  %1013 = vst.msk [vmem:[%s1836_s3 + $0xd0] sm:$0xf] %vm960_vm1, %v1211_v29  ;;  %v1180_v35 = vpack.c.bf16 %v661_v30, %v661_v30  ;;  %v1212_v36 = vpack.c.bf16 %v693_v31, %v693_v31  ;;  %v1284_v37 = vpop.f32.mrb[24].mxu0  ;;  %v1316_v38 = vpop.f32.mrb[24].mxu1 }
 0x10a   :  { %984 = vst.msk [vmem:[%s1836_s3 + $0x5c] sm:$0xf] %vm960_vm1, %v1182_v32  ;;  %1016 = vst.msk [vmem:[%s1836_s3 + $0xdc] sm:$0xf] %vm960_vm1, %v1214_v34  ;;  %v490_v39 = vadd.f32 %v1284_v37, %v1511_v33  ;;  %v618_v40 = vadd.f32 %v1316_v38, %v1511_v33  ;;  %v481_v41 = vpop.f32.mrb[25].mxu0  ;;  %v609_v42 = vpop.f32.mrb[25].mxu1 }
 0x10b   :  { %982 = vst.msk [vmem:[%s1836_s3 + $0x54] sm:$0xf] %vm960_vm1, %v1180_v35  ;;  %1014 = vst.msk [vmem:[%s1836_s3 + $0xd4] sm:$0xf] %vm960_vm1, %v1212_v36  ;;  %v482_v43 = vadd.f32 %v1511_v33, %v481_v41  ;;  %v610_v44 = vadd.f32 %v1511_v33, %v609_v42  ;;  %v1285_v45 = vpop.f32.mrb[26].mxu0  ;;  %v1317_v46 = vpop.f32.mrb[26].mxu1 }
 0x10c   :  { %v666_v47 = vmax.f32 %v490_v39, 0.0  ;;  %v698_v48 = vmax.f32 %v618_v40, 0.0  ;;  %v493_v49 = vadd.f32 %v1285_v45, %v1511_v33  ;;  %v621_v50 = vadd.f32 %v1317_v46, %v1511_v33  ;;  %v484_v51 = vpop.f32.mrb[27].mxu0  ;;  %v612_v52 = vpop.f32.mrb[27].mxu1 }
 0x10d   :  { %v664_v53 = vmax.f32 %v482_v43, 0.0  ;;  %v696_v54 = vmax.f32 %v610_v44, 0.0  ;;  %v485_v55 = vadd.f32 %v1511_v33, %v484_v51  ;;  %v613_v56 = vadd.f32 %v1511_v33, %v612_v52 }
 0x10e   :  { %v1185_v57 = vpack.c.bf16 %v666_v47, %v666_v47  ;;  %v1217_v58 = vpack.c.bf16 %v698_v48, %v698_v48  ;;  %v667_v59 = vmax.f32 %v493_v49, 0.0  ;;  %v699_v60 = vmax.f32 %v621_v50, 0.0 }
 0x10f   :  { %v1183_v61 = vpack.c.bf16 %v664_v53, %v664_v53  ;;  %v1215_v62 = vpack.c.bf16 %v696_v54, %v696_v54  ;;  %v665_v63 = vmax.f32 %v485_v55, 0.0  ;;  %v697_v0 = vmax.f32 %v613_v56, 0.0 }
 0x110   :  { %987 = vst.msk [vmem:[%s1836_s3 + $0x68] sm:$0xf] %vm960_vm1, %v1185_v57  ;;  %1019 = vst.msk [vmem:[%s1836_s3 + $0xe8] sm:$0xf] %vm960_vm1, %v1217_v58  ;;  %v1186_v1 = vpack.c.bf16 %v667_v59, %v667_v59  ;;  %v1218_v2 = vpack.c.bf16 %v699_v60, %v699_v60 }
 0x111   :  { %985 = vst.msk [vmem:[%s1836_s3 + $0x60] sm:$0xf] %vm960_vm1, %v1183_v61  ;;  %1017 = vst.msk [vmem:[%s1836_s3 + $0xe0] sm:$0xf] %vm960_vm1, %v1215_v62  ;;  %v1184_v3 = vpack.c.bf16 %v665_v63, %v665_v63  ;;  %v1216_v4 = vpack.c.bf16 %v697_v0, %v697_v0  ;;  %v1288_v5 = vpop.f32.mrb[28].mxu0  ;;  %v1320_v6 = vpop.f32.mrb[28].mxu1 }
 0x112   :  { %988 = vst.msk [vmem:[%s1836_s3 + $0x6c] sm:$0xf] %vm960_vm1, %v1186_v1  ;;  %1020 = vst.msk [vmem:[%s1836_s3 + $0xec] sm:$0xf] %vm960_vm1, %v1218_v2  ;;  %v506_v7 = vadd.f32 %v1288_v5, %v1511_v33  ;;  %v634_v8 = vadd.f32 %v1320_v6, %v1511_v33  ;;  %v497_v9 = vpop.f32.mrb[29].mxu0  ;;  %v625_v10 = vpop.f32.mrb[29].mxu1 }
 0x113   :  { %986 = vst.msk [vmem:[%s1836_s3 + $0x64] sm:$0xf] %vm960_vm1, %v1184_v3  ;;  %1018 = vst.msk [vmem:[%s1836_s3 + $0xe4] sm:$0xf] %vm960_vm1, %v1216_v4  ;;  %v498_v11 = vadd.f32 %v1511_v33, %v497_v9  ;;  %v626_v12 = vadd.f32 %v1511_v33, %v625_v10  ;;  %v1289_v13 = vpop.f32.mrb[30].mxu0  ;;  %v1321_v14 = vpop.f32.mrb[30].mxu1 }
 0x114   :  { %v670_v15 = vmax.f32 %v506_v7, 0.0  ;;  %v702_v16 = vmax.f32 %v634_v8, 0.0  ;;  %v509_v17 = vadd.f32 %v1289_v13, %v1511_v33  ;;  %v637_v18 = vadd.f32 %v1321_v14, %v1511_v33  ;;  %v500_v19 = vpop.f32.mrb[31].mxu0  ;;  %v628_v20 = vpop.f32.mrb[31].mxu1 }
 0x115   :  { %v668_v21 = vmax.f32 %v498_v11, 0.0  ;;  %v700_v22 = vmax.f32 %v626_v12, 0.0  ;;  %v501_v23 = vadd.f32 %v1511_v33, %v500_v19  ;;  %v629_v24 = vadd.f32 %v1511_v33, %v628_v20 }
 0x116   :  { %v1189_v25 = vpack.c.bf16 %v670_v15, %v670_v15  ;;  %v1221_v26 = vpack.c.bf16 %v702_v16, %v702_v16  ;;  %v671_v27 = vmax.f32 %v509_v17, 0.0  ;;  %v703_v28 = vmax.f32 %v637_v18, 0.0 }
 0x117   :  { %v1187_v29 = vpack.c.bf16 %v668_v21, %v668_v21  ;;  %v1219_v30 = vpack.c.bf16 %v700_v22, %v700_v22  ;;  %v669_v31 = vmax.f32 %v501_v23, 0.0  ;;  %v701_v32 = vmax.f32 %v629_v24, 0.0 }
 0x118   :  { %991 = vst.msk [vmem:[%s1836_s3 + $0x78] sm:$0xf] %vm960_vm1, %v1189_v25  ;;  %1023 = vst.msk [vmem:[%s1836_s3 + $0xf8] sm:$0xf] %vm960_vm1, %v1221_v26  ;;  %v1190_v34 = vpack.c.bf16 %v671_v27, %v671_v27  ;;  %v1222_v33 = vpack.c.bf16 %v703_v28, %v703_v28 }
 0x119   :  { %989 = vst.msk [vmem:[%s1836_s3 + $0x70] sm:$0xf] %vm960_vm1, %v1187_v29  ;;  %1021 = vst.msk [vmem:[%s1836_s3 + $0xf0] sm:$0xf] %vm960_vm1, %v1219_v30  ;;  %v1188_v35 = vpack.c.bf16 %v669_v31, %v669_v31  ;;  %v1220_v36 = vpack.c.bf16 %v701_v32, %v701_v32 }
 0x11a   :  { %992 = vst.msk [vmem:[%s1836_s3 + $0x7c] sm:$0xf] %vm960_vm1, %v1190_v34  ;;  %1024 = vst.msk [vmem:[%s1836_s3 + $0xfc] sm:$0xf] %vm960_vm1, %v1222_v33 }
 0x11b   :  { %990 = vst.msk [vmem:[%s1836_s3 + $0x74] sm:$0xf] %vm960_vm1, %v1188_v35  ;;  %1022 = vst.msk [vmem:[%s1836_s3 + $0xf4] sm:$0xf] %vm960_vm1, %v1220_v36 }

// kernel: _lambda_.19
= control target key start
LH: loop header
LB: loop body
LE: loop exit
PB: predicated region body
PF: predicated region fallthrough
CT: control target
= control target key end

     0   :  { %vm560_vm0 = vcmask 523264   ;;  %vm956_vm1 = vcmask 519168   ;;  %s1990_s1 = inlined_call_operand.vmem [shape: bf16[576,128], index: 1, kind: input, shape index: {}]   ;;  %s1991_s0 = inlined_call_operand.vmem [shape: bf16[128,576], index: 0, kind: input, shape index: {}]   ;;  %s1992_s2 = inlined_call_operand.vmem [shape: f32[1,128], index: 2, kind: input, shape index: {}]   ;;  %s1993_s3 = inlined_call_operand.vmem [shape: bf16[128,64], index: 3, kind: output, shape index: {0}]   ;;  %s1994_s4 = inlined_call_operand.vmem [shape: bf16[128,64], index: 4, kind: output, shape index: {1}]  }
   0x1   :  { %v1415_v0 = vld [vmem:[%s1990_s1 + $0x40] sm:$0xff]   ;;  %v1419_v4 = vld [vmem:[%s1990_s1 + $0x48] sm:$0xff]   ;;  %v1423_v8 = vld [vmem:[%s1990_s1 + $0x50] sm:$0xff]  }
   0x2   :  { %v1416_v1 = vld [vmem:[%s1990_s1 + $0xc0] sm:$0xff]   ;;  %1242 = vmatprep.subr.bf16.mxu0 %v1415_v0  ;;  %v1420_v5 = vld [vmem:[%s1990_s1 + $0xc8] sm:$0xff]   ;;  %v1424_v9 = vld [vmem:[%s1990_s1 + $0xd0] sm:$0xff]  }
   0x3   :  { %v1417_v2 = vld [vmem:[%s1990_s1] sm:$0xff]   ;;  %1306 = vmatprep.subr.bf16.mxu1 %v1416_v1  ;;  %v1421_v6 = vld [vmem:[%s1990_s1 + $0x8] sm:$0xff]   ;;  %v1425_v10 = vld [vmem:[%s1990_s1 + $0x10] sm:$0xff]  }
   0x4   :  { %v1418_v3 = vld [vmem:[%s1990_s1 + $0x80] sm:$0xff]   ;;  %1243 = vmatpush3.bf16.msra.mxu0 %v1417_v2  ;;  %v1422_v7 = vld [vmem:[%s1990_s1 + $0x88] sm:$0xff]   ;;  %v1426_v11 = vld [vmem:[%s1990_s1 + $0x90] sm:$0xff]  }
   0x5   :  { %1307 = vmatpush3.bf16.msra.mxu1 %v1418_v3  ;;  %1244 = vmatprep.subr.bf16.mxu0 %v1419_v4  ;;  %v1427_v12 = vld [vmem:[%s1990_s1 + $0x58] sm:$0xff]   ;;  %v1431_v16 = vld [vmem:[%s1990_s1 + $0x60] sm:$0xff]   ;;  %v1435_v20 = vld [vmem:[%s1990_s1 + $0x68] sm:$0xff]  }
   0x6   :  { %1308 = vmatprep.subr.bf16.mxu1 %v1420_v5  ;;  %v1428_v13 = vld [vmem:[%s1990_s1 + $0xd8] sm:$0xff]   ;;  %v1432_v17 = vld [vmem:[%s1990_s1 + $0xe0] sm:$0xff]   ;;  %v1436_v21 = vld [vmem:[%s1990_s1 + $0xe8] sm:$0xff]  }
   0x7   :  { %v1429_v14 = vld [vmem:[%s1990_s1 + $0x18] sm:$0xff]   ;;  %v1433_v18 = vld [vmem:[%s1990_s1 + $0x20] sm:$0xff]   ;;  %v1437_v22 = vld [vmem:[%s1990_s1 + $0x28] sm:$0xff]  }
   0x8   :  { %1245 = vmatpush3.bf16.msra.mxu0 %v1421_v6  ;;  %v1430_v15 = vld [vmem:[%s1990_s1 + $0x98] sm:$0xff]   ;;  %v1434_v19 = vld [vmem:[%s1990_s1 + $0xa0] sm:$0xff]   ;;  %v1438_v23 = vld [vmem:[%s1990_s1 + $0xa8] sm:$0xff]  }
   0x9   :  { %1309 = vmatpush3.bf16.msra.mxu1 %v1422_v7  ;;  %1246 = vmatprep.subr.bf16.mxu0 %v1423_v8  ;;  %v1439_v24 = vld [vmem:[%s1990_s1 + $0x70] sm:$0xff]   ;;  %v1443_v28 = vld [vmem:[%s1990_s1 + $0x78] sm:$0xff]   ;;  %v1452_v35 = vld [vmem:[%s1991_s0 + $0xc] ss:$20 sps:$4 sm:$0xff]  }
   0xa   :  { %1310 = vmatprep.subr.bf16.mxu1 %v1424_v9  ;;  %v1440_v25 = vld [vmem:[%s1990_s1 + $0xf0] sm:$0xff]   ;;  %v1444_v29 = vld [vmem:[%s1990_s1 + $0xf8] sm:$0xff]   ;;  %v1453_v36 = vld [vmem:[%s1990_s1 + $0x100] sm:$0xff]   ;;  %714 = vmatprep.mubr.bf16.mxu1 %v1452_v35 }
   0xb   :  { %v1441_v26 = vld [vmem:[%s1990_s1 + $0x30] sm:$0xff]   ;;  %v1445_v30 = vld [vmem:[%s1990_s1 + $0x38] sm:$0xff]   ;;  %v1454_v37 = vld [vmem:[%s1991_s0 + $0x2c] ss:$20 sps:$4 sm:$0xff]  }
   0xc   :  { %1247 = vmatpush3.bf16.msra.mxu0 %v1425_v10  ;;  %v1442_v27 = vld [vmem:[%s1990_s1 + $0xb0] sm:$0xff]   ;;  %v1446_v31 = vld [vmem:[%s1990_s1 + $0xb8] sm:$0xff]   ;;  %v1466_v42 = vld [vmem:[%s1990_s1 + $0x108] sm:$0xff]  }
   0xd   :  { %1311 = vmatpush3.bf16.msra.mxu1 %v1426_v11  ;;  %1248 = vmatprep.subr.bf16.mxu0 %v1427_v12  ;;  %v1447_v32 = vld [vmem:[%s1991_s0] ss:$20 sps:$4 sm:$0xff]   ;;  %v1449_v33 = vld [vmem:[%s1991_s0 + $0x4] ss:$20 sps:$4 sm:$0xff]   ;;  %v1450_v34 = vld [vmem:[%s1991_s0 + $0x8] ss:$20 sps:$4 sm:$0xff]  }
   0xe   :  { %1312 = vmatprep.subr.bf16.mxu1 %v1428_v13  ;;  %617 = vmatprep.mubr.bf16.mxu0 %v1449_v33  ;;  %v1456_v38 = vld [vmem:[%s1991_s0 + $0x34] ss:$20 sps:$4 sm:$0xff]   ;;  %v1459_v40 = vld [vmem:[%s1991_s0 + $0x30] ss:$20 sps:$4 sm:$0xff]   ;;  %v1465_v45 = vld [vmem:[%s1991_s0 + $0x58] ss:$20 sps:$4 sm:$0xff]  }
   0xf   :  { %v1458_v39 = vld [vmem:[%s1991_s0 + $0x28] ss:$20 sps:$4 sm:$0xff]   ;;  %v1464_v44 = vld [vmem:[%s1991_s0 + $0x50] ss:$20 sps:$4 sm:$0xff]   ;;  %v1471_v50 = vld [vmem:[%s1991_s0 + $0x78] ss:$20 sps:$4 sm:$0xff]  }
  0x10   :  { %1249 = vmatpush3.bf16.msra.mxu0 %v1429_v14  ;;  %v1460_v41 = vld [vmem:[%s1991_s0 + $0x54] ss:$20 sps:$4 sm:$0xff]   ;;  %v1462_v43 = vld [vmem:[%s1991_s0 + $0x5c] ss:$20 sps:$4 sm:$0xff]   ;;  %v1469_v48 = vld [vmem:[%s1991_s0 + $0x84] ss:$20 sps:$4 sm:$0xff]  }
  0x11   :  { %1313 = vmatpush3.bf16.msra.mxu1 %v1430_v15  ;;  %1250 = vmatprep.subr.bf16.mxu0 %v1431_v16  ;;  %v1479_v46 = vld [vmem:[%s1990_s1 + $0x110] sm:$0xff]   ;;  %v1492_v49 = vld [vmem:[%s1990_s1 + $0x118] sm:$0xff]   ;;  %v1475_v53 = vld [vmem:[%s1991_s0 + $0xac] ss:$20 sps:$4 sm:$0xff]  }
  0x12   :  { %1314 = vmatprep.subr.bf16.mxu1 %v1432_v17  ;;  %v1467_v47 = vld [vmem:[%s1991_s0 + $0x7c] ss:$20 sps:$4 sm:$0xff]   ;;  %v1472_v51 = vld [vmem:[%s1991_s0 + $0x80] ss:$20 sps:$4 sm:$0xff]   ;;  %v1473_v52 = vld [vmem:[%s1991_s0 + $0xa4] ss:$20 sps:$4 sm:$0xff]  }
  0x13   :  { %v1477_v54 = vld [vmem:[%s1991_s0 + $0xa0] ss:$20 sps:$4 sm:$0xff]   ;;  %v1478_v55 = vld [vmem:[%s1991_s0 + $0xa8] ss:$20 sps:$4 sm:$0xff]   ;;  %v1485_v59 = vld [vmem:[%s1991_s0 + $0xd0] ss:$20 sps:$4 sm:$0xff]  }
  0x14   :  { %1251 = vmatpush3.bf16.msra.mxu0 %v1433_v18  ;;  %v1480_v56 = vld [vmem:[%s1991_s0 + $0xcc] ss:$20 sps:$4 sm:$0xff]   ;;  %v1482_v57 = vld [vmem:[%s1991_s0 + $0xd4] ss:$20 sps:$4 sm:$0xff]   ;;  %v1488_v61 = vld [vmem:[%s1991_s0 + $0xfc] ss:$20 sps:$4 sm:$0xff]  }
  0x15   :  { %1315 = vmatpush3.bf16.msra.mxu1 %v1434_v19  ;;  %1252 = vmatprep.subr.bf16.mxu0 %v1435_v20  ;;  %v1484_v58 = vld [vmem:[%s1991_s0 + $0xc8] ss:$20 sps:$4 sm:$0xff]   ;;  %v1490_v62 = vld [vmem:[%s1991_s0 + $0xf0] ss:$20 sps:$4 sm:$0xff]   ;;  %v1491_v63 = vld [vmem:[%s1991_s0 + $0xf8] ss:$20 sps:$4 sm:$0xff]  }
  0x16   :  { %1316 = vmatprep.subr.bf16.mxu1 %v1436_v21  ;;  %v1486_v60 = vld [vmem:[%s1991_s0 + $0xf4] ss:$20 sps:$4 sm:$0xff]   ;;  %v1493_v0 = vld [vmem:[%s1991_s0 + $0x11c] ss:$20 sps:$4 sm:$0xff]   ;;  %v1495_v1 = vld [vmem:[%s1991_s0 + $0x124] ss:$20 sps:$4 sm:$0xff]  }
  0x17   :  { %v1497_v2 = vld [vmem:[%s1991_s0 + $0x118] ss:$20 sps:$4 sm:$0xff]   ;;  %v1498_v3 = vld [vmem:[%s1991_s0 + $0x120] ss:$20 sps:$4 sm:$0xff]   ;;  %v1499_v4 = vld [vmem:[%s1991_s0 + $0x10] ss:$20 sps:$4 sm:$0xff]  }
  0x18   :  { %1253 = vmatpush3.bf16.msra.mxu0 %v1437_v22  ;;  %v1500_v5 = vld [vmem:[%s1991_s0 + $0xb0] ss:$20 sps:$4 sm:$0xff]   ;;  %v1501_v6 = vld [vmem:[%s1991_s0 + $0x38] ss:$20 sps:$4 sm:$0xff]   ;;  %v1503_v8 = vld [vmem:[%s1991_s0 + $0x60] ss:$20 sps:$4 sm:$0xff]  }
  0x19   :  { %1317 = vmatpush3.bf16.msra.mxu1 %v1438_v23  ;;  %1254 = vmatprep.subr.bf16.mxu0 %v1439_v24  ;;  %v1502_v7 = vld [vmem:[%s1991_s0 + $0xd8] ss:$20 sps:$4 sm:$0xff]   ;;  %v1504_v9 = vld [vmem:[%s1991_s0 + $0x100] ss:$20 sps:$4 sm:$0xff]   ;;  %v1505_v10 = vld [vmem:[%s1991_s0 + $0x88] ss:$20 sps:$4 sm:$0xff]  }
  0x1a   :  { %1318 = vmatprep.subr.bf16.mxu1 %v1440_v25  ;;  %v1506_v11 = vld [vmem:[%s1991_s0 + $0x128] ss:$20 sps:$4 sm:$0xff]   ;;  %v1772_v14 = vld [vmem:[%s1992_s2] ss:$0 sm:$0xff]  ;;  %s1507_s0 = smov 64  }
  0x1c   :  { %1255 = vmatpush3.bf16.msra.mxu0 %v1441_v26 }
  0x1d   :  { %1319 = vmatpush3.bf16.msra.mxu1 %v1442_v27  ;;  %1256 = vmatprep.subr.bf16.mxu0 %v1443_v28 }
  0x1e   :  { %1320 = vmatprep.subr.bf16.mxu1 %v1444_v29 }
  0x20   :  { %1257 = vmatpush3.bf16.msra.mxu0 %v1445_v30 }
  0x21   :  { %1321 = vmatpush3.bf16.msra.mxu1 %v1446_v31  ;;  %1382 = vmatprep.subr.bf16.mxu0 %v1453_v36 }
  0x22   :  { %1406 = vmatprep.subr.bf16.mxu1 %v1453_v36 }
  0x23   :  { %618 = vmatmul.mubr.bf16.vlgmr.msra.gmra.mrb[0].mxu0 %v1447_v32 }
  0x24   :  { %715 = vmatmul.mubr.bf16.vlgmr.msra.gmra.mrb[0].mxu1 %v1450_v34  ;;  %1383 = vmatpush3.bf16.msra.mxu0 %v1453_v36 }
  0x25   :  { %1410 = vmatpush3.bf16.msra.mxu1 %v1453_v36  ;;  %625 = vmatprep.mubr.bf16.mxu0 %v1454_v37 }
  0x26   :  { %722 = vmatprep.mubr.bf16.mxu1 %v1456_v38  ;;  %1384 = vmatprep.subr.bf16.mxu0 %v1466_v42 }
  0x27   :  { %1407 = vmatprep.subr.bf16.mxu1 %v1466_v42 }
  0x28   :  { %1385 = vmatpush3.bf16.msra.mxu0 %v1466_v42 }
  0x29   :  { %1411 = vmatpush3.bf16.msra.mxu1 %v1466_v42  ;;  %1386 = vmatprep.subr.bf16.mxu0 %v1479_v46 }
  0x2a   :  { %1408 = vmatprep.subr.bf16.mxu1 %v1479_v46 }
  0x2b   :  { %626 = vmatmul.mubr.bf16.gmra.mrb[4].mxu0 %v1458_v39 }
  0x2c   :  { %723 = vmatmul.mubr.bf16.gmra.mrb[4].mxu1 %v1459_v40  ;;  %633 = vmatprep.mubr.bf16.mxu0 %v1460_v41 }
  0x2d   :  { %730 = vmatprep.mubr.bf16.mxu1 %v1462_v43  ;;  %1387 = vmatpush3.bf16.msra.mxu0 %v1479_v46 }
  0x2e   :  { %1412 = vmatpush3.bf16.msra.mxu1 %v1479_v46  ;;  %1388 = vmatprep.subr.bf16.mxu0 %v1492_v49 }
  0x2f   :  { %1409 = vmatprep.subr.bf16.mxu1 %v1492_v49 }
  0x31   :  { %1389 = vmatpush3.bf16.msra.mxu0 %v1492_v49 }
  0x32   :  { %1413 = vmatpush3.bf16.msra.mxu1 %v1492_v49 }
  0x33   :  { %634 = vmatmul.mubr.bf16.gmra.mrb[8].mxu0 %v1464_v44 }
  0x34   :  { %731 = vmatmul.mubr.bf16.gmra.mrb[8].mxu1 %v1465_v45  ;;  %641 = vmatprep.mubr.bf16.mxu0 %v1467_v47 }
  0x35   :  { %738 = vmatprep.mubr.bf16.mxu1 %v1469_v48 }
  0x3b   :  { %642 = vmatmul.mubr.bf16.gmra.mrb[12].mxu0 %v1471_v50 }
  0x3c   :  { %739 = vmatmul.mubr.bf16.gmra.mrb[12].mxu1 %v1472_v51  ;;  %649 = vmatprep.mubr.bf16.mxu0 %v1473_v52 }
  0x3d   :  { %746 = vmatprep.mubr.bf16.mxu1 %v1475_v53 }
  0x43   :  { %650 = vmatmul.mubr.bf16.gmra.mrb[16].mxu0 %v1477_v54 }
  0x44   :  { %747 = vmatmul.mubr.bf16.gmra.mrb[16].mxu1 %v1478_v55  ;;  %657 = vmatprep.mubr.bf16.mxu0 %v1480_v56 }
  0x45   :  { %754 = vmatprep.mubr.bf16.mxu1 %v1482_v57 }
  0x4b   :  { %658 = vmatmul.mubr.bf16.gmra.mrb[20].mxu0 %v1484_v58 }
  0x4c   :  { %755 = vmatmul.mubr.bf16.gmra.mrb[20].mxu1 %v1485_v59  ;;  %665 = vmatprep.mubr.bf16.mxu0 %v1486_v60 }
  0x4d   :  { %762 = vmatprep.mubr.bf16.mxu1 %v1488_v61 }
  0x53   :  { %666 = vmatmul.mubr.bf16.gmra.mrb[24].mxu0 %v1490_v62 }
  0x54   :  { %763 = vmatmul.mubr.bf16.gmra.mrb[24].mxu1 %v1491_v63  ;;  %673 = vmatprep.mubr.bf16.mxu0 %v1493_v0 }
  0x55   :  { %770 = vmatprep.mubr.bf16.mxu1 %v1495_v1 }
  0x5b   :  { %674 = vmatmul.mubr.bf16.gmra.mrb[28].mxu0 %v1497_v2 }
  0x5c   :  { %771 = vmatmul.mubr.bf16.gmra.mrb[28].mxu1 %v1498_v3  ;;  %1390 = vmatprep.mubr.msk.bf16.mxu0 %vm560_vm0, %v1499_v4 }
  0x5d   :  { %1398 = vmatprep.mubr.msk.bf16.mxu1 %vm560_vm0, %v1500_v5 }
  0x63   :  { %1391 = vmatmul.mubr.msk.bf16.vlgmr.msra.gmra.mrb[32].mxu0 %vm560_vm0, %v1501_v6 }
  0x64   :  { %1399 = vmatmul.mubr.msk.bf16.vlgmr.msra.gmra.mrb[32].mxu1 %vm560_vm0, %v1502_v7  ;;  %1394 = vmatprep.mubr.msk.bf16.mxu0 %vm560_vm0, %v1503_v8 }
  0x65   :  { %1402 = vmatprep.mubr.msk.bf16.mxu1 %vm560_vm0, %v1504_v9 }
  0x6b   :  { %1395 = vmatmul.mubr.msk.bf16.gmra.mrb[36].mxu0 %vm560_vm0, %v1505_v10 }
  0x6c   :  { %1403 = vmatmul.mubr.msk.bf16.gmra.mrb[36].mxu1 %vm560_vm0, %v1506_v11 }
  0xf6   :  { %v1258_v12 = vpop.f32.mrb[0].mxu0 }
  0xf7   :  { %v1322_v13 = vpop.f32.mrb[0].mxu1  ;;  %v1259_v15 = vpop.f32.mrb[1].mxu0 }
  0xf8   :  { %v1260_v16 = vadd.f32 %v1259_v15, %v1258_v12  ;;  %v1323_v17 = vpop.f32.mrb[1].mxu1  ;;  %v1261_v18 = vpop.f32.mrb[2].mxu0 }
  0xf9   :  { %v1324_v19 = vadd.f32 %v1323_v17, %v1322_v13  ;;  %v1325_v20 = vpop.f32.mrb[2].mxu1  ;;  %v1262_v21 = vpop.f32.mrb[3].mxu0 }
  0xfa   :  { %v620_v22 = vadd.f32 %v1260_v16, %v1772_v14  ;;  %v1263_v23 = vadd.f32 %v1262_v21, %v1261_v18  ;;  %v1326_v24 = vpop.f32.mrb[3].mxu1 }
  0xfb   :  { %v1327_v25 = vadd.f32 %v1326_v24, %v1325_v20 }
  0xfc   :  { %v623_v26 = vadd.f32 %v1263_v23, %v1772_v14  ;;  %v1776_v27 = vadd.f32 %v1324_v19, %v620_v22 }
  0xfe   :  { %v1264_v28 = vpop.f32.mrb[4].mxu0  ;;  %v1778_v29 = vadd.f32 %v1327_v25, %v623_v26 }
  0xff   :  { %v1328_v30 = vpop.f32.mrb[4].mxu1  ;;  %v1265_v31 = vpop.f32.mrb[5].mxu0 }
 0x100   :  { %v1266_v32 = vadd.f32 %v1265_v31, %v1264_v28  ;;  %v1329_v33 = vpop.f32.mrb[5].mxu1  ;;  %v1267_v34 = vpop.f32.mrb[6].mxu0 }
 0x101   :  { %v1330_v35 = vadd.f32 %v1329_v33, %v1328_v30  ;;  %v1331_v36 = vpop.f32.mrb[6].mxu1  ;;  %v1268_v37 = vpop.f32.mrb[7].mxu0 }
 0x102   :  { %v628_v38 = vadd.f32 %v1266_v32, %v1772_v14  ;;  %v1269_v39 = vadd.f32 %v1268_v37, %v1267_v34  ;;  %v1332_v40 = vpop.f32.mrb[7].mxu1 }
 0x103   :  { %v1333_v41 = vadd.f32 %v1332_v40, %v1331_v36 }
 0x104   :  { %v631_v42 = vadd.f32 %v1269_v39, %v1772_v14  ;;  %v1782_v43 = vadd.f32 %v1330_v35, %v628_v38 }
 0x106   :  { %v1270_v44 = vpop.f32.mrb[8].mxu0  ;;  %v1784_v45 = vadd.f32 %v1333_v41, %v631_v42 }
 0x107   :  { %v1334_v46 = vpop.f32.mrb[8].mxu1  ;;  %v1271_v47 = vpop.f32.mrb[9].mxu0 }
 0x108   :  { %v1272_v48 = vadd.f32 %v1271_v47, %v1270_v44  ;;  %v1335_v49 = vpop.f32.mrb[9].mxu1  ;;  %v1273_v50 = vpop.f32.mrb[10].mxu0 }
 0x109   :  { %v1336_v51 = vadd.f32 %v1335_v49, %v1334_v46  ;;  %v1337_v52 = vpop.f32.mrb[10].mxu1  ;;  %v1274_v53 = vpop.f32.mrb[11].mxu0 }
 0x10a   :  { %v636_v54 = vadd.f32 %v1272_v48, %v1772_v14  ;;  %v1275_v55 = vadd.f32 %v1274_v53, %v1273_v50  ;;  %v1338_v56 = vpop.f32.mrb[11].mxu1 }
 0x10b   :  { %v1339_v57 = vadd.f32 %v1338_v56, %v1337_v52 }
 0x10c   :  { %v639_v58 = vadd.f32 %v1275_v55, %v1772_v14  ;;  %v1788_v59 = vadd.f32 %v1336_v51, %v636_v54 }
 0x10e   :  { %v1276_v60 = vpop.f32.mrb[12].mxu0  ;;  %v1790_v61 = vadd.f32 %v1339_v57, %v639_v58 }
 0x10f   :  { %v1340_v62 = vpop.f32.mrb[12].mxu1  ;;  %v1277_v63 = vpop.f32.mrb[13].mxu0 }
 0x110   :  { %v1278_v0 = vadd.f32 %v1277_v63, %v1276_v60  ;;  %v1341_v1 = vpop.f32.mrb[13].mxu1  ;;  %v1279_v2 = vpop.f32.mrb[14].mxu0 }
 0x111   :  { %v1342_v3 = vadd.f32 %v1341_v1, %v1340_v62  ;;  %v1343_v4 = vpop.f32.mrb[14].mxu1  ;;  %v1280_v5 = vpop.f32.mrb[15].mxu0 }
 0x112   :  { %v644_v6 = vadd.f32 %v1278_v0, %v1772_v14  ;;  %v1281_v7 = vadd.f32 %v1280_v5, %v1279_v2  ;;  %v1344_v8 = vpop.f32.mrb[15].mxu1 }
 0x113   :  { %v1345_v9 = vadd.f32 %v1344_v8, %v1343_v4 }
 0x114   :  { %v647_v10 = vadd.f32 %v1281_v7, %v1772_v14  ;;  %v1794_v11 = vadd.f32 %v1342_v3, %v644_v6 }
 0x116   :  { %v1282_v12 = vpop.f32.mrb[16].mxu0  ;;  %v1796_v13 = vadd.f32 %v1345_v9, %v647_v10 }
 0x117   :  { %v1346_v15 = vpop.f32.mrb[16].mxu1  ;;  %v1283_v16 = vpop.f32.mrb[17].mxu0 }
 0x118   :  { %v1284_v17 = vadd.f32 %v1283_v16, %v1282_v12  ;;  %v1347_v18 = vpop.f32.mrb[17].mxu1  ;;  %v1285_v19 = vpop.f32.mrb[18].mxu0 }
 0x119   :  { %v1348_v20 = vadd.f32 %v1347_v18, %v1346_v15  ;;  %v1349_v21 = vpop.f32.mrb[18].mxu1  ;;  %v1286_v22 = vpop.f32.mrb[19].mxu0 }
 0x11a   :  { %v652_v23 = vadd.f32 %v1284_v17, %v1772_v14  ;;  %v1287_v24 = vadd.f32 %v1286_v22, %v1285_v19  ;;  %v1350_v25 = vpop.f32.mrb[19].mxu1 }
 0x11b   :  { %v1351_v26 = vadd.f32 %v1350_v25, %v1349_v21 }
 0x11c   :  { %v655_v28 = vadd.f32 %v1287_v24, %v1772_v14  ;;  %v749_v30 = vadd.f32 %v1348_v20, %v652_v23 }
 0x11e   :  { %v1288_v31 = vpop.f32.mrb[20].mxu0  ;;  %v1800_v32 = vadd.f32 %v1351_v26, %v655_v28 }
 0x11f   :  { %v1352_v33 = vpop.f32.mrb[20].mxu1  ;;  %v1289_v34 = vpop.f32.mrb[21].mxu0 }
 0x120   :  { %v1290_v35 = vadd.f32 %v1289_v34, %v1288_v31  ;;  %v1353_v36 = vpop.f32.mrb[21].mxu1  ;;  %v1291_v37 = vpop.f32.mrb[22].mxu0 }
 0x121   :  { %v1354_v38 = vadd.f32 %v1353_v36, %v1352_v33  ;;  %v1355_v39 = vpop.f32.mrb[22].mxu1  ;;  %v1292_v40 = vpop.f32.mrb[23].mxu0 }
 0x122   :  { %v660_v41 = vadd.f32 %v1290_v35, %v1772_v14  ;;  %v1293_v42 = vadd.f32 %v1292_v40, %v1291_v37  ;;  %v1356_v44 = vpop.f32.mrb[23].mxu1 }
 0x123   :  { %v1357_v46 = vadd.f32 %v1356_v44, %v1355_v39 }
 0x124   :  { %v663_v47 = vadd.f32 %v1293_v42, %v1772_v14  ;;  %v757_v48 = vadd.f32 %v1354_v38, %v660_v41 }
 0x126   :  { %v1294_v49 = vpop.f32.mrb[24].mxu0  ;;  %v760_v50 = vadd.f32 %v1357_v46, %v663_v47 }
 0x127   :  { %v1358_v51 = vpop.f32.mrb[24].mxu1  ;;  %v1295_v52 = vpop.f32.mrb[25].mxu0 }
 0x128   :  { %v1296_v53 = vadd.f32 %v1295_v52, %v1294_v49  ;;  %v1359_v54 = vpop.f32.mrb[25].mxu1  ;;  %v1297_v55 = vpop.f32.mrb[26].mxu0 }
 0x129   :  { %v1360_v56 = vadd.f32 %v1359_v54, %v1358_v51  ;;  %v1361_v57 = vpop.f32.mrb[26].mxu1  ;;  %v1298_v58 = vpop.f32.mrb[27].mxu0 }
 0x12a   :  { %v668_v60 = vadd.f32 %v1296_v53, %v1772_v14  ;;  %v1299_v62 = vadd.f32 %v1298_v58, %v1297_v55  ;;  %v1362_v63 = vpop.f32.mrb[27].mxu1 }
 0x12b   :  { %v1363_v0 = vadd.f32 %v1362_v63, %v1361_v57 }
 0x12c   :  { %v671_v1 = vadd.f32 %v1299_v62, %v1772_v14  ;;  %v1806_v2 = vadd.f32 %v1360_v56, %v668_v60 }
 0x12e   :  { %v1300_v3 = vpop.f32.mrb[28].mxu0  ;;  %v1808_v4 = vadd.f32 %v1363_v0, %v671_v1 }
 0x12f   :  { %v1364_v5 = vpop.f32.mrb[28].mxu1  ;;  %v1301_v6 = vpop.f32.mrb[29].mxu0 }
 0x130   :  { %v1302_v7 = vadd.f32 %v1301_v6, %v1300_v3  ;;  %v1365_v8 = vpop.f32.mrb[29].mxu1  ;;  %v1303_v9 = vpop.f32.mrb[30].mxu0 }
 0x131   :  { %v1366_v10 = vadd.f32 %v1365_v8, %v1364_v5  ;;  %v1367_v12 = vpop.f32.mrb[30].mxu1  ;;  %v1304_v15 = vpop.f32.mrb[31].mxu0 }
 0x132   :  { %v676_v16 = vadd.f32 %v1302_v7, %v1772_v14  ;;  %v1305_v17 = vadd.f32 %v1304_v15, %v1303_v9  ;;  %v1368_v18 = vpop.f32.mrb[31].mxu1 }
 0x133   :  { %v1369_v19 = vadd.f32 %v1368_v18, %v1367_v12 }
 0x134   :  { %v679_v20 = vadd.f32 %v1305_v17, %v1772_v14  ;;  %v773_v21 = vadd.f32 %v1366_v10, %v676_v16 }
 0x136   :  { %v1392_v22 = vpop.f32.mrb[32].mxu0  ;;  %v1812_v23 = vadd.f32 %v1369_v19, %v679_v20 }
 0x137   :  { %v822_v24 = vadd.f32 %v1392_v22, %v1782_v43  ;;  %v1400_v25 = vpop.f32.mrb[32].mxu1  ;;  %v813_v26 = vpop.f32.mrb[33].mxu0 }
 0x138   :  { %v854_v28 = vadd.f32 %v1400_v25, %v757_v48  ;;  %v1816_v31 = vadd.f32 %v813_v26, %v1776_v27  ;;  %v845_v33 = vpop.f32.mrb[33].mxu1  ;;  %v1393_v34 = vpop.f32.mrb[34].mxu0 }
 0x139   :  { %v878_v35 = vmax.f32 %v822_v24, 0.0  ;;  %v1818_v36 = vadd.f32 %v845_v33, %v749_v30  ;;  %v825_v37 = vadd.f32 %v1393_v34, %v1784_v45  ;;  %v1401_v14 = vpop.f32.mrb[34].mxu1  ;;  %v816_v38 = vpop.f32.mrb[35].mxu0  ;;  %v1228_v39 = vpack.c.bf16 %v822_v24, %v822_v24 }
 0x13a   :  { %v886_v40 = vmax.f32 %v854_v28, 0.0  ;;  %v876_v43 = vmax.f32 %v1816_v31, 0.0  ;;  %v857_v41 = vadd.f32 %v1401_v14, %v760_v50  ;;  %v848_v42 = vpop.f32.mrb[35].mxu1  ;;  %v1829_v50 = vadd.f32 %v816_v38, %v1778_v29 }
 0x13b   :  { %v1212_v44 = vpack.c.bf16 %v878_v35, %v878_v35  ;;  %v884_v27 = vmax.f32 %v1818_v36, 0.0  ;;  %v879_v46 = vmax.f32 %v825_v37, 0.0  ;;  %1025 = vrot.lane.b32.xlu1 %v1228_v39, %s1507_s0  ;;  %v1229_v51 = vpack.c.bf16 %v825_v37, %v825_v37 }
 0x13c   :  { %v1220_v30 = vpack.c.bf16 %v886_v40, %v886_v40  ;;  %v1210_v47 = vpack.c.bf16 %v876_v43, %v876_v43  ;;  %v887_v48 = vmax.f32 %v857_v41, 0.0  ;;  %v849_v53 = vadd.f32 %v848_v42, %v1800_v32 }
 0x13d   :  { %959 = vst.msk [vmem:[%s1993_s3 + $0x8] sm:$0xf] %vm956_vm1, %v1212_v44  ;;  %v1218_v45 = vpack.c.bf16 %v884_v27, %v884_v27  ;;  %v1213_v49 = vpack.c.bf16 %v879_v46, %v879_v46  ;;  %v1236_v54 = vpack.c.bf16 %v854_v28, %v854_v28  ;;  %v877_v29 = vmax.f32 %v1829_v50, 0.0 }
 0x13e   :  { %967 = vst.msk [vmem:[%s1993_s3 + $0x28] sm:$0xf] %vm956_vm1, %v1220_v30  ;;  %957 = vst.msk [vmem:[%s1993_s3] sm:$0xf] %vm956_vm1, %v1210_v47  ;;  %v1221_v52 = vpack.c.bf16 %v887_v48, %v887_v48  ;;  %v1396_v55 = vpop.f32.mrb[36].mxu0  ;;  %v885_v32 = vmax.f32 %v849_v53, 0.0  ;;  %v1237_v1 = vpack.c.bf16 %v857_v41, %v857_v41  ;;  %v1226_v8 = vpack.c.bf16 %v1816_v31, %v1816_v31 }
 0x13f   :  { %965 = vst.msk [vmem:[%s1993_s3 + $0x20] sm:$0xf] %vm956_vm1, %v1218_v45  ;;  %960 = vst.msk [vmem:[%s1993_s3 + $0xc] sm:$0xf] %vm956_vm1, %v1213_v49  ;;  %v838_v56 = vadd.f32 %v1396_v55, %v1794_v11  ;;  %v1404_v57 = vpop.f32.mrb[36].mxu1  ;;  %v829_v58 = vpop.f32.mrb[37].mxu0  ;;  %1027 = vrot.lane.b32.xlu1 %v1229_v51, %s1507_s0  ;;  %1041 = vrot.lane.b32.xlu0 %v1236_v54, %s1507_s0  ;;  %v1211_v11 = vpack.c.bf16 %v877_v29, %v877_v29 }
 0x140   :  { %968 = vst.msk [vmem:[%s1993_s3 + $0x2c] sm:$0xf] %vm956_vm1, %v1221_v52  ;;  %v1856_v60 = vadd.f32 %v1404_v57, %v773_v21  ;;  %v830_v62 = vadd.f32 %v829_v58, %v1788_v59  ;;  %v861_v63 = vpop.f32.mrb[37].mxu1  ;;  %v1397_v0 = vpop.f32.mrb[38].mxu0  ;;  %v1219_v9 = vpack.c.bf16 %v885_v32, %v885_v32  ;;  %v1235_v20 = vpack.c.bf16 %v849_v53, %v849_v53 }
 0x141   :  { %v882_v3 = vmax.f32 %v838_v56, 0.0  ;;  %v862_v5 = vadd.f32 %v861_v63, %v1806_v2  ;;  %v1405_v6 = vpop.f32.mrb[38].mxu1  ;;  %v832_v7 = vpop.f32.mrb[39].mxu0  ;;  %958 = vst.msk [vmem:[%s1993_s3 + $0x4] sm:$0xf] %vm956_vm1, %v1211_v11  ;;  %v841_v18 = vadd.f32 %v1397_v0, %v1796_v13  ;;  %v1234_v25 = vpack.c.bf16 %v1818_v36, %v1818_v36 }
 0x142   :  { %v890_v10 = vmax.f32 %v1856_v60, 0.0  ;;  %v880_v12 = vmax.f32 %v830_v62, 0.0  ;;  %v864_v15 = vpop.f32.mrb[39].mxu1  ;;  %966 = vst.msk [vmem:[%s1993_s3 + $0x24] sm:$0xf] %vm956_vm1, %v1219_v9  ;;  %v873_v19 = vadd.f32 %v1405_v6, %v1812_v23  ;;  %v833_v22 = vadd.f32 %v832_v7, %v1790_v61 }
 0x143   :  { %v1216_v59 = vpack.c.bf16 %v882_v3, %v882_v3  ;;  %v888_v16 = vmax.f32 %v862_v5, 0.0  ;;  %1043 = vrot.lane.b32.xlu1 %v1237_v1, %s1507_s0  ;;  %1021 = vrot.lane.b32.xlu0 %v1226_v8, %s1507_s0  ;;  %v865_v24 = vadd.f32 %v864_v15, %v1808_v4  ;;  %v883_v13 = vmax.f32 %v841_v18, 0.0 }
 0x144   :  { %v1224_v2 = vpack.c.bf16 %v890_v10, %v890_v10  ;;  %v1214_v17 = vpack.c.bf16 %v880_v12, %v880_v12  ;;  %v891_v23 = vmax.f32 %v873_v19, 0.0  ;;  %v881_v61 = vmax.f32 %v833_v22, 0.0 }
 0x145   :  { %963 = vst.msk [vmem:[%s1993_s3 + $0x18] sm:$0xf] %vm956_vm1, %v1216_v59  ;;  %v1222_v21 = vpack.c.bf16 %v888_v16, %v888_v16  ;;  %v889_v4 = vmax.f32 %v865_v24, 0.0  ;;  %v1217_v26 = vpack.c.bf16 %v883_v13, %v883_v13  ;;  %v1233_v31 = vpack.c.bf16 %v841_v18, %v841_v18 }
 0x146   :  { %971 = vst.msk [vmem:[%s1993_s3 + $0x38] sm:$0xf] %vm956_vm1, %v1224_v2  ;;  %961 = vst.msk [vmem:[%s1993_s3 + $0x10] sm:$0xf] %vm956_vm1, %v1214_v17  ;;  %v1225_v28 = vpack.c.bf16 %v891_v23, %v891_v23  ;;  %v1215_v33 = vpack.c.bf16 %v881_v61, %v881_v61  ;;  %v1227_v35 = vpack.c.bf16 %v1829_v50, %v1829_v50 }
 0x147   :  { %969 = vst.msk [vmem:[%s1993_s3 + $0x30] sm:$0xf] %vm956_vm1, %v1222_v21  ;;  %1039 = vrot.lane.b32.xlu1 %v1235_v20, %s1507_s0  ;;  %1037 = vrot.lane.b32.xlu0 %v1234_v25, %s1507_s0  ;;  %v1223_v34 = vpack.c.bf16 %v889_v4, %v889_v4  ;;  %964 = vst.msk [vmem:[%s1993_s3 + $0x1c] sm:$0xf] %vm956_vm1, %v1217_v26  ;;  %v1231_v36 = vpack.c.bf16 %v833_v22, %v833_v22 }
 0x148   :  { %972 = vst.msk [vmem:[%s1993_s3 + $0x3c] sm:$0xf] %vm956_vm1, %v1225_v28  ;;  %962 = vst.msk [vmem:[%s1993_s3 + $0x14] sm:$0xf] %vm956_vm1, %v1215_v33  ;;  %v1232_v37 = vpack.c.bf16 %v838_v56, %v838_v56  ;;  %v1239_v14 = vpack.c.bf16 %v865_v24, %v865_v24  ;;  %v1230_v38 = vpack.c.bf16 %v830_v62, %v830_v62 }
 0x149   :  { %970 = vst.msk [vmem:[%s1993_s3 + $0x34] sm:$0xf] %vm956_vm1, %v1223_v34  ;;  %v1241_v39 = vpack.c.bf16 %v873_v19, %v873_v19  ;;  %v1238_v40 = vpack.c.bf16 %v862_v5, %v862_v5  ;;  %v1240_v43 = vpack.c.bf16 %v1856_v60, %v1856_v60 }
 0x14b   :  { %1035 = vrot.lane.b32.xlu1 %v1233_v31, %s1507_s0  ;;  %1023 = vrot.lane.b32.xlu0 %v1227_v35, %s1507_s0 }
 0x14f   :  { %1031 = vrot.lane.b32.xlu1 %v1231_v36, %s1507_s0  ;;  %1033 = vrot.lane.b32.xlu0 %v1232_v37, %s1507_s0 }
 0x153   :  { %1047 = vrot.lane.b32.xlu1 %v1239_v14, %s1507_s0  ;;  %1029 = vrot.lane.b32.xlu0 %v1230_v38, %s1507_s0 }
 0x157   :  { %1051 = vrot.lane.b32.xlu1 %v1241_v39, %s1507_s0  ;;  %1045 = vrot.lane.b32.xlu0 %v1238_v40, %s1507_s0 }
 0x15b   :  { %1049 = vrot.lane.b32.xlu0 %v1240_v43, %s1507_s0 }
 0x1ad   :  { %v1026_v41 = vpop.permute.xlu1 %1025 }
 0x1ae   :  { %1071 = vst.msk [vmem:[%s1994_s4 + $0x8] sm:$0xf] %vm956_vm1, %v1026_v41 }
 0x1b1   :  { %v1028_v42 = vpop.permute.xlu1 %1027  ;;  %v1042_v44 = vpop.permute.xlu0 %1041 }
 0x1b2   :  { %1072 = vst.msk [vmem:[%s1994_s4 + $0xc] sm:$0xf] %vm956_vm1, %v1028_v42  ;;  %1079 = vst.msk [vmem:[%s1994_s4 + $0x28] sm:$0xf] %vm956_vm1, %v1042_v44 }
 0x1b5   :  { %v1044_v27 = vpop.permute.xlu1 %1043  ;;  %v1022_v46 = vpop.permute.xlu0 %1021 }
 0x1b6   :  { %1080 = vst.msk [vmem:[%s1994_s4 + $0x2c] sm:$0xf] %vm956_vm1, %v1044_v27  ;;  %1069 = vst.msk [vmem:[%s1994_s4] sm:$0xf] %vm956_vm1, %v1022_v46 }
 0x1b9   :  { %v1040_v30 = vpop.permute.xlu1 %1039  ;;  %v1038_v47 = vpop.permute.xlu0 %1037 }
 0x1ba   :  { %1078 = vst.msk [vmem:[%s1994_s4 + $0x24] sm:$0xf] %vm956_vm1, %v1040_v30  ;;  %1077 = vst.msk [vmem:[%s1994_s4 + $0x20] sm:$0xf] %vm956_vm1, %v1038_v47 }
 0x1bd   :  { %v1036_v48 = vpop.permute.xlu1 %1035  ;;  %v1024_v45 = vpop.permute.xlu0 %1023 }
 0x1be   :  { %1076 = vst.msk [vmem:[%s1994_s4 + $0x1c] sm:$0xf] %vm956_vm1, %v1036_v48  ;;  %1070 = vst.msk [vmem:[%s1994_s4 + $0x4] sm:$0xf] %vm956_vm1, %v1024_v45 }
 0x1c1   :  { %v1032_v49 = vpop.permute.xlu1 %1031  ;;  %v1034_v51 = vpop.permute.xlu0 %1033 }
 0x1c2   :  { %1074 = vst.msk [vmem:[%s1994_s4 + $0x14] sm:$0xf] %vm956_vm1, %v1032_v49  ;;  %1075 = vst.msk [vmem:[%s1994_s4 + $0x18] sm:$0xf] %vm956_vm1, %v1034_v51 }
 0x1c5   :  { %v1048_v50 = vpop.permute.xlu1 %1047  ;;  %v1030_v52 = vpop.permute.xlu0 %1029 }
 0x1c6   :  { %1082 = vst.msk [vmem:[%s1994_s4 + $0x34] sm:$0xf] %vm956_vm1, %v1048_v50  ;;  %1073 = vst.msk [vmem:[%s1994_s4 + $0x10] sm:$0xf] %vm956_vm1, %v1030_v52 }
 0x1c9   :  { %v1052_v53 = vpop.permute.xlu1 %1051  ;;  %v1046_v54 = vpop.permute.xlu0 %1045 }
 0x1ca   :  { %1084 = vst.msk [vmem:[%s1994_s4 + $0x3c] sm:$0xf] %vm956_vm1, %v1052_v53  ;;  %1081 = vst.msk [vmem:[%s1994_s4 + $0x30] sm:$0xf] %vm956_vm1, %v1046_v54 }
 0x1cd   :  { %v1050_v55 = vpop.permute.xlu0 %1049 }
 0x1ce   :  { %1083 = vst.msk [vmem:[%s1994_s4 + $0x38] sm:$0xf] %vm956_vm1, %v1050_v55 }

// kernel: _lambda_.20
= control target key start
LH: loop header
LB: loop body
LE: loop exit
PB: predicated region body
PF: predicated region fallthrough
CT: control target
= control target key end

     0   :  { %s2500_s18 = smov 0   ;;  %s2502_s19 = smov 0   ;;  %s2938_s0 = inlined_call_operand.vmem [shape: bf16[2,10,10,64], index: 0, kind: input, shape index: {}, may-alias: {0,1}]   ;;  %s2939_s1 = inlined_call_operand.vmem [shape: bf16[2,10,10,64], index: 1, kind: input, shape index: {}, may-alias: {0,1}]   ;;  %s2940_s2 = inlined_call_operand.vmem [shape: bf16[9,64,64], index: 2, kind: input, shape index: {}]   ;;  %s2941_s3 = inlined_call_operand.vmem [shape: f32[1,64], index: 3, kind: input, shape index: {}]   ;;  %s2942_s4 = inlined_call_operand.vmem [shape: bf16[2,8,8,64], index: 4, kind: input, shape index: {}]   ;;  %s2943_s5 = inlined_call_operand.vmem [shape: bf16[2,8,8,64], index: 5, kind: output, shape index: {}]  }
   0x1   :  { %s2504_s20 = smov 0  }
   0x2 LB: > { %s27_s21 = sadd.s32 1, %s2464_s19  ;;  %p1881_p0 = scmp.ge.s32.totalorder %s2468_s20, 1  ;;  %s2468_s20 = sphi %s2504_s20, %s15_s20   ;;  %s2464_s19 = sphi %s2502_s19, %s2949_s19   ;;  %s2460_s18 = sphi %s2500_s18, %s2948_s18  }
   0x3   : > { %p29_p1 = scmp.ge.s32.totalorder %s27_s21, 2  ;;  %p262_p2 = scmp.lt.s32.totalorder %s2468_s20, 3 }
   0x5   : > { %s2951_s21 = smov (%p29_p1, %s27_s21), 0  ;;  %p263_p3 = pnand %p1881_p0, %p262_p2 }
   0x6   : > { %v2402_v0 = vld [vmem:[%s2940_s2 + $0x20] sm:$0xff] (!%p263_p3)   ;;  %p331_p4 = scmp.lt.s32.totalorder (!%p263_p3), %s2460_s18, 1  ;;  %v2404_v2 = vld [vmem:[%s2940_s2 + $0x28] sm:$0xff] (!%p263_p3)   ;;  %v2406_v4 = vld [vmem:[%s2940_s2 + $0x30] sm:$0xff] (!%p263_p3)   ;;  %vm410_vm0 = vsmask.f32 (!%p263_p3), 3328 }
   0x7   : > { %266 = sbr.rel (%p263_p3) target bundleno = 330 (0x14a), region = 40  ;;  %v2403_v1 = vld [vmem:[%s2940_s2 + $0x80] sm:$0xff] (!%p263_p3)   ;;  %2159 = vmatprep.subr.bf16.mxu1 (!%p263_p3), %v2402_v0  ;;  %v2405_v3 = vld [vmem:[%s2940_s2 + $0x88] sm:$0xff] (!%p263_p3)   ;;  %v2407_v5 = vld [vmem:[%s2940_s2 + $0x90] sm:$0xff] (!%p263_p3)   ;;  %vm411_vm1 = vsmask.f32 (!%p263_p3), 7440 }
   0x8   : > { %2223 = vmatprep.subr.bf16.mxu0 (!%p263_p3), %v2403_v1  ;;  %2160 = vmatpush3.bf16.msra.mxu1 (!%p263_p3), %v2402_v0  ;;  %v2408_v6 = vld [vmem:[%s2940_s2 + $0x38] sm:$0xff] (!%p263_p3)   ;;  %v2573_v22 = vld [vmem:[%s2940_s2] sm:$0xff] (!%p263_p3)   ;;  %vm2597_vm2 = vmor (!%p263_p3), %vm410_vm0, %vm411_vm1  ;;  %vm570_vm3 = vcmask (!%p263_p3), 523264   ;;  %vm777_vm4 = vcmask (!%p263_p3), 1042432   ;;  %vm778_vm5 = vcmask (!%p263_p3), 1046532   ;;  %vm1739_vm7 = vcmask (!%p263_p3), 519168  }
   0x9   : > { %2224 = vmatpush3.bf16.msra.mxu0 (!%p263_p3), %v2403_v1  ;;  %2161 = vmatprep.subr.bf16.mxu1 (!%p263_p3), %v2404_v2  ;;  %v2409_v10 = vld [vmem:[%s2940_s2 + $0x98] sm:$0xff] (!%p263_p3)   ;;  %v2578_v23 = vld [vmem:[%s2940_s2 + $0xa0] sm:$0xff] (!%p263_p3)   ;;  %vm2701_vm6 = vmor (!%p263_p3), %vm777_vm4, %vm778_vm5 }
   0xa   : > { %2225 = vmatprep.subr.bf16.mxu0 (!%p263_p3), %v2405_v3  ;;  %v2445_v32 = vld [vmem:[%s2940_s2 + $0x118] sm:$0xff] (!%p263_p3)  }
   0xc   : > { %2162 = vmatpush3.bf16.msra.mxu1 (!%p263_p3), %v2404_v2 }
   0xd   : > { %2226 = vmatpush3.bf16.msra.mxu0 (!%p263_p3), %v2405_v3  ;;  %2163 = vmatprep.subr.bf16.mxu1 (!%p263_p3), %v2406_v4 }
   0xe   : > { %s2953_s18 = smov (!%p331_p4, %s2460_s18), 1  ;;  %2227 = vmatprep.subr.bf16.mxu0 %v2407_v5 }
   0xf   : > { %s2375_s7 = smul.u32 80, %s2953_s18  ;;  %s2066_s15 = sshll.u32 %s2953_s18, 5 }
  0x10   : > { %2164 = vmatpush3.bf16.msra.mxu1 %v2406_v4  ;;  %s369_s22 = scalar_lea.vmem %s2942_s4, %s2066_s15  ;;  %s379_s27 = scalar_lea.vmem %s2943_s5, %s2066_s15 }
  0x11   : > { %s2544_s12 = scalar_lea.vmem %s2938_s0, %s2375_s7  ;;  %2228 = vmatpush3.bf16.msra.mxu0 %v2407_v5  ;;  %2165 = vmatprep.subr.bf16.mxu1 %v2408_v6  ;;  %s2065_s25 = sadd.s32 64, %s2375_s7 }
  0x12   : > { %v2550_v7 = vld [vmem:[%s2544_s12] sm:$0xf]  ;;  %v2553_v8 = vld [vmem:[%s2544_s12 + $0x4] sm:$0x1]  ;;  %v2556_v9 = vld [vmem:[%s2544_s12 + $0x8] sm:$0xf]  ;;  %2229 = vmatprep.subr.bf16.mxu0 %v2409_v10  ;;  %s2645_s28 = scalar_lea.vmem %s2939_s1, %s2065_s25 }
  0x13   : > { %v2562_v11 = vld [vmem:[%s2544_s12 + $0xc] sm:$0x1]  ;;  %v414_v12 = vshrl.u32 %v2550_v7, 16  ;;  %v417_v13 = vshll.u32 %v2550_v7, 16  ;;  %v423_v14 = vshll.u32 %v2553_v8, 16  ;;  %v428_v15 = vshrl.u32 %v2556_v9, 16 }
  0x14   : > { %v431_v16 = vshll.u32 %v2556_v9, 16  ;;  %v437_v17 = vshll.u32 %v2562_v11, 16  ;;  %v2581_v26 = vld [vmem:[%s2544_s12 + $0x10] sm:$0xf]  ;;  %v2584_v27 = vld [vmem:[%s2544_s12 + $0x14] sm:$0x1]  ;;  %2166 = vmatpush3.bf16.msra.mxu1 %v2408_v6 }
  0x15   : > { %v416_v18 = vrot.slane %v414_v12, 4  ;;  %v419_v19 = vrot.slane %v417_v13, 5  ;;  %v425_v20 = vrot.slane %v423_v14, 5  ;;  %v430_v21 = vrot.slane %v428_v15, 4  ;;  %v2587_v29 = vld [vmem:[%s2544_s12 + $0x18] sm:$0xf]  ;;  %2230 = vmatpush3.bf16.msra.mxu0 %v2409_v10  ;;  %2175 = vmatprep.subr.bf16.mxu1 %v2573_v22 }
  0x16   : > { %v433_v24 = vrot.slane %v431_v16, 5  ;;  %v439_v25 = vrot.slane %v437_v17, 5  ;;  %v2590_v30 = vld [vmem:[%s2544_s12 + $0x1c] sm:$0x1]  ;;  %v2593_v31 = vld [vmem:[%s2544_s12 + $0x20] sm:$0xf]  ;;  %2239 = vmatprep.subr.bf16.mxu0 %v2578_v23 }
  0x17   : > { %v420_v28 = vor.u32 %v419_v19, %v416_v18  ;;  %v2602_v34 = vld [vmem:[%s2544_s12 + $0x24] sm:$0x1]  ;;  %v442_v35 = vshrl.u32 %v2581_v26, 16  ;;  %v445_v36 = vshll.u32 %v2581_v26, 16  ;;  %v451_v37 = vshll.u32 %v2584_v27, 16  ;;  %v2412_v18 = vld [vmem:[%s2940_s2 + $0x8] sm:$0xff]  }
  0x18   : > { %v434_v33 = vor.u32 %v433_v24, %v430_v21  ;;  %v456_v39 = vshrl.u32 %v2587_v29, 16  ;;  %v459_v40 = vshll.u32 %v2587_v29, 16  ;;  %v465_v41 = vshll.u32 %v2590_v30, 16  ;;  %v2620_v57 = vld [vmem:[%s2544_s12 + $0x28] sm:$0xf] }
  0x19   : > { %v421_v38 = vrot.slane %v420_v28, 4  ;;  %v444_v43 = vrot.slane %v442_v35, 4  ;;  %v447_v44 = vrot.slane %v445_v36, 5  ;;  %v453_v46 = vrot.slane %v451_v37, 5  ;;  %v2623_v61 = vld [vmem:[%s2544_s12 + $0x2c] sm:$0x1] }
  0x1a   : > { %v435_v42 = vrot.slane %v434_v33, 4  ;;  %v458_v47 = vrot.slane %v456_v39, 4  ;;  %v461_v48 = vrot.slane %v459_v40, 5  ;;  %v470_v51 = vshrl.u32 %v2593_v31, 16  ;;  %v2637_v13 = vld [vmem:[%s2544_s12 + $0x30] sm:$0xf] }
  0x1b   : > { %v426_v45 = vsel %vm2597_vm2, %v421_v38, %v425_v20  ;;  %v448_v50 = vor.u32 %v447_v44, %v444_v43  ;;  %v473_v52 = vshll.u32 %v2593_v31, 16  ;;  %v467_v55 = vrot.slane %v465_v41, 5  ;;  %v2640_v14 = vld [vmem:[%s2544_s12 + $0x34] sm:$0x1]  ;;  %v2413_v20 = vld [vmem:[%s2940_s2 + $0xa8] sm:$0xff]  }
  0x1c   : > { %v440_v49 = vsel %vm2597_vm2, %v435_v42, %v439_v25  ;;  %v462_v54 = vor.u32 %v461_v48, %v458_v47  ;;  %v479_v56 = vshll.u32 %v2602_v34, 16  ;;  %v472_v59 = vrot.slane %v470_v51, 4  ;;  %v2665_v36 = vld [vmem:[%s2544_s12 + $0x38] sm:$0xf]  ;;  %v2668_v37 = vld [vmem:[%s2544_s12 + $0x3c] sm:$0x1] }
  0x1d   : > { %v1896_v53 = vcombine.low %v426_v45, %v440_v49  ;;  %v449_v58 = vrot.slane %v448_v50, 4  ;;  %v475_v60 = vrot.slane %v473_v52, 5  ;;  %v484_v0 = vshrl.u32 %v2620_v57, 16  ;;  %v2671_v38 = vld [vmem:[%s2645_s28] sm:$0xf]  ;;  %v2414_v40 = vld [vmem:[%s2940_s2 + $0x10] sm:$0xff]  }
  0x1e   : > { %v463_v62 = vrot.slane %v462_v54, 4  ;;  %v481_v63 = vrot.slane %v479_v56, 5  ;;  %v487_v3 = vshll.u32 %v2620_v57, 16  ;;  %v493_v4 = vshll.u32 %v2623_v61, 16  ;;  %v2678_v44 = vld [vmem:[%s2645_s28 + $0x4] sm:$0x1] }
  0x1f   : > { %2167 = vmatprep.mubr.msk.bf16.mxu1 %vm570_vm3, %v1896_v53  ;;  %v454_v1 = vsel %vm2597_vm2, %v449_v58, %v453_v46  ;;  %v476_v2 = vor.u32 %v475_v60, %v472_v59  ;;  %v786_v5 = vrot.slane %v2562_v11, 5  ;;  %v486_v12 = vrot.slane %v484_v0, 4  ;;  %v2415_v54 = vld [vmem:[%s2940_s2 + $0xb0] sm:$0xff]  }
  0x20   : > { %v468_v6 = vsel %vm2597_vm2, %v463_v62, %v467_v55  ;;  %v1976_v10 = vcombine.low %v440_v49, %v454_v1  ;;  %v790_v17 = vrot.slane %v2584_v27, 5  ;;  %v489_v19 = vrot.slane %v487_v3, 5 }
  0x21   : > { %v477_v15 = vrot.slane %v476_v2, 4  ;;  %v2647_v16 = vcombine.low %v454_v1, %v468_v6  ;;  %v495_v21 = vrot.slane %v493_v4, 5  ;;  %v498_v24 = vshrl.u32 %v2637_v13, 16 }
  0x22   : > { %2231 = vmatprep.mubr.msk.bf16.mxu0 %vm570_vm3, %v1976_v10  ;;  %v501_v25 = vshll.u32 %v2637_v13, 16  ;;  %v507_v28 = vshll.u32 %v2640_v14, 16  ;;  %v490_v35 = vor.u32 %v489_v19, %v486_v12  ;;  %v512_v46 = vshrl.u32 %v2665_v36, 16 }
  0x23   : > { %v482_v33 = vsel %vm2597_vm2, %v477_v15, %v481_v63  ;;  %2168 = vmatmul.mubr.msk.bf16.vlgmr.msra.gmra.mrb[0].mxu1 %vm570_vm3, %v2647_v16  ;;  %v500_v41 = vrot.slane %v498_v24, 4  ;;  %v515_v47 = vshll.u32 %v2665_v36, 16  ;;  %v521_v48 = vshll.u32 %v2668_v37, 16  ;;  %v2417_v15 = vld [vmem:[%s2940_s2 + $0xb8] sm:$0xff]  }
  0x24   : > { %v1977_v39 = vcombine.low %v468_v6, %v482_v33  ;;  %2176 = vmatpush3.bf16.msra.mxu1 %v2573_v22  ;;  %v503_v42 = vrot.slane %v501_v25, 5  ;;  %v509_v43 = vrot.slane %v507_v28, 5  ;;  %v491_v45 = vrot.slane %v490_v35, 4 }
  0x25   : > { %2177 = vmatprep.subr.bf16.mxu1 %v2412_v18  ;;  %v1067_v49 = vshrl.u32 %v2671_v38, 16  ;;  %v1070_v50 = vshll.u32 %v2671_v38, 16  ;;  %v1076_v51 = vshll.u32 %v2678_v44, 16  ;;  %v794_v52 = vrot.slane %v2590_v30, 5 }
  0x26   : > { %2232 = vmatmul.mubr.msk.bf16.vlgmr.msra.gmra.mrb[0].mxu0 %vm570_vm3, %v1977_v39  ;;  %v504_v22 = vor.u32 %v503_v42, %v500_v41  ;;  %v496_v53 = vsel %vm2597_vm2, %v491_v45, %v495_v21  ;;  %v514_v55 = vrot.slane %v512_v46, 4  ;;  %v517_v56 = vrot.slane %v515_v47, 5  ;;  %v2420_v39 = vld [vmem:[%s2940_s2 + $0xc0] sm:$0xff]  }
  0x27   : > { %2240 = vmatpush3.bf16.msra.mxu0 %v2578_v23  ;;  %v2694_v58 = vcombine.low %v482_v33, %v496_v53  ;;  %v1069_v60 = vrot.slane %v1067_v49, 4  ;;  %v1072_v62 = vrot.slane %v1070_v50, 5  ;;  %v2416_v23 = vld [vmem:[%s2940_s2 + $0x18] sm:$0xff]   ;;  %v523_v63 = vrot.slane %v521_v48, 5  ;;  %v2422_v48 = vld [vmem:[%s2940_s2 + $0x48] sm:$0xff]  }
  0x28   : > { %2241 = vmatprep.subr.bf16.mxu0 %v2413_v20  ;;  %2178 = vmatpush3.bf16.msra.mxu1 %v2412_v18  ;;  %v505_v59 = vrot.slane %v504_v22, 4  ;;  %v518_v30 = vor.u32 %v517_v56, %v514_v55  ;;  %v1921_v1 = vrot.slane %v2556_v9, 9  ;;  %v1078_v4 = vrot.slane %v1076_v51, 5 }
  0x29   : > { %2179 = vmatprep.subr.bf16.mxu1 %v2414_v40  ;;  %2171 = vmatprep.mubr.msk.bf16.mxu1 %vm570_vm3, %v2694_v58  ;;  %v1073_v3 = vor.u32 %v1072_v62, %v1069_v60  ;;  %v1922_v6 = vrot.slane %v2581_v26, 9  ;;  %v1923_v21 = vrot.slane %v2587_v29, 9  ;;  %v798_v24 = vrot.slane %v2602_v34, 5  ;;  %v2419_v34 = vld [vmem:[%s2940_s2 + $0x40] sm:$0xff]  }
  0x2a   : > { %v510_v2 = vsel %vm2597_vm2, %v505_v59, %v509_v43  ;;  %v519_v12 = vrot.slane %v518_v30, 4  ;;  %v2718_v19 = vsel %vm2701_vm6, %v1921_v1, %v786_v5  ;;  %v1924_v11 = vrot.slane %v2593_v31, 9  ;;  %v2429_v30 = vld [vmem:[%s2940_s2 + $0xd8] sm:$0xff]   ;;  %v2430_v1 = vld [vmem:[%s2940_s2 + $0x60] sm:$0xff]  }
  0x2b   : > { %2242 = vmatpush3.bf16.msra.mxu0 %v2413_v20  ;;  %v1978_v10 = vcombine.low %v496_v53, %v510_v2  ;;  %v1074_v18 = vrot.slane %v1073_v3, 4  ;;  %v2724_v20 = vsel %vm2701_vm6, %v1922_v6, %v790_v17  ;;  %v1908_v17 = vcombine.low %v2550_v7, %v2556_v9  ;;  %v2433_v6 = vld [vmem:[%s2940_s2 + $0xe8] sm:$0xff]  }
  0x2c   : > { %2243 = vmatprep.subr.bf16.mxu0 %v2415_v54  ;;  %2180 = vmatpush3.bf16.msra.mxu1 %v2414_v40  ;;  %v524_v25 = vsel %vm2597_vm2, %v519_v12, %v523_v63  ;;  %v1997_v33 = vcombine.low %v2718_v19, %v2724_v20  ;;  %v795_v35 = vsel %vm2701_vm6, %v1923_v21, %v794_v52  ;;  %v1925_v40 = vrot.slane %v2620_v57, 9  ;;  %v2423_v52 = vld [vmem:[%s2940_s2 + $0xc8] sm:$0xff]  }
  0x2d   : > { %2235 = vmatprep.mubr.msk.bf16.mxu0 %vm570_vm3, %v1978_v10  ;;  %2181 = vmatprep.subr.bf16.mxu1 %v2416_v23  ;;  %v2732_v5 = vcombine.low %v510_v2, %v524_v25  ;;  %v2736_v27 = vsel %vm2597_vm2, %v1074_v18, %v1078_v4  ;;  %v799_v41 = vsel %vm2701_vm6, %v1924_v11, %v798_v24  ;;  %v802_v42 = vrot.slane %v2623_v61, 5  ;;  %v2431_v2 = vld [vmem:[%s2940_s2 + $0xe0] sm:$0xff]   ;;  %v2432_v4 = vld [vmem:[%s2940_s2 + $0x68] sm:$0xff]  }
  0x2e   : > { %v1979_v28 = vcombine.low %v524_v25, %v2736_v27  ;;  %v1926_v43 = vrot.slane %v2637_v13, 9  ;;  %v806_v45 = vrot.slane %v2640_v14, 5  ;;  %v1998_v46 = vcombine.low %v795_v35, %v799_v41  ;;  %v2837_v12 = vld [vmem:[%s2645_s28 + $0x8] sm:$0xf]  ;;  %v2437_v25 = vld [vmem:[%s2940_s2 + $0x78] sm:$0xff]  }
  0x2f   : > { %2244 = vmatpush3.bf16.msra.mxu0 %v2415_v54  ;;  %2172 = vmatmul.mubr.msk.bf16.gmra.mrb[4].mxu1 %vm570_vm3, %v2732_v5  ;;  %v1909_v47 = vcombine.low %v2581_v26, %v2587_v29  ;;  %v803_v61 = vsel %vm2701_vm6, %v1925_v40, %v802_v42  ;;  %v1927_v22 = vrot.slane %v2665_v36, 9  ;;  %v810_v49 = vrot.slane %v2668_v37, 5  ;;  %v2425_v37 = vld [vmem:[%s2940_s2 + $0x50] sm:$0xff]  }
  0x30   : > { %2245 = vmatprep.subr.bf16.mxu0 %v2417_v15  ;;  %2236 = vmatmul.mubr.msk.bf16.gmra.mrb[4].mxu0 %vm570_vm3, %v1979_v28  ;;  %v2771_v14 = vsel %vm2701_vm6, %v1926_v43, %v806_v45  ;;  %v1988_v50 = vrot.slane %v2671_v38, 9  ;;  %v1206_v51 = vrot.slane %v2678_v44, 5  ;;  %v1910_v53 = vcombine.low %v2593_v31, %v2620_v57  ;;  %v2438_v28 = vld [vmem:[%s2940_s2 + $0xf8] sm:$0xff]  }
  0x31   : > { %2182 = vmatpush3.bf16.msra.mxu1 %v2416_v23  ;;  %2183 = vmatprep.mubr.msk.bf16.mxu1 %vm570_vm3, %v1908_v17  ;;  %v782_v54 = vrot.slane %v2553_v8, 5  ;;  %v1999_v55 = vcombine.low %v803_v61, %v2771_v14  ;;  %v1920_v56 = vrot.slane %v2550_v7, 9  ;;  %v811_v44 = vsel %vm2701_vm6, %v1927_v22, %v810_v49  ;;  %v2426_v7 = vld [vmem:[%s2940_s2 + $0xd0] sm:$0xff]   ;;  %v2428_v23 = vld [vmem:[%s2940_s2 + $0x58] sm:$0xff]  }
  0x32   : > { %2191 = vmatprep.subr.bf16.mxu1 %v2419_v34  ;;  %2247 = vmatprep.mubr.msk.bf16.mxu0 %vm570_vm3, %v1997_v33  ;;  %v2794_v8 = vsel %vm2701_vm6, %v1988_v50, %v1206_v51  ;;  %v1911_v59 = vcombine.low %v2637_v13, %v2665_v36  ;;  %v2823_v3 = vcombine.low %v2724_v20, %v795_v35  ;;  %v1444_v18 = vshrl.u32 %v2837_v12, 16  ;;  %v2435_v20 = vld [vmem:[%s2940_s2 + $0xf0] sm:$0xff]   ;;  %v2440_v35 = vld [vmem:[%s2940_s2 + $0x100] sm:$0xff]  }
  0x33   : > { %2246 = vmatpush3.bf16.msra.mxu0 %v2417_v15  ;;  %v783_v60 = vsel %vm2701_vm6, %v1920_v56, %v782_v54  ;;  %v2000_v62 = vcombine.low %v811_v44, %v2794_v8  ;;  %v2832_v10 = vcombine.low %v799_v41, %v803_v61  ;;  %v2434_v15 = vld [vmem:[%s2940_s2 + $0x70] sm:$0xff]   ;;  %v1939_v21 = vcombine.low %v2771_v14, %v811_v44  ;;  %v2086_v56 = vld [vmem:[%s369_s22 + $0x18] sm:$0xff]  }
  0x34   : > { %2255 = vmatprep.subr.bf16.mxu0 %v2420_v39  ;;  %v1936_v63 = vcombine.low %v783_v60, %v2718_v19  ;;  %v1447_v19 = vshll.u32 %v2837_v12, 16  ;;  %v2017_v24 = vcombine.low %v2671_v38, %v2837_v12  ;;  %v1446_v11 = vrot.slane %v1444_v18, 4  ;;  %v2085_v44 = vld [vmem:[%s369_s22 + $0x10] sm:$0xff]  }
  0x35   : > { %v1956_v33 = vcombine.low %v2556_v9, %v2581_v26  ;;  %v1957_v9 = vcombine.low %v2587_v29, %v2593_v31  ;;  %v2442_v26 = vld [vmem:[%s2940_s2 + $0x108] sm:$0xff]   ;;  %v1958_v43 = vcombine.low %v2620_v57, %v2637_v13  ;;  %v2444_v29 = vld [vmem:[%s2940_s2 + $0x110] sm:$0xff]   ;;  %v1959_v57 = vcombine.low %v2665_v36, %v2671_v38 }
  0x36   : > { %v1449_v17 = vrot.slane %v1447_v19, 5  ;;  %v2043_v13 = vrot.slane %v2837_v12, 9  ;;  %v2082_v60 = vunpack.c.l.bf16 %v2086_v56  ;;  %v2079_v18 = vunpack.c.h.bf16 %v2085_v44 }
  0x37   : > { %2184 = vmatmul.mubr.msk.bf16.vlgmr.msra.gmra.mrb[0].mxu1 %vm570_vm3, %v1909_v47 }
  0x38   : > { %2192 = vmatpush3.bf16.msra.mxu1 %v2419_v34  ;;  %2248 = vmatmul.mubr.msk.bf16.vlgmr.msra.gmra.mrb[0].mxu0 %vm570_vm3, %v1998_v46  ;;  %v401_v34 = vld [vmem:[%s2645_s28 + $0xc] sm:$0x1] }
  0x39   : > { %2256 = vmatpush3.bf16.msra.mxu0 %v2420_v39  ;;  %2193 = vmatprep.subr.bf16.mxu1 %v2422_v48  ;;  %v1450_v39 = vor.u32 %v1449_v17, %v1446_v11  ;;  %v1453_v40 = vshll.u32 %v401_v34, 16 }
  0x3a   : > { %2257 = vmatprep.subr.bf16.mxu0 %v2423_v52  ;;  %2187 = vmatprep.mubr.msk.bf16.mxu1 %vm570_vm3, %v1910_v53 }
  0x3b   : > { %2251 = vmatprep.mubr.msk.bf16.mxu0 %vm570_vm3, %v1999_v55  ;;  %v1451_v41 = vrot.slane %v1450_v39, 4  ;;  %v1455_v42 = vrot.slane %v1453_v40, 5  ;;  %v2084_v55 = vld [vmem:[%s369_s22 + $0x8] sm:$0xff]  }
  0x3c   : > { %2194 = vmatpush3.bf16.msra.mxu1 %v2422_v48 }
  0x3d   : > { %2258 = vmatpush3.bf16.msra.mxu0 %v2423_v52  ;;  %2195 = vmatprep.subr.bf16.mxu1 %v2425_v37  ;;  %v1456_v31 = vsel %vm2597_vm2, %v1451_v41, %v1455_v42 }
  0x3e   : > { %2259 = vmatprep.subr.bf16.mxu0 %v2426_v7 }
  0x3f   : > { %2188 = vmatmul.mubr.msk.bf16.gmra.mrb[4].mxu1 %vm570_vm3, %v1911_v59 }
  0x40   : > { %2196 = vmatpush3.bf16.msra.mxu1 %v2425_v37  ;;  %2252 = vmatmul.mubr.msk.bf16.gmra.mrb[4].mxu0 %vm570_vm3, %v2000_v62  ;;  %v2069_v37 = vld [vmem:[%s369_s22] sm:$0xff]  }
  0x41   : > { %2260 = vmatpush3.bf16.msra.mxu0 %v2426_v7  ;;  %2197 = vmatprep.subr.bf16.mxu1 %v2428_v23  ;;  %v2074_v7 = vunpack.c.l.bf16 %v2084_v55  ;;  %v2070_v62 = vunpack.c.l.bf16 %v2069_v37 }
  0x42   : > { %2261 = vmatprep.subr.bf16.mxu0 %v2429_v30  ;;  %2199 = vmatprep.mubr.msk.bf16.mxu1 %vm570_vm3, %v1936_v63 }
  0x43   : > { %2263 = vmatprep.mubr.msk.bf16.mxu0 %vm570_vm3, %v1909_v47 }
  0x44   : > { %2198 = vmatpush3.bf16.msra.mxu1 %v2428_v23 }
  0x45   : > { %2262 = vmatpush3.bf16.msra.mxu0 %v2429_v30  ;;  %2207 = vmatprep.subr.bf16.mxu1 %v2430_v1 }
  0x46   : > { %2271 = vmatprep.subr.bf16.mxu0 %v2431_v2 }
  0x47   : > { %2200 = vmatmul.mubr.msk.bf16.vlgmr.msra.gmra.mrb[0].mxu1 %vm570_vm3, %v2823_v3 }
  0x48   : > { %2208 = vmatpush3.bf16.msra.mxu1 %v2430_v1  ;;  %2264 = vmatmul.mubr.msk.bf16.vlgmr.msra.gmra.mrb[0].mxu0 %vm570_vm3, %v1910_v53  ;;  %v2078_v1 = vunpack.c.l.bf16 %v2085_v44 }
  0x49   : > { %2272 = vmatpush3.bf16.msra.mxu0 %v2431_v2  ;;  %2209 = vmatprep.subr.bf16.mxu1 %v2432_v4  ;;  %v2075_v2 = vunpack.c.h.bf16 %v2084_v55 }
  0x4a   : > { %2273 = vmatprep.subr.bf16.mxu0 %v2433_v6  ;;  %2203 = vmatprep.mubr.msk.bf16.mxu1 %vm570_vm3, %v2832_v10 }
  0x4b   : > { %2267 = vmatprep.mubr.msk.bf16.mxu0 %vm570_vm3, %v1911_v59 }
  0x4c   : > { %2210 = vmatpush3.bf16.msra.mxu1 %v2432_v4 }
  0x4d   : > { %2274 = vmatpush3.bf16.msra.mxu0 %v2433_v6  ;;  %2211 = vmatprep.subr.bf16.mxu1 %v2434_v15 }
  0x4e   : > { %2275 = vmatprep.subr.bf16.mxu0 %v2435_v20 }
  0x4f   : > { %2204 = vmatmul.mubr.msk.bf16.gmra.mrb[4].mxu1 %vm570_vm3, %v1939_v21 }
  0x50   : > { %2212 = vmatpush3.bf16.msra.mxu1 %v2434_v15  ;;  %2268 = vmatmul.mubr.msk.bf16.gmra.mrb[4].mxu0 %vm570_vm3, %v2017_v24  ;;  %v2071_v15 = vunpack.c.h.bf16 %v2069_v37 }
  0x51   : > { %2276 = vmatpush3.bf16.msra.mxu0 %v2435_v20  ;;  %2213 = vmatprep.subr.bf16.mxu1 %v2437_v25 }
  0x52   : > { %2277 = vmatprep.subr.bf16.mxu0 %v2438_v28  ;;  %2215 = vmatprep.mubr.msk.bf16.mxu1 %vm570_vm3, %v1956_v33 }
  0x53   : > { %2279 = vmatprep.mubr.msk.bf16.mxu0 %vm570_vm3, %v2647_v16  ;;  %v1571_v16 = vrot.slane %v401_v34, 5 }
  0x54   : > { %2214 = vmatpush3.bf16.msra.mxu1 %v2437_v25 }
  0x55   : > { %2278 = vmatpush3.bf16.msra.mxu0 %v2438_v28  ;;  %2303 = vmatprep.subr.bf16.mxu1 %v2440_v35 }
  0x56   : > { %2287 = vmatprep.subr.bf16.mxu0 %v2440_v35 }
  0x57   : > { %2216 = vmatmul.mubr.msk.bf16.vlgmr.msra.gmra.mrb[0].mxu1 %vm570_vm3, %v1957_v9 }
  0x58   : > { %2280 = vmatmul.mubr.msk.bf16.vlgmr.msra.gmra.mrb[0].mxu0 %vm570_vm3, %v2694_v58  ;;  %2307 = vmatpush3.bf16.msra.mxu1 %v2440_v35  ;;  %v2034_v58 = vcombine.low %v2736_v27, %v1456_v31 }
  0x59   : > { %2288 = vmatpush3.bf16.msra.mxu0 %v2440_v35  ;;  %2304 = vmatprep.subr.bf16.mxu1 %v2442_v26 }
  0x5a   : > { %2289 = vmatprep.subr.bf16.mxu0 %v2442_v26  ;;  %2219 = vmatprep.mubr.msk.bf16.mxu1 %vm570_vm3, %v1958_v43 }
  0x5b   : > { %2283 = vmatprep.mubr.msk.bf16.mxu0 %vm570_vm3, %v2732_v5  ;;  %v1572_v5 = vsel %vm2701_vm6, %v2043_v13, %v1571_v16 }
  0x5c   : > { %2308 = vmatpush3.bf16.msra.mxu1 %v2442_v26  ;;  %v2052_v36 = vcombine.low %v2794_v8, %v1572_v5  ;;  %v2061_v8 = vld [vmem:[%s2941_s3] ss:$0 sm:$0xff] }
  0x5d   : > { %2290 = vmatpush3.bf16.msra.mxu0 %v2442_v26  ;;  %2305 = vmatprep.subr.bf16.mxu1 %v2444_v29 }
  0x5e   : > { %2291 = vmatprep.subr.bf16.mxu0 %v2444_v29 }
  0x5f   : > { %2220 = vmatmul.mubr.msk.bf16.gmra.mrb[4].mxu1 %vm570_vm3, %v1959_v57 }
  0x60   : > { %2284 = vmatmul.mubr.msk.bf16.gmra.mrb[4].mxu0 %vm570_vm3, %v2034_v58  ;;  %2309 = vmatpush3.bf16.msra.mxu1 %v2444_v29 }
  0x61   : > { %2292 = vmatpush3.bf16.msra.mxu0 %v2444_v29  ;;  %2306 = vmatprep.subr.bf16.mxu1 %v2445_v32 }
  0x62   : > { %2293 = vmatprep.subr.bf16.mxu0 %v2445_v32  ;;  %2295 = vmatprep.mubr.msk.bf16.mxu0 %vm570_vm3, %v2823_v3  ;;  %v2083_v3 = vunpack.c.h.bf16 %v2086_v56 }
  0x63   : > { %2299 = vmatprep.mubr.msk.bf16.mxu1 %vm570_vm3, %v1939_v21 }
  0x64   : > { %2310 = vmatpush3.bf16.msra.mxu1 %v2445_v32 }
  0x65   : > { %2294 = vmatpush3.bf16.msra.mxu0 %v2445_v32 }
  0x67   : > { %2300 = vmatmul.mubr.msk.bf16.vlgmr.msra.gmra.mrb[8].mxu1 %vm570_vm3, %v2052_v36 }
  0x68   : > { %2296 = vmatmul.mubr.msk.bf16.vlgmr.msra.gmra.mrb[0].mxu0 %vm570_vm3, %v2832_v10 }
 0x12a   : > { %v2217_v38 = vpop.f32.mrb[0].mxu1 }
 0x12b   : > { %v1027_v0 = vpop.f32.mrb[1].mxu1 }
 0x12c   : > { %v2218_v27 = vpop.f32.mrb[2].mxu1 }
 0x12d   : > { %v1030_v45 = vpop.f32.mrb[3].mxu1 }
 0x132   : > { %v2221_v46 = vpop.f32.mrb[4].mxu1 }
 0x133   : > { %v2285_v47 = vpop.f32.mrb[4].mxu0  ;;  %v1043_v48 = vpop.f32.mrb[5].mxu1 }
 0x134   : > { %v2315_v61 = vadd.f32 %v2285_v47, %v2221_v46  ;;  %v1545_v14 = vpop.f32.mrb[5].mxu0  ;;  %v2222_v22 = vpop.f32.mrb[6].mxu1 }
 0x135   : > { %v2317_v49 = vadd.f32 %v1545_v14, %v1043_v48  ;;  %v2286_v50 = vpop.f32.mrb[6].mxu0  ;;  %v1046_v51 = vpop.f32.mrb[7].mxu1 }
 0x136   : > { %v2319_v52 = vadd.f32 %v2286_v50, %v2222_v22  ;;  %v1548_v53 = vpop.f32.mrb[7].mxu0 }
 0x137   : > { %v2321_v54 = vadd.f32 %v1548_v53, %v1046_v51 }
 0x13a   : > { %v2301_v59 = vpop.f32.mrb[8].mxu1 }
 0x13b   : > { %v2297_v23 = vpop.f32.mrb[0].mxu0  ;;  %v2316_v30 = vadd.f32 %v2315_v61, %v2301_v59  ;;  %v1661_v63 = vpop.f32.mrb[9].mxu1 }
 0x13c   : > { %v2311_v4 = vadd.f32 %v2297_v23, %v2217_v38  ;;  %v1645_v6 = vpop.f32.mrb[1].mxu0  ;;  %v2318_v10 = vadd.f32 %v2317_v49, %v1661_v63  ;;  %v2302_v12 = vpop.f32.mrb[10].mxu1 }
 0x13d   : > { %v1697_v19 = vadd.f32 %v2316_v30, %v2061_v8  ;;  %v2312_v20 = vadd.f32 %v1645_v6, %v1027_v0  ;;  %v2298_v21 = vpop.f32.mrb[2].mxu0  ;;  %v2320_v24 = vadd.f32 %v2319_v52, %v2302_v12  ;;  %v1664_v25 = vpop.f32.mrb[11].mxu1 }
 0x13e   : > { %v1693_v11 = vadd.f32 %v2311_v4, %v2061_v8  ;;  %v1695_v17 = vadd.f32 %v2318_v10, %v2061_v8  ;;  %v2313_v34 = vadd.f32 %v2298_v21, %v2218_v27  ;;  %v1648_v28 = vpop.f32.mrb[3].mxu0  ;;  %v2322_v33 = vadd.f32 %v2321_v54, %v1664_v25 }
 0x13f   : > { %v1721_v35 = vadd.f32 %v2082_v60, %v1697_v19  ;;  %v1691_v39 = vadd.f32 %v2312_v20, %v2061_v8  ;;  %v1698_v40 = vadd.f32 %v2320_v24, %v2061_v8  ;;  %v2314_v9 = vadd.f32 %v1648_v28, %v1030_v45 }
 0x140   : > { %v1717_v26 = vadd.f32 %v2074_v7, %v1693_v11  ;;  %v1719_v41 = vadd.f32 %v2078_v1, %v1695_v17  ;;  %v1694_v42 = vadd.f32 %v2313_v34, %v2061_v8  ;;  %v1696_v43 = vadd.f32 %v2322_v33, %v2061_v8 }
 0x141   : > { %v1729_v29 = vmax.f32 %v1721_v35, 0.0  ;;  %v1715_v31 = vadd.f32 %v2070_v62, %v1691_v39  ;;  %v1722_v57 = vadd.f32 %v2083_v3, %v1698_v40  ;;  %v1692_v13 = vadd.f32 %v2314_v9, %v2061_v8 }
 0x142   : > { %v1725_v16 = vmax.f32 %v1717_v26, 0.0  ;;  %v1727_v58 = vmax.f32 %v1719_v41, 0.0  ;;  %v1718_v32 = vadd.f32 %v2075_v2, %v1694_v42  ;;  %v1720_v5 = vadd.f32 %v2079_v18, %v1696_v43 }
 0x143   : > { %v1737_v36 = vpack.c.bf16 %v1729_v29, %v1729_v29  ;;  %v1723_v38 = vmax.f32 %v1715_v31, 0.0  ;;  %v1730_v0 = vmax.f32 %v1722_v57, 0.0  ;;  %v1716_v27 = vadd.f32 %v2071_v15, %v1692_v13 }
 0x144   : > { %v1733_v45 = vpack.c.bf16 %v1725_v16, %v1725_v16  ;;  %v1735_v46 = vpack.c.bf16 %v1727_v58, %v1727_v58  ;;  %v1726_v47 = vmax.f32 %v1718_v32, 0.0  ;;  %v1728_v48 = vmax.f32 %v1720_v5, 0.0 }
 0x145   : > { %1746 = vst.msk [vmem:[%s379_s27 + $0x18] sm:$0xf] %vm1739_vm7, %v1737_v36  ;;  %v1731_v61 = vpack.c.bf16 %v1723_v38, %v1723_v38  ;;  %v1738_v14 = vpack.c.bf16 %v1730_v0, %v1730_v0  ;;  %v1724_v22 = vmax.f32 %v1716_v27, 0.0 }
 0x146   : > { %1742 = vst.msk [vmem:[%s379_s27 + $0x8] sm:$0xf] %vm1739_vm7, %v1733_v45  ;;  %1744 = vst.msk [vmem:[%s379_s27 + $0x10] sm:$0xf] %vm1739_vm7, %v1735_v46  ;;  %v1734_v49 = vpack.c.bf16 %v1726_v47, %v1726_v47  ;;  %v1736_v50 = vpack.c.bf16 %v1728_v48, %v1728_v48 }
 0x147   : > { %1740 = vst.msk [vmem:[%s379_s27] sm:$0xf] %vm1739_vm7, %v1731_v61  ;;  %1747 = vst.msk [vmem:[%s379_s27 + $0x1c] sm:$0xf] %vm1739_vm7, %v1738_v14  ;;  %v1732_v51 = vpack.c.bf16 %v1724_v22, %v1724_v22 }
 0x148   : > { %1743 = vst.msk [vmem:[%s379_s27 + $0xc] sm:$0xf] %vm1739_vm7, %v1734_v49  ;;  %1745 = vst.msk [vmem:[%s379_s27 + $0x14] sm:$0xf] %vm1739_vm7, %v1736_v50 }
 0x149   : > { %1741 = vst.msk [vmem:[%s379_s27 + $0x4] sm:$0xf] %vm1739_vm7, %v1732_v51 }
 0x14a PF: > { %s15_s20 = sadd.s32 1, %s2468_s20   ;;  %s2948_s18 = smov %s2464_s19 }
 0x14b   : > { %p12_p5 = scmp.ge.s32.totalorder %s15_s20, 4   ;;  %s2949_s19 = smov %s2951_s21 }
 0x14d   :  { %14 = sbr.rel (!%p12_p5) target bundleno = 2 (0x2), region = 84 }

// kernel: _lambda_.21
= control target key start
LH: loop header
LB: loop body
LE: loop exit
PB: predicated region body
PF: predicated region fallthrough
CT: control target
= control target key end

     0   :  { %s2368_s15 = smov 0   ;;  %s2370_s16 = smov 0   ;;  %s2799_s0 = inlined_call_operand.vmem [shape: bf16[2,10,10,64], index: 0, kind: input, shape index: {}, may-alias: {0,1}]   ;;  %s2800_s1 = inlined_call_operand.vmem [shape: bf16[2,10,10,64], index: 1, kind: input, shape index: {}, may-alias: {0,1}]   ;;  %s2801_s2 = inlined_call_operand.vmem [shape: bf16[9,64,64], index: 2, kind: input, shape index: {}]   ;;  %s2802_s3 = inlined_call_operand.vmem [shape: f32[1,64], index: 3, kind: input, shape index: {}]   ;;  %s2803_s4 = inlined_call_operand.vmem [shape: bf16[2,8,8,64], index: 4, kind: output, shape index: {}]  }
   0x1   :  { %s2372_s17 = smov 0  }
   0x2 LB: > { %s26_s18 = sadd.s32 1, %s2337_s16  ;;  %p1776_p0 = scmp.ge.s32.totalorder %s2341_s17, 1  ;;  %s2341_s17 = sphi %s2372_s17, %s14_s17   ;;  %s2337_s16 = sphi %s2370_s16, %s2809_s16   ;;  %s2333_s15 = sphi %s2368_s15, %s2808_s15  }
   0x3   : > { %p28_p1 = scmp.ge.s32.totalorder %s26_s18, 2  ;;  %p220_p2 = scmp.lt.s32.totalorder %s2341_s17, 3 }
   0x5   : > { %s2811_s18 = smov (%p28_p1, %s26_s18), 0  ;;  %p221_p3 = pnand %p1776_p0, %p220_p2 }
   0x6   : > { %v2275_v0 = vld [vmem:[%s2801_s2 + $0x20] sm:$0xff] (!%p221_p3)   ;;  %p278_p4 = scmp.lt.s32.totalorder (!%p221_p3), %s2333_s15, 1  ;;  %v2277_v2 = vld [vmem:[%s2801_s2 + $0x28] sm:$0xff] (!%p221_p3)   ;;  %v2279_v4 = vld [vmem:[%s2801_s2 + $0x30] sm:$0xff] (!%p221_p3)   ;;  %vm347_vm0 = vsmask.f32 (!%p221_p3), 3328 }
   0x7   : > { %224 = sbr.rel (%p221_p3) target bundleno = 328 (0x148), region = 36  ;;  %v2276_v1 = vld [vmem:[%s2801_s2 + $0x80] sm:$0xff] (!%p221_p3)   ;;  %2032 = vmatprep.subr.bf16.mxu1 (!%p221_p3), %v2275_v0  ;;  %v2278_v3 = vld [vmem:[%s2801_s2 + $0x88] sm:$0xff] (!%p221_p3)   ;;  %v2280_v5 = vld [vmem:[%s2801_s2 + $0x90] sm:$0xff] (!%p221_p3)   ;;  %vm348_vm1 = vsmask.f32 (!%p221_p3), 7440 }
   0x8   : > { %2096 = vmatprep.subr.bf16.mxu0 (!%p221_p3), %v2276_v1  ;;  %2033 = vmatpush3.bf16.msra.mxu1 (!%p221_p3), %v2275_v0  ;;  %v2281_v6 = vld [vmem:[%s2801_s2 + $0x38] sm:$0xff] (!%p221_p3)   ;;  %v2441_v22 = vld [vmem:[%s2801_s2] sm:$0xff] (!%p221_p3)   ;;  %vm2465_vm2 = vmor (!%p221_p3), %vm347_vm0, %vm348_vm1  ;;  %vm507_vm3 = vcmask (!%p221_p3), 523264   ;;  %vm714_vm4 = vcmask (!%p221_p3), 1042432   ;;  %vm715_vm5 = vcmask (!%p221_p3), 1046532   ;;  %vm1652_vm7 = vcmask (!%p221_p3), 519168  }
   0x9   : > { %2097 = vmatpush3.bf16.msra.mxu0 (!%p221_p3), %v2276_v1  ;;  %2034 = vmatprep.subr.bf16.mxu1 (!%p221_p3), %v2277_v2  ;;  %v2282_v10 = vld [vmem:[%s2801_s2 + $0x98] sm:$0xff] (!%p221_p3)   ;;  %v2446_v23 = vld [vmem:[%s2801_s2 + $0xa0] sm:$0xff] (!%p221_p3)   ;;  %vm2569_vm6 = vmor (!%p221_p3), %vm714_vm4, %vm715_vm5 }
   0xa   : > { %2098 = vmatprep.subr.bf16.mxu0 (!%p221_p3), %v2278_v3  ;;  %v2318_v32 = vld [vmem:[%s2801_s2 + $0x118] sm:$0xff] (!%p221_p3)  }
   0xc   : > { %2035 = vmatpush3.bf16.msra.mxu1 (!%p221_p3), %v2277_v2 }
   0xd   : > { %2099 = vmatpush3.bf16.msra.mxu0 (!%p221_p3), %v2278_v3  ;;  %2036 = vmatprep.subr.bf16.mxu1 (!%p221_p3), %v2279_v4 }
   0xe   : > { %s2813_s15 = smov (!%p278_p4, %s2333_s15), 1  ;;  %2100 = vmatprep.subr.bf16.mxu0 %v2280_v5 }
   0xf   : > { %s2248_s29 = smul.u32 80, %s2813_s15  ;;  %s1959_s10 = sshll.u32 %s2813_s15, 5 }
  0x10   : > { %2037 = vmatpush3.bf16.msra.mxu1 %v2279_v4  ;;  %s316_s13 = scalar_lea.vmem %s2803_s4, %s1959_s10 }
  0x11   : > { %s2412_s8 = scalar_lea.vmem %s2799_s0, %s2248_s29  ;;  %2101 = vmatpush3.bf16.msra.mxu0 %v2280_v5  ;;  %2038 = vmatprep.subr.bf16.mxu1 %v2281_v6  ;;  %s1958_s21 = sadd.s32 64, %s2248_s29 }
  0x12   : > { %v2418_v7 = vld [vmem:[%s2412_s8] sm:$0xf]  ;;  %v2421_v8 = vld [vmem:[%s2412_s8 + $0x4] sm:$0x1]  ;;  %v2424_v9 = vld [vmem:[%s2412_s8 + $0x8] sm:$0xf]  ;;  %2102 = vmatprep.subr.bf16.mxu0 %v2282_v10  ;;  %s2513_s24 = scalar_lea.vmem %s2800_s1, %s1958_s21 }
  0x13   : > { %v2430_v11 = vld [vmem:[%s2412_s8 + $0xc] sm:$0x1]  ;;  %v351_v12 = vshrl.u32 %v2418_v7, 16  ;;  %v354_v13 = vshll.u32 %v2418_v7, 16  ;;  %v360_v14 = vshll.u32 %v2421_v8, 16  ;;  %v365_v15 = vshrl.u32 %v2424_v9, 16 }
  0x14   : > { %v368_v16 = vshll.u32 %v2424_v9, 16  ;;  %v374_v17 = vshll.u32 %v2430_v11, 16  ;;  %v2449_v26 = vld [vmem:[%s2412_s8 + $0x10] sm:$0xf]  ;;  %v2452_v27 = vld [vmem:[%s2412_s8 + $0x14] sm:$0x1]  ;;  %2039 = vmatpush3.bf16.msra.mxu1 %v2281_v6 }
  0x15   : > { %v353_v18 = vrot.slane %v351_v12, 4  ;;  %v356_v19 = vrot.slane %v354_v13, 5  ;;  %v362_v20 = vrot.slane %v360_v14, 5  ;;  %v367_v21 = vrot.slane %v365_v15, 4  ;;  %v2455_v29 = vld [vmem:[%s2412_s8 + $0x18] sm:$0xf]  ;;  %2103 = vmatpush3.bf16.msra.mxu0 %v2282_v10  ;;  %2048 = vmatprep.subr.bf16.mxu1 %v2441_v22 }
  0x16   : > { %v370_v24 = vrot.slane %v368_v16, 5  ;;  %v376_v25 = vrot.slane %v374_v17, 5  ;;  %v2458_v30 = vld [vmem:[%s2412_s8 + $0x1c] sm:$0x1]  ;;  %v2461_v31 = vld [vmem:[%s2412_s8 + $0x20] sm:$0xf]  ;;  %2112 = vmatprep.subr.bf16.mxu0 %v2446_v23 }
  0x17   : > { %v357_v28 = vor.u32 %v356_v19, %v353_v18  ;;  %v2470_v34 = vld [vmem:[%s2412_s8 + $0x24] sm:$0x1]  ;;  %v379_v35 = vshrl.u32 %v2449_v26, 16  ;;  %v382_v36 = vshll.u32 %v2449_v26, 16  ;;  %v388_v37 = vshll.u32 %v2452_v27, 16  ;;  %v2285_v18 = vld [vmem:[%s2801_s2 + $0x8] sm:$0xff]  }
  0x18   : > { %v371_v33 = vor.u32 %v370_v24, %v367_v21  ;;  %v393_v39 = vshrl.u32 %v2455_v29, 16  ;;  %v396_v40 = vshll.u32 %v2455_v29, 16  ;;  %v402_v41 = vshll.u32 %v2458_v30, 16  ;;  %v2488_v57 = vld [vmem:[%s2412_s8 + $0x28] sm:$0xf] }
  0x19   : > { %v358_v38 = vrot.slane %v357_v28, 4  ;;  %v381_v43 = vrot.slane %v379_v35, 4  ;;  %v384_v44 = vrot.slane %v382_v36, 5  ;;  %v390_v46 = vrot.slane %v388_v37, 5  ;;  %v2491_v61 = vld [vmem:[%s2412_s8 + $0x2c] sm:$0x1] }
  0x1a   : > { %v372_v42 = vrot.slane %v371_v33, 4  ;;  %v395_v47 = vrot.slane %v393_v39, 4  ;;  %v398_v48 = vrot.slane %v396_v40, 5  ;;  %v407_v51 = vshrl.u32 %v2461_v31, 16  ;;  %v2505_v13 = vld [vmem:[%s2412_s8 + $0x30] sm:$0xf] }
  0x1b   : > { %v363_v45 = vsel %vm2465_vm2, %v358_v38, %v362_v20  ;;  %v385_v50 = vor.u32 %v384_v44, %v381_v43  ;;  %v410_v52 = vshll.u32 %v2461_v31, 16  ;;  %v404_v55 = vrot.slane %v402_v41, 5  ;;  %v2508_v14 = vld [vmem:[%s2412_s8 + $0x34] sm:$0x1]  ;;  %v2286_v20 = vld [vmem:[%s2801_s2 + $0xa8] sm:$0xff]  }
  0x1c   : > { %v377_v49 = vsel %vm2465_vm2, %v372_v42, %v376_v25  ;;  %v399_v54 = vor.u32 %v398_v48, %v395_v47  ;;  %v416_v56 = vshll.u32 %v2470_v34, 16  ;;  %v409_v59 = vrot.slane %v407_v51, 4  ;;  %v2533_v36 = vld [vmem:[%s2412_s8 + $0x38] sm:$0xf]  ;;  %v2536_v37 = vld [vmem:[%s2412_s8 + $0x3c] sm:$0x1] }
  0x1d   : > { %v1789_v53 = vcombine.low %v363_v45, %v377_v49  ;;  %v386_v58 = vrot.slane %v385_v50, 4  ;;  %v412_v60 = vrot.slane %v410_v52, 5  ;;  %v421_v0 = vshrl.u32 %v2488_v57, 16  ;;  %v2539_v38 = vld [vmem:[%s2513_s24] sm:$0xf]  ;;  %v2287_v40 = vld [vmem:[%s2801_s2 + $0x10] sm:$0xff]  }
  0x1e   : > { %v400_v62 = vrot.slane %v399_v54, 4  ;;  %v418_v63 = vrot.slane %v416_v56, 5  ;;  %v424_v3 = vshll.u32 %v2488_v57, 16  ;;  %v430_v4 = vshll.u32 %v2491_v61, 16  ;;  %v2546_v44 = vld [vmem:[%s2513_s24 + $0x4] sm:$0x1] }
  0x1f   : > { %2040 = vmatprep.mubr.msk.bf16.mxu1 %vm507_vm3, %v1789_v53  ;;  %v391_v1 = vsel %vm2465_vm2, %v386_v58, %v390_v46  ;;  %v413_v2 = vor.u32 %v412_v60, %v409_v59  ;;  %v723_v5 = vrot.slane %v2430_v11, 5  ;;  %v423_v12 = vrot.slane %v421_v0, 4  ;;  %v2288_v54 = vld [vmem:[%s2801_s2 + $0xb0] sm:$0xff]  }
  0x20   : > { %v405_v6 = vsel %vm2465_vm2, %v400_v62, %v404_v55  ;;  %v1869_v10 = vcombine.low %v377_v49, %v391_v1  ;;  %v727_v17 = vrot.slane %v2452_v27, 5  ;;  %v426_v19 = vrot.slane %v424_v3, 5 }
  0x21   : > { %v414_v15 = vrot.slane %v413_v2, 4  ;;  %v2515_v16 = vcombine.low %v391_v1, %v405_v6  ;;  %v432_v21 = vrot.slane %v430_v4, 5  ;;  %v435_v24 = vshrl.u32 %v2505_v13, 16 }
  0x22   : > { %2104 = vmatprep.mubr.msk.bf16.mxu0 %vm507_vm3, %v1869_v10  ;;  %v438_v25 = vshll.u32 %v2505_v13, 16  ;;  %v444_v28 = vshll.u32 %v2508_v14, 16  ;;  %v427_v35 = vor.u32 %v426_v19, %v423_v12  ;;  %v449_v46 = vshrl.u32 %v2533_v36, 16 }
  0x23   : > { %v419_v33 = vsel %vm2465_vm2, %v414_v15, %v418_v63  ;;  %2041 = vmatmul.mubr.msk.bf16.vlgmr.msra.gmra.mrb[0].mxu1 %vm507_vm3, %v2515_v16  ;;  %v437_v41 = vrot.slane %v435_v24, 4  ;;  %v452_v47 = vshll.u32 %v2533_v36, 16  ;;  %v458_v48 = vshll.u32 %v2536_v37, 16  ;;  %v2290_v15 = vld [vmem:[%s2801_s2 + $0xb8] sm:$0xff]  }
  0x24   : > { %v1870_v39 = vcombine.low %v405_v6, %v419_v33  ;;  %2049 = vmatpush3.bf16.msra.mxu1 %v2441_v22  ;;  %v440_v42 = vrot.slane %v438_v25, 5  ;;  %v446_v43 = vrot.slane %v444_v28, 5  ;;  %v428_v45 = vrot.slane %v427_v35, 4 }
  0x25   : > { %2050 = vmatprep.subr.bf16.mxu1 %v2285_v18  ;;  %v1004_v49 = vshrl.u32 %v2539_v38, 16  ;;  %v1007_v50 = vshll.u32 %v2539_v38, 16  ;;  %v1013_v51 = vshll.u32 %v2546_v44, 16  ;;  %v731_v52 = vrot.slane %v2458_v30, 5 }
  0x26   : > { %2105 = vmatmul.mubr.msk.bf16.vlgmr.msra.gmra.mrb[0].mxu0 %vm507_vm3, %v1870_v39  ;;  %v441_v22 = vor.u32 %v440_v42, %v437_v41  ;;  %v433_v53 = vsel %vm2465_vm2, %v428_v45, %v432_v21  ;;  %v451_v55 = vrot.slane %v449_v46, 4  ;;  %v454_v56 = vrot.slane %v452_v47, 5  ;;  %v2293_v39 = vld [vmem:[%s2801_s2 + $0xc0] sm:$0xff]  }
  0x27   : > { %2113 = vmatpush3.bf16.msra.mxu0 %v2446_v23  ;;  %v2562_v58 = vcombine.low %v419_v33, %v433_v53  ;;  %v1006_v60 = vrot.slane %v1004_v49, 4  ;;  %v1009_v62 = vrot.slane %v1007_v50, 5  ;;  %v2289_v23 = vld [vmem:[%s2801_s2 + $0x18] sm:$0xff]   ;;  %v460_v63 = vrot.slane %v458_v48, 5  ;;  %v2295_v48 = vld [vmem:[%s2801_s2 + $0x48] sm:$0xff]  }
  0x28   : > { %2114 = vmatprep.subr.bf16.mxu0 %v2286_v20  ;;  %2051 = vmatpush3.bf16.msra.mxu1 %v2285_v18  ;;  %v442_v59 = vrot.slane %v441_v22, 4  ;;  %v455_v30 = vor.u32 %v454_v56, %v451_v55  ;;  %v1814_v1 = vrot.slane %v2424_v9, 9  ;;  %v1015_v4 = vrot.slane %v1013_v51, 5 }
  0x29   : > { %2052 = vmatprep.subr.bf16.mxu1 %v2287_v40  ;;  %2044 = vmatprep.mubr.msk.bf16.mxu1 %vm507_vm3, %v2562_v58  ;;  %v1010_v3 = vor.u32 %v1009_v62, %v1006_v60  ;;  %v1815_v6 = vrot.slane %v2449_v26, 9  ;;  %v1816_v21 = vrot.slane %v2455_v29, 9  ;;  %v735_v24 = vrot.slane %v2470_v34, 5  ;;  %v2292_v34 = vld [vmem:[%s2801_s2 + $0x40] sm:$0xff]  }
  0x2a   : > { %v447_v2 = vsel %vm2465_vm2, %v442_v59, %v446_v43  ;;  %v456_v12 = vrot.slane %v455_v30, 4  ;;  %v2586_v19 = vsel %vm2569_vm6, %v1814_v1, %v723_v5  ;;  %v1817_v11 = vrot.slane %v2461_v31, 9  ;;  %v2302_v30 = vld [vmem:[%s2801_s2 + $0xd8] sm:$0xff]   ;;  %v2303_v1 = vld [vmem:[%s2801_s2 + $0x60] sm:$0xff]  }
  0x2b   : > { %2115 = vmatpush3.bf16.msra.mxu0 %v2286_v20  ;;  %v1871_v10 = vcombine.low %v433_v53, %v447_v2  ;;  %v1011_v18 = vrot.slane %v1010_v3, 4  ;;  %v2592_v20 = vsel %vm2569_vm6, %v1815_v6, %v727_v17  ;;  %v1801_v17 = vcombine.low %v2418_v7, %v2424_v9  ;;  %v2306_v6 = vld [vmem:[%s2801_s2 + $0xe8] sm:$0xff]  }
  0x2c   : > { %2116 = vmatprep.subr.bf16.mxu0 %v2288_v54  ;;  %2053 = vmatpush3.bf16.msra.mxu1 %v2287_v40  ;;  %v461_v25 = vsel %vm2465_vm2, %v456_v12, %v460_v63  ;;  %v1890_v33 = vcombine.low %v2586_v19, %v2592_v20  ;;  %v732_v35 = vsel %vm2569_vm6, %v1816_v21, %v731_v52  ;;  %v1818_v40 = vrot.slane %v2488_v57, 9  ;;  %v2296_v52 = vld [vmem:[%s2801_s2 + $0xc8] sm:$0xff]  }
  0x2d   : > { %2108 = vmatprep.mubr.msk.bf16.mxu0 %vm507_vm3, %v1871_v10  ;;  %2054 = vmatprep.subr.bf16.mxu1 %v2289_v23  ;;  %v2600_v5 = vcombine.low %v447_v2, %v461_v25  ;;  %v2604_v27 = vsel %vm2465_vm2, %v1011_v18, %v1015_v4  ;;  %v736_v41 = vsel %vm2569_vm6, %v1817_v11, %v735_v24  ;;  %v739_v42 = vrot.slane %v2491_v61, 5  ;;  %v2304_v2 = vld [vmem:[%s2801_s2 + $0xe0] sm:$0xff]   ;;  %v2305_v4 = vld [vmem:[%s2801_s2 + $0x68] sm:$0xff]  }
  0x2e   : > { %v1872_v28 = vcombine.low %v461_v25, %v2604_v27  ;;  %v1819_v43 = vrot.slane %v2505_v13, 9  ;;  %v743_v45 = vrot.slane %v2508_v14, 5  ;;  %v1891_v46 = vcombine.low %v732_v35, %v736_v41  ;;  %v2705_v12 = vld [vmem:[%s2513_s24 + $0x8] sm:$0xf]  ;;  %v2310_v25 = vld [vmem:[%s2801_s2 + $0x78] sm:$0xff]  }
  0x2f   : > { %2117 = vmatpush3.bf16.msra.mxu0 %v2288_v54  ;;  %2045 = vmatmul.mubr.msk.bf16.gmra.mrb[4].mxu1 %vm507_vm3, %v2600_v5  ;;  %v1802_v47 = vcombine.low %v2449_v26, %v2455_v29  ;;  %v740_v61 = vsel %vm2569_vm6, %v1818_v40, %v739_v42  ;;  %v1820_v22 = vrot.slane %v2533_v36, 9  ;;  %v747_v49 = vrot.slane %v2536_v37, 5  ;;  %v2298_v37 = vld [vmem:[%s2801_s2 + $0x50] sm:$0xff]  }
  0x30   : > { %2118 = vmatprep.subr.bf16.mxu0 %v2290_v15  ;;  %2109 = vmatmul.mubr.msk.bf16.gmra.mrb[4].mxu0 %vm507_vm3, %v1872_v28  ;;  %v2639_v14 = vsel %vm2569_vm6, %v1819_v43, %v743_v45  ;;  %v1881_v50 = vrot.slane %v2539_v38, 9  ;;  %v1143_v51 = vrot.slane %v2546_v44, 5  ;;  %v1803_v53 = vcombine.low %v2461_v31, %v2488_v57  ;;  %v2311_v28 = vld [vmem:[%s2801_s2 + $0xf8] sm:$0xff]  }
  0x31   : > { %2055 = vmatpush3.bf16.msra.mxu1 %v2289_v23  ;;  %2056 = vmatprep.mubr.msk.bf16.mxu1 %vm507_vm3, %v1801_v17  ;;  %v719_v54 = vrot.slane %v2421_v8, 5  ;;  %v1892_v55 = vcombine.low %v740_v61, %v2639_v14  ;;  %v1813_v56 = vrot.slane %v2418_v7, 9  ;;  %v748_v44 = vsel %vm2569_vm6, %v1820_v22, %v747_v49  ;;  %v2299_v7 = vld [vmem:[%s2801_s2 + $0xd0] sm:$0xff]   ;;  %v2301_v23 = vld [vmem:[%s2801_s2 + $0x58] sm:$0xff]  }
  0x32   : > { %2064 = vmatprep.subr.bf16.mxu1 %v2292_v34  ;;  %2120 = vmatprep.mubr.msk.bf16.mxu0 %vm507_vm3, %v1890_v33  ;;  %v2662_v8 = vsel %vm2569_vm6, %v1881_v50, %v1143_v51  ;;  %v1804_v59 = vcombine.low %v2505_v13, %v2533_v36  ;;  %v2691_v3 = vcombine.low %v2592_v20, %v732_v35  ;;  %v1381_v18 = vshrl.u32 %v2705_v12, 16  ;;  %v2308_v20 = vld [vmem:[%s2801_s2 + $0xf0] sm:$0xff]   ;;  %v2313_v35 = vld [vmem:[%s2801_s2 + $0x100] sm:$0xff]  }
  0x33   : > { %2119 = vmatpush3.bf16.msra.mxu0 %v2290_v15  ;;  %v720_v60 = vsel %vm2569_vm6, %v1813_v56, %v719_v54  ;;  %v1893_v62 = vcombine.low %v748_v44, %v2662_v8  ;;  %v2700_v10 = vcombine.low %v736_v41, %v740_v61  ;;  %v2307_v15 = vld [vmem:[%s2801_s2 + $0x70] sm:$0xff]   ;;  %v1832_v21 = vcombine.low %v2639_v14, %v748_v44 }
  0x34   : > { %2128 = vmatprep.subr.bf16.mxu0 %v2293_v39  ;;  %v1829_v63 = vcombine.low %v720_v60, %v2586_v19  ;;  %v1384_v19 = vshll.u32 %v2705_v12, 16  ;;  %v1910_v24 = vcombine.low %v2539_v38, %v2705_v12  ;;  %v1383_v11 = vrot.slane %v1381_v18, 4 }
  0x35   : > { %v1849_v33 = vcombine.low %v2424_v9, %v2449_v26  ;;  %v1850_v9 = vcombine.low %v2455_v29, %v2461_v31  ;;  %v2315_v26 = vld [vmem:[%s2801_s2 + $0x108] sm:$0xff]   ;;  %v1851_v43 = vcombine.low %v2488_v57, %v2505_v13  ;;  %v2317_v29 = vld [vmem:[%s2801_s2 + $0x110] sm:$0xff]   ;;  %v1852_v57 = vcombine.low %v2533_v36, %v2539_v38 }
  0x36   : > { %v1386_v17 = vrot.slane %v1384_v19, 5  ;;  %v1936_v13 = vrot.slane %v2705_v12, 9 }
  0x37   : > { %2057 = vmatmul.mubr.msk.bf16.vlgmr.msra.gmra.mrb[0].mxu1 %vm507_vm3, %v1802_v47 }
  0x38   : > { %2065 = vmatpush3.bf16.msra.mxu1 %v2292_v34  ;;  %2121 = vmatmul.mubr.msk.bf16.vlgmr.msra.gmra.mrb[0].mxu0 %vm507_vm3, %v1891_v46  ;;  %v338_v34 = vld [vmem:[%s2513_s24 + $0xc] sm:$0x1] }
  0x39   : > { %2129 = vmatpush3.bf16.msra.mxu0 %v2293_v39  ;;  %2066 = vmatprep.subr.bf16.mxu1 %v2295_v48  ;;  %v1387_v39 = vor.u32 %v1386_v17, %v1383_v11  ;;  %v1390_v40 = vshll.u32 %v338_v34, 16 }
  0x3a   : > { %2130 = vmatprep.subr.bf16.mxu0 %v2296_v52  ;;  %2060 = vmatprep.mubr.msk.bf16.mxu1 %vm507_vm3, %v1803_v53 }
  0x3b   : > { %2124 = vmatprep.mubr.msk.bf16.mxu0 %vm507_vm3, %v1892_v55  ;;  %v1388_v41 = vrot.slane %v1387_v39, 4  ;;  %v1392_v42 = vrot.slane %v1390_v40, 5  ;;  %v1954_v55 = vld [vmem:[%s2802_s3] ss:$0 sm:$0xff] }
  0x3c   : > { %2067 = vmatpush3.bf16.msra.mxu1 %v2295_v48 }
  0x3d   : > { %2131 = vmatpush3.bf16.msra.mxu0 %v2296_v52  ;;  %2068 = vmatprep.subr.bf16.mxu1 %v2298_v37  ;;  %v1393_v31 = vsel %vm2465_vm2, %v1388_v41, %v1392_v42 }
  0x3e   : > { %2132 = vmatprep.subr.bf16.mxu0 %v2299_v7 }
  0x3f   : > { %2061 = vmatmul.mubr.msk.bf16.gmra.mrb[4].mxu1 %vm507_vm3, %v1804_v59 }
  0x40   : > { %2069 = vmatpush3.bf16.msra.mxu1 %v2298_v37  ;;  %2125 = vmatmul.mubr.msk.bf16.gmra.mrb[4].mxu0 %vm507_vm3, %v1893_v62 }
  0x41   : > { %2133 = vmatpush3.bf16.msra.mxu0 %v2299_v7  ;;  %2070 = vmatprep.subr.bf16.mxu1 %v2301_v23 }
  0x42   : > { %2134 = vmatprep.subr.bf16.mxu0 %v2302_v30  ;;  %2072 = vmatprep.mubr.msk.bf16.mxu1 %vm507_vm3, %v1829_v63 }
  0x43   : > { %2136 = vmatprep.mubr.msk.bf16.mxu0 %vm507_vm3, %v1802_v47 }
  0x44   : > { %2071 = vmatpush3.bf16.msra.mxu1 %v2301_v23 }
  0x45   : > { %2135 = vmatpush3.bf16.msra.mxu0 %v2302_v30  ;;  %2080 = vmatprep.subr.bf16.mxu1 %v2303_v1 }
  0x46   : > { %2144 = vmatprep.subr.bf16.mxu0 %v2304_v2 }
  0x47   : > { %2073 = vmatmul.mubr.msk.bf16.vlgmr.msra.gmra.mrb[0].mxu1 %vm507_vm3, %v2691_v3 }
  0x48   : > { %2081 = vmatpush3.bf16.msra.mxu1 %v2303_v1  ;;  %2137 = vmatmul.mubr.msk.bf16.vlgmr.msra.gmra.mrb[0].mxu0 %vm507_vm3, %v1803_v53 }
  0x49   : > { %2145 = vmatpush3.bf16.msra.mxu0 %v2304_v2  ;;  %2082 = vmatprep.subr.bf16.mxu1 %v2305_v4 }
  0x4a   : > { %2146 = vmatprep.subr.bf16.mxu0 %v2306_v6  ;;  %2076 = vmatprep.mubr.msk.bf16.mxu1 %vm507_vm3, %v2700_v10 }
  0x4b   : > { %2140 = vmatprep.mubr.msk.bf16.mxu0 %vm507_vm3, %v1804_v59 }
  0x4c   : > { %2083 = vmatpush3.bf16.msra.mxu1 %v2305_v4 }
  0x4d   : > { %2147 = vmatpush3.bf16.msra.mxu0 %v2306_v6  ;;  %2084 = vmatprep.subr.bf16.mxu1 %v2307_v15 }
  0x4e   : > { %2148 = vmatprep.subr.bf16.mxu0 %v2308_v20 }
  0x4f   : > { %2077 = vmatmul.mubr.msk.bf16.gmra.mrb[4].mxu1 %vm507_vm3, %v1832_v21 }
  0x50   : > { %2085 = vmatpush3.bf16.msra.mxu1 %v2307_v15  ;;  %2141 = vmatmul.mubr.msk.bf16.gmra.mrb[4].mxu0 %vm507_vm3, %v1910_v24 }
  0x51   : > { %2149 = vmatpush3.bf16.msra.mxu0 %v2308_v20  ;;  %2086 = vmatprep.subr.bf16.mxu1 %v2310_v25 }
  0x52   : > { %2150 = vmatprep.subr.bf16.mxu0 %v2311_v28  ;;  %2088 = vmatprep.mubr.msk.bf16.mxu1 %vm507_vm3, %v1849_v33 }
  0x53   : > { %2152 = vmatprep.mubr.msk.bf16.mxu0 %vm507_vm3, %v2515_v16  ;;  %v1508_v16 = vrot.slane %v338_v34, 5 }
  0x54   : > { %2087 = vmatpush3.bf16.msra.mxu1 %v2310_v25 }
  0x55   : > { %2151 = vmatpush3.bf16.msra.mxu0 %v2311_v28  ;;  %2176 = vmatprep.subr.bf16.mxu1 %v2313_v35 }
  0x56   : > { %2160 = vmatprep.subr.bf16.mxu0 %v2313_v35 }
  0x57   : > { %2089 = vmatmul.mubr.msk.bf16.vlgmr.msra.gmra.mrb[0].mxu1 %vm507_vm3, %v1850_v9 }
  0x58   : > { %2153 = vmatmul.mubr.msk.bf16.vlgmr.msra.gmra.mrb[0].mxu0 %vm507_vm3, %v2562_v58  ;;  %2180 = vmatpush3.bf16.msra.mxu1 %v2313_v35  ;;  %v1927_v58 = vcombine.low %v2604_v27, %v1393_v31 }
  0x59   : > { %2161 = vmatpush3.bf16.msra.mxu0 %v2313_v35  ;;  %2177 = vmatprep.subr.bf16.mxu1 %v2315_v26 }
  0x5a   : > { %2162 = vmatprep.subr.bf16.mxu0 %v2315_v26  ;;  %2092 = vmatprep.mubr.msk.bf16.mxu1 %vm507_vm3, %v1851_v43 }
  0x5b   : > { %2156 = vmatprep.mubr.msk.bf16.mxu0 %vm507_vm3, %v2600_v5  ;;  %v1509_v5 = vsel %vm2569_vm6, %v1936_v13, %v1508_v16 }
  0x5c   : > { %2181 = vmatpush3.bf16.msra.mxu1 %v2315_v26  ;;  %v1945_v36 = vcombine.low %v2662_v8, %v1509_v5 }
  0x5d   : > { %2163 = vmatpush3.bf16.msra.mxu0 %v2315_v26  ;;  %2178 = vmatprep.subr.bf16.mxu1 %v2317_v29 }
  0x5e   : > { %2164 = vmatprep.subr.bf16.mxu0 %v2317_v29 }
  0x5f   : > { %2093 = vmatmul.mubr.msk.bf16.gmra.mrb[4].mxu1 %vm507_vm3, %v1852_v57 }
  0x60   : > { %2157 = vmatmul.mubr.msk.bf16.gmra.mrb[4].mxu0 %vm507_vm3, %v1927_v58  ;;  %2182 = vmatpush3.bf16.msra.mxu1 %v2317_v29 }
  0x61   : > { %2165 = vmatpush3.bf16.msra.mxu0 %v2317_v29  ;;  %2179 = vmatprep.subr.bf16.mxu1 %v2318_v32 }
  0x62   : > { %2166 = vmatprep.subr.bf16.mxu0 %v2318_v32  ;;  %2168 = vmatprep.mubr.msk.bf16.mxu0 %vm507_vm3, %v2691_v3 }
  0x63   : > { %2172 = vmatprep.mubr.msk.bf16.mxu1 %vm507_vm3, %v1832_v21 }
  0x64   : > { %2183 = vmatpush3.bf16.msra.mxu1 %v2318_v32 }
  0x65   : > { %2167 = vmatpush3.bf16.msra.mxu0 %v2318_v32 }
  0x67   : > { %2173 = vmatmul.mubr.msk.bf16.vlgmr.msra.gmra.mrb[8].mxu1 %vm507_vm3, %v1945_v36 }
  0x68   : > { %2169 = vmatmul.mubr.msk.bf16.vlgmr.msra.gmra.mrb[0].mxu0 %vm507_vm3, %v2700_v10 }
 0x12a   : > { %v2090_v38 = vpop.f32.mrb[0].mxu1 }
 0x12b   : > { %v964_v0 = vpop.f32.mrb[1].mxu1 }
 0x12c   : > { %v2091_v27 = vpop.f32.mrb[2].mxu1 }
 0x12d   : > { %v967_v45 = vpop.f32.mrb[3].mxu1 }
 0x132   : > { %v2094_v46 = vpop.f32.mrb[4].mxu1 }
 0x133   : > { %v2158_v47 = vpop.f32.mrb[4].mxu0  ;;  %v980_v48 = vpop.f32.mrb[5].mxu1 }
 0x134   : > { %v2188_v61 = vadd.f32 %v2158_v47, %v2094_v46  ;;  %v1482_v14 = vpop.f32.mrb[5].mxu0  ;;  %v2095_v22 = vpop.f32.mrb[6].mxu1 }
 0x135   : > { %v2190_v49 = vadd.f32 %v1482_v14, %v980_v48  ;;  %v2159_v50 = vpop.f32.mrb[6].mxu0  ;;  %v983_v51 = vpop.f32.mrb[7].mxu1 }
 0x136   : > { %v2192_v52 = vadd.f32 %v2159_v50, %v2095_v22  ;;  %v1485_v53 = vpop.f32.mrb[7].mxu0 }
 0x137   : > { %v2194_v54 = vadd.f32 %v1485_v53, %v983_v51 }
 0x13a   : > { %v2174_v56 = vpop.f32.mrb[8].mxu1 }
 0x13b   : > { %v2170_v37 = vpop.f32.mrb[0].mxu0  ;;  %v2189_v44 = vadd.f32 %v2188_v61, %v2174_v56  ;;  %v1598_v8 = vpop.f32.mrb[9].mxu1 }
 0x13c   : > { %v2184_v7 = vadd.f32 %v2170_v37, %v2090_v38  ;;  %v1582_v59 = vpop.f32.mrb[1].mxu0  ;;  %v2191_v60 = vadd.f32 %v2190_v49, %v1598_v8  ;;  %v2175_v62 = vpop.f32.mrb[10].mxu1 }
 0x13d   : > { %v1634_v23 = vadd.f32 %v2189_v44, %v1954_v55  ;;  %v2185_v30 = vadd.f32 %v1582_v59, %v964_v0  ;;  %v2171_v63 = vpop.f32.mrb[2].mxu0  ;;  %v2193_v1 = vadd.f32 %v2192_v52, %v2175_v62  ;;  %v1601_v2 = vpop.f32.mrb[11].mxu1 }
 0x13e   : > { %v1630_v3 = vadd.f32 %v2184_v7, %v1954_v55  ;;  %v1632_v4 = vadd.f32 %v2191_v60, %v1954_v55  ;;  %v2186_v6 = vadd.f32 %v2171_v63, %v2091_v27  ;;  %v1585_v10 = vpop.f32.mrb[3].mxu0  ;;  %v2195_v12 = vadd.f32 %v2194_v54, %v1601_v2 }
 0x13f   : > { %v1642_v15 = vmax.f32 %v1634_v23, 0.0  ;;  %v1628_v18 = vadd.f32 %v2185_v30, %v1954_v55  ;;  %v1635_v19 = vadd.f32 %v2193_v1, %v1954_v55  ;;  %v2187_v20 = vadd.f32 %v1585_v10, %v967_v45 }
 0x140   : > { %v1638_v21 = vmax.f32 %v1630_v3, 0.0  ;;  %v1640_v24 = vmax.f32 %v1632_v4, 0.0  ;;  %v1631_v25 = vadd.f32 %v2186_v6, %v1954_v55  ;;  %v1633_v11 = vadd.f32 %v2195_v12, %v1954_v55 }
 0x141   : > { %v1650_v17 = vpack.c.bf16 %v1642_v15, %v1642_v15  ;;  %v1636_v34 = vmax.f32 %v1628_v18, 0.0  ;;  %v1643_v28 = vmax.f32 %v1635_v19, 0.0  ;;  %v1629_v33 = vadd.f32 %v2187_v20, %v1954_v55 }
 0x142   : > { %v1646_v35 = vpack.c.bf16 %v1638_v21, %v1638_v21  ;;  %v1648_v39 = vpack.c.bf16 %v1640_v24, %v1640_v24  ;;  %v1639_v40 = vmax.f32 %v1631_v25, 0.0  ;;  %v1641_v9 = vmax.f32 %v1633_v11, 0.0 }
 0x143   : > { %1659 = vst.msk [vmem:[%s316_s13 + $0x18] sm:$0xf] %vm1652_vm7, %v1650_v17  ;;  %v1644_v26 = vpack.c.bf16 %v1636_v34, %v1636_v34  ;;  %v1651_v41 = vpack.c.bf16 %v1643_v28, %v1643_v28  ;;  %v1637_v42 = vmax.f32 %v1629_v33, 0.0 }
 0x144   : > { %1655 = vst.msk [vmem:[%s316_s13 + $0x8] sm:$0xf] %vm1652_vm7, %v1646_v35  ;;  %1657 = vst.msk [vmem:[%s316_s13 + $0x10] sm:$0xf] %vm1652_vm7, %v1648_v39  ;;  %v1647_v43 = vpack.c.bf16 %v1639_v40, %v1639_v40  ;;  %v1649_v29 = vpack.c.bf16 %v1641_v9, %v1641_v9 }
 0x145   : > { %1653 = vst.msk [vmem:[%s316_s13] sm:$0xf] %vm1652_vm7, %v1644_v26  ;;  %1660 = vst.msk [vmem:[%s316_s13 + $0x1c] sm:$0xf] %vm1652_vm7, %v1651_v41  ;;  %v1645_v31 = vpack.c.bf16 %v1637_v42, %v1637_v42 }
 0x146   : > { %1656 = vst.msk [vmem:[%s316_s13 + $0xc] sm:$0xf] %vm1652_vm7, %v1647_v43  ;;  %1658 = vst.msk [vmem:[%s316_s13 + $0x14] sm:$0xf] %vm1652_vm7, %v1649_v29 }
 0x147   : > { %1654 = vst.msk [vmem:[%s316_s13 + $0x4] sm:$0xf] %vm1652_vm7, %v1645_v31 }
 0x148 PF: > { %s14_s17 = sadd.s32 1, %s2341_s17   ;;  %s2808_s15 = smov %s2337_s16 }
 0x149   : > { %p11_p5 = scmp.ge.s32.totalorder %s14_s17, 4   ;;  %s2809_s16 = smov %s2811_s18 }
 0x14b   :  { %13 = sbr.rel (!%p11_p5) target bundleno = 2 (0x2), region = 77 }

// kernel: _lambda_.27
= control target key start
LH: loop header
LB: loop body
LE: loop exit
PB: predicated region body
PF: predicated region fallthrough
CT: control target
= control target key end

     0   :  { %vm523_vm0 = vcmask 523264   ;;  %s1305_s1 = inlined_call_operand.vmem [shape: bf16[576,256], index: 1, kind: input, shape index: {}]   ;;  %s1306_s0 = inlined_call_operand.vmem [shape: bf16[32,576], index: 0, kind: input, shape index: {}]   ;;  %s1307_s2 = inlined_call_operand.vmem [shape: f32[1,256], index: 2, kind: input, shape index: {}]   ;;  %s1308_s4 = inlined_call_operand.vmem [shape: bf16[32,128], index: 4, kind: output, shape index: {1}]   ;;  %s1309_s3 = inlined_call_operand.vmem [shape: bf16[32,128], index: 3, kind: output, shape index: {0}]  }
   0x1   :  { %v896_v0 = vld [vmem:[%s1305_s1 + $0x4] ss:$8 sps:$4 sm:$0xff]   ;;  %v900_v2 = vld [vmem:[%s1305_s1] ss:$8 sps:$4 sm:$0xff]   ;;  %v902_v4 = vld [vmem:[%s1305_s1 + $0x14] ss:$8 sps:$4 sm:$0xff]  }
   0x2   :  { %v898_v1 = vld [vmem:[%s1305_s1 + $0x104] ss:$8 sps:$4 sm:$0xff]   ;;  %530 = vmatprep.subr.bf16.mxu1 %v896_v0  ;;  %v901_v3 = vld [vmem:[%s1305_s1 + $0x100] ss:$8 sps:$4 sm:$0xff]   ;;  %v904_v5 = vld [vmem:[%s1305_s1 + $0x114] ss:$8 sps:$4 sm:$0xff]  }
   0x3   :  { %583 = vmatprep.subr.bf16.mxu0 %v898_v1  ;;  %531 = vmatpush1.bf16.msra.mxu1 %v900_v2  ;;  %v906_v6 = vld [vmem:[%s1305_s1 + $0x10] ss:$8 sps:$4 sm:$0xff]   ;;  %v908_v8 = vld [vmem:[%s1305_s1 + $0x24] ss:$8 sps:$4 sm:$0xff]   ;;  %v912_v10 = vld [vmem:[%s1305_s1 + $0x20] ss:$8 sps:$4 sm:$0xff]  }
   0x4   :  { %584 = vmatpush1.bf16.msra.mxu0 %v901_v3  ;;  %532 = vmatprep.subr.bf16.mxu1 %v902_v4  ;;  %v907_v7 = vld [vmem:[%s1305_s1 + $0x110] ss:$8 sps:$4 sm:$0xff]   ;;  %v910_v9 = vld [vmem:[%s1305_s1 + $0x124] ss:$8 sps:$4 sm:$0xff]   ;;  %v913_v11 = vld [vmem:[%s1305_s1 + $0x120] ss:$8 sps:$4 sm:$0xff]  }
   0x5   :  { %585 = vmatprep.subr.bf16.mxu0 %v904_v5  ;;  %v914_v12 = vld [vmem:[%s1305_s1 + $0x34] ss:$8 sps:$4 sm:$0xff]   ;;  %v918_v14 = vld [vmem:[%s1305_s1 + $0x30] ss:$8 sps:$4 sm:$0xff]   ;;  %v920_v16 = vld [vmem:[%s1305_s1 + $0x44] ss:$8 sps:$4 sm:$0xff]  }
   0x6   :  { %v916_v13 = vld [vmem:[%s1305_s1 + $0x134] ss:$8 sps:$4 sm:$0xff]   ;;  %v919_v15 = vld [vmem:[%s1305_s1 + $0x130] ss:$8 sps:$4 sm:$0xff]   ;;  %v922_v17 = vld [vmem:[%s1305_s1 + $0x144] ss:$8 sps:$4 sm:$0xff]  }
   0x7   :  { %533 = vmatpush1.bf16.msra.mxu1 %v906_v6  ;;  %v924_v18 = vld [vmem:[%s1305_s1 + $0x40] ss:$8 sps:$4 sm:$0xff]   ;;  %v926_v20 = vld [vmem:[%s1305_s1 + $0x54] ss:$8 sps:$4 sm:$0xff]   ;;  %v930_v22 = vld [vmem:[%s1305_s1 + $0x50] ss:$8 sps:$4 sm:$0xff]  }
   0x8   :  { %586 = vmatpush1.bf16.msra.mxu0 %v907_v7  ;;  %534 = vmatprep.subr.bf16.mxu1 %v908_v8  ;;  %v925_v19 = vld [vmem:[%s1305_s1 + $0x140] ss:$8 sps:$4 sm:$0xff]   ;;  %v928_v21 = vld [vmem:[%s1305_s1 + $0x154] ss:$8 sps:$4 sm:$0xff]   ;;  %v931_v23 = vld [vmem:[%s1305_s1 + $0x150] ss:$8 sps:$4 sm:$0xff]  }
   0x9   :  { %587 = vmatprep.subr.bf16.mxu0 %v910_v9  ;;  %v932_v24 = vld [vmem:[%s1305_s1 + $0x64] ss:$8 sps:$4 sm:$0xff]   ;;  %v936_v26 = vld [vmem:[%s1305_s1 + $0x60] ss:$8 sps:$4 sm:$0xff]   ;;  %v938_v28 = vld [vmem:[%s1305_s1 + $0x74] ss:$8 sps:$4 sm:$0xff]  }
   0xa   :  { %v934_v25 = vld [vmem:[%s1305_s1 + $0x164] ss:$8 sps:$4 sm:$0xff]   ;;  %v937_v27 = vld [vmem:[%s1305_s1 + $0x160] ss:$8 sps:$4 sm:$0xff]   ;;  %v940_v29 = vld [vmem:[%s1305_s1 + $0x174] ss:$8 sps:$4 sm:$0xff]  }
   0xb   :  { %535 = vmatpush1.bf16.msra.mxu1 %v912_v10  ;;  %v942_v30 = vld [vmem:[%s1305_s1 + $0x70] ss:$8 sps:$4 sm:$0xff]   ;;  %v944_v32 = vld [vmem:[%s1305_s1 + $0x84] ss:$8 sps:$4 sm:$0xff]   ;;  %v948_v34 = vld [vmem:[%s1305_s1 + $0x80] ss:$8 sps:$4 sm:$0xff]  }
   0xc   :  { %588 = vmatpush1.bf16.msra.mxu0 %v913_v11  ;;  %536 = vmatprep.subr.bf16.mxu1 %v914_v12  ;;  %v943_v31 = vld [vmem:[%s1305_s1 + $0x170] ss:$8 sps:$4 sm:$0xff]   ;;  %v946_v33 = vld [vmem:[%s1305_s1 + $0x184] ss:$8 sps:$4 sm:$0xff]   ;;  %v949_v35 = vld [vmem:[%s1305_s1 + $0x180] ss:$8 sps:$4 sm:$0xff]  }
   0xd   :  { %589 = vmatprep.subr.bf16.mxu0 %v916_v13  ;;  %v950_v36 = vld [vmem:[%s1305_s1 + $0x94] ss:$8 sps:$4 sm:$0xff]   ;;  %v954_v38 = vld [vmem:[%s1305_s1 + $0x90] ss:$8 sps:$4 sm:$0xff]   ;;  %v956_v40 = vld [vmem:[%s1305_s1 + $0xa4] ss:$8 sps:$4 sm:$0xff]  }
   0xe   :  { %v952_v37 = vld [vmem:[%s1305_s1 + $0x194] ss:$8 sps:$4 sm:$0xff]   ;;  %v955_v39 = vld [vmem:[%s1305_s1 + $0x190] ss:$8 sps:$4 sm:$0xff]   ;;  %v958_v41 = vld [vmem:[%s1305_s1 + $0x1a4] ss:$8 sps:$4 sm:$0xff]  }
   0xf   :  { %537 = vmatpush1.bf16.msra.mxu1 %v918_v14  ;;  %v960_v42 = vld [vmem:[%s1305_s1 + $0xa0] ss:$8 sps:$4 sm:$0xff]   ;;  %v962_v44 = vld [vmem:[%s1305_s1 + $0xb4] ss:$8 sps:$4 sm:$0xff]   ;;  %v966_v46 = vld [vmem:[%s1305_s1 + $0xb0] ss:$8 sps:$4 sm:$0xff]  }
  0x10   :  { %590 = vmatpush1.bf16.msra.mxu0 %v919_v15  ;;  %538 = vmatprep.subr.bf16.mxu1 %v920_v16  ;;  %v961_v43 = vld [vmem:[%s1305_s1 + $0x1a0] ss:$8 sps:$4 sm:$0xff]   ;;  %v964_v45 = vld [vmem:[%s1305_s1 + $0x1b4] ss:$8 sps:$4 sm:$0xff]   ;;  %v967_v47 = vld [vmem:[%s1305_s1 + $0x1b0] ss:$8 sps:$4 sm:$0xff]  }
  0x11   :  { %591 = vmatprep.subr.bf16.mxu0 %v922_v17  ;;  %v968_v48 = vld [vmem:[%s1305_s1 + $0xc4] ss:$8 sps:$4 sm:$0xff]   ;;  %v972_v52 = vld [vmem:[%s1305_s1 + $0xc0] ss:$8 sps:$4 sm:$0xff]   ;;  %v974_v54 = vld [vmem:[%s1305_s1 + $0xd4] ss:$8 sps:$4 sm:$0xff]  }
  0x12   :  { %v994_v49 = vld [vmem:[%s1306_s0 + $0x4] ss:$20 sps:$4 sm:$0xff]   ;;  %v997_v51 = vld [vmem:[%s1306_s0 + $0xc] ss:$20 sps:$4 sm:$0xff]   ;;  %v976_v55 = vld [vmem:[%s1305_s1 + $0x1d4] ss:$8 sps:$4 sm:$0xff]  }
  0x13   :  { %539 = vmatpush1.bf16.msra.mxu1 %v924_v18  ;;  %v970_v50 = vld [vmem:[%s1305_s1 + $0x1c4] ss:$8 sps:$4 sm:$0xff]   ;;  %562 = vmatprep.mubr.bf16.mxu1 %v994_v49  ;;  %v973_v53 = vld [vmem:[%s1305_s1 + $0x1c0] ss:$8 sps:$4 sm:$0xff]   ;;  %v978_v56 = vld [vmem:[%s1305_s1 + $0xd0] ss:$8 sps:$4 sm:$0xff]  }
  0x14   :  { %592 = vmatpush1.bf16.msra.mxu0 %v925_v19  ;;  %540 = vmatprep.subr.bf16.mxu1 %v926_v20  ;;  %v979_v57 = vld [vmem:[%s1305_s1 + $0x1d0] ss:$8 sps:$4 sm:$0xff]   ;;  %v980_v58 = vld [vmem:[%s1305_s1 + $0xe4] ss:$8 sps:$4 sm:$0xff]   ;;  %v984_v60 = vld [vmem:[%s1305_s1 + $0xe0] ss:$8 sps:$4 sm:$0xff]   ;;  %v103_v19 = vlaneseq }
  0x15   :  { %593 = vmatprep.subr.bf16.mxu0 %v928_v21  ;;  %615 = vmatprep.mubr.bf16.mxu0 %v997_v51  ;;  %v982_v59 = vld [vmem:[%s1305_s1 + $0x1e4] ss:$8 sps:$4 sm:$0xff]   ;;  %v985_v61 = vld [vmem:[%s1305_s1 + $0x1e0] ss:$8 sps:$4 sm:$0xff]   ;;  %v986_v62 = vld [vmem:[%s1305_s1 + $0xf4] ss:$8 sps:$4 sm:$0xff]  }
  0x16   :  { %v988_v63 = vld [vmem:[%s1305_s1 + $0x1f4] ss:$8 sps:$4 sm:$0xff]   ;;  %v990_v0 = vld [vmem:[%s1305_s1 + $0xf0] ss:$8 sps:$4 sm:$0xff]   ;;  %v1000_v2 = vld [vmem:[%s1305_s1 + $0x204] ss:$8 sps:$4 sm:$0xff]  }
  0x17   :  { %541 = vmatpush1.bf16.msra.mxu1 %v930_v22  ;;  %v991_v1 = vld [vmem:[%s1305_s1 + $0x1f0] ss:$8 sps:$4 sm:$0xff]   ;;  %v992_v3 = vld [vmem:[%s1306_s0] ss:$20 sps:$4 sm:$0xff]   ;;  %v995_v4 = vld [vmem:[%s1306_s0 + $0x8] ss:$20 sps:$4 sm:$0xff]  }
  0x18   :  { %594 = vmatpush1.bf16.msra.mxu0 %v931_v23  ;;  %542 = vmatprep.subr.bf16.mxu1 %v932_v24  ;;  %v998_v5 = vld [vmem:[%s1305_s1 + $0x200] ss:$8 sps:$4 sm:$0xff]   ;;  %v1003_v6 = vld [vmem:[%s1305_s1 + $0x214] ss:$8 sps:$4 sm:$0xff]   ;;  %v1001_v9 = vld [vmem:[%s1305_s1 + $0x210] ss:$8 sps:$4 sm:$0xff]  }
  0x19   :  { %595 = vmatprep.subr.bf16.mxu0 %v934_v25  ;;  %v1004_v7 = vld [vmem:[%s1306_s0 + $0x2c] ss:$20 sps:$4 sm:$0xff]   ;;  %v1006_v8 = vld [vmem:[%s1306_s0 + $0x34] ss:$20 sps:$4 sm:$0xff]   ;;  %v1009_v12 = vld [vmem:[%s1306_s0 + $0x30] ss:$20 sps:$4 sm:$0xff]  }
  0x1a   :  { %v1012_v10 = vld [vmem:[%s1305_s1 + $0x224] ss:$8 sps:$4 sm:$0xff]   ;;  %v1008_v11 = vld [vmem:[%s1306_s0 + $0x28] ss:$20 sps:$4 sm:$0xff]   ;;  %v1013_v15 = vld [vmem:[%s1305_s1 + $0x230] ss:$8 sps:$4 sm:$0xff]  }
  0x1b   :  { %543 = vmatpush1.bf16.msra.mxu1 %v936_v26  ;;  %v1010_v13 = vld [vmem:[%s1305_s1 + $0x220] ss:$8 sps:$4 sm:$0xff]   ;;  %v1015_v14 = vld [vmem:[%s1305_s1 + $0x234] ss:$8 sps:$4 sm:$0xff]   ;;  %v1018_v16 = vmov 0   ;;  %v104_v20 = vshrl.u32 %v103_v19, 7 }
  0x1c   :  { %596 = vmatpush1.bf16.msra.mxu0 %v937_v27  ;;  %544 = vmatprep.subr.bf16.mxu1 %v938_v28  ;;  %v1016_v17 = vld [vmem:[%s1306_s0 + $0x10] ss:$20 sps:$4 sm:$0xff]   ;;  %v1017_v18 = vld [vmem:[%s1306_s0 + $0x38] ss:$20 sps:$4 sm:$0xff]   ;;  %v101_v26 = vld [vmem:[%s1307_s2] sm:$0x3] }
  0x1d   :  { %597 = vmatprep.subr.bf16.mxu0 %v940_v29  ;;  %v105_v24 = vsub.s32 0, %v104_v20  ;;  %v109_v27 = vsub.s32 1, %v104_v20 }
  0x1f   :  { %545 = vmatpush1.bf16.msra.mxu1 %v942_v30  ;;  %v106_v28 = vrot.slane %v101_v26, %v105_v24  ;;  %v110_v29 = vrot.slane %v101_v26, %v109_v27 }
  0x20   :  { %598 = vmatpush1.bf16.msra.mxu0 %v943_v31  ;;  %546 = vmatprep.subr.bf16.mxu1 %v944_v32 }
  0x21   :  { %599 = vmatprep.subr.bf16.mxu0 %v946_v33 }
  0x23   :  { %547 = vmatpush1.bf16.msra.mxu1 %v948_v34 }
  0x24   :  { %600 = vmatpush1.bf16.msra.mxu0 %v949_v35  ;;  %548 = vmatprep.subr.bf16.mxu1 %v950_v36 }
  0x25   :  { %601 = vmatprep.subr.bf16.mxu0 %v952_v37 }
  0x27   :  { %549 = vmatpush1.bf16.msra.mxu1 %v954_v38 }
  0x28   :  { %602 = vmatpush1.bf16.msra.mxu0 %v955_v39  ;;  %550 = vmatprep.subr.bf16.mxu1 %v956_v40 }
  0x29   :  { %603 = vmatprep.subr.bf16.mxu0 %v958_v41 }
  0x2b   :  { %551 = vmatpush1.bf16.msra.mxu1 %v960_v42 }
  0x2c   :  { %604 = vmatpush1.bf16.msra.mxu0 %v961_v43  ;;  %552 = vmatprep.subr.bf16.mxu1 %v962_v44 }
  0x2d   :  { %605 = vmatprep.subr.bf16.mxu0 %v964_v45 }
  0x2f   :  { %553 = vmatpush1.bf16.msra.mxu1 %v966_v46 }
  0x30   :  { %606 = vmatpush1.bf16.msra.mxu0 %v967_v47  ;;  %554 = vmatprep.subr.bf16.mxu1 %v968_v48 }
  0x31   :  { %607 = vmatprep.subr.bf16.mxu0 %v970_v50 }
  0x33   :  { %555 = vmatpush1.bf16.msra.mxu1 %v972_v52 }
  0x34   :  { %608 = vmatpush1.bf16.msra.mxu0 %v973_v53  ;;  %556 = vmatprep.subr.bf16.mxu1 %v974_v54 }
  0x35   :  { %609 = vmatprep.subr.bf16.mxu0 %v976_v55 }
  0x37   :  { %557 = vmatpush1.bf16.msra.mxu1 %v978_v56 }
  0x38   :  { %610 = vmatpush1.bf16.msra.mxu0 %v979_v57  ;;  %558 = vmatprep.subr.bf16.mxu1 %v980_v58 }
  0x39   :  { %611 = vmatprep.subr.bf16.mxu0 %v982_v59 }
  0x3b   :  { %559 = vmatpush1.bf16.msra.mxu1 %v984_v60 }
  0x3c   :  { %612 = vmatpush1.bf16.msra.mxu0 %v985_v61  ;;  %560 = vmatprep.subr.bf16.mxu1 %v986_v62 }
  0x3d   :  { %613 = vmatprep.subr.bf16.mxu0 %v988_v63 }
  0x3f   :  { %561 = vmatpush1.bf16.msra.mxu1 %v990_v0 }
  0x40   :  { %614 = vmatpush1.bf16.msra.mxu0 %v991_v1  ;;  %863 = vmatprep.subr.bf16.mxu1 %v1000_v2 }
  0x41   :  { %636 = vmatprep.subr.bf16.mxu0 %v1000_v2 }
  0x42   :  { %563 = vmatmul.mubr.bf16.vlgmr.msra.gmra.mrb[0].mxu1 %v992_v3 }
  0x43   :  { %616 = vmatmul.mubr.bf16.vlgmr.msra.gmra.mrb[0].mxu0 %v995_v4  ;;  %867 = vmatpush1.bf16.msra.mxu1 %v998_v5 }
  0x44   :  { %637 = vmatpush1.bf16.msra.mxu0 %v998_v5  ;;  %864 = vmatprep.subr.bf16.mxu1 %v1003_v6 }
  0x45   :  { %638 = vmatprep.subr.bf16.mxu0 %v1003_v6  ;;  %572 = vmatprep.mubr.bf16.mxu1 %v1004_v7 }
  0x46   :  { %625 = vmatprep.mubr.bf16.mxu0 %v1006_v8 }
  0x47   :  { %868 = vmatpush1.bf16.msra.mxu1 %v1001_v9 }
  0x48   :  { %639 = vmatpush1.bf16.msra.mxu0 %v1001_v9  ;;  %865 = vmatprep.subr.bf16.mxu1 %v1012_v10 }
  0x49   :  { %640 = vmatprep.subr.bf16.mxu0 %v1012_v10 }
  0x4a   :  { %573 = vmatmul.mubr.bf16.gmra.mrb[4].mxu1 %v1008_v11 }
  0x4b   :  { %626 = vmatmul.mubr.bf16.gmra.mrb[4].mxu0 %v1009_v12  ;;  %869 = vmatpush1.bf16.msra.mxu1 %v1010_v13 }
  0x4c   :  { %641 = vmatpush1.bf16.msra.mxu0 %v1010_v13  ;;  %866 = vmatprep.subr.bf16.mxu1 %v1015_v14 }
  0x4d   :  { %642 = vmatprep.subr.bf16.mxu0 %v1015_v14  ;;  %668 = vmatprep.mubr.bf16.mxu0 %v1018_v16 }
  0x4e   :  { %678 = vmatprep.mubr.bf16.mxu1 %v1018_v16 }
  0x4f   :  { %870 = vmatpush1.bf16.msra.mxu1 %v1013_v15 }
  0x50   :  { %643 = vmatpush1.bf16.msra.mxu0 %v1013_v15 }
  0x52   :  { %824 = vmatmul.mubr.msk.bf16.vlgmr.msra.gmra.mrb[8].mxu1 %vm523_vm0, %v1017_v18 }
  0x53   :  { %823 = vmatmul.mubr.msk.bf16.vlgmr.msra.gmra.mrb[0].mxu0 %vm523_vm0, %v1016_v17 }
 0x115   :  { %v564_v21 = vpop.f32.mrb[0].mxu1 }
 0x116   :  { %v566_v22 = vpop.f32.mrb[1].mxu1  ;;  %v565_v46 = vadd.f32 %v564_v21, %v106_v28 }
 0x117   :  { %v568_v23 = vpop.f32.mrb[2].mxu1  ;;  %v567_v47 = vadd.f32 %v566_v22, %v110_v29 }
 0x118   :  { %v570_v25 = vpop.f32.mrb[3].mxu1  ;;  %v569_v50 = vadd.f32 %v568_v23, %v106_v28 }
 0x119   :  { %v571_v55 = vadd.f32 %v570_v25, %v110_v29 }
 0x11d   :  { %v574_v30 = vpop.f32.mrb[4].mxu1 }
 0x11e   :  { %v627_v31 = vpop.f32.mrb[4].mxu0  ;;  %v575_v32 = vadd.f32 %v574_v30, %v106_v28  ;;  %v576_v33 = vpop.f32.mrb[5].mxu1 }
 0x11f   :  { %v629_v34 = vpop.f32.mrb[5].mxu0  ;;  %v577_v35 = vadd.f32 %v576_v33, %v110_v29  ;;  %v578_v36 = vpop.f32.mrb[6].mxu1 }
 0x120   :  { %v631_v37 = vpop.f32.mrb[6].mxu0  ;;  %v628_v38 = vadd.f32 %v627_v31, %v575_v32  ;;  %v579_v39 = vadd.f32 %v578_v36, %v106_v28  ;;  %v580_v40 = vpop.f32.mrb[7].mxu1 }
 0x121   :  { %v633_v41 = vpop.f32.mrb[7].mxu0  ;;  %v630_v42 = vadd.f32 %v629_v34, %v577_v35  ;;  %v581_v43 = vadd.f32 %v580_v40, %v110_v29 }
 0x122   :  { %v632_v44 = vadd.f32 %v631_v37, %v579_v39 }
 0x123   :  { %v634_v45 = vadd.f32 %v633_v41, %v581_v43 }
 0x125   :  { %v680_v49 = vpop.f32.mrb[8].mxu1 }
 0x126   :  { %v670_v48 = vpop.f32.mrb[0].mxu0  ;;  %v681_v52 = vadd.f32 %v680_v49, %v628_v38  ;;  %v682_v54 = vpop.f32.mrb[9].mxu1 }
 0x127   :  { %v872_v51 = vadd.f32 %v670_v48, %v565_v46  ;;  %v672_v53 = vpop.f32.mrb[1].mxu0  ;;  %v683_v57 = vadd.f32 %v682_v54, %v630_v42  ;;  %v684_v59 = vpop.f32.mrb[10].mxu1 }
 0x128   :  { %v874_v56 = vadd.f32 %v672_v53, %v567_v47  ;;  %v674_v58 = vpop.f32.mrb[2].mxu0  ;;  %v685_v61 = vadd.f32 %v684_v59, %v632_v44  ;;  %v686_v63 = vpop.f32.mrb[11].mxu1  ;;  %v691_v3 = vmax.f32 %v681_v52, 0.0 }
 0x129   :  { %v876_v60 = vadd.f32 %v674_v58, %v569_v50  ;;  %v676_v62 = vpop.f32.mrb[3].mxu0  ;;  %v687_v1 = vadd.f32 %v686_v63, %v634_v45  ;;  %v689_v2 = vmax.f32 %v872_v51, 0.0 }
 0x12a   :  { %v878_v0 = vadd.f32 %v676_v62, %v571_v55  ;;  %v692_v5 = vmax.f32 %v685_v61, 0.0 }
 0x12b   :  { %v690_v4 = vmax.f32 %v876_v60, 0.0  ;;  %v859_v7 = vpack.c.bf16 %v687_v1, %v683_v57 }
 0x12c   :  { %v854_v6 = vpack.c.bf16 %v878_v0, %v874_v56  ;;  %v849_v9 = vpack.c.bf16 %v692_v5, %v691_v3 }
 0x12d   :  { %v844_v8 = vpack.c.bf16 %v690_v4, %v689_v2  ;;  %862 = vst [vmem:[%s1308_s4 + $0x8] sm:$0xff] %v859_v7  }
 0x12e   :  { %855 = vst [vmem:[%s1308_s4] sm:$0xff] %v854_v6   ;;  %861 = vst [vmem:[%s1309_s3 + $0x8] sm:$0xff] %v849_v9  }
 0x12f   :  { %845 = vst [vmem:[%s1309_s3] sm:$0xff] %v844_v8  }

// kernel: _lambda_.35
= control target key start
LH: loop header
LB: loop body
LE: loop exit
PB: predicated region body
PF: predicated region fallthrough
CT: control target
= control target key end

     0   :  { %8 = vsyncpa [#allocation3], 0  ;;  %vm385_vm0 = vcmask 261120   ;;  %s696_s0 = inlined_call_operand.vmem [shape: bf16[8,512], index: 0, kind: input, shape index: {}]   ;;  %s697_s1 = inlined_call_operand.vmem [shape: bf16[512,32], index: 1, kind: input, shape index: {}]   ;;  %s698_s2 = inlined_call_operand.vmem [shape: f32[1,32], index: 2, kind: input, shape index: {}]   ;;  %s699_s3 = inlined_call_operand.hbm [shape: f32[8,32], index: 3, kind: output, shape index: {}]  }
   0x1   :  { %v488_v0 = vld [vmem:[%s697_s1 + $0x40] sm:$0xff]   ;;  %v492_v4 = vld [vmem:[%s697_s1 + $0x48] sm:$0xff]   ;;  %v496_v8 = vld [vmem:[%s697_s1 + $0x50] sm:$0xff]  }
   0x2   :  { %v489_v1 = vld [vmem:[%s697_s1 + $0xc0] sm:$0xff]   ;;  %441 = vmatprep.subr.bf16.mxu0 %v488_v0  ;;  %v493_v5 = vld [vmem:[%s697_s1 + $0xc8] sm:$0xff]   ;;  %v497_v9 = vld [vmem:[%s697_s1 + $0xd0] sm:$0xff]  }
   0x3   :  { %v490_v2 = vld [vmem:[%s697_s1] sm:$0xff]   ;;  %463 = vmatprep.subr.bf16.mxu1 %v489_v1  ;;  %v494_v6 = vld [vmem:[%s697_s1 + $0x8] sm:$0xff]   ;;  %v498_v10 = vld [vmem:[%s697_s1 + $0x10] sm:$0xff]  }
   0x4   :  { %v491_v3 = vld [vmem:[%s697_s1 + $0x80] sm:$0xff]   ;;  %442 = vmatpush3.bf16.msra.mxu0 %v490_v2  ;;  %v495_v7 = vld [vmem:[%s697_s1 + $0x88] sm:$0xff]   ;;  %v499_v11 = vld [vmem:[%s697_s1 + $0x90] sm:$0xff]  }
   0x5   :  { %464 = vmatpush3.bf16.msra.mxu1 %v491_v3  ;;  %443 = vmatprep.subr.bf16.mxu0 %v492_v4  ;;  %v500_v12 = vld [vmem:[%s697_s1 + $0x58] sm:$0xff]   ;;  %v504_v16 = vld [vmem:[%s697_s1 + $0x60] sm:$0xff]   ;;  %v508_v20 = vld [vmem:[%s697_s1 + $0x68] sm:$0xff]  }
   0x6   :  { %465 = vmatprep.subr.bf16.mxu1 %v493_v5  ;;  %v501_v13 = vld [vmem:[%s697_s1 + $0xd8] sm:$0xff]   ;;  %v505_v17 = vld [vmem:[%s697_s1 + $0xe0] sm:$0xff]   ;;  %v509_v21 = vld [vmem:[%s697_s1 + $0xe8] sm:$0xff]  }
   0x7   :  { %v502_v14 = vld [vmem:[%s697_s1 + $0x18] sm:$0xff]   ;;  %v506_v18 = vld [vmem:[%s697_s1 + $0x20] sm:$0xff]   ;;  %v510_v22 = vld [vmem:[%s697_s1 + $0x28] sm:$0xff]  }
   0x8   :  { %444 = vmatpush3.bf16.msra.mxu0 %v494_v6  ;;  %v503_v15 = vld [vmem:[%s697_s1 + $0x98] sm:$0xff]   ;;  %v507_v19 = vld [vmem:[%s697_s1 + $0xa0] sm:$0xff]   ;;  %v511_v23 = vld [vmem:[%s697_s1 + $0xa8] sm:$0xff]  }
   0x9   :  { %466 = vmatpush3.bf16.msra.mxu1 %v495_v7  ;;  %445 = vmatprep.subr.bf16.mxu0 %v496_v8  ;;  %v512_v24 = vld [vmem:[%s697_s1 + $0x70] sm:$0xff]   ;;  %v516_v28 = vld [vmem:[%s697_s1 + $0x78] sm:$0xff]   ;;  %v404_v38 = vld [vmem:[%s698_s2] ss:$0 sm:$0xff] }
   0xa   :  { %467 = vmatprep.subr.bf16.mxu1 %v497_v9  ;;  %v513_v25 = vld [vmem:[%s697_s1 + $0xf0] sm:$0xff]   ;;  %v517_v29 = vld [vmem:[%s697_s1 + $0xf8] sm:$0xff]  }
   0xb   :  { %v514_v26 = vld [vmem:[%s697_s1 + $0x30] sm:$0xff]   ;;  %v518_v30 = vld [vmem:[%s697_s1 + $0x38] sm:$0xff]  }
   0xc   :  { %446 = vmatpush3.bf16.msra.mxu0 %v498_v10  ;;  %v515_v27 = vld [vmem:[%s697_s1 + $0xb0] sm:$0xff]   ;;  %v519_v31 = vld [vmem:[%s697_s1 + $0xb8] sm:$0xff]  }
   0xd   :  { %468 = vmatpush3.bf16.msra.mxu1 %v499_v11  ;;  %447 = vmatprep.subr.bf16.mxu0 %v500_v12  ;;  %v520_v32 = vld [vmem:[%s696_s0] ss:$16 sps:$4 sm:$0xff]   ;;  %v522_v33 = vld [vmem:[%s696_s0 + $0x4] ss:$16 sps:$4 sm:$0xff]   ;;  %v523_v34 = vld [vmem:[%s696_s0 + $0x8] ss:$16 sps:$4 sm:$0xff]  }
   0xe   :  { %469 = vmatprep.subr.bf16.mxu1 %v501_v13  ;;  %v525_v35 = vld [vmem:[%s696_s0 + $0xc] ss:$16 sps:$4 sm:$0xff]   ;;  %335 = vmatprep.mubr.bf16.mxu0 %v522_v33 }
   0xf   :  { %376 = vmatprep.mubr.bf16.mxu1 %v525_v35 }
  0x10   :  { %448 = vmatpush3.bf16.msra.mxu0 %v502_v14 }
  0x11   :  { %470 = vmatpush3.bf16.msra.mxu1 %v503_v15  ;;  %449 = vmatprep.subr.bf16.mxu0 %v504_v16 }
  0x12   :  { %471 = vmatprep.subr.bf16.mxu1 %v505_v17 }
  0x14   :  { %450 = vmatpush3.bf16.msra.mxu0 %v506_v18 }
  0x15   :  { %472 = vmatpush3.bf16.msra.mxu1 %v507_v19  ;;  %451 = vmatprep.subr.bf16.mxu0 %v508_v20 }
  0x16   :  { %473 = vmatprep.subr.bf16.mxu1 %v509_v21 }
  0x18   :  { %452 = vmatpush3.bf16.msra.mxu0 %v510_v22 }
  0x19   :  { %474 = vmatpush3.bf16.msra.mxu1 %v511_v23  ;;  %453 = vmatprep.subr.bf16.mxu0 %v512_v24 }
  0x1a   :  { %475 = vmatprep.subr.bf16.mxu1 %v513_v25 }
  0x1c   :  { %454 = vmatpush3.bf16.msra.mxu0 %v514_v26 }
  0x1d   :  { %476 = vmatpush3.bf16.msra.mxu1 %v515_v27  ;;  %455 = vmatprep.subr.bf16.mxu0 %v516_v28 }
  0x1e   :  { %477 = vmatprep.subr.bf16.mxu1 %v517_v29 }
  0x20   :  { %456 = vmatpush3.bf16.msra.mxu0 %v518_v30 }
  0x21   :  { %478 = vmatpush3.bf16.msra.mxu1 %v519_v31 }
  0x23   :  { %336 = vmatmul.mubr.bf16.vlgmr.msra.gmra.mrb[0].mxu0 %v520_v32 }
  0x24   :  { %377 = vmatmul.mubr.bf16.vlgmr.msra.gmra.mrb[0].mxu1 %v523_v34 }
  0xf6   :  { %v457_v36 = vpop.f32.mrb[0].mxu0 }
  0xf7   :  { %v479_v37 = vpop.f32.mrb[0].mxu1  ;;  %v458_v39 = vpop.f32.mrb[1].mxu0 }
  0xf8   :  { %v459_v40 = vadd.f32 %v458_v39, %v457_v36  ;;  %v480_v41 = vpop.f32.mrb[1].mxu1  ;;  %v460_v42 = vpop.f32.mrb[2].mxu0 }
  0xf9   :  { %v481_v43 = vadd.f32 %v480_v41, %v479_v37  ;;  %v482_v44 = vpop.f32.mrb[2].mxu1  ;;  %v461_v45 = vpop.f32.mrb[3].mxu0 }
  0xfa   :  { %v338_v46 = vadd.f32 %v459_v40, %v404_v38  ;;  %v462_v47 = vadd.f32 %v461_v45, %v460_v42  ;;  %v483_v48 = vpop.f32.mrb[3].mxu1 }
  0xfb   :  { %v484_v49 = vadd.f32 %v483_v48, %v482_v44 }
  0xfc   :  { %v379_v50 = vadd.f32 %v481_v43, %v338_v46  ;;  %v341_v51 = vadd.f32 %v462_v47, %v404_v38 }
  0xfe   :  { %386 = vst.msk [vmem:[#allocation2] sm:$0xff] %vm385_vm0, %v379_v50  ;;  %v382_v52 = vadd.f32 %v484_v49, %v341_v51 }
 0x100   :  { %387 = vst.msk [vmem:[#allocation2 + $0x8] sm:$0xff] %vm385_vm0, %v382_v52 }
 0x101   :  { %392 = vsyncadd [#allocation3], 128  ;;  %s550_s0 = smov [#allocation2]  }
 0x102   :  { %s393_s2 = sshll.u32 %s550_s0, 4  ;;  %s394_s2 = int_to_ptr.vmem [resolvable:$true] %s393_s2 }
 0x103   :  { %s526_s4 = scalar_lea.vmem %s394_s2, 128  ;;  %s530_s5 = scalar_lea.vmem %s394_s2, 256 }
 0x104   :  { %p527_p0 = scmp.ne.s32.totalorder %s394_s2, %s526_s4  ;;  %p531_p1 = scmp.lt.s32.totalorder %s394_s2, %s394_s2 }
 0x105   :  { %p532_p2 = scmp.lt.s32.totalorder %s530_s5, %s526_s4 }
 0x107   :  { %p533_p3 = por %p532_p2, %p531_p1 }
 0x109   :  { %p534_p4 = pnand %p533_p3, %p527_p0 }
 0x10b   :  { %537 = shalt.err (!%p534_p4)
}
 0x10c   :  { %s538_s8 = scalar_lea.hbm %s699_s3, 128 }
 0x10d   :  { %p539_p5 = scmp.ne.s32.totalorder %s699_s3, %s538_s8  ;;  %p542_p6 = scmp.lt.u32.totalorder %s538_s8, %s699_s3 }
 0x10f   :  { %p544_p7 = pnand %p542_p6, %p539_p5 }
 0x111   :  { %547 = shalt.err (!%p544_p7)
}
 0x112   :  { %s551_s13 = smov 128   ;;  %s552_s14 = smov 8  }
 0x113   :  { %399 = dma.vmem_to_hbm [thread:$0]  %s394_s2, 128, %s699_s3, [#allocation3], %s551_s13, %s551_s13, %s552_s14  }
 0x114   :  { %548 = dma.done.wait [#allocation3], 256  }
 0x115   :  { %549 = vsyncadd [#allocation3], 4294967040 }
 0x116   :  { %403 = vsyncpa [#allocation3], 1 }

// kernel: _lambda_.29
= control target key start
LH: loop header
LB: loop body
LE: loop exit
PB: predicated region body
PF: predicated region fallthrough
CT: control target
= control target key end

     0   :  { %s2986_s15 = smov 0   ;;  %s2988_s16 = smov 0   ;;  %s3665_s0 = inlined_call_operand.vmem [shape: bf16[2,10,6,128], index: 0, kind: input, shape index: {}, may-alias: {0,1}]   ;;  %s3666_s1 = inlined_call_operand.vmem [shape: bf16[2,10,6,128], index: 1, kind: input, shape index: {}, may-alias: {0,1}]   ;;  %s3667_s2 = inlined_call_operand.vmem [shape: bf16[9,128,128], index: 2, kind: input, shape index: {}]   ;;  %s3668_s3 = inlined_call_operand.vmem [shape: f32[1,128], index: 3, kind: input, shape index: {}]   ;;  %s3669_s4 = inlined_call_operand.vmem [shape: bf16[2,4,4,128], index: 4, kind: output, shape index: {}]  }
   0x1   :  { %s2990_s17 = smov 0   ;;  %s2992_s18 = smov 0  }
   0x2   :  { %s2994_s19 = smov 0  }
   0x3 LB: > { %s2207_s20 = sadd.s32 4294967295, %s2954_s19   ;;  %s26_s21 = sadd.s32 1, %s2950_s18  ;;  %s2954_s19 = sphi %s2994_s19, %s14_s19   ;;  %s2950_s18 = sphi %s2992_s18, %s3682_s18   ;;  %s2946_s17 = sphi %s2990_s17, %s3681_s17   ;;  %s2942_s16 = sphi %s2988_s16, %s3680_s16   ;;  %s2938_s15 = sphi %s2986_s15, %s3679_s15  }
   0x4   : > { %p28_p0 = scmp.ge.s32.totalorder %s26_s21, 2  ;;  %s137_s22 = sadd.s32 1, %s2942_s16 }
   0x5   : > { %p147_p1 = scmp.ne.s32.totalorder %s2942_s16, %s2938_s15  ;;  %p148_p2 = scmp.eq.s32.totalorder %s2207_s20, 1 }
   0x6   : > { %s3684_s21 = smov (%p28_p0, %s26_s21), 0  ;;  %p2211_p4 = scmp.ge.s32.totalorder %s2954_s19, 1 }
   0x7   : > { %p3018_p3 = por %p148_p2, %p147_p1  ;;  %s132_s24 = ssub.s32 %s2950_s18, %s3684_s21 }
   0x8   : > { %p216_p5 = scmp.lt.s32.totalorder %s2954_s19, 3  ;;  %p135_p6 = scmp.eq.s32.totalorder %s132_s24, 0 }
   0xa   : > { %p217_p7 = pnand %p2211_p4, %p216_p5 }
   0xb   : > { %s3027_s25 = scalar_select %p135_p6, %s2942_s16, %s137_s22  }
   0xc   : > { %220 = sbr.rel (%p217_p7) target bundleno = 430 (0x1ae), region = 36  ;;  %v2820_v0 = vld [vmem:[%s3667_s2 + $0x40] sm:$0xff] (!%p217_p7)   ;;  %p265_p8 = scmp.lt.s32.totalorder (!%p217_p7), %s2946_s17, 1  ;;  %v2822_v2 = vld [vmem:[%s3667_s2 + $0x48] sm:$0xff] (!%p217_p7)   ;;  %v2824_v4 = vld [vmem:[%s3667_s2 + $0x50] sm:$0xff] (!%p217_p7)   ;;  %v333_v10 = vlaneseq (!%p217_p7)  ;;  %vm796_vm7 = vcmask (!%p217_p7), 1040384  }
   0xd   : > { %v2821_v1 = vld [vmem:[%s3667_s2 + $0x100] sm:$0xff] (!%p217_p7)   ;;  %2532 = vmatprep.subr.bf16.mxu1 (!%p217_p7), %v2820_v0  ;;  %v2823_v3 = vld [vmem:[%s3667_s2 + $0x108] sm:$0xff] (!%p217_p7)   ;;  %v2825_v5 = vld [vmem:[%s3667_s2 + $0x110] sm:$0xff] (!%p217_p7)   ;;  %v2960_v14 = vmov (!%p217_p7), 1983009808   ;;  %vm797_vm8 = vcmask (!%p217_p7), 1042434  }
   0xe   : > { %2612 = vmatprep.subr.bf16.mxu0 (!%p217_p7), %v2821_v1  ;;  %2533 = vmatpush3.bf16.msra.mxu1 (!%p217_p7), %v2820_v0  ;;  %v2826_v6 = vld [vmem:[%s3667_s2 + $0x58] sm:$0xff] (!%p217_p7)   ;;  %v2828_v8 = vld [vmem:[%s3667_s2 + $0x60] sm:$0xff] (!%p217_p7)   ;;  %v2830_v11 = vld [vmem:[%s3667_s2 + $0x68] sm:$0xff] (!%p217_p7)   ;;  %v331_v15 = vunpack.c.l.s4 (!%p217_p7), %v2960_v14  ;;  %v334_v16 = vshrl.u32 (!%p217_p7), %v333_v10, 7  ;;  %vm394_vm0 = vsmask.f32 (!%p217_p7), 1280 }
   0xf   : > { %2613 = vmatpush3.bf16.msra.mxu0 (!%p217_p7), %v2821_v1  ;;  %2534 = vmatprep.subr.bf16.mxu1 (!%p217_p7), %v2822_v2  ;;  %v2827_v7 = vld [vmem:[%s3667_s2 + $0x118] sm:$0xff] (!%p217_p7)   ;;  %v2829_v9 = vld [vmem:[%s3667_s2 + $0x120] sm:$0xff] (!%p217_p7)   ;;  %v2831_v12 = vld [vmem:[%s3667_s2 + $0x128] sm:$0xff] (!%p217_p7)   ;;  %vm395_vm1 = vsmask.f32 (!%p217_p7), 3336  ;;  %vm799_vm9 = vcmask (!%p217_p7), 1044484  }
  0x10   : > { %2614 = vmatprep.subr.bf16.mxu0 (!%p217_p7), %v2823_v3  ;;  %v2832_v13 = vld [vmem:[%s3667_s2 + $0x70] sm:$0xff] (!%p217_p7)   ;;  %v332_v22 = vunpack.c.0.s8 (!%p217_p7), %v331_v15  ;;  %v2834_v27 = vld [vmem:[%s3667_s2 + $0x78] sm:$0xff] (!%p217_p7)   ;;  %vm397_vm2 = vsmask.f32 (!%p217_p7), 5392  ;;  %vm399_vm3 = vsmask.f32 (!%p217_p7), 7448  ;;  %vm3134_vm4 = vmor (!%p217_p7), %vm394_vm0, %vm395_vm1 }
  0x11   : > { %v2833_v17 = vld [vmem:[%s3667_s2 + $0x130] sm:$0xff] (!%p217_p7)   ;;  %v2835_v28 = vld [vmem:[%s3667_s2 + $0x138] sm:$0xff] (!%p217_p7)   ;;  %v3166_v43 = vld [vmem:[%s3667_s2] sm:$0xff] (!%p217_p7)   ;;  %vm801_vm10 = vcmask (!%p217_p7), 1046534   ;;  %s257_s10 = sand.u32 (!%p217_p7), 1, %s2938_s15  }
  0x12   : > { %2535 = vmatpush3.bf16.msra.mxu1 (!%p217_p7), %v2822_v2  ;;  %v3098_v24 = vsub.s32 (!%p217_p7), %v332_v22, %v334_v16  ;;  %v3178_v48 = vld [vmem:[%s3667_s2 + $0x140] sm:$0xff] (!%p217_p7)   ;;  %vm3186_vm5 = vmor (!%p217_p7), %vm3134_vm4, %vm397_vm2  ;;  %v2839_v2 = vld [vmem:[%s3667_s2 + $0x148] sm:$0xff] (!%p217_p7)   ;;  %s2212_s13 = sshll.u32 (!%p217_p7), %s257_s10, 4 }
  0x13   : > { %s3043_s8 = scalar_select %p265_p8, %s2946_s17, 1  ;;  %2615 = vmatpush3.bf16.msra.mxu0 %v2823_v3  ;;  %2536 = vmatprep.subr.bf16.mxu1 %v2824_v4  ;;  %vm3196_vm6 = vmor %vm3186_vm5, %vm399_vm3 }
  0x14   : > { %2616 = vmatprep.subr.bf16.mxu0 %v2825_v5  ;;  %vm798_vm11 = vmor %vm796_vm7, %vm797_vm8  ;;  %s259_s15 = scalar_lea.vmem [#allocation2], %s2212_s13   ;;  %s2441_s14 = sshll.u32 (%p3018_p3), %s2946_s17, 3 }
  0x15   : > { %s2744_s27 = smul.u32 40, %s3043_s8  ;;  %vm800_vm12 = vmor %vm798_vm11, %vm799_vm9  ;;  %s1960_s24 = scalar_lea.vmem (%p3018_p3), %s3669_s4, %s2441_s14  }
  0x16   : > { %2537 = vmatpush3.bf16.msra.mxu1 %v2824_v4  ;;  %vm3311_vm13 = vmor %vm800_vm12, %vm801_vm10  ;;  %s2956_s26 = smov (%p3018_p3), 0  }
  0x17   : > { %2617 = vmatpush3.bf16.msra.mxu0 %v2825_v5  ;;  %2538 = vmatprep.subr.bf16.mxu1 %v2826_v6  ;;  %s3072_s9 = scalar_lea.vmem %s3665_s0, %s2744_s27  ;;  %s2440_s7 = sadd.s32 32, %s2744_s27 }
  0x18   : > { %2618 = vmatprep.subr.bf16.mxu0 %v2827_v7  ;;  %v3084_v18 = vld [vmem:[%s3072_s9] sm:$0x7]  ;;  %v3087_v19 = vld [vmem:[%s3072_s9 + $0x4] sm:$0x7]  ;;  %v3090_v20 = vld [vmem:[%s3072_s9 + $0x8] sm:$0x7] }
  0x19   : > { %v3093_v21 = vld [vmem:[%s3072_s9 + $0xc] sm:$0x7]  ;;  %v3096_v23 = vld [vmem:[%s3072_s9 + $0x10] sm:$0x7]  ;;  %v3101_v25 = vld [vmem:[%s3072_s9 + $0x14] sm:$0x7]  ;;  %v663_v29 = vcombine.low %v3084_v18, %v3087_v19  ;;  %v3118_v31 = vrot.slane %v3084_v18, %v3098_v24  ;;  %v3122_v32 = vrot.slane %v3087_v19, %v3098_v24  ;;  %v3126_v33 = vrot.slane %v3090_v20, %v3098_v24 }
  0x1a   : > { %2539 = vmatpush3.bf16.msra.mxu1 %v2826_v6  ;;  %v3104_v26 = vld [vmem:[%s3072_s9 + $0x18] sm:$0x7]  ;;  %v664_v30 = vcombine.low %v3090_v20, %v3093_v21  ;;  %v3130_v34 = vrot.slane %v3093_v21, %v3098_v24  ;;  %v3140_v36 = vrot.slane %v3096_v23, %v3098_v24  ;;  %v3144_v37 = vrot.slane %v3101_v25, %v3098_v24 }
  0x1b   : > { %2619 = vmatpush3.bf16.msra.mxu0 %v2827_v7  ;;  %2540 = vmatprep.subr.bf16.mxu1 %v2828_v8  ;;  %v3148_v38 = vrot.slane %v3104_v26, %v3098_v24  ;;  %v3152_v39 = vcombine.high %v3118_v31, %v3118_v31  ;;  %v3156_v40 = vcombine.high %v3122_v32, %v3122_v32  ;;  %v402_v42 = vshrl.u32 %v3118_v31, 16 }
  0x1c   : > { %2620 = vmatprep.subr.bf16.mxu0 %v2829_v9  ;;  %v3160_v41 = vcombine.high %v3126_v33, %v3126_v33  ;;  %v3170_v44 = vcombine.high %v3130_v34, %v3130_v34  ;;  %v405_v45 = vshll.u32 %v3118_v31, 16  ;;  %v416_v46 = vshrl.u32 %v3122_v32, 16 }
  0x1d   : > { %v419_v47 = vshll.u32 %v3122_v32, 16  ;;  %v404_v49 = vrot.slane %v402_v42, 6  ;;  %v411_v50 = vshll.u32 %v3152_v39, 16  ;;  %v425_v51 = vshll.u32 %v3156_v40, 16 }
  0x1e   : > { %2541 = vmatpush3.bf16.msra.mxu1 %v2828_v8  ;;  %v430_v52 = vshrl.u32 %v3126_v33, 16  ;;  %v407_v54 = vrot.slane %v405_v45, 7  ;;  %v418_v55 = vrot.slane %v416_v46, 6  ;;  %v433_v57 = vshll.u32 %v3126_v33, 16 }
  0x1f   : > { %2621 = vmatpush3.bf16.msra.mxu0 %v2829_v9  ;;  %2542 = vmatprep.subr.bf16.mxu1 %v2830_v11  ;;  %v421_v56 = vrot.slane %v419_v47, 7  ;;  %v413_v58 = vrot.slane %v411_v50, 7  ;;  %v427_v59 = vrot.slane %v425_v51, 7  ;;  %v439_v61 = vshll.u32 %v3160_v41, 16 }
  0x20   : > { %2622 = vmatprep.subr.bf16.mxu0 %v2831_v12  ;;  %v432_v60 = vrot.slane %v430_v52, 6  ;;  %v408_v62 = vor.u32 %v407_v54, %v404_v49  ;;  %v435_v0 = vrot.slane %v433_v57, 7  ;;  %v444_v1 = vshrl.u32 %v3130_v34, 16 }
  0x21   : > { %v422_v63 = vor.u32 %v421_v56, %v418_v55  ;;  %v441_v3 = vrot.slane %v439_v61, 7  ;;  %v447_v4 = vshll.u32 %v3130_v34, 16  ;;  %v453_v5 = vshll.u32 %v3170_v44, 16 }
  0x22   : > { %2543 = vmatpush3.bf16.msra.mxu1 %v2830_v11  ;;  %v3205_v6 = vcombine.high %v3140_v36, %v3140_v36  ;;  %v409_v7 = vrot.slane %v408_v62, 2  ;;  %v436_v9 = vor.u32 %v435_v0, %v432_v60  ;;  %v446_v10 = vrot.slane %v444_v1, 6 }
  0x23   : > { %2623 = vmatpush3.bf16.msra.mxu0 %v2831_v12  ;;  %2544 = vmatprep.subr.bf16.mxu1 %v2832_v13  ;;  %v423_v8 = vrot.slane %v422_v63, 2  ;;  %v449_v11 = vrot.slane %v447_v4, 7  ;;  %v455_v12 = vrot.slane %v453_v5, 7  ;;  %v458_v14 = vshrl.u32 %v3140_v36, 16 }
  0x24   : > { %2624 = vmatprep.subr.bf16.mxu0 %v2833_v17  ;;  %v414_v15 = vsel %vm3196_vm6, %v409_v7, %v413_v58  ;;  %v461_v22 = vshll.u32 %v3140_v36, 16  ;;  %v467_v45 = vshll.u32 %v3205_v6, 16  ;;  %v472_v49 = vshrl.u32 %v3144_v37, 16 }
  0x25   : > { %v428_v16 = vsel %vm3196_vm6, %v423_v8, %v427_v59  ;;  %v460_v42 = vrot.slane %v458_v14, 6  ;;  %v475_v50 = vshll.u32 %v3144_v37, 16  ;;  %v3237_v61 = vcombine.high %v3148_v38, %v3148_v38 }
  0x26   : > { %2545 = vmatpush3.bf16.msra.mxu1 %v2832_v13  ;;  %v3210_v13 = vcombine.high %v3144_v37, %v3144_v37  ;;  %v530_v35 = vcombine.low %v414_v15, %v428_v16  ;;  %v463_v47 = vrot.slane %v461_v22, 7  ;;  %v469_v53 = vrot.slane %v467_v45, 7 }
  0x27   : > { %2625 = vmatpush3.bf16.msra.mxu0 %v2833_v17  ;;  %2546 = vmatprep.subr.bf16.mxu1 %v2834_v27  ;;  %v437_v17 = vrot.slane %v436_v9, 2  ;;  %v474_v56 = vrot.slane %v472_v49, 6  ;;  %v477_v57 = vrot.slane %v475_v50, 7  ;;  %v486_v5 = vshrl.u32 %v3148_v38, 16 }
  0x28   : > { %2626 = vmatprep.subr.bf16.mxu0 %v2835_v28  ;;  %v538_v52 = vrot.slane %v530_v35, %v3098_v24  ;;  %v481_v54 = vshll.u32 %v3210_v13, 16  ;;  %v464_v55 = vor.u32 %v463_v47, %v460_v42  ;;  %v489_v7 = vshll.u32 %v3148_v38, 16 }
  0x29   : > { %v442_v46 = vsel %vm3196_vm6, %v437_v17, %v441_v3  ;;  %v478_v1 = vor.u32 %v477_v57, %v474_v56  ;;  %v495_v8 = vshll.u32 %v3237_v61, 16 }
  0x2a   : > { %2547 = vmatpush3.bf16.msra.mxu1 %v2834_v27  ;;  %v3221_v27 = vld [vmem:[%s3072_s9 + $0x1c] sm:$0x7]  ;;  %v1183_v58 = vcombine.low %v428_v16, %v442_v46  ;;  %s288_s9 = scalar_lea.vmem %s3666_s1, %s2440_s7  ;;  %v483_v60 = vrot.slane %v481_v54, 7  ;;  %v465_v0 = vrot.slane %v464_v55, 2  ;;  %v488_v16 = vrot.slane %v486_v5, 6 }
  0x2b   : > { %2627 = vmatpush3.bf16.msra.mxu0 %v2835_v28  ;;  %2552 = vmatprep.subr.bf16.mxu1 %v3166_v43  ;;  %v450_v28 = vor.u32 %v449_v11, %v446_v10  ;;  %v3241_v62 = vrot.slane %v3221_v27, %v3098_v24  ;;  %v3251_v9 = vld [vmem:[%s288_s9] sm:$0x7]  ;;  %v491_v17 = vrot.slane %v489_v7, 7  ;;  %v497_v22 = vrot.slane %v495_v8, 7 }
  0x2c   : > { %2632 = vmatprep.subr.bf16.mxu0 %v3178_v48  ;;  %v1191_v3 = vrot.slane %v1183_v58, %v3098_v24  ;;  %v470_v11 = vsel %vm3196_vm6, %v465_v0, %v469_v53  ;;  %v3269_v54 = vrot.slane %v3251_v9, %v3098_v24  ;;  %v671_v55 = vrot.slane %v663_v29, %v3098_v24 }
  0x2d   : > { %v451_v51 = vrot.slane %v450_v28, 2  ;;  %v3246_v4 = vcombine.high %v3241_v62, %v3241_v62  ;;  %v500_v14 = vshrl.u32 %v3241_v62, 16  ;;  %v3259_v28 = vld [vmem:[%s288_s9 + $0x4] sm:$0x7]  ;;  %v492_v50 = vor.u32 %v491_v17, %v488_v16 }
  0x2e   : > { %v1153_v0 = vshrl.u32 %v3269_v54, 16 }
  0x2f   : > { %v456_v59 = vsel %vm3196_vm6, %v451_v51, %v455_v12  ;;  %v479_v12 = vrot.slane %v478_v1, 2  ;;  %v502_v45 = vrot.slane %v500_v14, 6  ;;  %v509_v51 = vshll.u32 %v3246_v4, 16 }
  0x30   : > { %v531_v63 = vcombine.low %v442_v46, %v456_v59  ;;  %v1184_v15 = vcombine.low %v456_v59, %v470_v11  ;;  %v503_v46 = vshll.u32 %v3241_v62, 16  ;;  %v493_v57 = vrot.slane %v492_v50, 2 }
  0x31   : > { %v484_v42 = vsel %vm3196_vm6, %v479_v12, %v483_v60  ;;  %v511_v58 = vrot.slane %v509_v51, 7  ;;  %v1156_v1 = vshll.u32 %v3269_v54, 16  ;;  %v1155_v8 = vrot.slane %v1153_v0, 6  ;;  %v2838_v0 = vld [vmem:[%s3667_s2 + $0x8] sm:$0xff]  }
  0x32   : > { %v3254_v10 = vrot.slane %v531_v63, %v3098_v24  ;;  %v547_v47 = vcombine.low %v470_v11, %v484_v42  ;;  %v1198_v49 = vrot.slane %v1184_v15, %v3098_v24  ;;  %v505_v53 = vrot.slane %v503_v46, 7 }
  0x33   : > { %v3286_v63 = vcombine.high %v3269_v54, %v3269_v54  ;;  %v498_v18 = vsel %vm3196_vm6, %v493_v57, %v497_v22  ;;  %v1158_v11 = vrot.slane %v1156_v1, 7  ;;  %v3307_v46 = vrot.slane %v664_v30, %v3098_v24 }
  0x34   : > { %v546_v35 = vcombine.low %v538_v52, %v3254_v10  ;;  %v3273_v52 = vrot.slane %v3259_v28, %v3098_v24  ;;  %v1199_v56 = vcombine.low %v1191_v3, %v1198_v49  ;;  %v3280_v59 = vrot.slane %v547_v47, %v3098_v24 }
  0x35   : > { %v506_v60 = vor.u32 %v505_v53, %v502_v45  ;;  %v1162_v12 = vshll.u32 %v3286_v63, 16  ;;  %v1200_v14 = vcombine.low %v484_v42, %v498_v18  ;;  %v2248_v57 = vrot.slane %v3122_v32, 9 }
  0x36   : > { %2548 = vmatprep.mubr.bf16.mxu1 %v546_v35  ;;  %2628 = vmatprep.mubr.bf16.mxu0 %v1199_v56  ;;  %v3294_v29 = vcombine.high %v3273_v52, %v3273_v52  ;;  %v1618_v3 = vshrl.u32 %v3273_v52, 16  ;;  %v1621_v5 = vshll.u32 %v3273_v52, 16  ;;  %v1159_v35 = vor.u32 %v1158_v11, %v1155_v8 }
  0x37   : > { %v507_v7 = vrot.slane %v506_v60, 2  ;;  %v1164_v45 = vrot.slane %v1162_v12, 7  ;;  %v1208_v49 = vrot.slane %v1200_v14, %v3098_v24  ;;  %v679_v56 = vcombine.low %v671_v55, %v3307_v46 }
  0x38   : > { %v1620_v15 = vrot.slane %v1618_v3, 6  ;;  %v1623_v16 = vrot.slane %v1621_v5, 7  ;;  %v1627_v17 = vshll.u32 %v3294_v29, 16  ;;  %v1160_v53 = vrot.slane %v1159_v35, 2  ;;  %v2841_v35 = vld [vmem:[%s3667_s2 + $0x150] sm:$0xff]  }
  0x39   : > { %v512_v22 = vsel %vm3196_vm6, %v507_v7, %v511_v58  ;;  %v809_v58 = vrot.slane %v3156_v40, 7  ;;  %v2249_v1 = vrot.slane %v3126_v33, 9  ;;  %v2250_v40 = vrot.slane %v3130_v34, 9 }
  0x3a   : > { %v548_v47 = vcombine.low %v498_v18, %v512_v22  ;;  %v1624_v50 = vor.u32 %v1623_v16, %v1620_v15  ;;  %v1629_v42 = vrot.slane %v1627_v17, 7  ;;  %v813_v18 = vrot.slane %v3160_v41, 7 }
  0x3b   : > { %v1165_v3 = vsel %vm3196_vm6, %v1160_v53, %v1164_v45  ;;  %v3330_v32 = vsel %vm3311_vm13, %v2248_v57, %v809_v58  ;;  %v817_v55 = vrot.slane %v3170_v44, 7  ;;  %v2251_v12 = vrot.slane %v3140_v36, 9  ;;  %v2840_v36 = vld [vmem:[%s3667_s2 + $0x10] sm:$0xff]   ;;  %v2842_v45 = vld [vmem:[%s3667_s2 + $0x18] sm:$0xff]  }
  0x3c   : > { %v3319_v30 = vrot.slane %v548_v47, %v3098_v24  ;;  %v1625_v60 = vrot.slane %v1624_v50, 2  ;;  %v1201_v7 = vcombine.low %v512_v22, %v1165_v3  ;;  %v814_v41 = vsel %vm3311_vm13, %v2249_v1, %v813_v18 }
  0x3d   : > { %v818_v11 = vsel %vm3311_vm13, %v2250_v40, %v817_v55  ;;  %v821_v34 = vrot.slane %v3205_v6, 7  ;;  %v1341_v14 = vcombine.low %v3330_v32, %v814_v41  ;;  %v2252_v22 = vrot.slane %v3144_v37, 9 }
  0x3e   : > { %v563_v5 = vcombine.low %v3280_v59, %v3319_v30  ;;  %v1630_v33 = vsel %vm3196_vm6, %v1625_v60, %v1629_v42  ;;  %v1215_v44 = vrot.slane %v1201_v7, %v3098_v24  ;;  %v829_v50 = vrot.slane %v3237_v61, 7  ;;  %v2843_v61 = vld [vmem:[%s3667_s2 + $0x158] sm:$0xff]  }
  0x3f   : > { %v3340_v8 = vcombine.low %v1165_v3, %v1630_v33  ;;  %v822_v15 = vsel %vm3311_vm13, %v2251_v12, %v821_v34  ;;  %v1349_v17 = vrot.slane %v1341_v14, %v3098_v24  ;;  %v2254_v37 = vrot.slane %v3241_v62, 9 }
  0x40   : > { %2549 = vmatmul.mubr.bf16.vlgmr.msra.gmra.mrb[0].mxu1 %v563_v5  ;;  %v1216_v16 = vcombine.low %v1208_v49, %v1215_v44  ;;  %v1342_v6 = vcombine.low %v818_v11, %v822_v15  ;;  %v2253_v49 = vrot.slane %v3148_v38, 9  ;;  %v2327_v42 = vrot.slane %v3269_v54, 9 }
  0x41   : > { %2553 = vmatpush3.bf16.msra.mxu1 %v3166_v43  ;;  %2568 = vmatprep.mubr.bf16.mxu1 %v679_v56  ;;  %v825_v43 = vrot.slane %v3210_v13, 7  ;;  %v833_v13 = vrot.slane %v3246_v4, 7  ;;  %v1322_v53 = vrot.slane %v3286_v63, 7  ;;  %v2844_v4 = vld [vmem:[%s3667_s2 + $0x20] sm:$0xff]   ;;  %v1497_v58 = vcombine.low %v3251_v9, %v3259_v28 }
  0x42   : > { %2554 = vmatprep.subr.bf16.mxu1 %v2838_v0  ;;  %2629 = vmatmul.mubr.bf16.vlgmr.msra.gmra.mrb[0].mxu0 %v1216_v16  ;;  %v1356_v47 = vrot.slane %v1342_v6, %v3098_v24  ;;  %v3384_v62 = vsel %vm3311_vm13, %v2253_v49, %v829_v50  ;;  %v2400_v60 = vrot.slane %v3273_v52, 9  ;;  %v1008_v1 = vcombine.low %v3093_v21, %v3096_v23 }
  0x43   : > { %2633 = vmatpush3.bf16.msra.mxu0 %v3178_v48  ;;  %v3376_v57 = vsel %vm3311_vm13, %v2252_v22, %v825_v43  ;;  %v853_v48 = vcombine.low %v814_v41, %v818_v11  ;;  %v3391_v54 = vsel %vm3311_vm13, %v2254_v37, %v833_v13  ;;  %v3395_v63 = vsel %vm3311_vm13, %v2327_v42, %v1322_v53  ;;  %v2849_v43 = vld [vmem:[%s3667_s2 + $0x170] sm:$0xff]   ;;  %v2855_v13 = vld [vmem:[%s3667_s2 + $0x180] sm:$0xff]   ;;  %v2858_v42 = vld [vmem:[%s3667_s2 + $0x88] sm:$0xff]  }
  0x44   : > { %2634 = vmatprep.subr.bf16.mxu0 %v2839_v2  ;;  %v1357_v56 = vcombine.low %v1349_v17, %v1356_v47  ;;  %v869_v38 = vcombine.low %v822_v15, %v3376_v57  ;;  %v1024_v18 = vcombine.low %v3101_v25, %v3104_v26  ;;  %v1763_v3 = vrot.slane %v3294_v29, 7 }
  0x45   : > { %2555 = vmatpush3.bf16.msra.mxu1 %v2838_v0  ;;  %v1007_v0 = vcombine.low %v3087_v19, %v3090_v20  ;;  %v3408_v40 = vrot.slane %v853_v48, %v3098_v24  ;;  %v3414_v28 = vrot.slane %v1497_v58, %v3098_v24  ;;  %v1025_v19 = vcombine.low %v3221_v27, %v3251_v9  ;;  %v2845_v20 = vld [vmem:[%s3667_s2 + $0x160] sm:$0xff]   ;;  %v2846_v9 = vld [vmem:[%s3667_s2 + $0x28] sm:$0xff]   ;;  %v2861_v48 = vld [vmem:[%s3667_s2 + $0x190] sm:$0xff]  }
  0x46   : > { %2556 = vmatprep.subr.bf16.mxu1 %v2840_v36  ;;  %2648 = vmatprep.mubr.bf16.mxu0 %v1357_v56  ;;  %v3411_v55 = vrot.slane %v869_v38, %v3098_v24  ;;  %v3425_v52 = vrot.slane %v1008_v1, %v3098_v24  ;;  %v3428_v29 = vrot.slane %v1024_v18, %v3098_v24  ;;  %v2247_v44 = vrot.slane %v3118_v31, 9  ;;  %v2848_v31 = vld [vmem:[%s3667_s2 + $0x30] sm:$0xff]   ;;  %v2871_v1 = vld [vmem:[%s3667_s2 + $0x1b8] sm:$0xff]   ;;  %v2872_v18 = vld [vmem:[%s3667_s2 + $0xc0] sm:$0xff]  }
  0x47   : > { %2635 = vmatpush3.bf16.msra.mxu0 %v2839_v2  ;;  %v3422_v21 = vrot.slane %v1007_v0, %v3098_v24  ;;  %v870_v5 = vcombine.low %v3384_v62, %v3391_v54  ;;  %v3436_v7 = vrot.slane %v1025_v19, %v3098_v24  ;;  %v1648_v33 = vcombine.low %v3254_v10, %v3280_v59  ;;  %v2868_v58 = vld [vmem:[%s3667_s2 + $0xb0] sm:$0xff]   ;;  %v2870_v0 = vld [vmem:[%s3667_s2 + $0xb8] sm:$0xff]   ;;  %v2873_v19 = vld [vmem:[%s3667_s2 + $0x1c0] sm:$0xff]  }
  0x48   : > { %2636 = vmatprep.subr.bf16.mxu0 %v2841_v35  ;;  %v1656_v11 = vrot.slane %v3340_v8, %v3098_v24  ;;  %v1782_v12 = vcombine.low %v3408_v40, %v3411_v55  ;;  %v1764_v34 = vsel %vm3311_vm13, %v2400_v60, %v1763_v3  ;;  %v805_v14 = vrot.slane %v3152_v39, 7  ;;  %v2847_v8 = vld [vmem:[%s3667_s2 + $0x168] sm:$0xff]   ;;  %v2869_v60 = vld [vmem:[%s3667_s2 + $0x1b0] sm:$0xff]   ;;  %v2882_v10 = vld [vmem:[%s3667_s2 + $0x1e0] sm:$0xff]  }
  0x49   : > { %2557 = vmatpush3.bf16.msra.mxu1 %v2840_v36  ;;  %v1023_v41 = vcombine.low %v3422_v21, %v3425_v52  ;;  %v1040_v2 = vcombine.low %v3428_v29, %v3436_v7  ;;  %v1783_v15 = vcombine.low %v3395_v63, %v1764_v34  ;;  %v3463_v39 = vrot.slane %v870_v5, %v3098_v24  ;;  %v2876_v5 = vld [vmem:[%s3667_s2 + $0x1c8] sm:$0xff]   ;;  %v2879_v34 = vld [vmem:[%s3667_s2 + $0xd8] sm:$0xff]   ;;  %v2881_v52 = vld [vmem:[%s3667_s2 + $0xe0] sm:$0xff]  }
  0x4a   : > { %2558 = vmatprep.subr.bf16.mxu1 %v2842_v45  ;;  %v3457_v16 = vcombine.low %v3319_v30, %v1656_v11  ;;  %v680_v6 = vcombine.low %v3096_v23, %v3101_v25  ;;  %v681_v17 = vcombine.low %v3104_v26, %v3221_v27  ;;  %v806_v30 = vsel %vm3311_vm13, %v2247_v44, %v805_v14  ;;  %v2850_v23 = vld [vmem:[%s3667_s2 + $0x38] sm:$0xff]   ;;  %v2877_v11 = vld [vmem:[%s3667_s2 + $0xd0] sm:$0xff]   ;;  %v2883_v59 = vld [vmem:[%s3667_s2 + $0xe8] sm:$0xff]  }
  0x4b   : > { %2637 = vmatpush3.bf16.msra.mxu0 %v2841_v35  ;;  %v3466_v36 = vrot.slane %v1783_v15, %v3098_v24  ;;  %v852_v25 = vcombine.low %v806_v30, %v3330_v32  ;;  %v1358_v51 = vcombine.low %v3376_v57, %v3384_v62  ;;  %v1359_v35 = vcombine.low %v3391_v54, %v3395_v63  ;;  %v2854_v32 = vld [vmem:[%s3667_s2 + $0x80] sm:$0xff]   ;;  %v2860_v57 = vld [vmem:[%s3667_s2 + $0x90] sm:$0xff]   ;;  %v2866_v54 = vld [vmem:[%s3667_s2 + $0xa8] sm:$0xff]  }
  0x4c   : > { %2638 = vmatprep.subr.bf16.mxu0 %v2843_v61  ;;  %v688_v26 = vrot.slane %v680_v6, %v3098_v24  ;;  %v3485_v27 = vrot.slane %v681_v17, %v3098_v24  ;;  %v2864_v62 = vld [vmem:[%s3667_s2 + $0xa0] sm:$0xff]   ;;  %v2867_v63 = vld [vmem:[%s3667_s2 + $0x1a8] sm:$0xff]   ;;  %v885_v3 = vcombine.low %v3411_v55, %v3463_v39  ;;  %v2880_v21 = vld [vmem:[%s3667_s2 + $0x1d8] sm:$0xff]  }
  0x4d   : > { %2559 = vmatpush3.bf16.msra.mxu1 %v2842_v45  ;;  %v1791_v22 = vcombine.low %v3463_v39, %v3466_v36  ;;  %v2851_v45 = vld [vmem:[%s3667_s2 + $0x178] sm:$0xff]   ;;  %v860_v47 = vrot.slane %v852_v25, %v3098_v24  ;;  %v1366_v50 = vrot.slane %v1358_v51, %v3098_v24  ;;  %v1373_v37 = vrot.slane %v1359_v35, %v3098_v24  ;;  %v2859_v24 = vld [vmem:[%s3667_s2 + $0x188] sm:$0xff]   ;;  %v2886_v44 = vld [vmem:[%s3667_s2 + $0x1f0] sm:$0xff]  }
  0x4e   : > { %2560 = vmatprep.subr.bf16.mxu1 %v2844_v4  ;;  %v696_v49 = vcombine.low %v688_v26, %v3485_v27  ;;  %v1496_v38 = vcombine.low %v3307_v46, %v688_v26  ;;  %v2863_v46 = vld [vmem:[%s3667_s2 + $0x198] sm:$0xff]   ;;  %v2894_v6 = vld [vmem:[%s3667_s2 + $0x210] sm:$0xff]   ;;  %v2896_v7 = vld [vmem:[%s3667_s2 + $0x220] sm:$0xff]  }
  0x4f   : > { %2639 = vmatpush3.bf16.msra.mxu0 %v2843_v61  ;;  %v868_v53 = vcombine.low %v860_v47, %v3408_v40  ;;  %v1374_v56 = vcombine.low %v1366_v50, %v1373_v37  ;;  %v2862_v61 = vld [vmem:[%s3667_s2 + $0x98] sm:$0xff]   ;;  %v2897_v40 = vld [vmem:[%s3667_s2 + $0x228] sm:$0xff]   ;;  %v2898_v55 = vld [vmem:[%s3667_s2 + $0x230] sm:$0xff]  }
  0x50   : > { %2640 = vmatprep.subr.bf16.mxu0 %v2845_v20  ;;  %v2887_v14 = vld [vmem:[%s3667_s2 + $0xf8] sm:$0xff]  }
  0x51   : > { %2561 = vmatpush3.bf16.msra.mxu1 %v2844_v4  ;;  %v2865_v4 = vld [vmem:[%s3667_s2 + $0x1a0] sm:$0xff]   ;;  %v2888_v15 = vld [vmem:[%s3667_s2 + $0x1f8] sm:$0xff]  }
  0x52   : > { %2562 = vmatprep.subr.bf16.mxu1 %v2846_v9  ;;  %v2895_v29 = vld [vmem:[%s3667_s2 + $0x218] sm:$0xff]  }
  0x53   : > { %2641 = vmatpush3.bf16.msra.mxu0 %v2845_v20  ;;  %v2875_v20 = vld [vmem:[%s3667_s2 + $0xc8] sm:$0xff]  }
  0x54   : > { %2642 = vmatprep.subr.bf16.mxu0 %v2847_v8 }
  0x55   : > { %2563 = vmatpush3.bf16.msra.mxu1 %v2846_v9  ;;  %v1505_v9 = vcombine.low %v3485_v27, %v3414_v28  ;;  %v2878_v28 = vld [vmem:[%s3667_s2 + $0x1d0] sm:$0xff]  }
  0x56   : > { %2564 = vmatprep.subr.bf16.mxu1 %v2848_v31 }
  0x57   : > { %2643 = vmatpush3.bf16.msra.mxu0 %v2847_v8  ;;  %v2892_v8 = vld [vmem:[%s3667_s2 + $0x200] sm:$0xff]  }
  0x58   : > { %2644 = vmatprep.subr.bf16.mxu0 %v2849_v43 }
  0x59   : > { %2565 = vmatpush3.bf16.msra.mxu1 %v2848_v31  ;;  %v2893_v31 = vld [vmem:[%s3667_s2 + $0x208] sm:$0xff]  }
  0x5a   : > { %2566 = vmatprep.subr.bf16.mxu1 %v2850_v23 }
  0x5b   : > { %2645 = vmatpush3.bf16.msra.mxu0 %v2849_v43 }
  0x5c   : > { %2646 = vmatprep.subr.bf16.mxu0 %v2851_v45 }
  0x5d   : > { %2567 = vmatpush3.bf16.msra.mxu1 %v2850_v23  ;;  %v2425_v23 = vld [vmem:[%s3668_s3] ss:$0 sm:$0xff] }
  0x5e   : > { %2572 = vmatprep.subr.bf16.mxu1 %v2854_v32 }
  0x5f   : > { %2647 = vmatpush3.bf16.msra.mxu0 %v2851_v45 }
  0x60   : > { %2569 = vmatmul.mubr.bf16.vlgmr.msra.gmra.mrb[0].mxu1 %v696_v49  ;;  %2652 = vmatprep.subr.bf16.mxu0 %v2855_v13 }
  0x61   : > { %2573 = vmatpush3.bf16.msra.mxu1 %v2854_v32  ;;  %2588 = vmatprep.mubr.bf16.mxu1 %v868_v53 }
  0x62   : > { %2574 = vmatprep.subr.bf16.mxu1 %v2858_v42  ;;  %2649 = vmatmul.mubr.bf16.vlgmr.msra.gmra.mrb[0].mxu0 %v1374_v56 }
  0x63   : > { %2653 = vmatpush3.bf16.msra.mxu0 %v2855_v13  ;;  %2668 = vmatprep.mubr.bf16.mxu0 %v1496_v38 }
  0x64   : > { %2654 = vmatprep.subr.bf16.mxu0 %v2859_v24 }
  0x65   : > { %2575 = vmatpush3.bf16.msra.mxu1 %v2858_v42 }
  0x66   : > { %2576 = vmatprep.subr.bf16.mxu1 %v2860_v57 }
  0x67   : > { %2655 = vmatpush3.bf16.msra.mxu0 %v2859_v24 }
  0x68   : > { %2656 = vmatprep.subr.bf16.mxu0 %v2861_v48 }
  0x69   : > { %2577 = vmatpush3.bf16.msra.mxu1 %v2860_v57 }
  0x6a   : > { %2578 = vmatprep.subr.bf16.mxu1 %v2862_v61 }
  0x6b   : > { %2657 = vmatpush3.bf16.msra.mxu0 %v2861_v48 }
  0x6c   : > { %2658 = vmatprep.subr.bf16.mxu0 %v2863_v46 }
  0x6d   : > { %2579 = vmatpush3.bf16.msra.mxu1 %v2862_v61 }
  0x6e   : > { %2580 = vmatprep.subr.bf16.mxu1 %v2864_v62 }
  0x6f   : > { %2659 = vmatpush3.bf16.msra.mxu0 %v2863_v46 }
  0x70   : > { %2660 = vmatprep.subr.bf16.mxu0 %v2865_v4 }
  0x71   : > { %2581 = vmatpush3.bf16.msra.mxu1 %v2864_v62 }
  0x72   : > { %2582 = vmatprep.subr.bf16.mxu1 %v2866_v54 }
  0x73   : > { %2661 = vmatpush3.bf16.msra.mxu0 %v2865_v4 }
  0x74   : > { %2662 = vmatprep.subr.bf16.mxu0 %v2867_v63 }
  0x75   : > { %2583 = vmatpush3.bf16.msra.mxu1 %v2866_v54 }
  0x76   : > { %2584 = vmatprep.subr.bf16.mxu1 %v2868_v58 }
  0x77   : > { %2663 = vmatpush3.bf16.msra.mxu0 %v2867_v63 }
  0x78   : > { %2664 = vmatprep.subr.bf16.mxu0 %v2869_v60 }
  0x79   : > { %2585 = vmatpush3.bf16.msra.mxu1 %v2868_v58 }
  0x7a   : > { %2586 = vmatprep.subr.bf16.mxu1 %v2870_v0 }
  0x7b   : > { %2665 = vmatpush3.bf16.msra.mxu0 %v2869_v60 }
  0x7c   : > { %2666 = vmatprep.subr.bf16.mxu0 %v2871_v1 }
  0x7d   : > { %2587 = vmatpush3.bf16.msra.mxu1 %v2870_v0 }
  0x7e   : > { %2592 = vmatprep.subr.bf16.mxu1 %v2872_v18 }
  0x7f   : > { %2667 = vmatpush3.bf16.msra.mxu0 %v2871_v1 }
  0x80   : > { %2589 = vmatmul.mubr.bf16.vlgmr.msra.gmra.mrb[0].mxu1 %v885_v3  ;;  %2672 = vmatprep.subr.bf16.mxu0 %v2873_v19 }
  0x81   : > { %2593 = vmatpush3.bf16.msra.mxu1 %v2872_v18  ;;  %2608 = vmatprep.mubr.bf16.mxu1 %v1023_v41  ;;  %v2885_v41 = vld [vmem:[%s3667_s2 + $0xf0] sm:$0xff]  }
  0x82   : > { %2594 = vmatprep.subr.bf16.mxu1 %v2875_v20  ;;  %2669 = vmatmul.mubr.bf16.vlgmr.msra.gmra.mrb[0].mxu0 %v1505_v9 }
  0x83   : > { %2673 = vmatpush3.bf16.msra.mxu0 %v2873_v19  ;;  %2688 = vmatprep.mubr.bf16.mxu0 %v1648_v33  ;;  %v2884_v33 = vld [vmem:[%s3667_s2 + $0x1e8] sm:$0xff]  }
  0x84   : > { %2674 = vmatprep.subr.bf16.mxu0 %v2876_v5 }
  0x85   : > { %2595 = vmatpush3.bf16.msra.mxu1 %v2875_v20 }
  0x86   : > { %2596 = vmatprep.subr.bf16.mxu1 %v2877_v11 }
  0x87   : > { %2675 = vmatpush3.bf16.msra.mxu0 %v2876_v5 }
  0x88   : > { %2676 = vmatprep.subr.bf16.mxu0 %v2878_v28 }
  0x89   : > { %2597 = vmatpush3.bf16.msra.mxu1 %v2877_v11 }
  0x8a   : > { %2598 = vmatprep.subr.bf16.mxu1 %v2879_v34 }
  0x8b   : > { %2677 = vmatpush3.bf16.msra.mxu0 %v2878_v28 }
  0x8c   : > { %2678 = vmatprep.subr.bf16.mxu0 %v2880_v21 }
  0x8d   : > { %2599 = vmatpush3.bf16.msra.mxu1 %v2879_v34 }
  0x8e   : > { %2600 = vmatprep.subr.bf16.mxu1 %v2881_v52 }
  0x8f   : > { %2679 = vmatpush3.bf16.msra.mxu0 %v2880_v21 }
  0x90   : > { %2680 = vmatprep.subr.bf16.mxu0 %v2882_v10 }
  0x91   : > { %2601 = vmatpush3.bf16.msra.mxu1 %v2881_v52 }
  0x92   : > { %2602 = vmatprep.subr.bf16.mxu1 %v2883_v59 }
  0x93   : > { %2681 = vmatpush3.bf16.msra.mxu0 %v2882_v10 }
  0x94   : > { %2682 = vmatprep.subr.bf16.mxu0 %v2884_v33 }
  0x95   : > { %2603 = vmatpush3.bf16.msra.mxu1 %v2883_v59 }
  0x96   : > { %2604 = vmatprep.subr.bf16.mxu1 %v2885_v41 }
  0x97   : > { %2683 = vmatpush3.bf16.msra.mxu0 %v2884_v33 }
  0x98   : > { %2684 = vmatprep.subr.bf16.mxu0 %v2886_v44 }
  0x99   : > { %2605 = vmatpush3.bf16.msra.mxu1 %v2885_v41 }
  0x9a   : > { %2606 = vmatprep.subr.bf16.mxu1 %v2887_v14 }
  0x9b   : > { %2685 = vmatpush3.bf16.msra.mxu0 %v2886_v44 }
  0x9c   : > { %2686 = vmatprep.subr.bf16.mxu0 %v2888_v15 }
  0x9d   : > { %2607 = vmatpush3.bf16.msra.mxu1 %v2887_v14 }
  0x9f   : > { %2687 = vmatpush3.bf16.msra.mxu0 %v2888_v15 }
  0xa0   : > { %2609 = vmatmul.mubr.bf16.vlgmr.msra.gmra.mrb[0].mxu1 %v1040_v2  ;;  %2692 = vmatprep.subr.bf16.mxu0 %v2892_v8 }
  0xa2   : > { %2689 = vmatmul.mubr.bf16.vlgmr.msra.gmra.mrb[0].mxu0 %v3457_v16 }
  0xa3   : > { %2693 = vmatpush3.bf16.msra.mxu0 %v2892_v8  ;;  %2708 = vmatprep.mubr.bf16.mxu0 %v1782_v12  ;;  %v2899_v12 = vld [vmem:[%s3667_s2 + $0x238] sm:$0xff]  }
  0xa4   : > { %2694 = vmatprep.subr.bf16.mxu0 %v2893_v31 }
  0xa7   : > { %2695 = vmatpush3.bf16.msra.mxu0 %v2893_v31 }
  0xa8   : > { %2696 = vmatprep.subr.bf16.mxu0 %v2894_v6 }
  0xab   : > { %2697 = vmatpush3.bf16.msra.mxu0 %v2894_v6 }
  0xac   : > { %2698 = vmatprep.subr.bf16.mxu0 %v2895_v29 }
  0xaf   : > { %2699 = vmatpush3.bf16.msra.mxu0 %v2895_v29 }
  0xb0   : > { %2700 = vmatprep.subr.bf16.mxu0 %v2896_v7 }
  0xb3   : > { %2701 = vmatpush3.bf16.msra.mxu0 %v2896_v7 }
  0xb4   : > { %2702 = vmatprep.subr.bf16.mxu0 %v2897_v40 }
  0xb7   : > { %2703 = vmatpush3.bf16.msra.mxu0 %v2897_v40 }
  0xb8   : > { %2704 = vmatprep.subr.bf16.mxu0 %v2898_v55 }
  0xbb   : > { %2705 = vmatpush3.bf16.msra.mxu0 %v2898_v55 }
  0xbc   : > { %2706 = vmatprep.subr.bf16.mxu0 %v2899_v12 }
  0xbf   : > { %2707 = vmatpush3.bf16.msra.mxu0 %v2899_v12 }
  0xc2   : > { %2709 = vmatmul.mubr.bf16.vlgmr.msra.gmra.mrb[0].mxu0 %v1791_v22 }
 0x173   : > { %v2610_v2 = vpop.f32.mrb[0].mxu1 }
 0x174   : > { %v1125_v16 = vpop.f32.mrb[1].mxu1 }
 0x175   : > { %v2611_v17 = vpop.f32.mrb[2].mxu1 }
 0x176   : > { %v1128_v30 = vpop.f32.mrb[3].mxu1 }
 0x195   : > { %v2710_v43 = vpop.f32.mrb[0].mxu0 }
 0x196   : > { %v1876_v25 = vpop.f32.mrb[1].mxu0 }
 0x197   : > { %v2713_v26 = vadd.f32 %v1876_v25, %v1125_v16  ;;  %v2711_v27 = vpop.f32.mrb[2].mxu0 }
 0x198   : > { %v1879_v51 = vpop.f32.mrb[3].mxu0 }
 0x199   : > { %v1899_v35 = vcombine.high %v2713_v26, %v2713_v26  ;;  %v1914_v45 = vadd.f32 %v2713_v26, %v2425_v23  ;;  %v2715_v32 = vadd.f32 %v1879_v51, %v1128_v30 }
 0x19b   : > { %v1915_v39 = vadd.f32 %v2425_v23, %v1899_v35  ;;  %v1922_v36 = vmax.f32 %v1914_v45, 0.0  ;;  %v1900_v22 = vcombine.high %v2715_v32, %v2715_v32  ;;  %v1916_v47 = vadd.f32 %v2715_v32, %v2425_v23 }
 0x19d   : > { %v1923_v49 = vmax.f32 %v1915_v39, 0.0  ;;  %v1930_v50 = vpack.c.bf16 %v1922_v36, %v1922_v36  ;;  %v1917_v37 = vadd.f32 %v2425_v23, %v1900_v22  ;;  %v1924_v13 = vmax.f32 %v1916_v47, 0.0  ;;  %1952 = sbr.rel (!%p3018_p3) target bundleno = 430 (0x1ae), region = 40 }
 0x19f   : > { %v1931_v42 = vpack.c.bf16 %v1923_v49, %v1923_v49  ;;  %1938 = vst [vmem:[%s259_s15] sm:$0x3] %v1930_v50  ;;  %v1925_v53 = vmax.f32 %v1917_v37, 0.0  ;;  %v1932_v56 = vpack.c.bf16 %v1924_v13, %v1924_v13 }
 0x1a1   : > { %1939 = vst [vmem:[%s259_s15 + $0x2] sm:$0x3] %v1931_v42  ;;  %v1933_v24 = vpack.c.bf16 %v1925_v53, %v1925_v53  ;;  %1940 = vst [vmem:[%s259_s15 + $0x4] sm:$0x3] %v1932_v56 }
 0x1a3   : > { %1941 = vst [vmem:[%s259_s15 + $0x6] sm:$0x3] %v1933_v24 }
 0x1a4 LB: >> { %s1973_s26 = sadd.s32 1, %s2958_s26   ;;  %s2958_s26 = sphi %s2956_s26, %s1973_s26  }
 0x1a5   : >> { %p1972_p9 = scmp.ge.s32.totalorder %s1973_s26, 1 }
 0x1a6   : >> { %v1979_v57 = vld [vmem:[%s259_s15] sm:$0x3] }
 0x1a7   : >> { %1980 = vst [vmem:[%s1960_s24] sm:$0x3] %v1979_v57  ;;  %1975 = sbr.rel (!%p1972_p9) target bundleno = 420 (0x1a4), region = 133 }
 0x1a8   : >> { %v1981_v38 = vld [vmem:[%s259_s15 + $0x2] sm:$0x3]  ;;  %v1983_v48 = vld [vmem:[%s259_s15 + $0x4] sm:$0x3] }
 0x1a9   : >> { %1982 = vst [vmem:[%s1960_s24 + $0x2] sm:$0x3] %v1981_v38  ;;  %1984 = vst [vmem:[%s1960_s24 + $0x4] sm:$0x3] %v1983_v48 }
 0x1aa   : >> { %v1985_v61 = vld [vmem:[%s259_s15 + $0x6] sm:$0x3] }
 0x1ab   : >> { %1986 = vst [vmem:[%s1960_s24 + $0x6] sm:$0x3] %v1985_v61 }
 0x1ae PF: > { %s14_s19 = sadd.s32 1, %s2954_s19   ;;  %s3679_s15 = smov %s2942_s16 }
 0x1af   : > { %p11_p10 = scmp.ge.s32.totalorder %s14_s19, 4   ;;  %s3680_s16 = smov %s3027_s25 }
 0x1b0   : > { %s3681_s17 = smov %s2950_s18  ;;  %s3682_s18 = smov %s3684_s21 }
 0x1b1   :  { %13 = sbr.rel (!%p11_p10) target bundleno = 3 (0x3), region = 155 }

// kernel: _lambda_.28
= control target key start
LH: loop header
LB: loop body
LE: loop exit
PB: predicated region body
PF: predicated region fallthrough
CT: control target
= control target key end

     0   :  { %s3109_s18 = smov 0   ;;  %s3111_s19 = smov 0   ;;  %s3792_s0 = inlined_call_operand.vmem [shape: bf16[2,10,6,128], index: 0, kind: input, shape index: {}, may-alias: {0,1}]   ;;  %s3793_s1 = inlined_call_operand.vmem [shape: bf16[2,10,6,128], index: 1, kind: input, shape index: {}, may-alias: {0,1}]   ;;  %s3794_s2 = inlined_call_operand.vmem [shape: bf16[9,128,128], index: 2, kind: input, shape index: {}]   ;;  %s3795_s3 = inlined_call_operand.vmem [shape: f32[1,128], index: 3, kind: input, shape index: {}]   ;;  %s3796_s4 = inlined_call_operand.vmem [shape: bf16[2,4,4,128], index: 4, kind: input, shape index: {}]   ;;  %s3797_s5 = inlined_call_operand.vmem [shape: bf16[2,4,4,128], index: 5, kind: output, shape index: {}]  }
   0x1   :  { %s3113_s20 = smov 0   ;;  %s3115_s21 = smov 0  }
   0x2   :  { %s3117_s22 = smov 0  }
   0x3 LB: > { %s2322_s23 = sadd.s32 4294967295, %s3072_s22   ;;  %s27_s24 = sadd.s32 1, %s3068_s21  ;;  %s3072_s22 = sphi %s3117_s22, %s15_s22   ;;  %s3068_s21 = sphi %s3115_s21, %s3810_s21   ;;  %s3064_s20 = sphi %s3113_s20, %s3809_s20   ;;  %s3060_s19 = sphi %s3111_s19, %s3808_s19   ;;  %s3056_s18 = sphi %s3109_s18, %s3807_s18  }
   0x4   : > { %p29_p0 = scmp.ge.s32.totalorder %s27_s24, 2  ;;  %s166_s25 = sadd.s32 1, %s3060_s19 }
   0x5   : > { %p176_p1 = scmp.ne.s32.totalorder %s3060_s19, %s3056_s18  ;;  %p177_p2 = scmp.eq.s32.totalorder %s2322_s23, 1 }
   0x6   : > { %s3812_s24 = smov (%p29_p0, %s27_s24), 0  ;;  %p2326_p4 = scmp.ge.s32.totalorder %s3072_s22, 1 }
   0x7   : > { %p3141_p3 = por %p177_p2, %p176_p1  ;;  %s161_s27 = ssub.s32 %s3068_s21, %s3812_s24 }
   0x8   : > { %p262_p5 = scmp.lt.s32.totalorder %s3072_s22, 3  ;;  %p164_p6 = scmp.eq.s32.totalorder %s161_s27, 0 }
   0xa   : > { %p263_p7 = pnand %p2326_p4, %p262_p5 }
   0xb   : > { %s3150_s28 = scalar_select %p164_p6, %s3060_s19, %s166_s25  }
   0xc   : > { %266 = sbr.rel (%p263_p7) target bundleno = 432 (0x1b0), region = 40  ;;  %v2938_v0 = vld [vmem:[%s3794_s2 + $0x40] sm:$0xff] (!%p263_p7)   ;;  %p324_p8 = scmp.lt.s32.totalorder (!%p263_p7), %s3064_s20, 1  ;;  %v2940_v2 = vld [vmem:[%s3794_s2 + $0x48] sm:$0xff] (!%p263_p7)   ;;  %v2942_v4 = vld [vmem:[%s3794_s2 + $0x50] sm:$0xff] (!%p263_p7)   ;;  %v406_v10 = vlaneseq (!%p263_p7)  ;;  %vm869_vm7 = vcmask (!%p263_p7), 1040384  }
   0xd   : > { %v2939_v1 = vld [vmem:[%s3794_s2 + $0x100] sm:$0xff] (!%p263_p7)   ;;  %2650 = vmatprep.subr.bf16.mxu1 (!%p263_p7), %v2938_v0  ;;  %v2941_v3 = vld [vmem:[%s3794_s2 + $0x108] sm:$0xff] (!%p263_p7)   ;;  %v2943_v5 = vld [vmem:[%s3794_s2 + $0x110] sm:$0xff] (!%p263_p7)   ;;  %v3078_v14 = vmov (!%p263_p7), 1983009808   ;;  %vm870_vm8 = vcmask (!%p263_p7), 1042434  }
   0xe   : > { %2730 = vmatprep.subr.bf16.mxu0 (!%p263_p7), %v2939_v1  ;;  %2651 = vmatpush3.bf16.msra.mxu1 (!%p263_p7), %v2938_v0  ;;  %v2944_v6 = vld [vmem:[%s3794_s2 + $0x58] sm:$0xff] (!%p263_p7)   ;;  %v2946_v8 = vld [vmem:[%s3794_s2 + $0x60] sm:$0xff] (!%p263_p7)   ;;  %v2948_v11 = vld [vmem:[%s3794_s2 + $0x68] sm:$0xff] (!%p263_p7)   ;;  %v404_v15 = vunpack.c.l.s4 (!%p263_p7), %v3078_v14  ;;  %v407_v16 = vshrl.u32 (!%p263_p7), %v406_v10, 7  ;;  %vm467_vm0 = vsmask.f32 (!%p263_p7), 1280 }
   0xf   : > { %2731 = vmatpush3.bf16.msra.mxu0 (!%p263_p7), %v2939_v1  ;;  %2652 = vmatprep.subr.bf16.mxu1 (!%p263_p7), %v2940_v2  ;;  %v2945_v7 = vld [vmem:[%s3794_s2 + $0x118] sm:$0xff] (!%p263_p7)   ;;  %v2947_v9 = vld [vmem:[%s3794_s2 + $0x120] sm:$0xff] (!%p263_p7)   ;;  %v2949_v12 = vld [vmem:[%s3794_s2 + $0x128] sm:$0xff] (!%p263_p7)   ;;  %vm468_vm1 = vsmask.f32 (!%p263_p7), 3336  ;;  %vm872_vm9 = vcmask (!%p263_p7), 1044484  }
  0x10   : > { %2732 = vmatprep.subr.bf16.mxu0 (!%p263_p7), %v2941_v3  ;;  %v2950_v13 = vld [vmem:[%s3794_s2 + $0x70] sm:$0xff] (!%p263_p7)   ;;  %v405_v22 = vunpack.c.0.s8 (!%p263_p7), %v404_v15  ;;  %v2952_v27 = vld [vmem:[%s3794_s2 + $0x78] sm:$0xff] (!%p263_p7)   ;;  %vm470_vm2 = vsmask.f32 (!%p263_p7), 5392  ;;  %vm472_vm3 = vsmask.f32 (!%p263_p7), 7448  ;;  %vm3257_vm4 = vmor (!%p263_p7), %vm467_vm0, %vm468_vm1 }
  0x11   : > { %v2951_v17 = vld [vmem:[%s3794_s2 + $0x130] sm:$0xff] (!%p263_p7)   ;;  %v2953_v28 = vld [vmem:[%s3794_s2 + $0x138] sm:$0xff] (!%p263_p7)   ;;  %v3289_v43 = vld [vmem:[%s3794_s2] sm:$0xff] (!%p263_p7)   ;;  %vm874_vm10 = vcmask (!%p263_p7), 1046534   ;;  %s316_s25 = sand.u32 (!%p263_p7), 1, %s3056_s18  }
  0x12   : > { %2653 = vmatpush3.bf16.msra.mxu1 (!%p263_p7), %v2940_v2  ;;  %v3221_v24 = vsub.s32 (!%p263_p7), %v405_v22, %v407_v16  ;;  %v3301_v48 = vld [vmem:[%s3794_s2 + $0x140] sm:$0xff] (!%p263_p7)   ;;  %vm3309_vm5 = vmor (!%p263_p7), %vm3257_vm4, %vm470_vm2  ;;  %v2957_v2 = vld [vmem:[%s3794_s2 + $0x148] sm:$0xff] (!%p263_p7)  }
  0x13   : > { %s3166_s12 = scalar_select %p324_p8, %s3064_s20, 1  ;;  %2733 = vmatpush3.bf16.msra.mxu0 %v2941_v3  ;;  %2654 = vmatprep.subr.bf16.mxu1 %v2942_v4  ;;  %vm3319_vm6 = vmor %vm3309_vm5, %vm472_vm3 }
  0x14   : > { %2734 = vmatprep.subr.bf16.mxu0 %v2943_v5  ;;  %vm871_vm11 = vmor %vm869_vm7, %vm870_vm8  ;;  %s2559_s27 = sshll.u32 (%p3141_p3), %s3064_s20, 3  ;;  %s3074_s8 = smov (%p3141_p3), 0  }
  0x15   : > { %s2862_s6 = smul.u32 40, %s3166_s12  ;;  %vm873_vm12 = vmor %vm871_vm11, %vm872_vm9  ;;  %s2057_s7 = scalar_lea.vmem (%p3141_p3), %s3797_s5, %s2559_s27  }
  0x16   : > { %2655 = vmatpush3.bf16.msra.mxu1 %v2942_v4  ;;  %vm3434_vm13 = vmor %vm873_vm12, %vm874_vm10 }
  0x17   : > { %2735 = vmatpush3.bf16.msra.mxu0 %v2943_v5  ;;  %2656 = vmatprep.subr.bf16.mxu1 %v2944_v6  ;;  %s3195_s14 = scalar_lea.vmem %s3792_s0, %s2862_s6  ;;  %s2557_s15 = sadd.s32 32, %s2862_s6 }
  0x18   : > { %2736 = vmatprep.subr.bf16.mxu0 %v2945_v7  ;;  %v3207_v18 = vld [vmem:[%s3195_s14] sm:$0x7]  ;;  %v3210_v19 = vld [vmem:[%s3195_s14 + $0x4] sm:$0x7]  ;;  %v3213_v20 = vld [vmem:[%s3195_s14 + $0x8] sm:$0x7]  ;;  %s347_s16 = scalar_lea.vmem %s3793_s1, %s2557_s15 }
  0x19   : > { %v3216_v21 = vld [vmem:[%s3195_s14 + $0xc] sm:$0x7]  ;;  %v3219_v23 = vld [vmem:[%s3195_s14 + $0x10] sm:$0x7]  ;;  %v3224_v25 = vld [vmem:[%s3195_s14 + $0x14] sm:$0x7]  ;;  %v736_v29 = vcombine.low %v3207_v18, %v3210_v19  ;;  %v3241_v31 = vrot.slane %v3207_v18, %v3221_v24  ;;  %v3245_v32 = vrot.slane %v3210_v19, %v3221_v24  ;;  %v3249_v33 = vrot.slane %v3213_v20, %v3221_v24 }
  0x1a   : > { %2657 = vmatpush3.bf16.msra.mxu1 %v2944_v6  ;;  %v3227_v26 = vld [vmem:[%s3195_s14 + $0x18] sm:$0x7]  ;;  %v737_v30 = vcombine.low %v3213_v20, %v3216_v21  ;;  %v3253_v34 = vrot.slane %v3216_v21, %v3221_v24  ;;  %v3263_v36 = vrot.slane %v3219_v23, %v3221_v24  ;;  %v3267_v37 = vrot.slane %v3224_v25, %v3221_v24  ;;  %s2558_s15 = sshll.u32 %s3166_s12, 3  ;;  %s2327_s12 = sshll.u32 %s316_s25, 4 }
  0x1b   : > { %2737 = vmatpush3.bf16.msra.mxu0 %v2945_v7  ;;  %2658 = vmatprep.subr.bf16.mxu1 %v2946_v8  ;;  %v3271_v38 = vrot.slane %v3227_v26, %v3221_v24  ;;  %v3275_v39 = vcombine.high %v3241_v31, %v3241_v31  ;;  %v3279_v40 = vcombine.high %v3245_v32, %v3245_v32  ;;  %v475_v42 = vshrl.u32 %v3241_v31, 16  ;;  %s318_s18 = scalar_lea.vmem [#allocation2], %s2327_s12  }
  0x1c   : > { %2738 = vmatprep.subr.bf16.mxu0 %v2947_v9  ;;  %v3283_v41 = vcombine.high %v3249_v33, %v3249_v33  ;;  %v3293_v44 = vcombine.high %v3253_v34, %v3253_v34  ;;  %v478_v45 = vshll.u32 %v3241_v31, 16  ;;  %v489_v46 = vshrl.u32 %v3245_v32, 16 }
  0x1d   : > { %v492_v47 = vshll.u32 %v3245_v32, 16  ;;  %v477_v49 = vrot.slane %v475_v42, 6  ;;  %v484_v50 = vshll.u32 %v3275_v39, 16  ;;  %v498_v51 = vshll.u32 %v3279_v40, 16 }
  0x1e   : > { %2659 = vmatpush3.bf16.msra.mxu1 %v2946_v8  ;;  %v503_v52 = vshrl.u32 %v3249_v33, 16  ;;  %v480_v54 = vrot.slane %v478_v45, 7  ;;  %v491_v55 = vrot.slane %v489_v46, 6  ;;  %v506_v57 = vshll.u32 %v3249_v33, 16 }
  0x1f   : > { %2739 = vmatpush3.bf16.msra.mxu0 %v2947_v9  ;;  %2660 = vmatprep.subr.bf16.mxu1 %v2948_v11  ;;  %v494_v56 = vrot.slane %v492_v47, 7  ;;  %v486_v58 = vrot.slane %v484_v50, 7  ;;  %v500_v59 = vrot.slane %v498_v51, 7  ;;  %v512_v61 = vshll.u32 %v3283_v41, 16 }
  0x20   : > { %2740 = vmatprep.subr.bf16.mxu0 %v2949_v12  ;;  %v505_v60 = vrot.slane %v503_v52, 6  ;;  %v481_v62 = vor.u32 %v480_v54, %v477_v49  ;;  %v508_v0 = vrot.slane %v506_v57, 7  ;;  %v517_v1 = vshrl.u32 %v3253_v34, 16 }
  0x21   : > { %v495_v63 = vor.u32 %v494_v56, %v491_v55  ;;  %v514_v3 = vrot.slane %v512_v61, 7  ;;  %v520_v4 = vshll.u32 %v3253_v34, 16  ;;  %v526_v5 = vshll.u32 %v3293_v44, 16 }
  0x22   : > { %2661 = vmatpush3.bf16.msra.mxu1 %v2948_v11  ;;  %v3328_v6 = vcombine.high %v3263_v36, %v3263_v36  ;;  %v482_v7 = vrot.slane %v481_v62, 2  ;;  %v509_v9 = vor.u32 %v508_v0, %v505_v60  ;;  %v519_v10 = vrot.slane %v517_v1, 6 }
  0x23   : > { %2741 = vmatpush3.bf16.msra.mxu0 %v2949_v12  ;;  %2662 = vmatprep.subr.bf16.mxu1 %v2950_v13  ;;  %v496_v8 = vrot.slane %v495_v63, 2  ;;  %v522_v11 = vrot.slane %v520_v4, 7  ;;  %v528_v12 = vrot.slane %v526_v5, 7  ;;  %v531_v14 = vshrl.u32 %v3263_v36, 16 }
  0x24   : > { %2742 = vmatprep.subr.bf16.mxu0 %v2951_v17  ;;  %v487_v15 = vsel %vm3319_vm6, %v482_v7, %v486_v58  ;;  %v534_v22 = vshll.u32 %v3263_v36, 16  ;;  %v540_v45 = vshll.u32 %v3328_v6, 16  ;;  %v545_v49 = vshrl.u32 %v3267_v37, 16 }
  0x25   : > { %v501_v16 = vsel %vm3319_vm6, %v496_v8, %v500_v59  ;;  %v533_v42 = vrot.slane %v531_v14, 6  ;;  %v548_v50 = vshll.u32 %v3267_v37, 16  ;;  %v3360_v61 = vcombine.high %v3271_v38, %v3271_v38 }
  0x26   : > { %2663 = vmatpush3.bf16.msra.mxu1 %v2950_v13  ;;  %v3333_v13 = vcombine.high %v3267_v37, %v3267_v37  ;;  %v603_v35 = vcombine.low %v487_v15, %v501_v16  ;;  %v536_v47 = vrot.slane %v534_v22, 7  ;;  %v542_v53 = vrot.slane %v540_v45, 7 }
  0x27   : > { %2743 = vmatpush3.bf16.msra.mxu0 %v2951_v17  ;;  %2664 = vmatprep.subr.bf16.mxu1 %v2952_v27  ;;  %v510_v17 = vrot.slane %v509_v9, 2  ;;  %v547_v56 = vrot.slane %v545_v49, 6  ;;  %v550_v57 = vrot.slane %v548_v50, 7  ;;  %v559_v5 = vshrl.u32 %v3271_v38, 16  ;;  %v3374_v9 = vld [vmem:[%s347_s16] sm:$0x7] }
  0x28   : > { %2744 = vmatprep.subr.bf16.mxu0 %v2953_v28  ;;  %v611_v52 = vrot.slane %v603_v35, %v3221_v24  ;;  %v554_v54 = vshll.u32 %v3333_v13, 16  ;;  %v537_v55 = vor.u32 %v536_v47, %v533_v42  ;;  %v562_v7 = vshll.u32 %v3271_v38, 16 }
  0x29   : > { %v515_v46 = vsel %vm3319_vm6, %v510_v17, %v514_v3  ;;  %v551_v1 = vor.u32 %v550_v57, %v547_v56  ;;  %v568_v8 = vshll.u32 %v3360_v61, 16 }
  0x2a   : > { %2665 = vmatpush3.bf16.msra.mxu1 %v2952_v27  ;;  %v3344_v27 = vld [vmem:[%s3195_s14 + $0x1c] sm:$0x7]  ;;  %v1256_v58 = vcombine.low %v501_v16, %v515_v46  ;;  %v556_v60 = vrot.slane %v554_v54, 7  ;;  %v538_v0 = vrot.slane %v537_v55, 2  ;;  %v561_v16 = vrot.slane %v559_v5, 6 }
  0x2b   : > { %2745 = vmatpush3.bf16.msra.mxu0 %v2953_v28  ;;  %2670 = vmatprep.subr.bf16.mxu1 %v3289_v43  ;;  %v523_v28 = vor.u32 %v522_v11, %v519_v10  ;;  %v3364_v62 = vrot.slane %v3344_v27, %v3221_v24  ;;  %v564_v17 = vrot.slane %v562_v7, 7  ;;  %v570_v22 = vrot.slane %v568_v8, 7 }
  0x2c   : > { %2750 = vmatprep.subr.bf16.mxu0 %v3301_v48  ;;  %v1264_v3 = vrot.slane %v1256_v58, %v3221_v24  ;;  %v543_v11 = vsel %vm3319_vm6, %v538_v0, %v542_v53  ;;  %v3392_v54 = vrot.slane %v3374_v9, %v3221_v24  ;;  %v744_v55 = vrot.slane %v736_v29, %v3221_v24 }
  0x2d   : > { %v524_v51 = vrot.slane %v523_v28, 2  ;;  %v3369_v4 = vcombine.high %v3364_v62, %v3364_v62  ;;  %v573_v14 = vshrl.u32 %v3364_v62, 16  ;;  %v3382_v28 = vld [vmem:[%s347_s16 + $0x4] sm:$0x7]  ;;  %v565_v50 = vor.u32 %v564_v17, %v561_v16  ;;  %s361_s16 = scalar_lea.vmem %s3796_s4, %s2558_s15 }
  0x2e   : > { %v1226_v0 = vshrl.u32 %v3392_v54, 16 }
  0x2f   : > { %v529_v59 = vsel %vm3319_vm6, %v524_v51, %v528_v12  ;;  %v552_v12 = vrot.slane %v551_v1, 2  ;;  %v575_v45 = vrot.slane %v573_v14, 6  ;;  %v582_v51 = vshll.u32 %v3369_v4, 16 }
  0x30   : > { %v604_v63 = vcombine.low %v515_v46, %v529_v59  ;;  %v1257_v15 = vcombine.low %v529_v59, %v543_v11  ;;  %v576_v46 = vshll.u32 %v3364_v62, 16  ;;  %v566_v57 = vrot.slane %v565_v50, 2 }
  0x31   : > { %v557_v42 = vsel %vm3319_vm6, %v552_v12, %v556_v60  ;;  %v584_v58 = vrot.slane %v582_v51, 7  ;;  %v1229_v1 = vshll.u32 %v3392_v54, 16  ;;  %v1228_v8 = vrot.slane %v1226_v0, 6  ;;  %v2956_v0 = vld [vmem:[%s3794_s2 + $0x8] sm:$0xff]  }
  0x32   : > { %v3377_v10 = vrot.slane %v604_v63, %v3221_v24  ;;  %v620_v47 = vcombine.low %v543_v11, %v557_v42  ;;  %v1271_v49 = vrot.slane %v1257_v15, %v3221_v24  ;;  %v578_v53 = vrot.slane %v576_v46, 7 }
  0x33   : > { %v3409_v63 = vcombine.high %v3392_v54, %v3392_v54  ;;  %v571_v18 = vsel %vm3319_vm6, %v566_v57, %v570_v22  ;;  %v1231_v11 = vrot.slane %v1229_v1, 7  ;;  %v3430_v46 = vrot.slane %v737_v30, %v3221_v24 }
  0x34   : > { %v619_v35 = vcombine.low %v611_v52, %v3377_v10  ;;  %v3396_v52 = vrot.slane %v3382_v28, %v3221_v24  ;;  %v1272_v56 = vcombine.low %v1264_v3, %v1271_v49  ;;  %v3403_v59 = vrot.slane %v620_v47, %v3221_v24 }
  0x35   : > { %v579_v60 = vor.u32 %v578_v53, %v575_v45  ;;  %v1235_v12 = vshll.u32 %v3409_v63, 16  ;;  %v1273_v14 = vcombine.low %v557_v42, %v571_v18  ;;  %v2365_v57 = vrot.slane %v3245_v32, 9 }
  0x36   : > { %2666 = vmatprep.mubr.bf16.mxu1 %v619_v35  ;;  %2746 = vmatprep.mubr.bf16.mxu0 %v1272_v56  ;;  %v3417_v29 = vcombine.high %v3396_v52, %v3396_v52  ;;  %v1691_v3 = vshrl.u32 %v3396_v52, 16  ;;  %v1694_v5 = vshll.u32 %v3396_v52, 16  ;;  %v1232_v35 = vor.u32 %v1231_v11, %v1228_v8 }
  0x37   : > { %v580_v7 = vrot.slane %v579_v60, 2  ;;  %v1237_v45 = vrot.slane %v1235_v12, 7  ;;  %v1281_v49 = vrot.slane %v1273_v14, %v3221_v24  ;;  %v752_v56 = vcombine.low %v744_v55, %v3430_v46 }
  0x38   : > { %v1693_v15 = vrot.slane %v1691_v3, 6  ;;  %v1696_v16 = vrot.slane %v1694_v5, 7  ;;  %v1700_v17 = vshll.u32 %v3417_v29, 16  ;;  %v1233_v53 = vrot.slane %v1232_v35, 2  ;;  %v2959_v35 = vld [vmem:[%s3794_s2 + $0x150] sm:$0xff]  }
  0x39   : > { %v585_v22 = vsel %vm3319_vm6, %v580_v7, %v584_v58  ;;  %v882_v58 = vrot.slane %v3279_v40, 7  ;;  %v2366_v1 = vrot.slane %v3249_v33, 9  ;;  %v2367_v40 = vrot.slane %v3253_v34, 9 }
  0x3a   : > { %v621_v47 = vcombine.low %v571_v18, %v585_v22  ;;  %v1697_v50 = vor.u32 %v1696_v16, %v1693_v15  ;;  %v1702_v42 = vrot.slane %v1700_v17, 7  ;;  %v886_v18 = vrot.slane %v3283_v41, 7 }
  0x3b   : > { %v1238_v3 = vsel %vm3319_vm6, %v1233_v53, %v1237_v45  ;;  %v3453_v32 = vsel %vm3434_vm13, %v2365_v57, %v882_v58  ;;  %v890_v55 = vrot.slane %v3293_v44, 7  ;;  %v2368_v12 = vrot.slane %v3263_v36, 9  ;;  %v2958_v36 = vld [vmem:[%s3794_s2 + $0x10] sm:$0xff]   ;;  %v2960_v45 = vld [vmem:[%s3794_s2 + $0x18] sm:$0xff]  }
  0x3c   : > { %v3442_v30 = vrot.slane %v621_v47, %v3221_v24  ;;  %v1698_v60 = vrot.slane %v1697_v50, 2  ;;  %v1274_v7 = vcombine.low %v585_v22, %v1238_v3  ;;  %v887_v41 = vsel %vm3434_vm13, %v2366_v1, %v886_v18 }
  0x3d   : > { %v891_v11 = vsel %vm3434_vm13, %v2367_v40, %v890_v55  ;;  %v894_v34 = vrot.slane %v3328_v6, 7  ;;  %v1414_v14 = vcombine.low %v3453_v32, %v887_v41  ;;  %v2369_v22 = vrot.slane %v3267_v37, 9 }
  0x3e   : > { %v636_v5 = vcombine.low %v3403_v59, %v3442_v30  ;;  %v1703_v33 = vsel %vm3319_vm6, %v1698_v60, %v1702_v42  ;;  %v1288_v44 = vrot.slane %v1274_v7, %v3221_v24  ;;  %v902_v50 = vrot.slane %v3360_v61, 7  ;;  %v2961_v61 = vld [vmem:[%s3794_s2 + $0x158] sm:$0xff]  }
  0x3f   : > { %v3463_v8 = vcombine.low %v1238_v3, %v1703_v33  ;;  %v895_v15 = vsel %vm3434_vm13, %v2368_v12, %v894_v34  ;;  %v1422_v17 = vrot.slane %v1414_v14, %v3221_v24  ;;  %v2371_v37 = vrot.slane %v3364_v62, 9 }
  0x40   : > { %2667 = vmatmul.mubr.bf16.vlgmr.msra.gmra.mrb[0].mxu1 %v636_v5  ;;  %v1289_v16 = vcombine.low %v1281_v49, %v1288_v44  ;;  %v1415_v6 = vcombine.low %v891_v11, %v895_v15  ;;  %v2370_v49 = vrot.slane %v3271_v38, 9  ;;  %v2444_v42 = vrot.slane %v3392_v54, 9 }
  0x41   : > { %2671 = vmatpush3.bf16.msra.mxu1 %v3289_v43  ;;  %2686 = vmatprep.mubr.bf16.mxu1 %v752_v56  ;;  %v898_v43 = vrot.slane %v3333_v13, 7  ;;  %v906_v13 = vrot.slane %v3369_v4, 7  ;;  %v1395_v53 = vrot.slane %v3409_v63, 7  ;;  %v2962_v4 = vld [vmem:[%s3794_s2 + $0x20] sm:$0xff]   ;;  %v1570_v58 = vcombine.low %v3374_v9, %v3382_v28 }
  0x42   : > { %2672 = vmatprep.subr.bf16.mxu1 %v2956_v0  ;;  %2747 = vmatmul.mubr.bf16.vlgmr.msra.gmra.mrb[0].mxu0 %v1289_v16  ;;  %v1429_v47 = vrot.slane %v1415_v6, %v3221_v24  ;;  %v3507_v62 = vsel %vm3434_vm13, %v2370_v49, %v902_v50  ;;  %v2517_v60 = vrot.slane %v3396_v52, 9  ;;  %v1081_v1 = vcombine.low %v3216_v21, %v3219_v23 }
  0x43   : > { %2751 = vmatpush3.bf16.msra.mxu0 %v3301_v48  ;;  %v3499_v57 = vsel %vm3434_vm13, %v2369_v22, %v898_v43  ;;  %v926_v48 = vcombine.low %v887_v41, %v891_v11  ;;  %v3514_v54 = vsel %vm3434_vm13, %v2371_v37, %v906_v13  ;;  %v3518_v63 = vsel %vm3434_vm13, %v2444_v42, %v1395_v53  ;;  %v2967_v43 = vld [vmem:[%s3794_s2 + $0x170] sm:$0xff]   ;;  %v2973_v13 = vld [vmem:[%s3794_s2 + $0x180] sm:$0xff]   ;;  %v2976_v42 = vld [vmem:[%s3794_s2 + $0x88] sm:$0xff]  }
  0x44   : > { %2752 = vmatprep.subr.bf16.mxu0 %v2957_v2  ;;  %v1430_v56 = vcombine.low %v1422_v17, %v1429_v47  ;;  %v942_v38 = vcombine.low %v895_v15, %v3499_v57  ;;  %v1097_v18 = vcombine.low %v3224_v25, %v3227_v26  ;;  %v1836_v3 = vrot.slane %v3417_v29, 7 }
  0x45   : > { %2673 = vmatpush3.bf16.msra.mxu1 %v2956_v0  ;;  %v1080_v0 = vcombine.low %v3210_v19, %v3213_v20  ;;  %v3531_v40 = vrot.slane %v926_v48, %v3221_v24  ;;  %v3537_v28 = vrot.slane %v1570_v58, %v3221_v24  ;;  %v1098_v19 = vcombine.low %v3344_v27, %v3374_v9  ;;  %v2963_v20 = vld [vmem:[%s3794_s2 + $0x160] sm:$0xff]   ;;  %v2964_v9 = vld [vmem:[%s3794_s2 + $0x28] sm:$0xff]   ;;  %v2979_v48 = vld [vmem:[%s3794_s2 + $0x190] sm:$0xff]  }
  0x46   : > { %2674 = vmatprep.subr.bf16.mxu1 %v2958_v36  ;;  %2766 = vmatprep.mubr.bf16.mxu0 %v1430_v56  ;;  %v3534_v55 = vrot.slane %v942_v38, %v3221_v24  ;;  %v3548_v52 = vrot.slane %v1081_v1, %v3221_v24  ;;  %v3551_v29 = vrot.slane %v1097_v18, %v3221_v24  ;;  %v2364_v44 = vrot.slane %v3241_v31, 9  ;;  %v2966_v31 = vld [vmem:[%s3794_s2 + $0x30] sm:$0xff]   ;;  %v2989_v1 = vld [vmem:[%s3794_s2 + $0x1b8] sm:$0xff]   ;;  %v2990_v18 = vld [vmem:[%s3794_s2 + $0xc0] sm:$0xff]  }
  0x47   : > { %2753 = vmatpush3.bf16.msra.mxu0 %v2957_v2  ;;  %v3545_v21 = vrot.slane %v1080_v0, %v3221_v24  ;;  %v943_v5 = vcombine.low %v3507_v62, %v3514_v54  ;;  %v3559_v7 = vrot.slane %v1098_v19, %v3221_v24  ;;  %v1721_v33 = vcombine.low %v3377_v10, %v3403_v59  ;;  %v2986_v58 = vld [vmem:[%s3794_s2 + $0xb0] sm:$0xff]   ;;  %v2988_v0 = vld [vmem:[%s3794_s2 + $0xb8] sm:$0xff]   ;;  %v2991_v19 = vld [vmem:[%s3794_s2 + $0x1c0] sm:$0xff]  }
  0x48   : > { %2754 = vmatprep.subr.bf16.mxu0 %v2959_v35  ;;  %v1729_v11 = vrot.slane %v3463_v8, %v3221_v24  ;;  %v1855_v12 = vcombine.low %v3531_v40, %v3534_v55  ;;  %v1837_v34 = vsel %vm3434_vm13, %v2517_v60, %v1836_v3  ;;  %v878_v14 = vrot.slane %v3275_v39, 7  ;;  %v2965_v8 = vld [vmem:[%s3794_s2 + $0x168] sm:$0xff]   ;;  %v2987_v60 = vld [vmem:[%s3794_s2 + $0x1b0] sm:$0xff]   ;;  %v3000_v10 = vld [vmem:[%s3794_s2 + $0x1e0] sm:$0xff]  }
  0x49   : > { %2675 = vmatpush3.bf16.msra.mxu1 %v2958_v36  ;;  %v1096_v41 = vcombine.low %v3545_v21, %v3548_v52  ;;  %v1113_v2 = vcombine.low %v3551_v29, %v3559_v7  ;;  %v1856_v15 = vcombine.low %v3518_v63, %v1837_v34  ;;  %v3586_v39 = vrot.slane %v943_v5, %v3221_v24  ;;  %v2994_v5 = vld [vmem:[%s3794_s2 + $0x1c8] sm:$0xff]   ;;  %v2997_v34 = vld [vmem:[%s3794_s2 + $0xd8] sm:$0xff]   ;;  %v2999_v52 = vld [vmem:[%s3794_s2 + $0xe0] sm:$0xff]  }
  0x4a   : > { %2676 = vmatprep.subr.bf16.mxu1 %v2960_v45  ;;  %v3580_v16 = vcombine.low %v3442_v30, %v1729_v11  ;;  %v753_v6 = vcombine.low %v3219_v23, %v3224_v25  ;;  %v754_v17 = vcombine.low %v3227_v26, %v3344_v27  ;;  %v879_v30 = vsel %vm3434_vm13, %v2364_v44, %v878_v14  ;;  %v2968_v23 = vld [vmem:[%s3794_s2 + $0x38] sm:$0xff]   ;;  %v2995_v11 = vld [vmem:[%s3794_s2 + $0xd0] sm:$0xff]   ;;  %v3001_v59 = vld [vmem:[%s3794_s2 + $0xe8] sm:$0xff]  }
  0x4b   : > { %2755 = vmatpush3.bf16.msra.mxu0 %v2959_v35  ;;  %v3589_v36 = vrot.slane %v1856_v15, %v3221_v24  ;;  %v925_v25 = vcombine.low %v879_v30, %v3453_v32  ;;  %v1431_v51 = vcombine.low %v3499_v57, %v3507_v62  ;;  %v1432_v35 = vcombine.low %v3514_v54, %v3518_v63  ;;  %v2972_v32 = vld [vmem:[%s3794_s2 + $0x80] sm:$0xff]   ;;  %v2978_v57 = vld [vmem:[%s3794_s2 + $0x90] sm:$0xff]   ;;  %v2984_v54 = vld [vmem:[%s3794_s2 + $0xa8] sm:$0xff]  }
  0x4c   : > { %2756 = vmatprep.subr.bf16.mxu0 %v2961_v61  ;;  %v761_v26 = vrot.slane %v753_v6, %v3221_v24  ;;  %v3608_v27 = vrot.slane %v754_v17, %v3221_v24  ;;  %v2982_v62 = vld [vmem:[%s3794_s2 + $0xa0] sm:$0xff]   ;;  %v2985_v63 = vld [vmem:[%s3794_s2 + $0x1a8] sm:$0xff]   ;;  %v958_v3 = vcombine.low %v3534_v55, %v3586_v39  ;;  %v2998_v21 = vld [vmem:[%s3794_s2 + $0x1d8] sm:$0xff]  }
  0x4d   : > { %2677 = vmatpush3.bf16.msra.mxu1 %v2960_v45  ;;  %v1864_v22 = vcombine.low %v3586_v39, %v3589_v36  ;;  %v2969_v45 = vld [vmem:[%s3794_s2 + $0x178] sm:$0xff]   ;;  %v933_v47 = vrot.slane %v925_v25, %v3221_v24  ;;  %v1439_v50 = vrot.slane %v1431_v51, %v3221_v24  ;;  %v1446_v37 = vrot.slane %v1432_v35, %v3221_v24  ;;  %v2977_v24 = vld [vmem:[%s3794_s2 + $0x188] sm:$0xff]   ;;  %v3004_v44 = vld [vmem:[%s3794_s2 + $0x1f0] sm:$0xff]  }
  0x4e   : > { %2678 = vmatprep.subr.bf16.mxu1 %v2962_v4  ;;  %v769_v49 = vcombine.low %v761_v26, %v3608_v27  ;;  %v1569_v38 = vcombine.low %v3430_v46, %v761_v26  ;;  %v2981_v46 = vld [vmem:[%s3794_s2 + $0x198] sm:$0xff]   ;;  %v3012_v6 = vld [vmem:[%s3794_s2 + $0x210] sm:$0xff]   ;;  %v3014_v7 = vld [vmem:[%s3794_s2 + $0x220] sm:$0xff]  }
  0x4f   : > { %2757 = vmatpush3.bf16.msra.mxu0 %v2961_v61  ;;  %v941_v53 = vcombine.low %v933_v47, %v3531_v40  ;;  %v1447_v56 = vcombine.low %v1439_v50, %v1446_v37  ;;  %v2980_v61 = vld [vmem:[%s3794_s2 + $0x98] sm:$0xff]   ;;  %v3015_v40 = vld [vmem:[%s3794_s2 + $0x228] sm:$0xff]   ;;  %v3016_v55 = vld [vmem:[%s3794_s2 + $0x230] sm:$0xff]  }
  0x50   : > { %2758 = vmatprep.subr.bf16.mxu0 %v2963_v20  ;;  %v3005_v14 = vld [vmem:[%s3794_s2 + $0xf8] sm:$0xff]   ;;  %v1997_v25 = vld [vmem:[%s361_s16 + $0x4] sm:$0x3] }
  0x51   : > { %2679 = vmatpush3.bf16.msra.mxu1 %v2962_v4  ;;  %v2983_v4 = vld [vmem:[%s3794_s2 + $0x1a0] sm:$0xff]   ;;  %v3006_v15 = vld [vmem:[%s3794_s2 + $0x1f8] sm:$0xff]  }
  0x52   : > { %2680 = vmatprep.subr.bf16.mxu1 %v2964_v9  ;;  %v3013_v29 = vld [vmem:[%s3794_s2 + $0x218] sm:$0xff]  }
  0x53   : > { %2759 = vmatpush3.bf16.msra.mxu0 %v2963_v20  ;;  %v2993_v20 = vld [vmem:[%s3794_s2 + $0xc8] sm:$0xff]  }
  0x54   : > { %2760 = vmatprep.subr.bf16.mxu0 %v2965_v8 }
  0x55   : > { %2681 = vmatpush3.bf16.msra.mxu1 %v2964_v9  ;;  %v1578_v9 = vcombine.low %v3608_v27, %v3537_v28  ;;  %v2996_v28 = vld [vmem:[%s3794_s2 + $0x1d0] sm:$0xff]   ;;  %v2542_v27 = vld [vmem:[%s3795_s3] ss:$0 sm:$0xff] }
  0x56   : > { %2682 = vmatprep.subr.bf16.mxu1 %v2966_v31 }
  0x57   : > { %2761 = vmatpush3.bf16.msra.mxu0 %v2965_v8  ;;  %v3010_v8 = vld [vmem:[%s3794_s2 + $0x200] sm:$0xff]  }
  0x58   : > { %2762 = vmatprep.subr.bf16.mxu0 %v2967_v43 }
  0x59   : > { %2683 = vmatpush3.bf16.msra.mxu1 %v2966_v31  ;;  %v3011_v31 = vld [vmem:[%s3794_s2 + $0x208] sm:$0xff]  }
  0x5a   : > { %2684 = vmatprep.subr.bf16.mxu1 %v2968_v23 }
  0x5b   : > { %2763 = vmatpush3.bf16.msra.mxu0 %v2967_v43  ;;  %v1995_v43 = vld [vmem:[%s361_s16] sm:$0x3] }
  0x5c   : > { %2764 = vmatprep.subr.bf16.mxu0 %v2969_v45  ;;  %v2003_v36 = vunpack.c.l.bf16 %v1995_v43 }
  0x5d   : > { %2685 = vmatpush3.bf16.msra.mxu1 %v2968_v23  ;;  %v1996_v23 = vld [vmem:[%s361_s16 + $0x2] sm:$0x3] }
  0x5e   : > { %2690 = vmatprep.subr.bf16.mxu1 %v2972_v32  ;;  %v2004_v35 = vunpack.c.l.bf16 %v1996_v23 }
  0x5f   : > { %2765 = vmatpush3.bf16.msra.mxu0 %v2969_v45 }
  0x60   : > { %2687 = vmatmul.mubr.bf16.vlgmr.msra.gmra.mrb[0].mxu1 %v769_v49  ;;  %2770 = vmatprep.subr.bf16.mxu0 %v2973_v13 }
  0x61   : > { %2691 = vmatpush3.bf16.msra.mxu1 %v2972_v32  ;;  %2706 = vmatprep.mubr.bf16.mxu1 %v941_v53  ;;  %v2005_v32 = vunpack.c.l.bf16 %v1997_v25 }
  0x62   : > { %2692 = vmatprep.subr.bf16.mxu1 %v2976_v42  ;;  %2767 = vmatmul.mubr.bf16.vlgmr.msra.gmra.mrb[0].mxu0 %v1447_v56 }
  0x63   : > { %2771 = vmatpush3.bf16.msra.mxu0 %v2973_v13  ;;  %2786 = vmatprep.mubr.bf16.mxu0 %v1569_v38 }
  0x64   : > { %2772 = vmatprep.subr.bf16.mxu0 %v2977_v24 }
  0x65   : > { %2693 = vmatpush3.bf16.msra.mxu1 %v2976_v42 }
  0x66   : > { %2694 = vmatprep.subr.bf16.mxu1 %v2978_v57 }
  0x67   : > { %2773 = vmatpush3.bf16.msra.mxu0 %v2977_v24 }
  0x68   : > { %2774 = vmatprep.subr.bf16.mxu0 %v2979_v48 }
  0x69   : > { %2695 = vmatpush3.bf16.msra.mxu1 %v2978_v57 }
  0x6a   : > { %2696 = vmatprep.subr.bf16.mxu1 %v2980_v61 }
  0x6b   : > { %2775 = vmatpush3.bf16.msra.mxu0 %v2979_v48 }
  0x6c   : > { %2776 = vmatprep.subr.bf16.mxu0 %v2981_v46 }
  0x6d   : > { %2697 = vmatpush3.bf16.msra.mxu1 %v2980_v61 }
  0x6e   : > { %2698 = vmatprep.subr.bf16.mxu1 %v2982_v62 }
  0x6f   : > { %2777 = vmatpush3.bf16.msra.mxu0 %v2981_v46 }
  0x70   : > { %2778 = vmatprep.subr.bf16.mxu0 %v2983_v4 }
  0x71   : > { %2699 = vmatpush3.bf16.msra.mxu1 %v2982_v62 }
  0x72   : > { %2700 = vmatprep.subr.bf16.mxu1 %v2984_v54 }
  0x73   : > { %2779 = vmatpush3.bf16.msra.mxu0 %v2983_v4 }
  0x74   : > { %2780 = vmatprep.subr.bf16.mxu0 %v2985_v63 }
  0x75   : > { %2701 = vmatpush3.bf16.msra.mxu1 %v2984_v54 }
  0x76   : > { %2702 = vmatprep.subr.bf16.mxu1 %v2986_v58 }
  0x77   : > { %2781 = vmatpush3.bf16.msra.mxu0 %v2985_v63 }
  0x78   : > { %2782 = vmatprep.subr.bf16.mxu0 %v2987_v60 }
  0x79   : > { %2703 = vmatpush3.bf16.msra.mxu1 %v2986_v58 }
  0x7a   : > { %2704 = vmatprep.subr.bf16.mxu1 %v2988_v0 }
  0x7b   : > { %2783 = vmatpush3.bf16.msra.mxu0 %v2987_v60 }
  0x7c   : > { %2784 = vmatprep.subr.bf16.mxu0 %v2989_v1 }
  0x7d   : > { %2705 = vmatpush3.bf16.msra.mxu1 %v2988_v0 }
  0x7e   : > { %2710 = vmatprep.subr.bf16.mxu1 %v2990_v18 }
  0x7f   : > { %2785 = vmatpush3.bf16.msra.mxu0 %v2989_v1 }
  0x80   : > { %2707 = vmatmul.mubr.bf16.vlgmr.msra.gmra.mrb[0].mxu1 %v958_v3  ;;  %2790 = vmatprep.subr.bf16.mxu0 %v2991_v19 }
  0x81   : > { %2711 = vmatpush3.bf16.msra.mxu1 %v2990_v18  ;;  %2726 = vmatprep.mubr.bf16.mxu1 %v1096_v41  ;;  %v3003_v41 = vld [vmem:[%s3794_s2 + $0xf0] sm:$0xff]  }
  0x82   : > { %2712 = vmatprep.subr.bf16.mxu1 %v2993_v20  ;;  %2787 = vmatmul.mubr.bf16.vlgmr.msra.gmra.mrb[0].mxu0 %v1578_v9 }
  0x83   : > { %2791 = vmatpush3.bf16.msra.mxu0 %v2991_v19  ;;  %2806 = vmatprep.mubr.bf16.mxu0 %v1721_v33  ;;  %v3002_v33 = vld [vmem:[%s3794_s2 + $0x1e8] sm:$0xff]  }
  0x84   : > { %2792 = vmatprep.subr.bf16.mxu0 %v2994_v5 }
  0x85   : > { %2713 = vmatpush3.bf16.msra.mxu1 %v2993_v20 }
  0x86   : > { %2714 = vmatprep.subr.bf16.mxu1 %v2995_v11 }
  0x87   : > { %2793 = vmatpush3.bf16.msra.mxu0 %v2994_v5 }
  0x88   : > { %2794 = vmatprep.subr.bf16.mxu0 %v2996_v28 }
  0x89   : > { %2715 = vmatpush3.bf16.msra.mxu1 %v2995_v11 }
  0x8a   : > { %2716 = vmatprep.subr.bf16.mxu1 %v2997_v34 }
  0x8b   : > { %2795 = vmatpush3.bf16.msra.mxu0 %v2996_v28 }
  0x8c   : > { %2796 = vmatprep.subr.bf16.mxu0 %v2998_v21 }
  0x8d   : > { %2717 = vmatpush3.bf16.msra.mxu1 %v2997_v34 }
  0x8e   : > { %2718 = vmatprep.subr.bf16.mxu1 %v2999_v52 }
  0x8f   : > { %2797 = vmatpush3.bf16.msra.mxu0 %v2998_v21 }
  0x90   : > { %2798 = vmatprep.subr.bf16.mxu0 %v3000_v10 }
  0x91   : > { %2719 = vmatpush3.bf16.msra.mxu1 %v2999_v52 }
  0x92   : > { %2720 = vmatprep.subr.bf16.mxu1 %v3001_v59 }
  0x93   : > { %2799 = vmatpush3.bf16.msra.mxu0 %v3000_v10 }
  0x94   : > { %2800 = vmatprep.subr.bf16.mxu0 %v3002_v33 }
  0x95   : > { %2721 = vmatpush3.bf16.msra.mxu1 %v3001_v59 }
  0x96   : > { %2722 = vmatprep.subr.bf16.mxu1 %v3003_v41 }
  0x97   : > { %2801 = vmatpush3.bf16.msra.mxu0 %v3002_v33 }
  0x98   : > { %2802 = vmatprep.subr.bf16.mxu0 %v3004_v44 }
  0x99   : > { %2723 = vmatpush3.bf16.msra.mxu1 %v3003_v41 }
  0x9a   : > { %2724 = vmatprep.subr.bf16.mxu1 %v3005_v14 }
  0x9b   : > { %2803 = vmatpush3.bf16.msra.mxu0 %v3004_v44 }
  0x9c   : > { %2804 = vmatprep.subr.bf16.mxu0 %v3006_v15 }
  0x9d   : > { %2725 = vmatpush3.bf16.msra.mxu1 %v3005_v14 }
  0x9f   : > { %2805 = vmatpush3.bf16.msra.mxu0 %v3006_v15 }
  0xa0   : > { %2727 = vmatmul.mubr.bf16.vlgmr.msra.gmra.mrb[0].mxu1 %v1113_v2  ;;  %2810 = vmatprep.subr.bf16.mxu0 %v3010_v8 }
  0xa2   : > { %2807 = vmatmul.mubr.bf16.vlgmr.msra.gmra.mrb[0].mxu0 %v3580_v16 }
  0xa3   : > { %2811 = vmatpush3.bf16.msra.mxu0 %v3010_v8  ;;  %2826 = vmatprep.mubr.bf16.mxu0 %v1855_v12  ;;  %v3017_v12 = vld [vmem:[%s3794_s2 + $0x238] sm:$0xff]  }
  0xa4   : > { %2812 = vmatprep.subr.bf16.mxu0 %v3011_v31 }
  0xa7   : > { %2813 = vmatpush3.bf16.msra.mxu0 %v3011_v31 }
  0xa8   : > { %2814 = vmatprep.subr.bf16.mxu0 %v3012_v6 }
  0xab   : > { %2815 = vmatpush3.bf16.msra.mxu0 %v3012_v6 }
  0xac   : > { %2816 = vmatprep.subr.bf16.mxu0 %v3013_v29 }
  0xaf   : > { %2817 = vmatpush3.bf16.msra.mxu0 %v3013_v29 }
  0xb0   : > { %2818 = vmatprep.subr.bf16.mxu0 %v3014_v7 }
  0xb3   : > { %2819 = vmatpush3.bf16.msra.mxu0 %v3014_v7 }
  0xb4   : > { %2820 = vmatprep.subr.bf16.mxu0 %v3015_v40 }
  0xb7   : > { %2821 = vmatpush3.bf16.msra.mxu0 %v3015_v40 }
  0xb8   : > { %2822 = vmatprep.subr.bf16.mxu0 %v3016_v55 }
  0xbb   : > { %2823 = vmatpush3.bf16.msra.mxu0 %v3016_v55 }
  0xbc   : > { %2824 = vmatprep.subr.bf16.mxu0 %v3017_v12 }
  0xbf   : > { %2825 = vmatpush3.bf16.msra.mxu0 %v3017_v12 }
  0xc2   : > { %2827 = vmatmul.mubr.bf16.vlgmr.msra.gmra.mrb[0].mxu0 %v1864_v22  ;;  %v1998_v22 = vld [vmem:[%s361_s16 + $0x6] sm:$0x3] }
  0xc3   : > { %v2006_v13 = vunpack.c.l.bf16 %v1998_v22 }
 0x173   : > { %v2728_v2 = vpop.f32.mrb[0].mxu1 }
 0x174   : > { %v1198_v16 = vpop.f32.mrb[1].mxu1 }
 0x175   : > { %v2729_v17 = vpop.f32.mrb[2].mxu1 }
 0x176   : > { %v1201_v30 = vpop.f32.mrb[3].mxu1 }
 0x195   : > { %v2828_v26 = vpop.f32.mrb[0].mxu0 }
 0x196   : > { %v1949_v39 = vpop.f32.mrb[1].mxu0 }
 0x197   : > { %v2831_v51 = vadd.f32 %v1949_v39, %v1198_v16  ;;  %v2829_v45 = vpop.f32.mrb[2].mxu0 }
 0x198   : > { %v1952_v47 = vpop.f32.mrb[3].mxu0 }
 0x199   : > { %v1972_v49 = vcombine.high %v2831_v51, %v2831_v51  ;;  %v1987_v50 = vadd.f32 %v2831_v51, %v2542_v27  ;;  %v2833_v37 = vadd.f32 %v1952_v47, %v1201_v30 }
 0x19b   : > { %v1988_v42 = vadd.f32 %v2542_v27, %v1972_v49  ;;  %v2011_v53 = vadd.f32 %v2003_v36, %v1987_v50  ;;  %v1973_v56 = vcombine.high %v2833_v37, %v2833_v37  ;;  %v1989_v24 = vadd.f32 %v2833_v37, %v2542_v27 }
 0x19d   : > { %v2012_v57 = vadd.f32 %v2004_v35, %v1988_v42  ;;  %v2019_v38 = vmax.f32 %v2011_v53, 0.0  ;;  %v1990_v48 = vadd.f32 %v2542_v27, %v1973_v56  ;;  %v2013_v61 = vadd.f32 %v2005_v32, %v1989_v24 }
 0x19f   : > { %v2020_v46 = vmax.f32 %v2012_v57, 0.0  ;;  %v2027_v62 = vpack.c.bf16 %v2019_v38, %v2019_v38  ;;  %v2014_v4 = vadd.f32 %v2006_v13, %v1990_v48  ;;  %v2021_v54 = vmax.f32 %v2013_v61, 0.0  ;;  %2049 = sbr.rel (!%p3141_p3) target bundleno = 432 (0x1b0), region = 44 }
 0x1a1   : > { %v2028_v63 = vpack.c.bf16 %v2020_v46, %v2020_v46  ;;  %2035 = vst [vmem:[%s318_s18] sm:$0x3] %v2027_v62  ;;  %v2022_v58 = vmax.f32 %v2014_v4, 0.0  ;;  %v2029_v60 = vpack.c.bf16 %v2021_v54, %v2021_v54 }
 0x1a3   : > { %2036 = vst [vmem:[%s318_s18 + $0x2] sm:$0x3] %v2028_v63  ;;  %v2030_v0 = vpack.c.bf16 %v2022_v58, %v2022_v58  ;;  %2037 = vst [vmem:[%s318_s18 + $0x4] sm:$0x3] %v2029_v60 }
 0x1a5   : > { %2038 = vst [vmem:[%s318_s18 + $0x6] sm:$0x3] %v2030_v0 }
 0x1a6 LB: >> { %s2070_s8 = sadd.s32 1, %s3076_s8   ;;  %s3076_s8 = sphi %s3074_s8, %s2070_s8  }
 0x1a7   : >> { %p2069_p9 = scmp.ge.s32.totalorder %s2070_s8, 1 }
 0x1a8   : >> { %v2076_v1 = vld [vmem:[%s318_s18] sm:$0x3] }
 0x1a9   : >> { %2077 = vst [vmem:[%s2057_s7] sm:$0x3] %v2076_v1  ;;  %2072 = sbr.rel (!%p2069_p9) target bundleno = 422 (0x1a6), region = 140 }
 0x1aa   : >> { %v2078_v18 = vld [vmem:[%s318_s18 + $0x2] sm:$0x3]  ;;  %v2080_v3 = vld [vmem:[%s318_s18 + $0x4] sm:$0x3] }
 0x1ab   : >> { %2079 = vst [vmem:[%s2057_s7 + $0x2] sm:$0x3] %v2078_v18  ;;  %2081 = vst [vmem:[%s2057_s7 + $0x4] sm:$0x3] %v2080_v3 }
 0x1ac   : >> { %v2082_v19 = vld [vmem:[%s318_s18 + $0x6] sm:$0x3] }
 0x1ad   : >> { %2083 = vst [vmem:[%s2057_s7 + $0x6] sm:$0x3] %v2082_v19 }
 0x1b0 PF: > { %s15_s22 = sadd.s32 1, %s3072_s22   ;;  %s3807_s18 = smov %s3060_s19 }
 0x1b1   : > { %p12_p10 = scmp.ge.s32.totalorder %s15_s22, 4   ;;  %s3808_s19 = smov %s3150_s28 }
 0x1b2   : > { %s3809_s20 = smov %s3068_s21  ;;  %s3810_s21 = smov %s3812_s24 }
 0x1b3   :  { %14 = sbr.rel (!%p12_p10) target bundleno = 3 (0x3), region = 162 }

</bundles_post_ra>
